<compile_context>
chip_gen: v6e
topology: v6e:2x2x1
jax: 0.10.0
libtpu: 0.0.40
codegen_flags: <defaults>
</compile_context>

<pallas_src>
import jax
import jax.numpy as jnp
from jax.experimental import pallas as pl
from jax.experimental.pallas import tpu as pltpu

H = 64      # logical GRU hidden size
HP = 128    # lane-padded hidden size (one full 128-lane vreg)
COL_PAD = 128  # lane-padded collision-classifier output width (true width = 7)


# ----------------------------------------------------------------------------
# Kernel A: embedders + collision classifier + hoisted GRU layer-0 input proj.
# ----------------------------------------------------------------------------
def _embed_col_kernel(envs_ref, col_in_ref, st_ref,
                      env_w_ref, env_b_ref, se_w_ref, se_b_ref,
                      cw0_ref, cb0_ref, cwh_ref, cbh_ref, cw5_ref, cb5_ref,
                      wih0e_ref, wih0s_ref, bi0_ref,
                      col_out_ref, gi0_ref):
    # --- env embedder + relu --------------------------------------------------
    h_env = jnp.maximum(
        jnp.dot(envs_ref[...], env_w_ref[...],
                preferred_element_type=jnp.float32) + env_b_ref[...], 0.0)   # (B, 32)

    # --- collision classifier: all 6 layers stay resident in VMEM -------------
    def elu(y):
        # exp(y)-1 (not expm1) for guaranteed Mosaic lowering; abs. error near
        # y == 0 is < 1e-7 which is irrelevant at this scale.
        return jnp.where(y > 0.0, y, jnp.exp(y) - 1.0)

    h = elu(jnp.dot(col_in_ref[...], cw0_ref[...],
                    preferred_element_type=jnp.float32) + cb0_ref[...])
    for i in range(cwh_ref.shape[0]):
        h = elu(jnp.dot(h, cwh_ref[i], preferred_element_type=jnp.float32)
                + cbh_ref[i])
    col_out_ref[...] = (jnp.dot(h, cw5_ref[...],
                                preferred_element_type=jnp.float32)
                        + cb5_ref[...])                                      # (B*T, 128)

    # --- state embedder + GRU layer-0 input projection hoisted over time ------
    T, B, _ = gi0_ref.shape
    se = (jnp.dot(st_ref[...], se_w_ref[...],
                  preferred_element_type=jnp.float32) + se_b_ref[...])       # (T*B, 32)
    # h_env is constant over time -> project once; bi0 already contains
    # b_ih (all gates) + b_hh (r,z gates) pre-added (see pack_params).
    he_proj = (jnp.dot(h_env, wih0e_ref[...],
                       preferred_element_type=jnp.float32) + bi0_ref[...])   # (B, 3*HP)
    gi = jnp.dot(se, wih0s_ref[...], preferred_element_type=jnp.float32)     # (T*B, 3*HP)
    for t in range(T):
        gi0_ref[t] = gi[t * B:(t + 1) * B, :] + he_proj


# ----------------------------------------------------------------------------
# Kernel B: fully-unrolled 2-layer GRU recurrence + head MLP (fused).
# ----------------------------------------------------------------------------
def _gru_head_kernel(gi0_ref, whh0_ref, bhh0n_ref,
                     wih1_ref, bi1_ref, whh1_ref, bhh1n_ref,
                     w0_ref, b0_ref, w1_ref, b1_ref,
                     p_ref, hseq_scr):
    T, B, H3 = gi0_ref.shape
    Hp = H3 // 3

    whh0 = whh0_ref[...]
    wih1 = wih1_ref[...]
    whh1 = whh1_ref[...]
    bi1 = bi1_ref[...]
    bhh0n = bhh0n_ref[...]
    bhh1n = bhh1n_ref[...]

    def cell(gi, h, whh, bhn):
        # PyTorch GRU gate order [r, z, n]; r/z biases already folded into gi.
        # Gate slices are vreg-aligned (Hp == 128) -> no cross-lane extraction.
        gh = jnp.dot(h, whh, preferred_element_type=jnp.float32)
        r = jax.nn.sigmoid(gi[:, :Hp] + gh[:, :Hp])
        z = jax.nn.sigmoid(gi[:, Hp:2 * Hp] + gh[:, Hp:2 * Hp])
        n = jnp.tanh(gi[:, 2 * Hp:] + r * (gh[:, 2 * Hp:] + bhn))
        return (1.0 - z) * n + z * h

    h0 = jnp.zeros((B, Hp), jnp.float32)
    h1 = jnp.zeros((B, Hp), jnp.float32)
    for t in range(T):                 # T is small & static -> fully unrolled
        h0 = cell(gi0_ref[t], h0, whh0, bhh0n)
        gi1 = jnp.dot(h0, wih1, preferred_element_type=jnp.float32) + bi1
        h1 = cell(gi1, h1, whh1, bhh1n)
        hseq_scr[t * B:(t + 1) * B, :] = h1

    # Head MLP on the whole (T*B, Hp) slab: batched rows feed the MXU, and the
    # final store is lane-dense (128 wide; true 2 columns sliced in the wrapper).
    h_all = hseq_scr[...]
    hh = jnp.maximum(
        jnp.dot(h_all, w0_ref[...], preferred_element_type=jnp.float32)
        + b0_ref[...], 0.0)
    p_ref[...] = (jnp.dot(hh, w1_ref[...], preferred_element_type=jnp.float32)
                  + b1_ref[...])


# ----------------------------------------------------------------------------
# pallas_call wrappers (no grid: everything is one VMEM-resident invocation)
# ----------------------------------------------------------------------------
def embed_col_forward(envs, col_in, st_tmaj, q, *, T, B):
    col_w = q["col_w5"].shape[-1]
    g3 = q["bi0"].shape[-1]
    return pl.pallas_call(
        _embed_col_kernel,
        out_shape=(jax.ShapeDtypeStruct((B * T, col_w), jnp.float32),
                   jax.ShapeDtypeStruct((T, B, g3), jnp.float32)),
    )(envs, col_in, st_tmaj,
      q["env_w"], q["env_b"], q["se_w"], q["se_b"],
      q["col_w0"], q["col_b0"], q["col_wh"], q["col_bh"],
      q["col_w5"], q["col_b5"],
      q["wih0_e"], q["wih0_s"], q["bi0"])


def gru_head_forward(gi0, q):
    T, B, _ = gi0.shape
    Hp = q["mlp_w0"].shape[0]
    ow = q["mlp_w1"].shape[-1]
    return pl.pallas_call(
        _gru_head_kernel,
        out_shape=jax.ShapeDtypeStruct((T * B, ow), jnp.float32),
        scratch_shapes=[pltpu.VMEM((T * B, Hp), jnp.float32)],
    )(gi0, q["whh0"], q["bhh0_n"], q["wih1"], q["bi1"],
      q["whh1"], q["bhh1_n"],
      q["mlp_w0"], q["mlp_b0"], q["mlp_w1"], q["mlp_b1"])


# ----------------------------------------------------------------------------
# Parameter init (deterministic, mimics PyTorch's U(-1/sqrt(fan_in), ...))
# ----------------------------------------------------------------------------
def init_params(key, env_size, state_size,
                env_embed=32, state_embed=32, hidden=H):
    keys = iter(jax.random.split(key, 64))

    def lin(fan_in, fan_out):
        s = 1.0 / float(fan_in) ** 0.5
        w = jax.random.uniform(next(keys), (fan_in, fan_out), jnp.float32, -s, s)
        b = jax.random.uniform(next(keys), (fan_out,), jnp.float32, -s, s)
        return w, b

    p = {}
    p["env_w"], p["env_b"] = lin(env_size, env_embed)
    p["se_w"], p["se_b"] = lin(state_size, state_embed)

    gin = env_embed + state_embed
    p["wih0"], p["bih0"] = lin(gin, 3 * hidden)      # gate order [r | z | n]
    p["whh0"], p["bhh0"] = lin(hidden, 3 * hidden)
    p["wih1"], p["bih1"] = lin(hidden, 3 * hidden)
    p["whh1"], p["bhh1"] = lin(hidden, 3 * hidden)

    p["mlp_w0"], p["mlp_b0"] = lin(hidden, hidden)
    p["mlp_w1"], p["mlp_b1"] = lin(hidden, 2)

    col_dims = [env_size + (state_size - 2), 32, 32, 32, 32, 32, 7]
    for i in range(6):
        p[f"col_w{i}"], p[f"col_b{i}"] = lin(col_dims[i], col_dims[i + 1])
    return p


def _pad_gates(w, h, hp):
    """(..., 3h) gate-blocked [r|z|n] -> (..., 3hp); each gate zero-padded to hp."""
    blocks = [w[..., g * h:(g + 1) * h] for g in range(3)]
    pad = [(0, 0)] * (w.ndim - 1) + [(0, hp - h)]
    return jnp.concatenate([jnp.pad(b, pad) for b in blocks], axis=-1)


def pack_params(p, env_embed=32, hidden=H, hp=HP, col_pad=COL_PAD, head_pad=HP):
    """Repack/zero-pad raw params for the fused 128-lane-aligned kernels.
    Padded rows/cols/biases are zero, so padded hidden lanes stay exactly 0
    through the recurrence.  r/z gate biases of input and hidden paths are
    pre-added; b_hn stays separate because it is scaled by r."""
    h, dt = hidden, jnp.float32
    q = {}
    q["env_w"] = p["env_w"]
    q["env_b"] = p["env_b"].reshape(1, -1)
    q["se_w"] = p["se_w"]
    q["se_b"] = p["se_b"].reshape(1, -1)

    q["col_w0"] = p["col_w0"]
    q["col_b0"] = p["col_b0"].reshape(1, -1)
    q["col_wh"] = jnp.stack([p[f"col_w{i}"] for i in range(1, 5)])          # (4,32,32)
    q["col_bh"] = jnp.stack([p[f"col_b{i}"].reshape(1, -1) for i in range(1, 5)])
    n_col = p["col_w5"].shape[-1]
    q["col_w5"] = jnp.pad(p["col_w5"], ((0, 0), (0, col_pad - n_col)))
    q["col_b5"] = jnp.pad(p["col_b5"], (0, col_pad - n_col)).reshape(1, -1)

    def fold_rz_bias(bih, bhh):
        comb = bih + jnp.concatenate([bhh[:2 * h], jnp.zeros((h,), dt)])
        return _pad_gates(comb.reshape(1, 3 * h), h, hp)

    wih0 = _pad_gates(p["wih0"], h, hp)
    q["wih0_e"] = wih0[:env_embed]          # rows multiplying h_env (concat order)
    q["wih0_s"] = wih0[env_embed:]          # rows multiplying the state embed
    q["bi0"] = fold_rz_bias(p["bih0"], p["bhh0"])
    q["whh0"] = _pad_gates(jnp.pad(p["whh0"], ((0, hp - h), (0, 0))), h, hp)
    q["bhh0_n"] = jnp.pad(p["bhh0"][2 * h:], (0, hp - h)).reshape(1, hp)

    q["wih1"] = _pad_gates(jnp.pad(p["wih1"], ((0, hp - h), (0, 0))), h, hp)
    q["bi1"] = fold_rz_bias(p["bih1"], p["bhh1"])
    q["whh1"] = _pad_gates(jnp.pad(p["whh1"], ((0, hp - h), (0, 0))), h, hp)
    q["bhh1_n"] = jnp.pad(p["bhh1"][2 * h:], (0, hp - h)).reshape(1, hp)

    q["mlp_w0"] = jnp.pad(p["mlp_w0"], ((0, hp - h), (0, hp - h)))
    q["mlp_b0"] = jnp.pad(p["mlp_b0"], (0, hp - h)).reshape(1, hp)
    n_out = p["mlp_w1"].shape[-1]
    q["mlp_w1"] = jnp.pad(p["mlp_w1"], ((0, hp - h), (0, head_pad - n_out)))
    q["mlp_b1"] = jnp.pad(p["mlp_b1"], (0, head_pad - n_out)).reshape(1, head_pad)
    return q


# ----------------------------------------------------------------------------
# Forward pass (predict_t == 0): returns (p, next_t, col_output)
# ----------------------------------------------------------------------------
def forward(q, envs, states):
    B, T, S = states.shape
    E = envs.shape[-1]

    # collision-classifier input, rows in (b, t) order (matches torch reshape)
    envs_rep = jnp.broadcast_to(envs[:, None, :], (B, T, E)).reshape(B * T, E)
    col_in = jnp.concatenate([envs_rep, states.reshape(B * T, S)[:, :2]], axis=-1)

    # state rows in (t, b) order for the GRU path (torch permutes to (T, B, S))
    st_tmaj = jnp.transpose(states, (1, 0, 2)).reshape(T * B, S)

    col_pad, gi0 = embed_col_forward(envs, col_in, st_tmaj, q, T=T, B=B)
    col_output = col_pad[:, :7]

    p_pad = gru_head_forward(gi0, q)
    p = jnp.transpose(p_pad.reshape(T, B, -1)[:, :, :2], (1, 0, 2))   # (B, T, 2)

    next_t = (states[:, :, S - 1] + 1.0)[:, :, None]                  # (B, T, 1)
    return p, next_t, col_output


if __name__ == "__main__":
    key = jax.random.PRNGKey(0)
    env_size, state_size = 16, 4      # state = [x, y, col, t]
    B, T = 2, 8

    k_param, k_env, k_state = jax.random.split(key, 3)
    raw = init_params(k_param, env_size, state_size)
    params = pack_params(raw)

    envs = jax.random.normal(k_env, (B, env_size), jnp.float32)
    pos = jax.random.normal(k_state, (B, T, state_size - 1), jnp.float32)
    tcol = jnp.broadcast_to(jnp.arange(T, dtype=jnp.float32)[None, :, None], (B, T, 1))
    states = jnp.concatenate([pos, tcol], axis=-1)                    # (B, T, 4)

    fwd = jax.jit(forward)
    p, next_t, col_output = fwd(params, envs, states)
    jax.block_until_ready((p, next_t, col_output))

    assert p.shape == (B, T, 2)
    assert next_t.shape == (B, T, 1)
    assert col_output.shape == (B * T, 7)
    print("KERNEL_OK")
</pallas_src>

<mosaic_0001>
module attributes {stable_mosaic.version = 11 : i64} {
  func.func @_embed_col_kernel(%arg0: memref<2x16xf32, #tpu.memory_space<vmem>>, %arg1: memref<16x18xf32, #tpu.memory_space<vmem>>, %arg2: memref<16x4xf32, #tpu.memory_space<vmem>>, %arg3: memref<16x32xf32, #tpu.memory_space<vmem>>, %arg4: memref<1x32xf32, #tpu.memory_space<vmem>>, %arg5: memref<4x32xf32, #tpu.memory_space<vmem>>, %arg6: memref<1x32xf32, #tpu.memory_space<vmem>>, %arg7: memref<18x32xf32, #tpu.memory_space<vmem>>, %arg8: memref<1x32xf32, #tpu.memory_space<vmem>>, %arg9: memref<4x32x32xf32, #tpu.memory_space<vmem>>, %arg10: memref<4x1x32xf32, #tpu.memory_space<vmem>>, %arg11: memref<32x128xf32, #tpu.memory_space<vmem>>, %arg12: memref<1x128xf32, #tpu.memory_space<vmem>>, %arg13: memref<32x384xf32, #tpu.memory_space<vmem>>, %arg14: memref<32x384xf32, #tpu.memory_space<vmem>>, %arg15: memref<1x384xf32, #tpu.memory_space<vmem>>, %arg16: memref<16x128xf32, #tpu.memory_space<vmem>>, %arg17: memref<8x2x384xf32, #tpu.memory_space<vmem>>) attributes {dimension_semantics = [], scalar_prefetch = 0 : i64, scratch_operands = 0 : i64, tpu.core_type = #tpu.core_type<tc>} {
    %c0 = arith.constant 0 : index
    %c0_0 = arith.constant 0 : index
    %0 = vector.load %arg0[%c0, %c0_0] : memref<2x16xf32, #tpu.memory_space<vmem>>, vector<2x16xf32>
    %c0_1 = arith.constant 0 : index
    %c0_2 = arith.constant 0 : index
    %1 = vector.load %arg3[%c0_1, %c0_2] : memref<16x32xf32, #tpu.memory_space<vmem>>, vector<16x32xf32>
    %cst = arith.constant dense<0.000000e+00> : vector<2x32xf32>
    %2 = tpu.matmul %0, %1, %cst {dimension_numbers = #tpu.dot_dimension_numbers<[1], [0], [0], [1], [0, 0, 1, 1], [], []>} : vector<2x16xf32>, vector<16x32xf32>, vector<2x32xf32> -> vector<2x32xf32>
    %c0_3 = arith.constant 0 : index
    %c0_4 = arith.constant 0 : index
    %3 = vector.load %arg4[%c0_3, %c0_4] : memref<1x32xf32, #tpu.memory_space<vmem>>, vector<1x32xf32>
    %4 = vector.broadcast %3 : vector<1x32xf32> to vector<2x32xf32>
    %5 = arith.addf %2, %4 : vector<2x32xf32>
    %cst_5 = arith.constant 0.000000e+00 : f32
    %6 = vector.broadcast %cst_5 : f32 to vector<2x32xf32>
    %7 = arith.maximumf %5, %6 : vector<2x32xf32>
    %c0_6 = arith.constant 0 : index
    %c0_7 = arith.constant 0 : index
    %8 = vector.load %arg1[%c0_6, %c0_7] : memref<16x18xf32, #tpu.memory_space<vmem>>, vector<16x18xf32>
    %c0_8 = arith.constant 0 : index
    %c0_9 = arith.constant 0 : index
    %9 = vector.load %arg7[%c0_8, %c0_9] : memref<18x32xf32, #tpu.memory_space<vmem>>, vector<18x32xf32>
    %cst_10 = arith.constant dense<0.000000e+00> : vector<16x32xf32>
    %10 = tpu.matmul %8, %9, %cst_10 {dimension_numbers = #tpu.dot_dimension_numbers<[1], [0], [0], [1], [0, 0, 1, 1], [], []>} : vector<16x18xf32>, vector<18x32xf32>, vector<16x32xf32> -> vector<16x32xf32>
    %c0_11 = arith.constant 0 : index
    %c0_12 = arith.constant 0 : index
    %11 = vector.load %arg8[%c0_11, %c0_12] : memref<1x32xf32, #tpu.memory_space<vmem>>, vector<1x32xf32>
    %12 = vector.broadcast %11 : vector<1x32xf32> to vector<16x32xf32>
    %13 = arith.addf %10, %12 : vector<16x32xf32>
    %cst_13 = arith.constant 0.000000e+00 : f32
    %14 = vector.broadcast %cst_13 : f32 to vector<16x32xf32>
    %15 = arith.cmpf ogt, %13, %14 : vector<16x32xf32>
    %16 = math.exp %13 : vector<16x32xf32>
    %cst_14 = arith.constant 1.000000e+00 : f32
    %17 = vector.broadcast %cst_14 : f32 to vector<16x32xf32>
    %18 = arith.subf %16, %17 : vector<16x32xf32>
    %19 = arith.select %15, %13, %18 : vector<16x32xi1>, vector<16x32xf32>
    %c0_15 = arith.constant 0 : index
    %c0_16 = arith.constant 0 : index
    %c0_17 = arith.constant 0 : index
    %20 = vector.load %arg9[%c0_15, %c0_16, %c0_17] : memref<4x32x32xf32, #tpu.memory_space<vmem>>, vector<1x32x32xf32>
    %21 = vector.shape_cast %20 : vector<1x32x32xf32> to vector<32x32xf32>
    %cst_18 = arith.constant dense<0.000000e+00> : vector<16x32xf32>
    %22 = tpu.matmul %19, %21, %cst_18 {dimension_numbers = #tpu.dot_dimension_numbers<[1], [0], [0], [1], [0, 0, 1, 1], [], []>} : vector<16x32xf32>, vector<32x32xf32>, vector<16x32xf32> -> vector<16x32xf32>
    %c0_19 = arith.constant 0 : index
    %c0_20 = arith.constant 0 : index
    %c0_21 = arith.constant 0 : index
    %23 = vector.load %arg10[%c0_19, %c0_20, %c0_21] : memref<4x1x32xf32, #tpu.memory_space<vmem>>, vector<1x1x32xf32>
    %24 = vector.shape_cast %23 : vector<1x1x32xf32> to vector<1x32xf32>
    %25 = vector.broadcast %24 : vector<1x32xf32> to vector<16x32xf32>
    %26 = arith.addf %22, %25 : vector<16x32xf32>
    %cst_22 = arith.constant 0.000000e+00 : f32
    %27 = vector.broadcast %cst_22 : f32 to vector<16x32xf32>
    %28 = arith.cmpf ogt, %26, %27 : vector<16x32xf32>
    %29 = math.exp %26 : vector<16x32xf32>
    %cst_23 = arith.constant 1.000000e+00 : f32
    %30 = vector.broadcast %cst_23 : f32 to vector<16x32xf32>
    %31 = arith.subf %29, %30 : vector<16x32xf32>
    %32 = arith.select %28, %26, %31 : vector<16x32xi1>, vector<16x32xf32>
    %c1 = arith.constant 1 : index
    %c0_24 = arith.constant 0 : index
    %c0_25 = arith.constant 0 : index
    %33 = vector.load %arg9[%c1, %c0_24, %c0_25] : memref<4x32x32xf32, #tpu.memory_space<vmem>>, vector<1x32x32xf32>
    %34 = vector.shape_cast %33 : vector<1x32x32xf32> to vector<32x32xf32>
    %cst_26 = arith.constant dense<0.000000e+00> : vector<16x32xf32>
    %35 = tpu.matmul %32, %34, %cst_26 {dimension_numbers = #tpu.dot_dimension_numbers<[1], [0], [0], [1], [0, 0, 1, 1], [], []>} : vector<16x32xf32>, vector<32x32xf32>, vector<16x32xf32> -> vector<16x32xf32>
    %c1_27 = arith.constant 1 : index
    %c0_28 = arith.constant 0 : index
    %c0_29 = arith.constant 0 : index
    %36 = vector.load %arg10[%c1_27, %c0_28, %c0_29] : memref<4x1x32xf32, #tpu.memory_space<vmem>>, vector<1x1x32xf32>
    %37 = vector.shape_cast %36 : vector<1x1x32xf32> to vector<1x32xf32>
    %38 = vector.broadcast %37 : vector<1x32xf32> to vector<16x32xf32>
    %39 = arith.addf %35, %38 : vector<16x32xf32>
    %cst_30 = arith.constant 0.000000e+00 : f32
    %40 = vector.broadcast %cst_30 : f32 to vector<16x32xf32>
    %41 = arith.cmpf ogt, %39, %40 : vector<16x32xf32>
    %42 = math.exp %39 : vector<16x32xf32>
    %cst_31 = arith.constant 1.000000e+00 : f32
    %43 = vector.broadcast %cst_31 : f32 to vector<16x32xf32>
    %44 = arith.subf %42, %43 : vector<16x32xf32>
    %45 = arith.select %41, %39, %44 : vector<16x32xi1>, vector<16x32xf32>
    %c2 = arith.constant 2 : index
    %c0_32 = arith.constant 0 : index
    %c0_33 = arith.constant 0 : index
    %46 = vector.load %arg9[%c2, %c0_32, %c0_33] : memref<4x32x32xf32, #tpu.memory_space<vmem>>, vector<1x32x32xf32>
    %47 = vector.shape_cast %46 : vector<1x32x32xf32> to vector<32x32xf32>
    %cst_34 = arith.constant dense<0.000000e+00> : vector<16x32xf32>
    %48 = tpu.matmul %45, %47, %cst_34 {dimension_numbers = #tpu.dot_dimension_numbers<[1], [0], [0], [1], [0, 0, 1, 1], [], []>} : vector<16x32xf32>, vector<32x32xf32>, vector<16x32xf32> -> vector<16x32xf32>
    %c2_35 = arith.constant 2 : index
    %c0_36 = arith.constant 0 : index
    %c0_37 = arith.constant 0 : index
    %49 = vector.load %arg10[%c2_35, %c0_36, %c0_37] : memref<4x1x32xf32, #tpu.memory_space<vmem>>, vector<1x1x32xf32>
    %50 = vector.shape_cast %49 : vector<1x1x32xf32> to vector<1x32xf32>
    %51 = vector.broadcast %50 : vector<1x32xf32> to vector<16x32xf32>
    %52 = arith.addf %48, %51 : vector<16x32xf32>
    %cst_38 = arith.constant 0.000000e+00 : f32
    %53 = vector.broadcast %cst_38 : f32 to vector<16x32xf32>
    %54 = arith.cmpf ogt, %52, %53 : vector<16x32xf32>
    %55 = math.exp %52 : vector<16x32xf32>
    %cst_39 = arith.constant 1.000000e+00 : f32
    %56 = vector.broadcast %cst_39 : f32 to vector<16x32xf32>
    %57 = arith.subf %55, %56 : vector<16x32xf32>
    %58 = arith.select %54, %52, %57 : vector<16x32xi1>, vector<16x32xf32>
    %c3 = arith.constant 3 : index
    %c0_40 = arith.constant 0 : index
    %c0_41 = arith.constant 0 : index
    %59 = vector.load %arg9[%c3, %c0_40, %c0_41] : memref<4x32x32xf32, #tpu.memory_space<vmem>>, vector<1x32x32xf32>
    %60 = vector.shape_cast %59 : vector<1x32x32xf32> to vector<32x32xf32>
    %cst_42 = arith.constant dense<0.000000e+00> : vector<16x32xf32>
    %61 = tpu.matmul %58, %60, %cst_42 {dimension_numbers = #tpu.dot_dimension_numbers<[1], [0], [0], [1], [0, 0, 1, 1], [], []>} : vector<16x32xf32>, vector<32x32xf32>, vector<16x32xf32> -> vector<16x32xf32>
    %c3_43 = arith.constant 3 : index
    %c0_44 = arith.constant 0 : index
    %c0_45 = arith.constant 0 : index
    %62 = vector.load %arg10[%c3_43, %c0_44, %c0_45] : memref<4x1x32xf32, #tpu.memory_space<vmem>>, vector<1x1x32xf32>
    %63 = vector.shape_cast %62 : vector<1x1x32xf32> to vector<1x32xf32>
    %64 = vector.broadcast %63 : vector<1x32xf32> to vector<16x32xf32>
    %65 = arith.addf %61, %64 : vector<16x32xf32>
    %cst_46 = arith.constant 0.000000e+00 : f32
    %66 = vector.broadcast %cst_46 : f32 to vector<16x32xf32>
    %67 = arith.cmpf ogt, %65, %66 : vector<16x32xf32>
    %68 = math.exp %65 : vector<16x32xf32>
    %cst_47 = arith.constant 1.000000e+00 : f32
    %69 = vector.broadcast %cst_47 : f32 to vector<16x32xf32>
    %70 = arith.subf %68, %69 : vector<16x32xf32>
    %71 = arith.select %67, %65, %70 : vector<16x32xi1>, vector<16x32xf32>
    %c0_48 = arith.constant 0 : index
    %c0_49 = arith.constant 0 : index
    %72 = vector.load %arg11[%c0_48, %c0_49] : memref<32x128xf32, #tpu.memory_space<vmem>>, vector<32x128xf32>
    %cst_50 = arith.constant dense<0.000000e+00> : vector<16x128xf32>
    %73 = tpu.matmul %71, %72, %cst_50 {dimension_numbers = #tpu.dot_dimension_numbers<[1], [0], [0], [1], [0, 0, 1, 1], [], []>} : vector<16x32xf32>, vector<32x128xf32>, vector<16x128xf32> -> vector<16x128xf32>
    %c0_51 = arith.constant 0 : index
    %c0_52 = arith.constant 0 : index
    %74 = vector.load %arg12[%c0_51, %c0_52] : memref<1x128xf32, #tpu.memory_space<vmem>>, vector<1x128xf32>
    %75 = vector.broadcast %74 : vector<1x128xf32> to vector<16x128xf32>
    %76 = arith.addf %73, %75 : vector<16x128xf32>
    %c0_53 = arith.constant 0 : index
    %c0_54 = arith.constant 0 : index
    %77 = vector.load %arg16[%c0_53, %c0_54] : memref<16x128xf32, #tpu.memory_space<vmem>>, vector<16x128xf32>
    tpu.vector_store %arg16[%c0_53, %c0_54], %76 {strides = array<i32>} : memref<16x128xf32, #tpu.memory_space<vmem>>, vector<16x128xf32>,
    %c0_55 = arith.constant 0 : index
    %c0_56 = arith.constant 0 : index
    %78 = vector.load %arg2[%c0_55, %c0_56] : memref<16x4xf32, #tpu.memory_space<vmem>>, vector<16x4xf32>
    %c0_57 = arith.constant 0 : index
    %c0_58 = arith.constant 0 : index
    %79 = vector.load %arg5[%c0_57, %c0_58] : memref<4x32xf32, #tpu.memory_space<vmem>>, vector<4x32xf32>
    %cst_59 = arith.constant dense<0.000000e+00> : vector<16x32xf32>
    %80 = tpu.matmul %78, %79, %cst_59 {dimension_numbers = #tpu.dot_dimension_numbers<[1], [0], [0], [1], [0, 0, 1, 1], [], []>} : vector<16x4xf32>, vector<4x32xf32>, vector<16x32xf32> -> vector<16x32xf32>
    %c0_60 = arith.constant 0 : index
    %c0_61 = arith.constant 0 : index
    %81 = vector.load %arg6[%c0_60, %c0_61] : memref<1x32xf32, #tpu.memory_space<vmem>>, vector<1x32xf32>
    %82 = vector.broadcast %81 : vector<1x32xf32> to vector<16x32xf32>
    %83 = arith.addf %80, %82 : vector<16x32xf32>
    %c0_62 = arith.constant 0 : index
    %c0_63 = arith.constant 0 : index
    %84 = vector.load %arg13[%c0_62, %c0_63] : memref<32x384xf32, #tpu.memory_space<vmem>>, vector<32x384xf32>
    %cst_64 = arith.constant dense<0.000000e+00> : vector<2x384xf32>
    %85 = tpu.matmul %7, %84, %cst_64 {dimension_numbers = #tpu.dot_dimension_numbers<[1], [0], [0], [1], [0, 0, 1, 1], [], []>} : vector<2x32xf32>, vector<32x384xf32>, vector<2x384xf32> -> vector<2x384xf32>
    %c0_65 = arith.constant 0 : index
    %c0_66 = arith.constant 0 : index
    %86 = vector.load %arg15[%c0_65, %c0_66] : memref<1x384xf32, #tpu.memory_space<vmem>>, vector<1x384xf32>
    %87 = vector.broadcast %86 : vector<1x384xf32> to vector<2x384xf32>
    %88 = arith.addf %85, %87 : vector<2x384xf32>
    %c0_67 = arith.constant 0 : index
    %c0_68 = arith.constant 0 : index
    %89 = vector.load %arg14[%c0_67, %c0_68] : memref<32x384xf32, #tpu.memory_space<vmem>>, vector<32x384xf32>
    %cst_69 = arith.constant dense<0.000000e+00> : vector<16x384xf32>
    %90 = tpu.matmul %83, %89, %cst_69 {dimension_numbers = #tpu.dot_dimension_numbers<[1], [0], [0], [1], [0, 0, 1, 1], [], []>} : vector<16x32xf32>, vector<32x384xf32>, vector<16x384xf32> -> vector<16x384xf32>
    %91 = vector.extract_strided_slice %90 {offsets = [0, 0], sizes = [2, 384], strides = [1, 1]} : vector<16x384xf32> to vector<2x384xf32>
    %92 = arith.addf %91, %88 : vector<2x384xf32>
    %c0_70 = arith.constant 0 : index
    %c0_71 = arith.constant 0 : index
    %c0_72 = arith.constant 0 : index
    %93 = vector.load %arg17[%c0_70, %c0_71, %c0_72] : memref<8x2x384xf32, #tpu.memory_space<vmem>>, vector<1x2x384xf32>
    %94 = vector.shape_cast %93 : vector<1x2x384xf32> to vector<2x384xf32>
    %95 = vector.shape_cast %92 : vector<2x384xf32> to vector<1x2x384xf32>
    tpu.vector_store %arg17[%c0_70, %c0_71, %c0_72], %95 {strides = array<i32>} : memref<8x2x384xf32, #tpu.memory_space<vmem>>, vector<1x2x384xf32>,
    %96 = vector.extract_strided_slice %90 {offsets = [2, 0], sizes = [2, 384], strides = [1, 1]} : vector<16x384xf32> to vector<2x384xf32>
    %97 = arith.addf %96, %88 : vector<2x384xf32>
    %c1_73 = arith.constant 1 : index
    %c0_74 = arith.constant 0 : index
    %c0_75 = arith.constant 0 : index
    %98 = vector.load %arg17[%c1_73, %c0_74, %c0_75] : memref<8x2x384xf32, #tpu.memory_space<vmem>>, vector<1x2x384xf32>
    %99 = vector.shape_cast %98 : vector<1x2x384xf32> to vector<2x384xf32>
    %100 = vector.shape_cast %97 : vector<2x384xf32> to vector<1x2x384xf32>
    tpu.vector_store %arg17[%c1_73, %c0_74, %c0_75], %100 {strides = array<i32>} : memref<8x2x384xf32, #tpu.memory_space<vmem>>, vector<1x2x384xf32>,
    %101 = vector.extract_strided_slice %90 {offsets = [4, 0], sizes = [2, 384], strides = [1, 1]} : vector<16x384xf32> to vector<2x384xf32>
    %102 = arith.addf %101, %88 : vector<2x384xf32>
    %c2_76 = arith.constant 2 : index
    %c0_77 = arith.constant 0 : index
    %c0_78 = arith.constant 0 : index
    %103 = vector.load %arg17[%c2_76, %c0_77, %c0_78] : memref<8x2x384xf32, #tpu.memory_space<vmem>>, vector<1x2x384xf32>
    %104 = vector.shape_cast %103 : vector<1x2x384xf32> to vector<2x384xf32>
    %105 = vector.shape_cast %102 : vector<2x384xf32> to vector<1x2x384xf32>
    tpu.vector_store %arg17[%c2_76, %c0_77, %c0_78], %105 {strides = array<i32>} : memref<8x2x384xf32, #tpu.memory_space<vmem>>, vector<1x2x384xf32>,
    %106 = vector.extract_strided_slice %90 {offsets = [6, 0], sizes = [2, 384], strides = [1, 1]} : vector<16x384xf32> to vector<2x384xf32>
    %107 = arith.addf %106, %88 : vector<2x384xf32>
    %c3_79 = arith.constant 3 : index
    %c0_80 = arith.constant 0 : index
    %c0_81 = arith.constant 0 : index
    %108 = vector.load %arg17[%c3_79, %c0_80, %c0_81] : memref<8x2x384xf32, #tpu.memory_space<vmem>>, vector<1x2x384xf32>
    %109 = vector.shape_cast %108 : vector<1x2x384xf32> to vector<2x384xf32>
    %110 = vector.shape_cast %107 : vector<2x384xf32> to vector<1x2x384xf32>
    tpu.vector_store %arg17[%c3_79, %c0_80, %c0_81], %110 {strides = array<i32>} : memref<8x2x384xf32, #tpu.memory_space<vmem>>, vector<1x2x384xf32>,
    %111 = vector.extract_strided_slice %90 {offsets = [8, 0], sizes = [2, 384], strides = [1, 1]} : vector<16x384xf32> to vector<2x384xf32>
    %112 = arith.addf %111, %88 : vector<2x384xf32>
    %c4 = arith.constant 4 : index
    %c0_82 = arith.constant 0 : index
    %c0_83 = arith.constant 0 : index
    %113 = vector.load %arg17[%c4, %c0_82, %c0_83] : memref<8x2x384xf32, #tpu.memory_space<vmem>>, vector<1x2x384xf32>
    %114 = vector.shape_cast %113 : vector<1x2x384xf32> to vector<2x384xf32>
    %115 = vector.shape_cast %112 : vector<2x384xf32> to vector<1x2x384xf32>
    tpu.vector_store %arg17[%c4, %c0_82, %c0_83], %115 {strides = array<i32>} : memref<8x2x384xf32, #tpu.memory_space<vmem>>, vector<1x2x384xf32>,
    %116 = vector.extract_strided_slice %90 {offsets = [10, 0], sizes = [2, 384], strides = [1, 1]} : vector<16x384xf32> to vector<2x384xf32>
    %117 = arith.addf %116, %88 : vector<2x384xf32>
    %c5 = arith.constant 5 : index
    %c0_84 = arith.constant 0 : index
    %c0_85 = arith.constant 0 : index
    %118 = vector.load %arg17[%c5, %c0_84, %c0_85] : memref<8x2x384xf32, #tpu.memory_space<vmem>>, vector<1x2x384xf32>
    %119 = vector.shape_cast %118 : vector<1x2x384xf32> to vector<2x384xf32>
    %120 = vector.shape_cast %117 : vector<2x384xf32> to vector<1x2x384xf32>
    tpu.vector_store %arg17[%c5, %c0_84, %c0_85], %120 {strides = array<i32>} : memref<8x2x384xf32, #tpu.memory_space<vmem>>, vector<1x2x384xf32>,
    %121 = vector.extract_strided_slice %90 {offsets = [12, 0], sizes = [2, 384], strides = [1, 1]} : vector<16x384xf32> to vector<2x384xf32>
    %122 = arith.addf %121, %88 : vector<2x384xf32>
    %c6 = arith.constant 6 : index
    %c0_86 = arith.constant 0 : index
    %c0_87 = arith.constant 0 : index
    %123 = vector.load %arg17[%c6, %c0_86, %c0_87] : memref<8x2x384xf32, #tpu.memory_space<vmem>>, vector<1x2x384xf32>
    %124 = vector.shape_cast %123 : vector<1x2x384xf32> to vector<2x384xf32>
    %125 = vector.shape_cast %122 : vector<2x384xf32> to vector<1x2x384xf32>
    tpu.vector_store %arg17[%c6, %c0_86, %c0_87], %125 {strides = array<i32>} : memref<8x2x384xf32, #tpu.memory_space<vmem>>, vector<1x2x384xf32>,
    %126 = vector.extract_strided_slice %90 {offsets = [14, 0], sizes = [2, 384], strides = [1, 1]} : vector<16x384xf32> to vector<2x384xf32>
    %127 = arith.addf %126, %88 : vector<2x384xf32>
    %c7 = arith.constant 7 : index
    %c0_88 = arith.constant 0 : index
    %c0_89 = arith.constant 0 : index
    %128 = vector.load %arg17[%c7, %c0_88, %c0_89] : memref<8x2x384xf32, #tpu.memory_space<vmem>>, vector<1x2x384xf32>
    %129 = vector.shape_cast %128 : vector<1x2x384xf32> to vector<2x384xf32>
    %130 = vector.shape_cast %127 : vector<2x384xf32> to vector<1x2x384xf32>
    tpu.vector_store %arg17[%c7, %c0_88, %c0_89], %130 {strides = array<i32>} : memref<8x2x384xf32, #tpu.memory_space<vmem>>, vector<1x2x384xf32>,
    return
  }
}

module attributes {stable_mosaic.version = 11 : i64} {
  func.func @_gru_head_kernel(%arg0: memref<8x2x384xf32, #tpu.memory_space<vmem>>, %arg1: memref<128x384xf32, #tpu.memory_space<vmem>>, %arg2: memref<1x128xf32, #tpu.memory_space<vmem>>, %arg3: memref<128x384xf32, #tpu.memory_space<vmem>>, %arg4: memref<1x384xf32, #tpu.memory_space<vmem>>, %arg5: memref<128x384xf32, #tpu.memory_space<vmem>>, %arg6: memref<1x128xf32, #tpu.memory_space<vmem>>, %arg7: memref<128x128xf32, #tpu.memory_space<vmem>>, %arg8: memref<1x128xf32, #tpu.memory_space<vmem>>, %arg9: memref<128x128xf32, #tpu.memory_space<vmem>>, %arg10: memref<1x128xf32, #tpu.memory_space<vmem>>, %arg11: memref<16x128xf32, #tpu.memory_space<vmem>>, %arg12: memref<16x128xf32, #tpu.memory_space<vmem>>) attributes {dimension_semantics = [], scalar_prefetch = 0 : i64, scratch_operands = 1 : i64, tpu.core_type = #tpu.core_type<tc>} {
    %c0 = arith.constant 0 : index
    %c0_0 = arith.constant 0 : index
    %0 = vector.load %arg1[%c0, %c0_0] : memref<128x384xf32, #tpu.memory_space<vmem>>, vector<128x384xf32>
    %c0_1 = arith.constant 0 : index
    %c0_2 = arith.constant 0 : index
    %1 = vector.load %arg3[%c0_1, %c0_2] : memref<128x384xf32, #tpu.memory_space<vmem>>, vector<128x384xf32>
    %c0_3 = arith.constant 0 : index
    %c0_4 = arith.constant 0 : index
    %2 = vector.load %arg5[%c0_3, %c0_4] : memref<128x384xf32, #tpu.memory_space<vmem>>, vector<128x384xf32>
    %c0_5 = arith.constant 0 : index
    %c0_6 = arith.constant 0 : index
    %3 = vector.load %arg4[%c0_5, %c0_6] : memref<1x384xf32, #tpu.memory_space<vmem>>, vector<1x384xf32>
    %c0_7 = arith.constant 0 : index
    %c0_8 = arith.constant 0 : index
    %4 = vector.load %arg2[%c0_7, %c0_8] : memref<1x128xf32, #tpu.memory_space<vmem>>, vector<1x128xf32>
    %c0_9 = arith.constant 0 : index
    %c0_10 = arith.constant 0 : index
    %5 = vector.load %arg6[%c0_9, %c0_10] : memref<1x128xf32, #tpu.memory_space<vmem>>, vector<1x128xf32>
    %cst = arith.constant 0.000000e+00 : f32
    %6 = vector.broadcast %cst : f32 to vector<2x128xf32>
    %cst_11 = arith.constant 0.000000e+00 : f32
    %7 = vector.broadcast %cst_11 : f32 to vector<2x128xf32>
    %c0_12 = arith.constant 0 : index
    %c0_13 = arith.constant 0 : index
    %c0_14 = arith.constant 0 : index
    %8 = vector.load %arg0[%c0_12, %c0_13, %c0_14] : memref<8x2x384xf32, #tpu.memory_space<vmem>>, vector<1x2x384xf32>
    %9 = vector.shape_cast %8 : vector<1x2x384xf32> to vector<2x384xf32>
    %cst_15 = arith.constant dense<0.000000e+00> : vector<2x384xf32>
    %10 = tpu.matmul %6, %0, %cst_15 {dimension_numbers = #tpu.dot_dimension_numbers<[1], [0], [0], [1], [0, 0, 1, 1], [], []>} : vector<2x128xf32>, vector<128x384xf32>, vector<2x384xf32> -> vector<2x384xf32>
    %11 = vector.extract_strided_slice %9 {offsets = [0, 0], sizes = [2, 128], strides = [1, 1]} : vector<2x384xf32> to vector<2x128xf32>
    %12 = vector.extract_strided_slice %10 {offsets = [0, 0], sizes = [2, 128], strides = [1, 1]} : vector<2x384xf32> to vector<2x128xf32>
    %13 = arith.addf %11, %12 : vector<2x128xf32>
    %14 = arith.negf %13 : vector<2x128xf32>
    %15 = math.exp %14 : vector<2x128xf32>
    %cst_16 = arith.constant 1.000000e+00 : f32
    %16 = vector.broadcast %cst_16 : f32 to vector<2x128xf32>
    %17 = arith.addf %16, %15 : vector<2x128xf32>
    %18 = arith.divf %16, %17 : vector<2x128xf32>
    %19 = vector.extract_strided_slice %9 {offsets = [0, 128], sizes = [2, 128], strides = [1, 1]} : vector<2x384xf32> to vector<2x128xf32>
    %20 = vector.extract_strided_slice %10 {offsets = [0, 128], sizes = [2, 128], strides = [1, 1]} : vector<2x384xf32> to vector<2x128xf32>
    %21 = arith.addf %19, %20 : vector<2x128xf32>
    %22 = arith.negf %21 : vector<2x128xf32>
    %23 = math.exp %22 : vector<2x128xf32>
    %cst_17 = arith.constant 1.000000e+00 : f32
    %24 = vector.broadcast %cst_17 : f32 to vector<2x128xf32>
    %25 = arith.addf %24, %23 : vector<2x128xf32>
    %26 = arith.divf %24, %25 : vector<2x128xf32>
    %27 = vector.extract_strided_slice %9 {offsets = [0, 256], sizes = [2, 128], strides = [1, 1]} : vector<2x384xf32> to vector<2x128xf32>
    %28 = vector.extract_strided_slice %10 {offsets = [0, 256], sizes = [2, 128], strides = [1, 1]} : vector<2x384xf32> to vector<2x128xf32>
    %29 = vector.broadcast %4 : vector<1x128xf32> to vector<2x128xf32>
    %30 = arith.addf %28, %29 : vector<2x128xf32>
    %31 = arith.mulf %18, %30 : vector<2x128xf32>
    %32 = arith.addf %27, %31 : vector<2x128xf32>
    %33 = math.tanh %32 : vector<2x128xf32>
    %cst_18 = arith.constant 1.000000e+00 : f32
    %34 = vector.broadcast %cst_18 : f32 to vector<2x128xf32>
    %35 = arith.subf %34, %26 : vector<2x128xf32>
    %36 = arith.mulf %35, %33 : vector<2x128xf32>
    %37 = arith.mulf %26, %6 : vector<2x128xf32>
    %38 = arith.addf %36, %37 : vector<2x128xf32>
    %cst_19 = arith.constant dense<0.000000e+00> : vector<2x384xf32>
    %39 = tpu.matmul %38, %1, %cst_19 {dimension_numbers = #tpu.dot_dimension_numbers<[1], [0], [0], [1], [0, 0, 1, 1], [], []>} : vector<2x128xf32>, vector<128x384xf32>, vector<2x384xf32> -> vector<2x384xf32>
    %40 = vector.broadcast %3 : vector<1x384xf32> to vector<2x384xf32>
    %41 = arith.addf %39, %40 : vector<2x384xf32>
    %cst_20 = arith.constant dense<0.000000e+00> : vector<2x384xf32>
    %42 = tpu.matmul %7, %2, %cst_20 {dimension_numbers = #tpu.dot_dimension_numbers<[1], [0], [0], [1], [0, 0, 1, 1], [], []>} : vector<2x128xf32>, vector<128x384xf32>, vector<2x384xf32> -> vector<2x384xf32>
    %43 = vector.extract_strided_slice %41 {offsets = [0, 0], sizes = [2, 128], strides = [1, 1]} : vector<2x384xf32> to vector<2x128xf32>
    %44 = vector.extract_strided_slice %42 {offsets = [0, 0], sizes = [2, 128], strides = [1, 1]} : vector<2x384xf32> to vector<2x128xf32>
    %45 = arith.addf %43, %44 : vector<2x128xf32>
    %46 = arith.negf %45 : vector<2x128xf32>
    %47 = math.exp %46 : vector<2x128xf32>
    %cst_21 = arith.constant 1.000000e+00 : f32
    %48 = vector.broadcast %cst_21 : f32 to vector<2x128xf32>
    %49 = arith.addf %48, %47 : vector<2x128xf32>
    %50 = arith.divf %48, %49 : vector<2x128xf32>
    %51 = vector.extract_strided_slice %41 {offsets = [0, 128], sizes = [2, 128], strides = [1, 1]} : vector<2x384xf32> to vector<2x128xf32>
    %52 = vector.extract_strided_slice %42 {offsets = [0, 128], sizes = [2, 128], strides = [1, 1]} : vector<2x384xf32> to vector<2x128xf32>
    %53 = arith.addf %51, %52 : vector<2x128xf32>
    %54 = arith.negf %53 : vector<2x128xf32>
    %55 = math.exp %54 : vector<2x128xf32>
    %cst_22 = arith.constant 1.000000e+00 : f32
    %56 = vector.broadcast %cst_22 : f32 to vector<2x128xf32>
    %57 = arith.addf %56, %55 : vector<2x128xf32>
    %58 = arith.divf %56, %57 : vector<2x128xf32>
    %59 = vector.extract_strided_slice %41 {offsets = [0, 256], sizes = [2, 128], strides = [1, 1]} : vector<2x384xf32> to vector<2x128xf32>
    %60 = vector.extract_strided_slice %42 {offsets = [0, 256], sizes = [2, 128], strides = [1, 1]} : vector<2x384xf32> to vector<2x128xf32>
    %61 = vector.broadcast %5 : vector<1x128xf32> to vector<2x128xf32>
    %62 = arith.addf %60, %61 : vector<2x128xf32>
    %63 = arith.mulf %50, %62 : vector<2x128xf32>
    %64 = arith.addf %59, %63 : vector<2x128xf32>
    %65 = math.tanh %64 : vector<2x128xf32>
    %cst_23 = arith.constant 1.000000e+00 : f32
    %66 = vector.broadcast %cst_23 : f32 to vector<2x128xf32>
    %67 = arith.subf %66, %58 : vector<2x128xf32>
    %68 = arith.mulf %67, %65 : vector<2x128xf32>
    %69 = arith.mulf %58, %7 : vector<2x128xf32>
    %70 = arith.addf %68, %69 : vector<2x128xf32>
    %c0_24 = arith.constant 0 : index
    %c0_25 = arith.constant 0 : index
    %71 = vector.load %arg12[%c0_24, %c0_25] : memref<16x128xf32, #tpu.memory_space<vmem>>, vector<2x128xf32>
    tpu.vector_store %arg12[%c0_24, %c0_25], %70 {strides = array<i32>} : memref<16x128xf32, #tpu.memory_space<vmem>>, vector<2x128xf32>,
    %c1 = arith.constant 1 : index
    %c0_26 = arith.constant 0 : index
    %c0_27 = arith.constant 0 : index
    %72 = vector.load %arg0[%c1, %c0_26, %c0_27] : memref<8x2x384xf32, #tpu.memory_space<vmem>>, vector<1x2x384xf32>
    %73 = vector.shape_cast %72 : vector<1x2x384xf32> to vector<2x384xf32>
    %cst_28 = arith.constant dense<0.000000e+00> : vector<2x384xf32>
    %74 = tpu.matmul %38, %0, %cst_28 {dimension_numbers = #tpu.dot_dimension_numbers<[1], [0], [0], [1], [0, 0, 1, 1], [], []>} : vector<2x128xf32>, vector<128x384xf32>, vector<2x384xf32> -> vector<2x384xf32>
    %75 = vector.extract_strided_slice %73 {offsets = [0, 0], sizes = [2, 128], strides = [1, 1]} : vector<2x384xf32> to vector<2x128xf32>
    %76 = vector.extract_strided_slice %74 {offsets = [0, 0], sizes = [2, 128], strides = [1, 1]} : vector<2x384xf32> to vector<2x128xf32>
    %77 = arith.addf %75, %76 : vector<2x128xf32>
    %78 = arith.negf %77 : vector<2x128xf32>
    %79 = math.exp %78 : vector<2x128xf32>
    %cst_29 = arith.constant 1.000000e+00 : f32
    %80 = vector.broadcast %cst_29 : f32 to vector<2x128xf32>
    %81 = arith.addf %80, %79 : vector<2x128xf32>
    %82 = arith.divf %80, %81 : vector<2x128xf32>
    %83 = vector.extract_strided_slice %73 {offsets = [0, 128], sizes = [2, 128], strides = [1, 1]} : vector<2x384xf32> to vector<2x128xf32>
    %84 = vector.extract_strided_slice %74 {offsets = [0, 128], sizes = [2, 128], strides = [1, 1]} : vector<2x384xf32> to vector<2x128xf32>
    %85 = arith.addf %83, %84 : vector<2x128xf32>
    %86 = arith.negf %85 : vector<2x128xf32>
    %87 = math.exp %86 : vector<2x128xf32>
    %cst_30 = arith.constant 1.000000e+00 : f32
    %88 = vector.broadcast %cst_30 : f32 to vector<2x128xf32>
    %89 = arith.addf %88, %87 : vector<2x128xf32>
    %90 = arith.divf %88, %89 : vector<2x128xf32>
    %91 = vector.extract_strided_slice %73 {offsets = [0, 256], sizes = [2, 128], strides = [1, 1]} : vector<2x384xf32> to vector<2x128xf32>
    %92 = vector.extract_strided_slice %74 {offsets = [0, 256], sizes = [2, 128], strides = [1, 1]} : vector<2x384xf32> to vector<2x128xf32>
    %93 = vector.broadcast %4 : vector<1x128xf32> to vector<2x128xf32>
    %94 = arith.addf %92, %93 : vector<2x128xf32>
    %95 = arith.mulf %82, %94 : vector<2x128xf32>
    %96 = arith.addf %91, %95 : vector<2x128xf32>
    %97 = math.tanh %96 : vector<2x128xf32>
    %cst_31 = arith.constant 1.000000e+00 : f32
    %98 = vector.broadcast %cst_31 : f32 to vector<2x128xf32>
    %99 = arith.subf %98, %90 : vector<2x128xf32>
    %100 = arith.mulf %99, %97 : vector<2x128xf32>
    %101 = arith.mulf %90, %38 : vector<2x128xf32>
    %102 = arith.addf %100, %101 : vector<2x128xf32>
    %cst_32 = arith.constant dense<0.000000e+00> : vector<2x384xf32>
    %103 = tpu.matmul %102, %1, %cst_32 {dimension_numbers = #tpu.dot_dimension_numbers<[1], [0], [0], [1], [0, 0, 1, 1], [], []>} : vector<2x128xf32>, vector<128x384xf32>, vector<2x384xf32> -> vector<2x384xf32>
    %104 = vector.broadcast %3 : vector<1x384xf32> to vector<2x384xf32>
    %105 = arith.addf %103, %104 : vector<2x384xf32>
    %cst_33 = arith.constant dense<0.000000e+00> : vector<2x384xf32>
    %106 = tpu.matmul %70, %2, %cst_33 {dimension_numbers = #tpu.dot_dimension_numbers<[1], [0], [0], [1], [0, 0, 1, 1], [], []>} : vector<2x128xf32>, vector<128x384xf32>, vector<2x384xf32> -> vector<2x384xf32>
    %107 = vector.extract_strided_slice %105 {offsets = [0, 0], sizes = [2, 128], strides = [1, 1]} : vector<2x384xf32> to vector<2x128xf32>
    %108 = vector.extract_strided_slice %106 {offsets = [0, 0], sizes = [2, 128], strides = [1, 1]} : vector<2x384xf32> to vector<2x128xf32>
    %109 = arith.addf %107, %108 : vector<2x128xf32>
    %110 = arith.negf %109 : vector<2x128xf32>
    %111 = math.exp %110 : vector<2x128xf32>
    %cst_34 = arith.constant 1.000000e+00 : f32
    %112 = vector.broadcast %cst_34 : f32 to vector<2x128xf32>
    %113 = arith.addf %112, %111 : vector<2x128xf32>
    %114 = arith.divf %112, %113 : vector<2x128xf32>
    %115 = vector.extract_strided_slice %105 {offsets = [0, 128], sizes = [2, 128], strides = [1, 1]} : vector<2x384xf32> to vector<2x128xf32>
    %116 = vector.extract_strided_slice %106 {offsets = [0, 128], sizes = [2, 128], strides = [1, 1]} : vector<2x384xf32> to vector<2x128xf32>
    %117 = arith.addf %115, %116 : vector<2x128xf32>
    %118 = arith.negf %117 : vector<2x128xf32>
    %119 = math.exp %118 : vector<2x128xf32>
    %cst_35 = arith.constant 1.000000e+00 : f32
    %120 = vector.broadcast %cst_35 : f32 to vector<2x128xf32>
    %121 = arith.addf %120, %119 : vector<2x128xf32>
    %122 = arith.divf %120, %121 : vector<2x128xf32>
    %123 = vector.extract_strided_slice %105 {offsets = [0, 256], sizes = [2, 128], strides = [1, 1]} : vector<2x384xf32> to vector<2x128xf32>
    %124 = vector.extract_strided_slice %106 {offsets = [0, 256], sizes = [2, 128], strides = [1, 1]} : vector<2x384xf32> to vector<2x128xf32>
    %125 = vector.broadcast %5 : vector<1x128xf32> to vector<2x128xf32>
    %126 = arith.addf %124, %125 : vector<2x128xf32>
    %127 = arith.mulf %114, %126 : vector<2x128xf32>
    %128 = arith.addf %123, %127 : vector<2x128xf32>
    %129 = math.tanh %128 : vector<2x128xf32>
    %cst_36 = arith.constant 1.000000e+00 : f32
    %130 = vector.broadcast %cst_36 : f32 to vector<2x128xf32>
    %131 = arith.subf %130, %122 : vector<2x128xf32>
    %132 = arith.mulf %131, %129 : vector<2x128xf32>
    %133 = arith.mulf %122, %70 : vector<2x128xf32>
    %134 = arith.addf %132, %133 : vector<2x128xf32>
    %c2 = arith.constant 2 : index
    %c0_37 = arith.constant 0 : index
    %135 = vector.load %arg12[%c2, %c0_37] : memref<16x128xf32, #tpu.memory_space<vmem>>, vector<2x128xf32>
    tpu.vector_store %arg12[%c2, %c0_37], %134 {strides = array<i32>} : memref<16x128xf32, #tpu.memory_space<vmem>>, vector<2x128xf32>,
    %c2_38 = arith.constant 2 : index
    %c0_39 = arith.constant 0 : index
    %c0_40 = arith.constant 0 : index
    %136 = vector.load %arg0[%c2_38, %c0_39, %c0_40] : memref<8x2x384xf32, #tpu.memory_space<vmem>>, vector<1x2x384xf32>
    %137 = vector.shape_cast %136 : vector<1x2x384xf32> to vector<2x384xf32>
    %cst_41 = arith.constant dense<0.000000e+00> : vector<2x384xf32>
    %138 = tpu.matmul %102, %0, %cst_41 {dimension_numbers = #tpu.dot_dimension_numbers<[1], [0], [0], [1], [0, 0, 1, 1], [], []>} : vector<2x128xf32>, vector<128x384xf32>, vector<2x384xf32> -> vector<2x384xf32>
    %139 = vector.extract_strided_slice %137 {offsets = [0, 0], sizes = [2, 128], strides = [1, 1]} : vector<2x384xf32> to vector<2x128xf32>
    %140 = vector.extract_strided_slice %138 {offsets = [0, 0], sizes = [2, 128], strides = [1, 1]} : vector<2x384xf32> to vector<2x128xf32>
    %141 = arith.addf %139, %140 : vector<2x128xf32>
    %142 = arith.negf %141 : vector<2x128xf32>
    %143 = math.exp %142 : vector<2x128xf32>
    %cst_42 = arith.constant 1.000000e+00 : f32
    %144 = vector.broadcast %cst_42 : f32 to vector<2x128xf32>
    %145 = arith.addf %144, %143 : vector<2x128xf32>
    %146 = arith.divf %144, %145 : vector<2x128xf32>
    %147 = vector.extract_strided_slice %137 {offsets = [0, 128], sizes = [2, 128], strides = [1, 1]} : vector<2x384xf32> to vector<2x128xf32>
    %148 = vector.extract_strided_slice %138 {offsets = [0, 128], sizes = [2, 128], strides = [1, 1]} : vector<2x384xf32> to vector<2x128xf32>
    %149 = arith.addf %147, %148 : vector<2x128xf32>
    %150 = arith.negf %149 : vector<2x128xf32>
    %151 = math.exp %150 : vector<2x128xf32>
    %cst_43 = arith.constant 1.000000e+00 : f32
    %152 = vector.broadcast %cst_43 : f32 to vector<2x128xf32>
    %153 = arith.addf %152, %151 : vector<2x128xf32>
    %154 = arith.divf %152, %153 : vector<2x128xf32>
    %155 = vector.extract_strided_slice %137 {offsets = [0, 256], sizes = [2, 128], strides = [1, 1]} : vector<2x384xf32> to vector<2x128xf32>
    %156 = vector.extract_strided_slice %138 {offsets = [0, 256], sizes = [2, 128], strides = [1, 1]} : vector<2x384xf32> to vector<2x128xf32>
    %157 = vector.broadcast %4 : vector<1x128xf32> to vector<2x128xf32>
    %158 = arith.addf %156, %157 : vector<2x128xf32>
    %159 = arith.mulf %146, %158 : vector<2x128xf32>
    %160 = arith.addf %155, %159 : vector<2x128xf32>
    %161 = math.tanh %160 : vector<2x128xf32>
    %cst_44 = arith.constant 1.000000e+00 : f32
    %162 = vector.broadcast %cst_44 : f32 to vector<2x128xf32>
    %163 = arith.subf %162, %154 : vector<2x128xf32>
    %164 = arith.mulf %163, %161 : vector<2x128xf32>
    %165 = arith.mulf %154, %102 : vector<2x128xf32>
    %166 = arith.addf %164, %165 : vector<2x128xf32>
    %cst_45 = arith.constant dense<0.000000e+00> : vector<2x384xf32>
    %167 = tpu.matmul %166, %1, %cst_45 {dimension_numbers = #tpu.dot_dimension_numbers<[1], [0], [0], [1], [0, 0, 1, 1], [], []>} : vector<2x128xf32>, vector<128x384xf32>, vector<2x384xf32> -> vector<2x384xf32>
    %168 = vector.broadcast %3 : vector<1x384xf32> to vector<2x384xf32>
    %169 = arith.addf %167, %168 : vector<2x384xf32>
    %cst_46 = arith.constant dense<0.000000e+00> : vector<2x384xf32>
    %170 = tpu.matmul %134, %2, %cst_46 {dimension_numbers = #tpu.dot_dimension_numbers<[1], [0], [0], [1], [0, 0, 1, 1], [], []>} : vector<2x128xf32>, vector<128x384xf32>, vector<2x384xf32> -> vector<2x384xf32>
    %171 = vector.extract_strided_slice %169 {offsets = [0, 0], sizes = [2, 128], strides = [1, 1]} : vector<2x384xf32> to vector<2x128xf32>
    %172 = vector.extract_strided_slice %170 {offsets = [0, 0], sizes = [2, 128], strides = [1, 1]} : vector<2x384xf32> to vector<2x128xf32>
    %173 = arith.addf %171, %172 : vector<2x128xf32>
    %174 = arith.negf %173 : vector<2x128xf32>
    %175 = math.exp %174 : vector<2x128xf32>
    %cst_47 = arith.constant 1.000000e+00 : f32
    %176 = vector.broadcast %cst_47 : f32 to vector<2x128xf32>
    %177 = arith.addf %176, %175 : vector<2x128xf32>
    %178 = arith.divf %176, %177 : vector<2x128xf32>
    %179 = vector.extract_strided_slice %169 {offsets = [0, 128], sizes = [2, 128], strides = [1, 1]} : vector<2x384xf32> to vector<2x128xf32>
    %180 = vector.extract_strided_slice %170 {offsets = [0, 128], sizes = [2, 128], strides = [1, 1]} : vector<2x384xf32> to vector<2x128xf32>
    %181 = arith.addf %179, %180 : vector<2x128xf32>
    %182 = arith.negf %181 : vector<2x128xf32>
    %183 = math.exp %182 : vector<2x128xf32>
    %cst_48 = arith.constant 1.000000e+00 : f32
    %184 = vector.broadcast %cst_48 : f32 to vector<2x128xf32>
    %185 = arith.addf %184, %183 : vector<2x128xf32>
    %186 = arith.divf %184, %185 : vector<2x128xf32>
    %187 = vector.extract_strided_slice %169 {offsets = [0, 256], sizes = [2, 128], strides = [1, 1]} : vector<2x384xf32> to vector<2x128xf32>
    %188 = vector.extract_strided_slice %170 {offsets = [0, 256], sizes = [2, 128], strides = [1, 1]} : vector<2x384xf32> to vector<2x128xf32>
    %189 = vector.broadcast %5 : vector<1x128xf32> to vector<2x128xf32>
    %190 = arith.addf %188, %189 : vector<2x128xf32>
    %191 = arith.mulf %178, %190 : vector<2x128xf32>
    %192 = arith.addf %187, %191 : vector<2x128xf32>
    %193 = math.tanh %192 : vector<2x128xf32>
    %cst_49 = arith.constant 1.000000e+00 : f32
    %194 = vector.broadcast %cst_49 : f32 to vector<2x128xf32>
    %195 = arith.subf %194, %186 : vector<2x128xf32>
    %196 = arith.mulf %195, %193 : vector<2x128xf32>
    %197 = arith.mulf %186, %134 : vector<2x128xf32>
    %198 = arith.addf %196, %197 : vector<2x128xf32>
    %c4 = arith.constant 4 : index
    %c0_50 = arith.constant 0 : index
    %199 = vector.load %arg12[%c4, %c0_50] : memref<16x128xf32, #tpu.memory_space<vmem>>, vector<2x128xf32>
    tpu.vector_store %arg12[%c4, %c0_50], %198 {strides = array<i32>} : memref<16x128xf32, #tpu.memory_space<vmem>>, vector<2x128xf32>,
    %c3 = arith.constant 3 : index
    %c0_51 = arith.constant 0 : index
    %c0_52 = arith.constant 0 : index
    %200 = vector.load %arg0[%c3, %c0_51, %c0_52] : memref<8x2x384xf32, #tpu.memory_space<vmem>>, vector<1x2x384xf32>
    %201 = vector.shape_cast %200 : vector<1x2x384xf32> to vector<2x384xf32>
    %cst_53 = arith.constant dense<0.000000e+00> : vector<2x384xf32>
    %202 = tpu.matmul %166, %0, %cst_53 {dimension_numbers = #tpu.dot_dimension_numbers<[1], [0], [0], [1], [0, 0, 1, 1], [], []>} : vector<2x128xf32>, vector<128x384xf32>, vector<2x384xf32> -> vector<2x384xf32>
    %203 = vector.extract_strided_slice %201 {offsets = [0, 0], sizes = [2, 128], strides = [1, 1]} : vector<2x384xf32> to vector<2x128xf32>
    %204 = vector.extract_strided_slice %202 {offsets = [0, 0], sizes = [2, 128], strides = [1, 1]} : vector<2x384xf32> to vector<2x128xf32>
    %205 = arith.addf %203, %204 : vector<2x128xf32>
    %206 = arith.negf %205 : vector<2x128xf32>
    %207 = math.exp %206 : vector<2x128xf32>
    %cst_54 = arith.constant 1.000000e+00 : f32
    %208 = vector.broadcast %cst_54 : f32 to vector<2x128xf32>
    %209 = arith.addf %208, %207 : vector<2x128xf32>
    %210 = arith.divf %208, %209 : vector<2x128xf32>
    %211 = vector.extract_strided_slice %201 {offsets = [0, 128], sizes = [2, 128], strides = [1, 1]} : vector<2x384xf32> to vector<2x128xf32>
    %212 = vector.extract_strided_slice %202 {offsets = [0, 128], sizes = [2, 128], strides = [1, 1]} : vector<2x384xf32> to vector<2x128xf32>
    %213 = arith.addf %211, %212 : vector<2x128xf32>
    %214 = arith.negf %213 : vector<2x128xf32>
    %215 = math.exp %214 : vector<2x128xf32>
    %cst_55 = arith.constant 1.000000e+00 : f32
    %216 = vector.broadcast %cst_55 : f32 to vector<2x128xf32>
    %217 = arith.addf %216, %215 : vector<2x128xf32>
    %218 = arith.divf %216, %217 : vector<2x128xf32>
    %219 = vector.extract_strided_slice %201 {offsets = [0, 256], sizes = [2, 128], strides = [1, 1]} : vector<2x384xf32> to vector<2x128xf32>
    %220 = vector.extract_strided_slice %202 {offsets = [0, 256], sizes = [2, 128], strides = [1, 1]} : vector<2x384xf32> to vector<2x128xf32>
    %221 = vector.broadcast %4 : vector<1x128xf32> to vector<2x128xf32>
    %222 = arith.addf %220, %221 : vector<2x128xf32>
    %223 = arith.mulf %210, %222 : vector<2x128xf32>
    %224 = arith.addf %219, %223 : vector<2x128xf32>
    %225 = math.tanh %224 : vector<2x128xf32>
    %cst_56 = arith.constant 1.000000e+00 : f32
    %226 = vector.broadcast %cst_56 : f32 to vector<2x128xf32>
    %227 = arith.subf %226, %218 : vector<2x128xf32>
    %228 = arith.mulf %227, %225 : vector<2x128xf32>
    %229 = arith.mulf %218, %166 : vector<2x128xf32>
    %230 = arith.addf %228, %229 : vector<2x128xf32>
    %cst_57 = arith.constant dense<0.000000e+00> : vector<2x384xf32>
    %231 = tpu.matmul %230, %1, %cst_57 {dimension_numbers = #tpu.dot_dimension_numbers<[1], [0], [0], [1], [0, 0, 1, 1], [], []>} : vector<2x128xf32>, vector<128x384xf32>, vector<2x384xf32> -> vector<2x384xf32>
    %232 = vector.broadcast %3 : vector<1x384xf32> to vector<2x384xf32>
    %233 = arith.addf %231, %232 : vector<2x384xf32>
    %cst_58 = arith.constant dense<0.000000e+00> : vector<2x384xf32>
    %234 = tpu.matmul %198, %2, %cst_58 {dimension_numbers = #tpu.dot_dimension_numbers<[1], [0], [0], [1], [0, 0, 1, 1], [], []>} : vector<2x128xf32>, vector<128x384xf32>, vector<2x384xf32> -> vector<2x384xf32>
    %235 = vector.extract_strided_slice %233 {offsets = [0, 0], sizes = [2, 128], strides = [1, 1]} : vector<2x384xf32> to vector<2x128xf32>
    %236 = vector.extract_strided_slice %234 {offsets = [0, 0], sizes = [2, 128], strides = [1, 1]} : vector<2x384xf32> to vector<2x128xf32>
    %237 = arith.addf %235, %236 : vector<2x128xf32>
    %238 = arith.negf %237 : vector<2x128xf32>
    %239 = math.exp %238 : vector<2x128xf32>
    %cst_59 = arith.constant 1.000000e+00 : f32
    %240 = vector.broadcast %cst_59 : f32 to vector<2x128xf32>
    %241 = arith.addf %240, %239 : vector<2x128xf32>
    %242 = arith.divf %240, %241 : vector<2x128xf32>
    %243 = vector.extract_strided_slice %233 {offsets = [0, 128], sizes = [2, 128], strides = [1, 1]} : vector<2x384xf32> to vector<2x128xf32>
    %244 = vector.extract_strided_slice %234 {offsets = [0, 128], sizes = [2, 128], strides = [1, 1]} : vector<2x384xf32> to vector<2x128xf32>
    %245 = arith.addf %243, %244 : vector<2x128xf32>
    %246 = arith.negf %245 : vector<2x128xf32>
    %247 = math.exp %246 : vector<2x128xf32>
    %cst_60 = arith.constant 1.000000e+00 : f32
    %248 = vector.broadcast %cst_60 : f32 to vector<2x128xf32>
    %249 = arith.addf %248, %247 : vector<2x128xf32>
    %250 = arith.divf %248, %249 : vector<2x128xf32>
    %251 = vector.extract_strided_slice %233 {offsets = [0, 256], sizes = [2, 128], strides = [1, 1]} : vector<2x384xf32> to vector<2x128xf32>
    %252 = vector.extract_strided_slice %234 {offsets = [0, 256], sizes = [2, 128], strides = [1, 1]} : vector<2x384xf32> to vector<2x128xf32>
    %253 = vector.broadcast %5 : vector<1x128xf32> to vector<2x128xf32>
    %254 = arith.addf %252, %253 : vector<2x128xf32>
    %255 = arith.mulf %242, %254 : vector<2x128xf32>
    %256 = arith.addf %251, %255 : vector<2x128xf32>
    %257 = math.tanh %256 : vector<2x128xf32>
    %cst_61 = arith.constant 1.000000e+00 : f32
    %258 = vector.broadcast %cst_61 : f32 to vector<2x128xf32>
    %259 = arith.subf %258, %250 : vector<2x128xf32>
    %260 = arith.mulf %259, %257 : vector<2x128xf32>
    %261 = arith.mulf %250, %198 : vector<2x128xf32>
    %262 = arith.addf %260, %261 : vector<2x128xf32>
    %c6 = arith.constant 6 : index
    %c0_62 = arith.constant 0 : index
    %263 = vector.load %arg12[%c6, %c0_62] : memref<16x128xf32, #tpu.memory_space<vmem>>, vector<2x128xf32>
    tpu.vector_store %arg12[%c6, %c0_62], %262 {strides = array<i32>} : memref<16x128xf32, #tpu.memory_space<vmem>>, vector<2x128xf32>,
    %c4_63 = arith.constant 4 : index
    %c0_64 = arith.constant 0 : index
    %c0_65 = arith.constant 0 : index
    %264 = vector.load %arg0[%c4_63, %c0_64, %c0_65] : memref<8x2x384xf32, #tpu.memory_space<vmem>>, vector<1x2x384xf32>
    %265 = vector.shape_cast %264 : vector<1x2x384xf32> to vector<2x384xf32>
    %cst_66 = arith.constant dense<0.000000e+00> : vector<2x384xf32>
    %266 = tpu.matmul %230, %0, %cst_66 {dimension_numbers = #tpu.dot_dimension_numbers<[1], [0], [0], [1], [0, 0, 1, 1], [], []>} : vector<2x128xf32>, vector<128x384xf32>, vector<2x384xf32> -> vector<2x384xf32>
    %267 = vector.extract_strided_slice %265 {offsets = [0, 0], sizes = [2, 128], strides = [1, 1]} : vector<2x384xf32> to vector<2x128xf32>
    %268 = vector.extract_strided_slice %266 {offsets = [0, 0], sizes = [2, 128], strides = [1, 1]} : vector<2x384xf32> to vector<2x128xf32>
    %269 = arith.addf %267, %268 : vector<2x128xf32>
    %270 = arith.negf %269 : vector<2x128xf32>
    %271 = math.exp %270 : vector<2x128xf32>
    %cst_67 = arith.constant 1.000000e+00 : f32
    %272 = vector.broadcast %cst_67 : f32 to vector<2x128xf32>
    %273 = arith.addf %272, %271 : vector<2x128xf32>
    %274 = arith.divf %272, %273 : vector<2x128xf32>
    %275 = vector.extract_strided_slice %265 {offsets = [0, 128], sizes = [2, 128], strides = [1, 1]} : vector<2x384xf32> to vector<2x128xf32>
    %276 = vector.extract_strided_slice %266 {offsets = [0, 128], sizes = [2, 128], strides = [1, 1]} : vector<2x384xf32> to vector<2x128xf32>
    %277 = arith.addf %275, %276 : vector<2x128xf32>
    %278 = arith.negf %277 : vector<2x128xf32>
    %279 = math.exp %278 : vector<2x128xf32>
    %cst_68 = arith.constant 1.000000e+00 : f32
    %280 = vector.broadcast %cst_68 : f32 to vector<2x128xf32>
    %281 = arith.addf %280, %279 : vector<2x128xf32>
    %282 = arith.divf %280, %281 : vector<2x128xf32>
    %283 = vector.extract_strided_slice %265 {offsets = [0, 256], sizes = [2, 128], strides = [1, 1]} : vector<2x384xf32> to vector<2x128xf32>
    %284 = vector.extract_strided_slice %266 {offsets = [0, 256], sizes = [2, 128], strides = [1, 1]} : vector<2x384xf32> to vector<2x128xf32>
    %285 = vector.broadcast %4 : vector<1x128xf32> to vector<2x128xf32>
    %286 = arith.addf %284, %285 : vector<2x128xf32>
    %287 = arith.mulf %274, %286 : vector<2x128xf32>
    %288 = arith.addf %283, %287 : vector<2x128xf32>
    %289 = math.tanh %288 : vector<2x128xf32>
    %cst_69 = arith.constant 1.000000e+00 : f32
    %290 = vector.broadcast %cst_69 : f32 to vector<2x128xf32>
    %291 = arith.subf %290, %282 : vector<2x128xf32>
    %292 = arith.mulf %291, %289 : vector<2x128xf32>
    %293 = arith.mulf %282, %230 : vector<2x128xf32>
    %294 = arith.addf %292, %293 : vector<2x128xf32>
    %cst_70 = arith.constant dense<0.000000e+00> : vector<2x384xf32>
    %295 = tpu.matmul %294, %1, %cst_70 {dimension_numbers = #tpu.dot_dimension_numbers<[1], [0], [0], [1], [0, 0, 1, 1], [], []>} : vector<2x128xf32>, vector<128x384xf32>, vector<2x384xf32> -> vector<2x384xf32>
    %296 = vector.broadcast %3 : vector<1x384xf32> to vector<2x384xf32>
    %297 = arith.addf %295, %296 : vector<2x384xf32>
    %cst_71 = arith.constant dense<0.000000e+00> : vector<2x384xf32>
    %298 = tpu.matmul %262, %2, %cst_71 {dimension_numbers = #tpu.dot_dimension_numbers<[1], [0], [0], [1], [0, 0, 1, 1], [], []>} : vector<2x128xf32>, vector<128x384xf32>, vector<2x384xf32> -> vector<2x384xf32>
    %299 = vector.extract_strided_slice %297 {offsets = [0, 0], sizes = [2, 128], strides = [1, 1]} : vector<2x384xf32> to vector<2x128xf32>
    %300 = vector.extract_strided_slice %298 {offsets = [0, 0], sizes = [2, 128], strides = [1, 1]} : vector<2x384xf32> to vector<2x128xf32>
    %301 = arith.addf %299, %300 : vector<2x128xf32>
    %302 = arith.negf %301 : vector<2x128xf32>
    %303 = math.exp %302 : vector<2x128xf32>
    %cst_72 = arith.constant 1.000000e+00 : f32
    %304 = vector.broadcast %cst_72 : f32 to vector<2x128xf32>
    %305 = arith.addf %304, %303 : vector<2x128xf32>
    %306 = arith.divf %304, %305 : vector<2x128xf32>
    %307 = vector.extract_strided_slice %297 {offsets = [0, 128], sizes = [2, 128], strides = [1, 1]} : vector<2x384xf32> to vector<2x128xf32>
    %308 = vector.extract_strided_slice %298 {offsets = [0, 128], sizes = [2, 128], strides = [1, 1]} : vector<2x384xf32> to vector<2x128xf32>
    %309 = arith.addf %307, %308 : vector<2x128xf32>
    %310 = arith.negf %309 : vector<2x128xf32>
    %311 = math.exp %310 : vector<2x128xf32>
    %cst_73 = arith.constant 1.000000e+00 : f32
    %312 = vector.broadcast %cst_73 : f32 to vector<2x128xf32>
    %313 = arith.addf %312, %311 : vector<2x128xf32>
    %314 = arith.divf %312, %313 : vector<2x128xf32>
    %315 = vector.extract_strided_slice %297 {offsets = [0, 256], sizes = [2, 128], strides = [1, 1]} : vector<2x384xf32> to vector<2x128xf32>
    %316 = vector.extract_strided_slice %298 {offsets = [0, 256], sizes = [2, 128], strides = [1, 1]} : vector<2x384xf32> to vector<2x128xf32>
    %317 = vector.broadcast %5 : vector<1x128xf32> to vector<2x128xf32>
    %318 = arith.addf %316, %317 : vector<2x128xf32>
    %319 = arith.mulf %306, %318 : vector<2x128xf32>
    %320 = arith.addf %315, %319 : vector<2x128xf32>
    %321 = math.tanh %320 : vector<2x128xf32>
    %cst_74 = arith.constant 1.000000e+00 : f32
    %322 = vector.broadcast %cst_74 : f32 to vector<2x128xf32>
    %323 = arith.subf %322, %314 : vector<2x128xf32>
    %324 = arith.mulf %323, %321 : vector<2x128xf32>
    %325 = arith.mulf %314, %262 : vector<2x128xf32>
    %326 = arith.addf %324, %325 : vector<2x128xf32>
    %c8 = arith.constant 8 : index
    %c0_75 = arith.constant 0 : index
    %327 = vector.load %arg12[%c8, %c0_75] : memref<16x128xf32, #tpu.memory_space<vmem>>, vector<2x128xf32>
    tpu.vector_store %arg12[%c8, %c0_75], %326 {strides = array<i32>} : memref<16x128xf32, #tpu.memory_space<vmem>>, vector<2x128xf32>,
    %c5 = arith.constant 5 : index
    %c0_76 = arith.constant 0 : index
    %c0_77 = arith.constant 0 : index
    %328 = vector.load %arg0[%c5, %c0_76, %c0_77] : memref<8x2x384xf32, #tpu.memory_space<vmem>>, vector<1x2x384xf32>
    %329 = vector.shape_cast %328 : vector<1x2x384xf32> to vector<2x384xf32>
    %cst_78 = arith.constant dense<0.000000e+00> : vector<2x384xf32>
    %330 = tpu.matmul %294, %0, %cst_78 {dimension_numbers = #tpu.dot_dimension_numbers<[1], [0], [0], [1], [0, 0, 1, 1], [], []>} : vector<2x128xf32>, vector<128x384xf32>, vector<2x384xf32> -> vector<2x384xf32>
    %331 = vector.extract_strided_slice %329 {offsets = [0, 0], sizes = [2, 128], strides = [1, 1]} : vector<2x384xf32> to vector<2x128xf32>
    %332 = vector.extract_strided_slice %330 {offsets = [0, 0], sizes = [2, 128], strides = [1, 1]} : vector<2x384xf32> to vector<2x128xf32>
    %333 = arith.addf %331, %332 : vector<2x128xf32>
    %334 = arith.negf %333 : vector<2x128xf32>
    %335 = math.exp %334 : vector<2x128xf32>
    %cst_79 = arith.constant 1.000000e+00 : f32
    %336 = vector.broadcast %cst_79 : f32 to vector<2x128xf32>
    %337 = arith.addf %336, %335 : vector<2x128xf32>
    %338 = arith.divf %336, %337 : vector<2x128xf32>
    %339 = vector.extract_strided_slice %329 {offsets = [0, 128], sizes = [2, 128], strides = [1, 1]} : vector<2x384xf32> to vector<2x128xf32>
    %340 = vector.extract_strided_slice %330 {offsets = [0, 128], sizes = [2, 128], strides = [1, 1]} : vector<2x384xf32> to vector<2x128xf32>
    %341 = arith.addf %339, %340 : vector<2x128xf32>
    %342 = arith.negf %341 : vector<2x128xf32>
    %343 = math.exp %342 : vector<2x128xf32>
    %cst_80 = arith.constant 1.000000e+00 : f32
    %344 = vector.broadcast %cst_80 : f32 to vector<2x128xf32>
    %345 = arith.addf %344, %343 : vector<2x128xf32>
    %346 = arith.divf %344, %345 : vector<2x128xf32>
    %347 = vector.extract_strided_slice %329 {offsets = [0, 256], sizes = [2, 128], strides = [1, 1]} : vector<2x384xf32> to vector<2x128xf32>
    %348 = vector.extract_strided_slice %330 {offsets = [0, 256], sizes = [2, 128], strides = [1, 1]} : vector<2x384xf32> to vector<2x128xf32>
    %349 = vector.broadcast %4 : vector<1x128xf32> to vector<2x128xf32>
    %350 = arith.addf %348, %349 : vector<2x128xf32>
    %351 = arith.mulf %338, %350 : vector<2x128xf32>
    %352 = arith.addf %347, %351 : vector<2x128xf32>
    %353 = math.tanh %352 : vector<2x128xf32>
    %cst_81 = arith.constant 1.000000e+00 : f32
    %354 = vector.broadcast %cst_81 : f32 to vector<2x128xf32>
    %355 = arith.subf %354, %346 : vector<2x128xf32>
    %356 = arith.mulf %355, %353 : vector<2x128xf32>
    %357 = arith.mulf %346, %294 : vector<2x128xf32>
    %358 = arith.addf %356, %357 : vector<2x128xf32>
    %cst_82 = arith.constant dense<0.000000e+00> : vector<2x384xf32>
    %359 = tpu.matmul %358, %1, %cst_82 {dimension_numbers = #tpu.dot_dimension_numbers<[1], [0], [0], [1], [0, 0, 1, 1], [], []>} : vector<2x128xf32>, vector<128x384xf32>, vector<2x384xf32> -> vector<2x384xf32>
    %360 = vector.broadcast %3 : vector<1x384xf32> to vector<2x384xf32>
    %361 = arith.addf %359, %360 : vector<2x384xf32>
    %cst_83 = arith.constant dense<0.000000e+00> : vector<2x384xf32>
    %362 = tpu.matmul %326, %2, %cst_83 {dimension_numbers = #tpu.dot_dimension_numbers<[1], [0], [0], [1], [0, 0, 1, 1], [], []>} : vector<2x128xf32>, vector<128x384xf32>, vector<2x384xf32> -> vector<2x384xf32>
    %363 = vector.extract_strided_slice %361 {offsets = [0, 0], sizes = [2, 128], strides = [1, 1]} : vector<2x384xf32> to vector<2x128xf32>
    %364 = vector.extract_strided_slice %362 {offsets = [0, 0], sizes = [2, 128], strides = [1, 1]} : vector<2x384xf32> to vector<2x128xf32>
    %365 = arith.addf %363, %364 : vector<2x128xf32>
    %366 = arith.negf %365 : vector<2x128xf32>
    %367 = math.exp %366 : vector<2x128xf32>
    %cst_84 = arith.constant 1.000000e+00 : f32
    %368 = vector.broadcast %cst_84 : f32 to vector<2x128xf32>
    %369 = arith.addf %368, %367 : vector<2x128xf32>
    %370 = arith.divf %368, %369 : vector<2x128xf32>
    %371 = vector.extract_strided_slice %361 {offsets = [0, 128], sizes = [2, 128], strides = [1, 1]} : vector<2x384xf32> to vector<2x128xf32>
    %372 = vector.extract_strided_slice %362 {offsets = [0, 128], sizes = [2, 128], strides = [1, 1]} : vector<2x384xf32> to vector<2x128xf32>
    %373 = arith.addf %371, %372 : vector<2x128xf32>
    %374 = arith.negf %373 : vector<2x128xf32>
    %375 = math.exp %374 : vector<2x128xf32>
    %cst_85 = arith.constant 1.000000e+00 : f32
    %376 = vector.broadcast %cst_85 : f32 to vector<2x128xf32>
    %377 = arith.addf %376, %375 : vector<2x128xf32>
    %378 = arith.divf %376, %377 : vector<2x128xf32>
    %379 = vector.extract_strided_slice %361 {offsets = [0, 256], sizes = [2, 128], strides = [1, 1]} : vector<2x384xf32> to vector<2x128xf32>
    %380 = vector.extract_strided_slice %362 {offsets = [0, 256], sizes = [2, 128], strides = [1, 1]} : vector<2x384xf32> to vector<2x128xf32>
    %381 = vector.broadcast %5 : vector<1x128xf32> to vector<2x128xf32>
    %382 = arith.addf %380, %381 : vector<2x128xf32>
    %383 = arith.mulf %370, %382 : vector<2x128xf32>
    %384 = arith.addf %379, %383 : vector<2x128xf32>
    %385 = math.tanh %384 : vector<2x128xf32>
    %cst_86 = arith.constant 1.000000e+00 : f32
    %386 = vector.broadcast %cst_86 : f32 to vector<2x128xf32>
    %387 = arith.subf %386, %378 : vector<2x128xf32>
    %388 = arith.mulf %387, %385 : vector<2x128xf32>
    %389 = arith.mulf %378, %326 : vector<2x128xf32>
    %390 = arith.addf %388, %389 : vector<2x128xf32>
    %c10 = arith.constant 10 : index
    %c0_87 = arith.constant 0 : index
    %391 = vector.load %arg12[%c10, %c0_87] : memref<16x128xf32, #tpu.memory_space<vmem>>, vector<2x128xf32>
    tpu.vector_store %arg12[%c10, %c0_87], %390 {strides = array<i32>} : memref<16x128xf32, #tpu.memory_space<vmem>>, vector<2x128xf32>,
    %c6_88 = arith.constant 6 : index
    %c0_89 = arith.constant 0 : index
    %c0_90 = arith.constant 0 : index
    %392 = vector.load %arg0[%c6_88, %c0_89, %c0_90] : memref<8x2x384xf32, #tpu.memory_space<vmem>>, vector<1x2x384xf32>
    %393 = vector.shape_cast %392 : vector<1x2x384xf32> to vector<2x384xf32>
    %cst_91 = arith.constant dense<0.000000e+00> : vector<2x384xf32>
    %394 = tpu.matmul %358, %0, %cst_91 {dimension_numbers = #tpu.dot_dimension_numbers<[1], [0], [0], [1], [0, 0, 1, 1], [], []>} : vector<2x128xf32>, vector<128x384xf32>, vector<2x384xf32> -> vector<2x384xf32>
    %395 = vector.extract_strided_slice %393 {offsets = [0, 0], sizes = [2, 128], strides = [1, 1]} : vector<2x384xf32> to vector<2x128xf32>
    %396 = vector.extract_strided_slice %394 {offsets = [0, 0], sizes = [2, 128], strides = [1, 1]} : vector<2x384xf32> to vector<2x128xf32>
    %397 = arith.addf %395, %396 : vector<2x128xf32>
    %398 = arith.negf %397 : vector<2x128xf32>
    %399 = math.exp %398 : vector<2x128xf32>
    %cst_92 = arith.constant 1.000000e+00 : f32
    %400 = vector.broadcast %cst_92 : f32 to vector<2x128xf32>
    %401 = arith.addf %400, %399 : vector<2x128xf32>
    %402 = arith.divf %400, %401 : vector<2x128xf32>
    %403 = vector.extract_strided_slice %393 {offsets = [0, 128], sizes = [2, 128], strides = [1, 1]} : vector<2x384xf32> to vector<2x128xf32>
    %404 = vector.extract_strided_slice %394 {offsets = [0, 128], sizes = [2, 128], strides = [1, 1]} : vector<2x384xf32> to vector<2x128xf32>
    %405 = arith.addf %403, %404 : vector<2x128xf32>
    %406 = arith.negf %405 : vector<2x128xf32>
    %407 = math.exp %406 : vector<2x128xf32>
    %cst_93 = arith.constant 1.000000e+00 : f32
    %408 = vector.broadcast %cst_93 : f32 to vector<2x128xf32>
    %409 = arith.addf %408, %407 : vector<2x128xf32>
    %410 = arith.divf %408, %409 : vector<2x128xf32>
    %411 = vector.extract_strided_slice %393 {offsets = [0, 256], sizes = [2, 128], strides = [1, 1]} : vector<2x384xf32> to vector<2x128xf32>
    %412 = vector.extract_strided_slice %394 {offsets = [0, 256], sizes = [2, 128], strides = [1, 1]} : vector<2x384xf32> to vector<2x128xf32>
    %413 = vector.broadcast %4 : vector<1x128xf32> to vector<2x128xf32>
    %414 = arith.addf %412, %413 : vector<2x128xf32>
    %415 = arith.mulf %402, %414 : vector<2x128xf32>
    %416 = arith.addf %411, %415 : vector<2x128xf32>
    %417 = math.tanh %416 : vector<2x128xf32>
    %cst_94 = arith.constant 1.000000e+00 : f32
    %418 = vector.broadcast %cst_94 : f32 to vector<2x128xf32>
    %419 = arith.subf %418, %410 : vector<2x128xf32>
    %420 = arith.mulf %419, %417 : vector<2x128xf32>
    %421 = arith.mulf %410, %358 : vector<2x128xf32>
    %422 = arith.addf %420, %421 : vector<2x128xf32>
    %cst_95 = arith.constant dense<0.000000e+00> : vector<2x384xf32>
    %423 = tpu.matmul %422, %1, %cst_95 {dimension_numbers = #tpu.dot_dimension_numbers<[1], [0], [0], [1], [0, 0, 1, 1], [], []>} : vector<2x128xf32>, vector<128x384xf32>, vector<2x384xf32> -> vector<2x384xf32>
    %424 = vector.broadcast %3 : vector<1x384xf32> to vector<2x384xf32>
    %425 = arith.addf %423, %424 : vector<2x384xf32>
    %cst_96 = arith.constant dense<0.000000e+00> : vector<2x384xf32>
    %426 = tpu.matmul %390, %2, %cst_96 {dimension_numbers = #tpu.dot_dimension_numbers<[1], [0], [0], [1], [0, 0, 1, 1], [], []>} : vector<2x128xf32>, vector<128x384xf32>, vector<2x384xf32> -> vector<2x384xf32>
    %427 = vector.extract_strided_slice %425 {offsets = [0, 0], sizes = [2, 128], strides = [1, 1]} : vector<2x384xf32> to vector<2x128xf32>
    %428 = vector.extract_strided_slice %426 {offsets = [0, 0], sizes = [2, 128], strides = [1, 1]} : vector<2x384xf32> to vector<2x128xf32>
    %429 = arith.addf %427, %428 : vector<2x128xf32>
    %430 = arith.negf %429 : vector<2x128xf32>
    %431 = math.exp %430 : vector<2x128xf32>
    %cst_97 = arith.constant 1.000000e+00 : f32
    %432 = vector.broadcast %cst_97 : f32 to vector<2x128xf32>
    %433 = arith.addf %432, %431 : vector<2x128xf32>
    %434 = arith.divf %432, %433 : vector<2x128xf32>
    %435 = vector.extract_strided_slice %425 {offsets = [0, 128], sizes = [2, 128], strides = [1, 1]} : vector<2x384xf32> to vector<2x128xf32>
    %436 = vector.extract_strided_slice %426 {offsets = [0, 128], sizes = [2, 128], strides = [1, 1]} : vector<2x384xf32> to vector<2x128xf32>
    %437 = arith.addf %435, %436 : vector<2x128xf32>
    %438 = arith.negf %437 : vector<2x128xf32>
    %439 = math.exp %438 : vector<2x128xf32>
    %cst_98 = arith.constant 1.000000e+00 : f32
    %440 = vector.broadcast %cst_98 : f32 to vector<2x128xf32>
    %441 = arith.addf %440, %439 : vector<2x128xf32>
    %442 = arith.divf %440, %441 : vector<2x128xf32>
    %443 = vector.extract_strided_slice %425 {offsets = [0, 256], sizes = [2, 128], strides = [1, 1]} : vector<2x384xf32> to vector<2x128xf32>
    %444 = vector.extract_strided_slice %426 {offsets = [0, 256], sizes = [2, 128], strides = [1, 1]} : vector<2x384xf32> to vector<2x128xf32>
    %445 = vector.broadcast %5 : vector<1x128xf32> to vector<2x128xf32>
    %446 = arith.addf %444, %445 : vector<2x128xf32>
    %447 = arith.mulf %434, %446 : vector<2x128xf32>
    %448 = arith.addf %443, %447 : vector<2x128xf32>
    %449 = math.tanh %448 : vector<2x128xf32>
    %cst_99 = arith.constant 1.000000e+00 : f32
    %450 = vector.broadcast %cst_99 : f32 to vector<2x128xf32>
    %451 = arith.subf %450, %442 : vector<2x128xf32>
    %452 = arith.mulf %451, %449 : vector<2x128xf32>
    %453 = arith.mulf %442, %390 : vector<2x128xf32>
    %454 = arith.addf %452, %453 : vector<2x128xf32>
    %c12 = arith.constant 12 : index
    %c0_100 = arith.constant 0 : index
    %455 = vector.load %arg12[%c12, %c0_100] : memref<16x128xf32, #tpu.memory_space<vmem>>, vector<2x128xf32>
    tpu.vector_store %arg12[%c12, %c0_100], %454 {strides = array<i32>} : memref<16x128xf32, #tpu.memory_space<vmem>>, vector<2x128xf32>,
    %c7 = arith.constant 7 : index
    %c0_101 = arith.constant 0 : index
    %c0_102 = arith.constant 0 : index
    %456 = vector.load %arg0[%c7, %c0_101, %c0_102] : memref<8x2x384xf32, #tpu.memory_space<vmem>>, vector<1x2x384xf32>
    %457 = vector.shape_cast %456 : vector<1x2x384xf32> to vector<2x384xf32>
    %cst_103 = arith.constant dense<0.000000e+00> : vector<2x384xf32>
    %458 = tpu.matmul %422, %0, %cst_103 {dimension_numbers = #tpu.dot_dimension_numbers<[1], [0], [0], [1], [0, 0, 1, 1], [], []>} : vector<2x128xf32>, vector<128x384xf32>, vector<2x384xf32> -> vector<2x384xf32>
    %459 = vector.extract_strided_slice %457 {offsets = [0, 0], sizes = [2, 128], strides = [1, 1]} : vector<2x384xf32> to vector<2x128xf32>
    %460 = vector.extract_strided_slice %458 {offsets = [0, 0], sizes = [2, 128], strides = [1, 1]} : vector<2x384xf32> to vector<2x128xf32>
    %461 = arith.addf %459, %460 : vector<2x128xf32>
    %462 = arith.negf %461 : vector<2x128xf32>
    %463 = math.exp %462 : vector<2x128xf32>
    %cst_104 = arith.constant 1.000000e+00 : f32
    %464 = vector.broadcast %cst_104 : f32 to vector<2x128xf32>
    %465 = arith.addf %464, %463 : vector<2x128xf32>
    %466 = arith.divf %464, %465 : vector<2x128xf32>
    %467 = vector.extract_strided_slice %457 {offsets = [0, 128], sizes = [2, 128], strides = [1, 1]} : vector<2x384xf32> to vector<2x128xf32>
    %468 = vector.extract_strided_slice %458 {offsets = [0, 128], sizes = [2, 128], strides = [1, 1]} : vector<2x384xf32> to vector<2x128xf32>
    %469 = arith.addf %467, %468 : vector<2x128xf32>
    %470 = arith.negf %469 : vector<2x128xf32>
    %471 = math.exp %470 : vector<2x128xf32>
    %cst_105 = arith.constant 1.000000e+00 : f32
    %472 = vector.broadcast %cst_105 : f32 to vector<2x128xf32>
    %473 = arith.addf %472, %471 : vector<2x128xf32>
    %474 = arith.divf %472, %473 : vector<2x128xf32>
    %475 = vector.extract_strided_slice %457 {offsets = [0, 256], sizes = [2, 128], strides = [1, 1]} : vector<2x384xf32> to vector<2x128xf32>
    %476 = vector.extract_strided_slice %458 {offsets = [0, 256], sizes = [2, 128], strides = [1, 1]} : vector<2x384xf32> to vector<2x128xf32>
    %477 = vector.broadcast %4 : vector<1x128xf32> to vector<2x128xf32>
    %478 = arith.addf %476, %477 : vector<2x128xf32>
    %479 = arith.mulf %466, %478 : vector<2x128xf32>
    %480 = arith.addf %475, %479 : vector<2x128xf32>
    %481 = math.tanh %480 : vector<2x128xf32>
    %cst_106 = arith.constant 1.000000e+00 : f32
    %482 = vector.broadcast %cst_106 : f32 to vector<2x128xf32>
    %483 = arith.subf %482, %474 : vector<2x128xf32>
    %484 = arith.mulf %483, %481 : vector<2x128xf32>
    %485 = arith.mulf %474, %422 : vector<2x128xf32>
    %486 = arith.addf %484, %485 : vector<2x128xf32>
    %cst_107 = arith.constant dense<0.000000e+00> : vector<2x384xf32>
    %487 = tpu.matmul %486, %1, %cst_107 {dimension_numbers = #tpu.dot_dimension_numbers<[1], [0], [0], [1], [0, 0, 1, 1], [], []>} : vector<2x128xf32>, vector<128x384xf32>, vector<2x384xf32> -> vector<2x384xf32>
    %488 = vector.broadcast %3 : vector<1x384xf32> to vector<2x384xf32>
    %489 = arith.addf %487, %488 : vector<2x384xf32>
    %cst_108 = arith.constant dense<0.000000e+00> : vector<2x384xf32>
    %490 = tpu.matmul %454, %2, %cst_108 {dimension_numbers = #tpu.dot_dimension_numbers<[1], [0], [0], [1], [0, 0, 1, 1], [], []>} : vector<2x128xf32>, vector<128x384xf32>, vector<2x384xf32> -> vector<2x384xf32>
    %491 = vector.extract_strided_slice %489 {offsets = [0, 0], sizes = [2, 128], strides = [1, 1]} : vector<2x384xf32> to vector<2x128xf32>
    %492 = vector.extract_strided_slice %490 {offsets = [0, 0], sizes = [2, 128], strides = [1, 1]} : vector<2x384xf32> to vector<2x128xf32>
    %493 = arith.addf %491, %492 : vector<2x128xf32>
    %494 = arith.negf %493 : vector<2x128xf32>
    %495 = math.exp %494 : vector<2x128xf32>
    %cst_109 = arith.constant 1.000000e+00 : f32
    %496 = vector.broadcast %cst_109 : f32 to vector<2x128xf32>
    %497 = arith.addf %496, %495 : vector<2x128xf32>
    %498 = arith.divf %496, %497 : vector<2x128xf32>
    %499 = vector.extract_strided_slice %489 {offsets = [0, 128], sizes = [2, 128], strides = [1, 1]} : vector<2x384xf32> to vector<2x128xf32>
    %500 = vector.extract_strided_slice %490 {offsets = [0, 128], sizes = [2, 128], strides = [1, 1]} : vector<2x384xf32> to vector<2x128xf32>
    %501 = arith.addf %499, %500 : vector<2x128xf32>
    %502 = arith.negf %501 : vector<2x128xf32>
    %503 = math.exp %502 : vector<2x128xf32>
    %cst_110 = arith.constant 1.000000e+00 : f32
    %504 = vector.broadcast %cst_110 : f32 to vector<2x128xf32>
    %505 = arith.addf %504, %503 : vector<2x128xf32>
    %506 = arith.divf %504, %505 : vector<2x128xf32>
    %507 = vector.extract_strided_slice %489 {offsets = [0, 256], sizes = [2, 128], strides = [1, 1]} : vector<2x384xf32> to vector<2x128xf32>
    %508 = vector.extract_strided_slice %490 {offsets = [0, 256], sizes = [2, 128], strides = [1, 1]} : vector<2x384xf32> to vector<2x128xf32>
    %509 = vector.broadcast %5 : vector<1x128xf32> to vector<2x128xf32>
    %510 = arith.addf %508, %509 : vector<2x128xf32>
    %511 = arith.mulf %498, %510 : vector<2x128xf32>
    %512 = arith.addf %507, %511 : vector<2x128xf32>
    %513 = math.tanh %512 : vector<2x128xf32>
    %cst_111 = arith.constant 1.000000e+00 : f32
    %514 = vector.broadcast %cst_111 : f32 to vector<2x128xf32>
    %515 = arith.subf %514, %506 : vector<2x128xf32>
    %516 = arith.mulf %515, %513 : vector<2x128xf32>
    %517 = arith.mulf %506, %454 : vector<2x128xf32>
    %518 = arith.addf %516, %517 : vector<2x128xf32>
    %c14 = arith.constant 14 : index
    %c0_112 = arith.constant 0 : index
    %519 = vector.load %arg12[%c14, %c0_112] : memref<16x128xf32, #tpu.memory_space<vmem>>, vector<2x128xf32>
    tpu.vector_store %arg12[%c14, %c0_112], %518 {strides = array<i32>} : memref<16x128xf32, #tpu.memory_space<vmem>>, vector<2x128xf32>,
    %c0_113 = arith.constant 0 : index
    %c0_114 = arith.constant 0 : index
    %520 = vector.load %arg12[%c0_113, %c0_114] : memref<16x128xf32, #tpu.memory_space<vmem>>, vector<16x128xf32>
    %c0_115 = arith.constant 0 : index
    %c0_116 = arith.constant 0 : index
    %521 = vector.load %arg7[%c0_115, %c0_116] : memref<128x128xf32, #tpu.memory_space<vmem>>, vector<128x128xf32>
    %cst_117 = arith.constant dense<0.000000e+00> : vector<16x128xf32>
    %522 = tpu.matmul %520, %521, %cst_117 {dimension_numbers = #tpu.dot_dimension_numbers<[1], [0], [0], [1], [0, 0, 1, 1], [], []>} : vector<16x128xf32>, vector<128x128xf32>, vector<16x128xf32> -> vector<16x128xf32>
    %c0_118 = arith.constant 0 : index
    %c0_119 = arith.constant 0 : index
    %523 = vector.load %arg8[%c0_118, %c0_119] : memref<1x128xf32, #tpu.memory_space<vmem>>, vector<1x128xf32>
    %524 = vector.broadcast %523 : vector<1x128xf32> to vector<16x128xf32>
    %525 = arith.addf %522, %524 : vector<16x128xf32>
    %cst_120 = arith.constant 0.000000e+00 : f32
    %526 = vector.broadcast %cst_120 : f32 to vector<16x128xf32>
    %527 = arith.maximumf %525, %526 : vector<16x128xf32>
    %c0_121 = arith.constant 0 : index
    %c0_122 = arith.constant 0 : index
    %528 = vector.load %arg9[%c0_121, %c0_122] : memref<128x128xf32, #tpu.memory_space<vmem>>, vector<128x128xf32>
    %cst_123 = arith.constant dense<0.000000e+00> : vector<16x128xf32>
    %529 = tpu.matmul %527, %528, %cst_123 {dimension_numbers = #tpu.dot_dimension_numbers<[1], [0], [0], [1], [0, 0, 1, 1], [], []>} : vector<16x128xf32>, vector<128x128xf32>, vector<16x128xf32> -> vector<16x128xf32>
    %c0_124 = arith.constant 0 : index
    %c0_125 = arith.constant 0 : index
    %530 = vector.load %arg10[%c0_124, %c0_125] : memref<1x128xf32, #tpu.memory_space<vmem>>, vector<1x128xf32>
    %531 = vector.broadcast %530 : vector<1x128xf32> to vector<16x128xf32>
    %532 = arith.addf %529, %531 : vector<16x128xf32>
    %c0_126 = arith.constant 0 : index
    %c0_127 = arith.constant 0 : index
    %533 = vector.load %arg11[%c0_126, %c0_127] : memref<16x128xf32, #tpu.memory_space<vmem>>, vector<16x128xf32>
    tpu.vector_store %arg11[%c0_126, %c0_127], %532 {strides = array<i32>} : memref<16x128xf32, #tpu.memory_space<vmem>>, vector<16x128xf32>,
    return
  }
}

</mosaic_0001>

<bundles_post_ra>
// kernel: forward.2
= control target key start
LH: loop header
LB: loop body
LE: loop exit
PB: predicated region body
PF: predicated region fallthrough
CT: control target
= control target key end

     0   :  { %s2290_s0 = inlined_call_operand.vmem [shape: f32[2,16], index: 0, kind: input, shape index: {}]   ;;  %s2291_s1 = inlined_call_operand.vmem [shape: f32[16,18], index: 1, kind: input, shape index: {}]   ;;  %s2292_s2 = inlined_call_operand.vmem [shape: f32[16,4], index: 2, kind: input, shape index: {}]   ;;  %s2293_s3 = inlined_call_operand.vmem [shape: f32[16,32], index: 3, kind: input, shape index: {}]   ;;  %s2294_s4 = inlined_call_operand.hbm [shape: f32[1,32], index: 4, kind: input, shape index: {}]   ;;  %s2295_s5 = inlined_call_operand.hbm [shape: f32[4,32], index: 5, kind: input, shape index: {}]   ;;  %s2296_s6 = inlined_call_operand.hbm [shape: f32[1,32], index: 6, kind: input, shape index: {}]   ;;  %s2297_s7 = inlined_call_operand.hbm [shape: f32[18,32], index: 7, kind: input, shape index: {}]   ;;  %s2298_s8 = inlined_call_operand.vmem [shape: f32[1,32], index: 8, kind: input, shape index: {}]   ;;  %s2299_s9 = inlined_call_operand.vmem [shape: f32[4,32,32], index: 9, kind: input, shape index: {}]   ;;  %s2300_s10 = inlined_call_operand.hbm [shape: f32[4,1,32], index: 10, kind: input, shape index: {}]   ;;  %s2301_s11 = inlined_call_operand.hbm [shape: f32[32,128], index: 11, kind: input, shape index: {}]   ;;  %s2302_s12 = inlined_call_operand.hbm [shape: f32[1,128], index: 12, kind: input, shape index: {}]   ;;  %s2303_s13 = inlined_call_operand.hbm [shape: f32[32,384], index: 13, kind: input, shape index: {}]   ;;  %s2304_s14 = inlined_call_operand.hbm [shape: f32[32,384], index: 14, kind: input, shape index: {}]   ;;  %s2305_s15 = inlined_call_operand.vmem [shape: f32[1,384], index: 15, kind: input, shape index: {}]   ;;  %s2306_s16 = inlined_call_operand.vmem [shape: f32[16,128], index: 16, kind: output, shape index: {0}]   ;;  %s2307_s17 = inlined_call_operand.vmem [shape: f32[8,2,384], index: 17, kind: output, shape index: {1}]  }
   0x1   :  { %2309 = sst [smem:[#allocation21_spill]] %s2290_s0 }
   0x2   :  { %2310 = sst [smem:[#allocation22_spill]] %s2291_s1 }
   0x3   :  { %23 = vsyncpa [#allocation3], 0 }
   0x4   :  { %24 = vsyncpa [#allocation5], 0 }
   0x5   :  { %25 = vsyncpa [#allocation8], 0 }
   0x6   :  { %26 = vsyncpa [#allocation11], 0 }
   0x7   :  { %27 = vsyncpa [#allocation14], 0  ;;  %s1985_s24 = smov [#allocation4]   ;;  %s1986_s26 = smov [#allocation7]  }
   0x8   :  { %s52_s25 = sshll.u32 %s1985_s24, 4  ;;  %s71_s27 = sshll.u32 %s1986_s26, 4  ;;  %s53_s25 = int_to_ptr.vmem [resolvable:$true] %s52_s25  ;;  %s72_s27 = int_to_ptr.vmem [resolvable:$true] %s71_s27 }
   0x9   :  { %s1803_s28 = scalar_lea.vmem %s53_s25, 64  ;;  %p1808_p1 = scmp.lt.s32.totalorder %s53_s25, %s53_s25 }
   0xa   :  { %p1804_p0 = scmp.ne.s32.totalorder %s53_s25, %s1803_s28  ;;  %p1809_p2 = scmp.lt.s32.totalorder %s1803_s28, %s1803_s28 }
   0xc   :  { %p1810_p3 = por %p1809_p2, %p1808_p1 }
   0xe   :  { %p1811_p4 = pnand %p1810_p3, %p1804_p0 }
  0x10   :  { %1814 = shalt.err (!%p1811_p4)
}
  0x11   :  { %55 = dma.hbm_to_vmem [thread:$0]  %s2295_s5, 64, %s53_s25, [#allocation5]  }
  0x12   :  { %s1823_s30 = scalar_lea.vmem %s72_s27, 384  ;;  %p1828_p6 = scmp.lt.s32.totalorder %s72_s27, %s72_s27 }
  0x13   :  { %p1824_p5 = scmp.ne.s32.totalorder %s72_s27, %s1823_s30  ;;  %p1829_p7 = scmp.lt.s32.totalorder %s1823_s30, %s1823_s30 }
  0x15   :  { %p1830_p8 = por %p1829_p7, %p1828_p6 }
  0x17   :  { %p1831_p9 = pnand %p1830_p8, %p1824_p5 }
  0x19   :  { %1834 = shalt.err (!%p1831_p9)
}
  0x1a   :  { %s1987_s18 = smov 128   ;;  %s1988_s19 = smov 8  }
  0x1b   :  { %77 = dma.hbm_to_vmem [thread:$0]  %s2297_s7, 384, %s72_s27, [#allocation8], %s1987_s18, %s1987_s18, %s1988_s19  }
  0x1c   :  { %s1989_s21 = smov [#allocation10]   ;;  %s1990_s23 = smov [#allocation13]  }
  0x1d   :  { %s99_s22 = sshll.u32 %s1989_s21, 4  ;;  %s121_s24 = sshll.u32 %s1990_s23, 4  ;;  %s100_s22 = int_to_ptr.vmem [resolvable:$true] %s99_s22  ;;  %s122_s24 = int_to_ptr.vmem [resolvable:$true] %s121_s24 }
  0x1e   :  { %s1843_s5 = scalar_lea.vmem %s100_s22, 512  ;;  %p1848_p11 = scmp.lt.s32.totalorder %s100_s22, %s100_s22 }
  0x1f   :  { %p1844_p10 = scmp.ne.s32.totalorder %s100_s22, %s1843_s5  ;;  %p1849_p12 = scmp.lt.s32.totalorder %s1843_s5, %s1843_s5 }
  0x21   :  { %p1850_p13 = por %p1849_p12, %p1848_p11 }
  0x23   :  { %p1851_p0 = pnand %p1850_p13, %p1844_p10 }
  0x25   :  { %1854 = shalt.err (!%p1851_p0)
}
  0x26   :  { %105 = dma.hbm_to_vmem [thread:$0]  %s2301_s11, 512, %s100_s22, [#allocation11], %s1987_s18, %s1987_s18, %s1988_s19  }
  0x27   :  { %s1863_s28 = scalar_lea.vmem %s122_s24, 1536  ;;  %p1868_p2 = scmp.lt.s32.totalorder %s122_s24, %s122_s24 }
  0x28   :  { %p1864_p1 = scmp.ne.s32.totalorder %s122_s24, %s1863_s28  ;;  %p1869_p3 = scmp.lt.s32.totalorder %s1863_s28, %s1863_s28 }
  0x2a   :  { %p1870_p4 = por %p1869_p3, %p1868_p2 }
  0x2c   :  { %p1871_p5 = pnand %p1870_p4, %p1864_p1 }
  0x2e   :  { %1874 = shalt.err (!%p1871_p5)
}
  0x2f   :  { %s1991_s7 = smov 384   ;;  %s1992_s27 = smov 24  }
  0x30   :  { %127 = dma.hbm_to_vmem [thread:$0]  %s2303_s13, 1536, %s122_s24, [#allocation14], %s1991_s7, %s1991_s7, %s1992_s27  }
  0x31   :  { %s1993_s30 = smov [#allocation2]   ;;  %s1994_s20 = smov [#allocation6]  }
  0x32   :  { %s42_s1 = sshll.u32 %s1993_s30, 4  ;;  %s62_s11 = sshll.u32 %s1994_s20, 4  ;;  %s43_s1 = int_to_ptr.vmem [resolvable:$true] %s42_s1  ;;  %s63_s11 = int_to_ptr.vmem [resolvable:$true] %s62_s11 }
  0x33   :  { %s1883_s18 = scalar_lea.vmem %s43_s1, 16  ;;  %s1887_s19 = scalar_lea.vmem %s43_s1, 32 }
  0x34   :  { %p1884_p6 = scmp.ne.s32.totalorder %s43_s1, %s1883_s18  ;;  %p1888_p7 = scmp.lt.s32.totalorder %s43_s1, %s43_s1 }
  0x35   :  { %p1889_p8 = scmp.lt.s32.totalorder %s1887_s19, %s1883_s18 }
  0x37   :  { %p1890_p9 = por %p1889_p8, %p1888_p7 }
  0x39   :  { %p1891_p10 = pnand %p1890_p9, %p1884_p6 }
  0x3b   :  { %1894 = shalt.err (!%p1891_p10)
}
  0x3c   :  { %45 = dma.hbm_to_vmem [thread:$0]  %s2294_s4, 16, %s43_s1, [#allocation3]  }
  0x3d   :  { %s1903_s23 = scalar_lea.vmem %s63_s11, 16  ;;  %s1907_s13 = scalar_lea.vmem %s63_s11, 32 }
  0x3e   :  { %p1904_p11 = scmp.ne.s32.totalorder %s63_s11, %s1903_s23  ;;  %p1908_p12 = scmp.lt.s32.totalorder %s63_s11, %s63_s11 }
  0x3f   :  { %p1909_p13 = scmp.lt.s32.totalorder %s1907_s13, %s1903_s23 }
  0x41   :  { %p1910_p0 = por %p1909_p13, %p1908_p12 }
  0x43   :  { %p1911_p1 = pnand %p1910_p0, %p1904_p11 }
  0x45   :  { %1914 = shalt.err (!%p1911_p1)
}
  0x46   :  { %65 = dma.hbm_to_vmem [thread:$0]  %s2296_s6, 16, %s63_s11, [#allocation5]  }
  0x47   :  { %s1995_s25 = smov [#allocation9]  }
  0x48   :  { %s87_s26 = sshll.u32 %s1995_s25, 4  ;;  %s88_s26 = int_to_ptr.vmem [resolvable:$true] %s87_s26 }
  0x49   :  { %s1923_s28 = scalar_lea.vmem %s88_s26, 64  ;;  %p1928_p3 = scmp.lt.s32.totalorder %s88_s26, %s88_s26 }
  0x4a   :  { %p1924_p2 = scmp.ne.s32.totalorder %s88_s26, %s1923_s28  ;;  %p1929_p4 = scmp.lt.s32.totalorder %s1923_s28, %s1923_s28 }
  0x4c   :  { %p1930_p5 = por %p1929_p4, %p1928_p3 }
  0x4e   :  { %p1931_p6 = pnand %p1930_p5, %p1924_p2 }
  0x50   :  { %1934 = shalt.err (!%p1931_p6)
}
  0x51   :  { %s1996_s4 = smov 16   ;;  %s1997_s29 = smov 1  }
  0x52   :  { %93 = dma.hbm_to_vmem [thread:$0]  %s2300_s10, 64, %s88_s26, [#allocation8], %s1996_s4, %s1996_s4, %s1997_s29  }
  0x53   :  { %s1998_s1 = smov [#allocation12]   ;;  %s1999_s6 = smov [#allocation15]  }
  0x54   :  { %s112_s20 = sshll.u32 %s1998_s1, 4  ;;  %s133_s11 = sshll.u32 %s1999_s6, 4  ;;  %s113_s20 = int_to_ptr.vmem [resolvable:$true] %s112_s20  ;;  %s134_s11 = int_to_ptr.vmem [resolvable:$true] %s133_s11 }
  0x55   :  { %s1943_s18 = scalar_lea.vmem %s113_s20, 16  ;;  %s1947_s19 = scalar_lea.vmem %s113_s20, 32 }
  0x56   :  { %p1944_p7 = scmp.ne.s32.totalorder %s113_s20, %s1943_s18  ;;  %p1948_p8 = scmp.lt.s32.totalorder %s113_s20, %s113_s20 }
  0x57   :  { %p1949_p9 = scmp.lt.s32.totalorder %s1947_s19, %s1943_s18 }
  0x59   :  { %p1950_p10 = por %p1949_p9, %p1948_p8 }
  0x5b   :  { %p1951_p11 = pnand %p1950_p10, %p1944_p7 }
  0x5d   :  { %1954 = shalt.err (!%p1951_p11)
}
  0x5e   :  { %115 = dma.hbm_to_vmem [thread:$0]  %s2302_s12, 16, %s113_s20, [#allocation11]  }
  0x5f   :  { %s1963_s23 = scalar_lea.vmem %s134_s11, 1536  ;;  %p1968_p13 = scmp.lt.s32.totalorder %s134_s11, %s134_s11 }
  0x60   :  { %p1964_p12 = scmp.ne.s32.totalorder %s134_s11, %s1963_s23  ;;  %p1969_p0 = scmp.lt.s32.totalorder %s1963_s23, %s1963_s23 }
  0x62   :  { %p1970_p1 = por %p1969_p0, %p1968_p13 }
  0x64   :  { %p1971_p2 = pnand %p1970_p1, %p1964_p12 }
  0x66   :  { %1974 = shalt.err (!%p1971_p2)
}
  0x67   :  { %139 = dma.hbm_to_vmem [thread:$0]  %s2304_s14, 1536, %s134_s11, [#allocation14], %s1991_s7, %s1991_s7, %s1992_s27  }
  0x68   :  { %1975 = dma.done.wait [#allocation3], 16  }
  0x69   :  { %1976 = vsyncadd [#allocation3], 4294967280 }
  0x6a   :  { %1977 = dma.done.wait [#allocation5], 80  }
  0x6b   :  { %1978 = vsyncadd [#allocation5], 4294967216 }
  0x6c   :  { %1979 = dma.done.wait [#allocation8], 448  }
  0x6d   :  { %1980 = vsyncadd [#allocation8], 4294966848 }
  0x6e   :  { %1981 = dma.done.wait [#allocation11], 528  }
  0x6f   :  { %1982 = vsyncadd [#allocation11], 4294966768 }
  0x70   :  { %1983 = dma.done.wait [#allocation14], 3072  }
  0x71   :  { %1984 = vsyncadd [#allocation14], 4294964224  ;;  %vm273_vm0 = vcmask 1041408   ;;  %vm266_vm1 = vcmask 146432   ;;  %v258_v0 = vld [vmem:[#allocation7 + $0x10] sm:$0x3] }
  0x72   :  { %v257_v1 = vld [vmem:[#allocation7 + $0x8] sm:$0xff]  ;;  %1666 = vmatprep.subr.msk.mxu1 %vm273_vm0, %v258_v0  ;;  %s2311_s5 = sld [smem:[#allocation22_spill]]  ;;  %v256_v3 = vld [vmem:[#allocation7] sm:$0xff]  ;;  %v2000_v5 = vmov 0.0   ;;  %v170_v7 = vld [vmem:[%s2293_s3] sm:$0xff]  ;;  %vm2001_vm2 = vmmov 0  }
  0x73   :  { %1667 = vmatpush3.msk.msra.mxu1 %vm273_vm0, %v258_v0  ;;  %1659 = vmatprep.subr.mxu0 %v2000_v5  ;;  %v171_v6 = vld [vmem:[%s2293_s3 + $0x8] sm:$0xff]  ;;  %s2312_s0 = sld [smem:[#allocation21_spill]]  ;;  %vm179_vm3 = vcmask 130048   ;;  %v365_v9 = vld [vmem:[%s2299_s9 + $0x18] sm:$0xff]  ;;  %v364_v10 = vld [vmem:[%s2299_s9 + $0x10] sm:$0xff]  ;;  %vm373_vm4 = vcmask 261120  }
  0x74   :  { %1668 = vmatprep.subr.mxu1 %v257_v1  ;;  %1660 = vmatpush3.msra.mxu0 %v171_v6  ;;  %v363_v11 = vld [vmem:[%s2299_s9 + $0x8] sm:$0xff]  ;;  %v362_v12 = vld [vmem:[%s2299_s9] sm:$0xff]  ;;  %v1563_v28 = vld [vmem:[%s2299_s9 + $0x38] sm:$0xff]  ;;  %vm888_vm11 = vcmask 1043456   ;;  %vm881_vm14 = vcmask 31744  }
  0x75   :  { %1669 = vmatpush3.msra.mxu1 %v257_v1  ;;  %1661 = vmatprep.subr.mxu0 %v2000_v5  ;;  %v1549_v13 = vld [vmem:[%s2298_s8] ss:$0 sm:$0xff]  ;;  %v1562_v29 = vld [vmem:[%s2299_s9 + $0x30] sm:$0xff]  ;;  %v1561_v30 = vld [vmem:[%s2299_s9 + $0x28] sm:$0xff] }
  0x76   :  { %1670 = vmatprep.subr.mxu1 %v256_v3  ;;  %1662 = vmatpush3.msra.mxu0 %v170_v7  ;;  %v1560_v31 = vld [vmem:[%s2299_s9 + $0x20] sm:$0xff]  ;;  %v1572_v45 = vld [vmem:[%s2299_s9 + $0x58] sm:$0xff]  ;;  %v1571_v46 = vld [vmem:[%s2299_s9 + $0x50] sm:$0xff] }
  0x77   :  { %1671 = vmatpush3.msra.mxu1 %v256_v3  ;;  %1663 = vmatprep.mubr.msk.f32.mxu0 %vm2001_vm2, %v2000_v5  ;;  %v1555_v32 = vld [vmem:[#allocation9] ss:$0 sm:$0xff]  ;;  %v1570_v47 = vld [vmem:[%s2299_s9 + $0x48] sm:$0xff]  ;;  %v1564_v49 = vld [vmem:[#allocation9 + $0x1] ss:$0 sm:$0xff] }
  0x78   :  { %v254_v2 = vld [vmem:[%s2311_s5] sm:$0xff]  ;;  %v255_v4 = vld [vmem:[%s2311_s5 + $0x8] sm:$0xff]  ;;  %1675 = vmatprep.subr.mxu0 %v365_v9  ;;  %1686 = vmatprep.subr.mxu1 %v1563_v28  ;;  %v1581_v62 = vld [vmem:[%s2299_s9 + $0x78] sm:$0xff] }
  0x79   :  { %1672 = vmatprep.mubr.msk.f32.mxu1 %vm266_vm1, %v254_v2  ;;  %v169_v8 = vld [vmem:[%s2312_s0] sm:$0x3]  ;;  %v1580_v63 = vld [vmem:[%s2299_s9 + $0x70] sm:$0xff]  ;;  %v1579_v0 = vld [vmem:[%s2299_s9 + $0x68] sm:$0xff] }
  0x7a   :  { %1673 = vmatmul.mubr.msk.f32.vlgmr.msra.gmra.mxu1 %vm266_vm1, %v255_v4  ;;  %1664 = vmatmul.mubr.msk.f32.vlgmr.msra.gmra.mxu0 %vm179_vm3, %v169_v8  ;;  %v1569_v48 = vld [vmem:[%s2299_s9 + $0x40] sm:$0xff] }
  0x7b   :  { %1676 = vmatpush3.msra.mxu0 %v365_v9  ;;  %1687 = vmatpush3.msra.mxu1 %v1563_v28  ;;  %v1578_v1 = vld [vmem:[%s2299_s9 + $0x60] sm:$0xff]  ;;  %v968_v28 = vld [vmem:[#allocation13 + $0x8] sm:$0xff] }
  0x7c   :  { %1677 = vmatprep.subr.mxu0 %v364_v10  ;;  %1688 = vmatprep.subr.mxu1 %v1562_v29  ;;  %v873_v2 = vld [vmem:[#allocation4] sm:$0xf] }
  0x7d   :  { %1678 = vmatpush3.msra.mxu0 %v364_v10  ;;  %1689 = vmatpush3.msra.mxu1 %v1562_v29  ;;  %v1573_v3 = vld [vmem:[#allocation9 + $0x2] ss:$0 sm:$0xff]  ;;  %v967_v29 = vld [vmem:[#allocation13] sm:$0xff] }
  0x7e   :  { %1679 = vmatprep.subr.mxu0 %v363_v11  ;;  %1690 = vmatprep.subr.mxu1 %v1561_v30 }
  0x7f   :  { %1680 = vmatpush3.msra.mxu0 %v363_v11  ;;  %1691 = vmatpush3.msra.mxu1 %v1561_v30 }
  0x80   :  { %1681 = vmatprep.subr.mxu0 %v362_v12  ;;  %1692 = vmatprep.subr.mxu1 %v1560_v31 }
  0x81   :  { %1682 = vmatpush3.msra.mxu0 %v362_v12  ;;  %1693 = vmatpush3.msra.mxu1 %v1560_v31  ;;  %v1150_v31 = vld [vmem:[#allocation15 + $0x50] sm:$0xff] }
  0x82   :  { %1697 = vmatprep.subr.mxu0 %v1572_v45  ;;  %1708 = vmatprep.subr.mxu1 %v1581_v62 }
 0x13a   :  { %v1674_v14 = vpop.f32.mrf.mxu1  ;;  %v2162_v26 = vpop.f32.mrf.mxu0 }
 0x13b   :  { %v349_v15 = vadd.f32 %v1674_v14, %v1549_v13 }
 0x13c   :  { %v343_v16 = vpop.f32.mrf.mxu1  ;;  %v1665_v27 = vpop.f32.mrf.mxu0 }
 0x13d   :  { %v356_v17 = vmul.f32 1.442695, %v349_v15  ;;  %v344_v18 = vadd.f32 %v1549_v13, %v343_v16  ;;  %vm353_vm6 = vcmp.gt.f32.partialorder %v349_v15, 0.0  ;;  %v871_v16 = vld [vmem:[%s2292_s2] sm:$0xff] }
 0x13e   :  { %v970_v27 = vld [vmem:[#allocation13 + $0x18] sm:$0xff] }
 0x13f   :  { %1775 = vpow2.f32 %v356_v17  ;;  %v354_v19 = vmul.f32 1.442695, %v344_v18  ;;  %vm352_vm5 = vcmp.gt.f32.partialorder %v344_v18, 0.0 }
 0x141   :  { %1777 = vpow2.f32 %v354_v19  ;;  %v872_v19 = vld [vmem:[%s2292_s2 + $0x8] sm:$0xff] }
 0x14c   :  { %v1776_v20 = vpop.eup %1775 }
 0x14d   :  { %v1554_v22 = vadd.f32 -1.0, %v1776_v20  ;;  %v976_v20 = vld [vmem:[#allocation13 + $0x48] sm:$0xff] }
 0x14e   :  { %v1778_v21 = vpop.eup %1777 }
 0x14f   :  { %v1553_v23 = vadd.f32 -1.0, %v1778_v21  ;;  %v361_v25 = vsel %vm353_vm6, %v349_v15, %v1554_v22  ;;  %v1547_v21 = vld [vmem:[#allocation2] ss:$0 sm:$0xff] }
 0x150   :  { %v974_v22 = vld [vmem:[#allocation13 + $0x38] sm:$0xff] }
 0x151   :  { %v360_v24 = vsel %vm352_vm5, %v344_v18, %v1553_v23  ;;  %v977_v18 = vld [vmem:[#allocation13 + $0x50] sm:$0xff] }
 0x152   :  { %1683 = vmatprep.mubr.msk.f32.mxu0 %vm373_vm4, %v360_v24  ;;  %v973_v23 = vld [vmem:[#allocation13 + $0x30] sm:$0xff]  ;;  %v971_v24 = vld [vmem:[#allocation13 + $0x20] sm:$0xff] }
 0x153   :  { %1684 = vmatmul.mubr.msk.f32.vlgmr.msra.gmra.mxu0 %vm373_vm4, %v361_v25  ;;  %v2216_v25 = vadd.f32 %v1547_v21, %v2162_v26  ;;  %v1149_v26 = vld [vmem:[#allocation15 + $0x48] sm:$0xff] }
 0x154   :  { %1698 = vmatpush3.msra.mxu0 %v1572_v45 }
 0x155   :  { %1699 = vmatprep.subr.mxu0 %v1571_v46  ;;  %v253_v30 = vmax.f32 %v2216_v25, 0.0 }
 0x156   :  { %1700 = vmatpush3.msra.mxu0 %v1571_v46 }
 0x157   :  { %1701 = vmatprep.subr.mxu0 %v1570_v47 }
 0x158   :  { %1702 = vmatpush3.msra.mxu0 %v1570_v47 }
 0x159   :  { %1703 = vmatprep.subr.mxu0 %v1569_v48 }
 0x15a   :  { %1704 = vmatpush3.msra.mxu0 %v1569_v48 }
 0x213   :  { %v1685_v33 = vpop.f32.mrf.mxu0 }
 0x214   :  { %v452_v34 = vadd.f32 %v1685_v33, %v1555_v32  ;;  %v1146_v33 = vld [vmem:[#allocation15 + $0x30] sm:$0xff] }
 0x215   :  { %v446_v35 = vpop.f32.mrf.mxu0 }
 0x216   :  { %v459_v36 = vmul.f32 1.442695, %v452_v34  ;;  %v447_v37 = vadd.f32 %v1555_v32, %v446_v35  ;;  %vm456_vm8 = vcmp.gt.f32.partialorder %v452_v34, 0.0  ;;  %v1147_v32 = vld [vmem:[#allocation15 + $0x38] sm:$0xff] }
 0x217   :  { %v1143_v35 = vld [vmem:[#allocation15 + $0x18] sm:$0xff] }
 0x218   :  { %1779 = vpow2.f32 %v459_v36  ;;  %v457_v38 = vmul.f32 1.442695, %v447_v37  ;;  %vm455_vm7 = vcmp.gt.f32.partialorder %v447_v37, 0.0  ;;  %v1141_v36 = vld [vmem:[#allocation15 + $0x8] sm:$0xff] }
 0x21a   :  { %1781 = vpow2.f32 %v457_v38  ;;  %v780_v38 = vld [vmem:[#allocation10 + $0x18] sm:$0xff] }
 0x21b   :  { %1719 = vmatprep.subr.mxu0 %v780_v38 }
 0x225   :  { %v1780_v39 = vpop.eup %1779 }
 0x226   :  { %v1559_v41 = vadd.f32 -1.0, %v1780_v39  ;;  %v779_v39 = vld [vmem:[#allocation10 + $0x10] sm:$0xff] }
 0x227   :  { %v1782_v40 = vpop.eup %1781 }
 0x228   :  { %v1558_v42 = vadd.f32 -1.0, %v1782_v40  ;;  %v464_v44 = vsel %vm456_vm8, %v452_v34, %v1559_v41  ;;  %v1144_v34 = vld [vmem:[#allocation15 + $0x20] sm:$0xff] }
 0x229   :  { %v778_v40 = vld [vmem:[#allocation10 + $0x8] sm:$0xff]  ;;  %v777_v41 = vld [vmem:[#allocation10] sm:$0xff] }
 0x22a   :  { %v463_v43 = vsel %vm455_vm7, %v447_v37, %v1558_v42  ;;  %v1140_v37 = vld [vmem:[#allocation15] sm:$0xff]  ;;  %v1582_v42 = vld [vmem:[#allocation9 + $0x3] ss:$0 sm:$0xff] }
 0x22b   :  { %1694 = vmatprep.mubr.msk.f32.mxu1 %vm373_vm4, %v463_v43 }
 0x22c   :  { %1695 = vmatmul.mubr.msk.f32.vlgmr.msra.gmra.mxu1 %vm373_vm4, %v464_v44 }
 0x22d   :  { %1709 = vmatpush3.msra.mxu1 %v1581_v62  ;;  %v972_v62 = vld [vmem:[#allocation13 + $0x28] sm:$0xff] }
 0x22e   :  { %1710 = vmatprep.subr.mxu1 %v1580_v63 }
 0x22f   :  { %1711 = vmatpush3.msra.mxu1 %v1580_v63  ;;  %v969_v63 = vld [vmem:[#allocation13 + $0x10] sm:$0xff] }
 0x230   :  { %1712 = vmatprep.subr.mxu1 %v1579_v0 }
 0x231   :  { %1713 = vmatpush3.msra.mxu1 %v1579_v0  ;;  %v1151_v0 = vld [vmem:[#allocation15 + $0x58] sm:$0xff] }
 0x232   :  { %1714 = vmatprep.subr.mxu1 %v1578_v1 }
 0x233   :  { %1715 = vmatpush3.msra.mxu1 %v1578_v1  ;;  %v1148_v1 = vld [vmem:[#allocation15 + $0x40] sm:$0xff] }
 0x234   :  { %1730 = vmatprep.subr.msk.mxu1 %vm888_vm11, %v873_v2 }
 0x2ec   :  { %v1696_v50 = vpop.f32.mrf.mxu1 }
 0x2ed   :  { %v556_v51 = vadd.f32 %v1696_v50, %v1564_v49 }
 0x2ee   :  { %v550_v52 = vpop.f32.mrf.mxu1 }
 0x2ef   :  { %v563_v53 = vmul.f32 1.442695, %v556_v51  ;;  %v551_v54 = vadd.f32 %v1564_v49, %v550_v52  ;;  %vm560_vm10 = vcmp.gt.f32.partialorder %v556_v51, 0.0  ;;  %v1590_v49 = vld [vmem:[#allocation6] ss:$0 sm:$0xff] }
 0x2f1   :  { %1783 = vpow2.f32 %v563_v53  ;;  %v561_v55 = vmul.f32 1.442695, %v551_v54  ;;  %vm559_vm9 = vcmp.gt.f32.partialorder %v551_v54, 0.0 }
 0x2f3   :  { %1785 = vpow2.f32 %v561_v55 }
 0x2fe   :  { %v1784_v56 = vpop.eup %1783 }
 0x2ff   :  { %v1568_v58 = vadd.f32 -1.0, %v1784_v56 }
 0x300   :  { %v1786_v57 = vpop.eup %1785 }
 0x301   :  { %v1567_v59 = vadd.f32 -1.0, %v1786_v57  ;;  %v568_v61 = vsel %vm560_vm10, %v556_v51, %v1568_v58 }
 0x303   :  { %v567_v60 = vsel %vm559_vm9, %v551_v54, %v1567_v59  ;;  %v978_v59 = vld [vmem:[#allocation13 + $0x58] sm:$0xff] }
 0x304   :  { %1705 = vmatprep.mubr.msk.f32.mxu0 %vm373_vm4, %v567_v60 }
 0x305   :  { %1706 = vmatmul.mubr.msk.f32.vlgmr.msra.gmra.mxu0 %vm373_vm4, %v568_v61  ;;  %v975_v61 = vld [vmem:[#allocation13 + $0x40] sm:$0xff] }
 0x306   :  { %1720 = vmatpush3.msra.mxu0 %v780_v38 }
 0x307   :  { %1721 = vmatprep.subr.mxu0 %v779_v39 }
 0x308   :  { %1722 = vmatpush3.msra.mxu0 %v779_v39 }
 0x309   :  { %1723 = vmatprep.subr.mxu0 %v778_v40 }
 0x30a   :  { %1724 = vmatpush3.msra.mxu0 %v778_v40 }
 0x30b   :  { %1725 = vmatprep.subr.mxu0 %v777_v41 }
 0x30c   :  { %1726 = vmatpush3.msra.mxu0 %v777_v41 }
 0x30d   :  { %1735 = vmatprep.subr.mxu0 %v2000_v5 }
 0x3c5   :  { %v1707_v4 = vpop.f32.mrf.mxu0 }
 0x3c6   :  { %v660_v6 = vadd.f32 %v1707_v4, %v1573_v3 }
 0x3c7   :  { %v654_v7 = vpop.f32.mrf.mxu0 }
 0x3c8   :  { %v667_v8 = vmul.f32 1.442695, %v660_v6  ;;  %v655_v9 = vadd.f32 %v1573_v3, %v654_v7  ;;  %vm664_vm13 = vcmp.gt.f32.partialorder %v660_v6, 0.0  ;;  %v1142_v3 = vld [vmem:[#allocation15 + $0x10] sm:$0xff] }
 0x3ca   :  { %1787 = vpow2.f32 %v667_v8  ;;  %v665_v10 = vmul.f32 1.442695, %v655_v9  ;;  %vm663_vm12 = vcmp.gt.f32.partialorder %v655_v9, 0.0 }
 0x3cc   :  { %1789 = vpow2.f32 %v665_v10 }
 0x3d7   :  { %v1788_v11 = vpop.eup %1787 }
 0x3d8   :  { %v1577_v13 = vadd.f32 -1.0, %v1788_v11  ;;  %v979_v11 = vld [vmem:[%s2305_s15] sm:$0x7] }
 0x3d9   :  { %v1790_v12 = vpop.eup %1789 }
 0x3da   :  { %v1576_v14 = vadd.f32 -1.0, %v1790_v12  ;;  %v672_v17 = vsel %vm664_vm13, %v660_v6, %v1577_v13  ;;  %v1587_v13 = vld [vmem:[#allocation12] ss:$0 sm:$0xff] }
 0x3dc   :  { %v671_v15 = vsel %vm663_vm12, %v655_v9, %v1576_v14 }
 0x3dd   :  { %1716 = vmatprep.mubr.msk.f32.mxu1 %vm373_vm4, %v671_v15 }
 0x3de   :  { %1717 = vmatmul.mubr.msk.f32.vlgmr.msra.gmra.mxu1 %vm373_vm4, %v672_v17 }
 0x3df   :  { %1731 = vmatpush3.msk.msra.mxu1 %vm888_vm11, %v873_v2  ;;  %1732 = vmatprep.mubr.msk.f32.mxu1 %vm881_vm14, %v871_v16  ;;  %v1145_v2 = vld [vmem:[#allocation15 + $0x28] sm:$0xff]  ;;  %v2002_v16 = vmov 1983009808  }
 0x3e0   :  { %1023 = vmatprep.subr.mxu1 %v977_v18  ;;  %v1318_v17 = vunpack.c.l.s4 %v2002_v16 }
 0x3e2   :  { %1733 = vmatmul.mubr.msk.f32.vlgmr.msra.gmra.mxu1 %vm881_vm14, %v872_v19 }
 0x3e3   :  { %1024 = vmatpush1.msra.mxu1 %v976_v20  ;;  %1063 = vmatprep.mubr.f32.mxu1 %v2000_v5 }
 0x3e4   :  { %1025 = vmatprep.subr.mxu1 %v974_v22 }
 0x3e5   :  { %1026 = vmatpush1.msra.mxu1 %v973_v23 }
 0x3e6   :  { %1027 = vmatprep.subr.mxu1 %v971_v24 }
 0x3e7   :  { %1028 = vmatpush1.msra.mxu1 %v970_v27  ;;  %v1319_v27 = vunpack.c.0.s8 %v1318_v17 }
 0x3e8   :  { %1029 = vmatprep.subr.mxu1 %v968_v28 }
 0x3e9   :  { %1030 = vmatpush1.msra.mxu1 %v967_v29 }
 0x3ea   :  { %1594 = vmatmul.mubr.msk.f32.vlgmr.msra.gmra.mxu1 %vm373_vm4, %v253_v30  ;;  %1182 = vmatprep.subr.mxu1 %v1150_v31 }
 0x3eb   :  { %1222 = vmatprep.mubr.f32.mxu1 %v2000_v5  ;;  %1183 = vmatpush1.msra.mxu1 %v1149_v26 }
 0x3ec   :  { %1184 = vmatprep.subr.mxu1 %v1147_v32 }
 0x3ed   :  { %1185 = vmatpush1.msra.mxu1 %v1146_v33 }
 0x3ee   :  { %1186 = vmatprep.subr.mxu1 %v1144_v34 }
 0x3ef   :  { %1187 = vmatpush1.msra.mxu1 %v1143_v35 }
 0x3f0   :  { %1188 = vmatprep.subr.mxu1 %v1141_v36 }
 0x3f1   :  { %1189 = vmatpush1.msra.mxu1 %v1140_v37 }
 0x49e   :  { %v1718_v43 = vpop.f32.mrf.mxu1 }
 0x49f   :  { %v764_v44 = vadd.f32 %v1718_v43, %v1582_v42 }
 0x4a0   :  { %v758_v45 = vpop.f32.mrf.mxu1 }
 0x4a1   :  { %v771_v46 = vmul.f32 1.442695, %v764_v44  ;;  %v759_v47 = vadd.f32 %v1582_v42, %v758_v45  ;;  %vm768_vm0 = vcmp.gt.f32.partialorder %v764_v44, 0.0 }
 0x4a2   :  { %v1734_v48 = vpop.f32.mrf.mxu1 }
 0x4a3   :  { %1791 = vpow2.f32 %v771_v46  ;;  %v769_v50 = vmul.f32 1.442695, %v759_v47  ;;  %v964_v53 = vadd.f32 %v1734_v48, %v1590_v49  ;;  %vm767_vm15 = vcmp.gt.f32.partialorder %v759_v47, 0.0 }
 0x4a4   :  { %v958_v51 = vpop.f32.mrf.mxu1 }
 0x4a5   :  { %1793 = vpow2.f32 %v769_v50  ;;  %v959_v52 = vadd.f32 %v1590_v49, %v958_v51 }
 0x4a7   :  { %1596 = vmatmul.mubr.msk.f32.vlgmr.msra.gmra.mxu1 %vm373_vm4, %v959_v52 }
 0x4a8   :  { %1228 = vmatprep.mubr.f32.mxu1 %v2000_v5 }
 0x4aa   :  { %v1065_v4 = vpop.f32.mrf.mxu1 }
 0x4ab   :  { %1597 = vmatmul.mubr.msk.f32.gmra.mxu1 %vm373_vm4, %v964_v53 }
 0x4ac   :  { %v1067_v7 = vpop.f32.mrf.mxu1 }
 0x4b0   :  { %v1792_v54 = vpop.eup %1791 }
 0x4b1   :  { %v1586_v56 = vadd.f32 -1.0, %v1792_v54 }
 0x4b2   :  { %v1794_v55 = vpop.eup %1793 }
 0x4b3   :  { %v1585_v57 = vadd.f32 -1.0, %v1794_v55  ;;  %v776_v60 = vsel %vm768_vm0, %v764_v44, %v1586_v56 }
 0x4b5   :  { %v775_v58 = vsel %vm767_vm15, %v759_v47, %v1585_v57 }
 0x4b6   :  { %1727 = vmatprep.mubr.msk.f32.mxu0 %vm373_vm4, %v775_v58 }
 0x4b7   :  { %1728 = vmatmul.mubr.msk.f32.vlgmr.msra.gmra.mxu0 %vm373_vm4, %v776_v60 }
 0x4b8   :  { %1736 = vmatpush3.msra.mxu0 %v978_v59  ;;  %1743 = vmatprep.mubr.msk.f32.mxu0 %vm2001_vm2, %v2000_v5 }
 0x4b9   :  { %1737 = vmatprep.subr.mxu0 %v2000_v5 }
 0x4ba   :  { %1738 = vmatpush3.msra.mxu0 %v975_v61 }
 0x4bb   :  { %1739 = vmatprep.subr.mxu0 %v2000_v5 }
 0x4bc   :  { %1740 = vmatpush3.msra.mxu0 %v972_v62 }
 0x4bd   :  { %1741 = vmatprep.subr.mxu0 %v2000_v5  ;;  %v981_v5 = vlaneseq }
 0x4be   :  { %1742 = vmatpush3.msra.mxu0 %v969_v63 }
 0x4bf   :  { %1744 = vmatmul.mubr.msk.f32.vlgmr.msra.gmra.mxu0 %vm373_vm4, %v253_v30  ;;  %1746 = vmatprep.subr.mxu0 %v1151_v0  ;;  %v982_v6 = vshrl.u32 %v981_v5, 7 }
 0x4c0   :  { %1747 = vmatpush3.msra.mxu0 %v1151_v0  ;;  %1754 = vmatprep.mubr.msk.f32.mxu0 %vm373_vm4, %v959_v52 }
 0x4c1   :  { %1748 = vmatprep.subr.mxu0 %v1148_v1  ;;  %v987_v8 = vsub.s32 1, %v982_v6  ;;  %v983_v9 = vsub.s32 0, %v982_v6  ;;  %v991_v25 = vsub.s32 2, %v982_v6  ;;  %v2248_v33 = vsub.s32 %v1319_v27, %v982_v6 }
 0x4c2   :  { %1749 = vmatpush3.msra.mxu0 %v1148_v1 }
 0x4c3   :  { %1750 = vmatprep.subr.mxu0 %v1145_v2  ;;  %v988_v12 = vrot.slane %v979_v11, %v987_v8  ;;  %v984_v14 = vrot.slane %v979_v11, %v983_v9  ;;  %v992_v32 = vrot.slane %v979_v11, %v991_v25 }
 0x4c4   :  { %1751 = vmatpush3.msra.mxu0 %v1145_v2 }
 0x4c5   :  { %1752 = vmatprep.subr.mxu0 %v1142_v3  ;;  %v1068_v20 = vadd.f32 %v1067_v7, %v988_v12  ;;  %v1066_v22 = vadd.f32 %v1065_v4, %v984_v14 }
 0x4c6   :  { %1753 = vmatpush3.msra.mxu0 %v1142_v3 }
 0x4c7   :  { %1755 = vmatmul.mubr.msk.f32.vlgmr.msra.gmra.mxu0 %vm373_vm4, %v964_v53  ;;  %v1338_v28 = vrot.slane %v1068_v20, 6  ;;  %v1337_v29 = vrot.slane %v1066_v22, 6  ;;  %v1369_v26 = vrot.slane %v1068_v20, 4  ;;  %v1368_v34 = vrot.slane %v1066_v22, 4 }
 0x4c8   :  { %v1401_v36 = vrot.slane %v1068_v20, 2  ;;  %v1400_v40 = vrot.slane %v1066_v22, 2 }
 0x567   :  { %v1224_v10 = vpop.f32.mrf.mxu1 }
 0x568   :  { %v1310_v38 = vadd.f32 %v1224_v10, %v1066_v22  ;;  %v1343_v39 = vadd.f32 %v1337_v29, %v1224_v10  ;;  %v1374_v55 = vadd.f32 %v1368_v34, %v1224_v10  ;;  %v1406_v56 = vadd.f32 %v1400_v40, %v1224_v10 }
 0x569   :  { %v1226_v15 = vpop.f32.mrf.mxu1 }
 0x56a   :  { %v1311_v30 = vadd.f32 %v1226_v15, %v1068_v20  ;;  %v1344_v35 = vadd.f32 %v1338_v28, %v1226_v15  ;;  %v1375_v41 = vadd.f32 %v1369_v26, %v1226_v15  ;;  %v1407_v49 = vadd.f32 %v1401_v36, %v1226_v15 }
 0x56b   :  { %v1230_v23 = vpop.f32.mrf.mxu1 }
 0x56c   :  { %v1316_v47 = vcombine.low %v1310_v38, %v1311_v30  ;;  %v1432_v48 = vadd.f32 %v1230_v23, %v1066_v22  ;;  %v1457_v51 = vadd.f32 %v1337_v29, %v1230_v23  ;;  %v1482_v52 = vadd.f32 %v1368_v34, %v1230_v23 }
 0x56d   :  { %v1232_v31 = vpop.f32.mrf.mxu1  ;;  %v1508_v53 = vadd.f32 %v1400_v40, %v1230_v23  ;;  %v1349_v54 = vcombine.low %v1343_v39, %v1344_v35  ;;  %v1380_v0 = vcombine.high %v1374_v55, %v1375_v41  ;;  %v1412_v1 = vcombine.high %v1406_v56, %v1407_v49 }
 0x56e   :  { %v1433_v42 = vadd.f32 %v1232_v31, %v1068_v20  ;;  %v1458_v43 = vadd.f32 %v1338_v28, %v1232_v31  ;;  %v1483_v44 = vadd.f32 %v1369_v26, %v1232_v31  ;;  %v1509_v45 = vadd.f32 %v1401_v36, %v1232_v31 }
 0x56f   :  { %v1323_v3 = vrot.slane %v1316_v47, %v2248_v33  ;;  %v1356_v5 = vrot.slane %v1349_v54, %v2248_v33  ;;  %v1420_v35 = vrot.slane %v1412_v1, %v2248_v33 }
 0x570   :  { %v1438_v57 = vcombine.low %v1432_v48, %v1433_v42  ;;  %v1463_v58 = vcombine.low %v1457_v51, %v1458_v43  ;;  %v1488_v59 = vcombine.high %v1482_v52, %v1483_v44  ;;  %v1514_v60 = vcombine.high %v1508_v53, %v1509_v45 }
 0x572   :  { %v1445_v9 = vrot.slane %v1438_v57, %v2248_v33  ;;  %v1470_v10 = vrot.slane %v1463_v58, %v2248_v33  ;;  %v1496_v11 = vrot.slane %v1488_v59, %v2248_v33  ;;  %v1522_v12 = vrot.slane %v1514_v60, %v2248_v33 }
 0x577   :  { %v1729_v18 = vpop.f32.mrf.mxu0 }
 0x578   :  { %v866_v19 = vadd.f32 %v1729_v18, %v1587_v13 }
 0x579   :  { %v860_v21 = vpop.f32.mrf.mxu0 }
 0x57a   :  { %870 = vst [vmem:[%s2306_s16 + $0x8] sm:$0xff] %v866_v19  ;;  %v861_v24 = vadd.f32 %v1587_v13, %v860_v21 }
 0x57c   :  { %869 = vst [vmem:[%s2306_s16] sm:$0xff] %v861_v24 }
 0x57f   :  { %v1136_v37 = vpop.f32.mrf.mxu0 }
 0x580   :  { %v1137_v50 = vadd.f32 %v1136_v37, %v992_v32  ;;  %v1388_v32 = vrot.slane %v1380_v0, %v2248_v33 }
 0x581   :  { %v1745_v46 = vpop.f32.mrf.mxu0 }
 0x582   :  { %v1339_v61 = vrot.slane %v1137_v50, 6  ;;  %v1370_v62 = vrot.slane %v1137_v50, 4  ;;  %v1402_v63 = vrot.slane %v1137_v50, 2 }
 0x587   :  { %v1756_v2 = vpop.f32.mrf.mxu0 }
 0x588   :  { %v1434_v4 = vadd.f32 %v1756_v2, %v1137_v50  ;;  %v1459_v6 = vadd.f32 %v1756_v2, %v1339_v61  ;;  %v1484_v7 = vadd.f32 %v1756_v2, %v1370_v62  ;;  %v1510_v8 = vadd.f32 %v1756_v2, %v1402_v63 }
 0x589   :  { %v1301_v13 = vpop.f32.mrf.mxu0 }
 0x58a   :  { %v1452_v14 = vrot.slane %v1434_v4, %v2248_v33  ;;  %v1312_v15 = vadd.f32 %v1301_v13, %v1137_v50  ;;  %v1345_v16 = vadd.f32 %v1339_v61, %v1301_v13  ;;  %v1376_v17 = vadd.f32 %v1370_v62, %v1301_v13 }
 0x58b   :  { %v1408_v18 = vadd.f32 %v1402_v63, %v1301_v13  ;;  %v1477_v19 = vrot.slane %v1459_v6, %v2248_v33  ;;  %v1489_v20 = vcombine.high %v1484_v7, %v1484_v7  ;;  %v1515_v21 = vcombine.high %v1510_v8, %v1510_v8 }
 0x58c   :  { %v1453_v22 = vcombine.low %v1445_v9, %v1452_v14  ;;  %v1330_v23 = vrot.slane %v1312_v15, %v2248_v33  ;;  %v1363_v24 = vrot.slane %v1345_v16, %v2248_v33  ;;  %v1381_v25 = vcombine.high %v1376_v17, %v1376_v17 }
 0x58d   :  { %v1413_v27 = vcombine.high %v1408_v18, %v1408_v18  ;;  %v1478_v28 = vcombine.high %v1470_v10, %v1477_v19  ;;  %v1503_v29 = vrot.slane %v1489_v20, %v2248_v33  ;;  %v1529_v30 = vrot.slane %v1515_v21, %v2248_v33 }
 0x58e   :  { %1603 = vst [vmem:[%s2307_s17 + $0x18] sm:$0x3f] %v1453_v22  ;;  %v1331_v31 = vcombine.low %v1323_v3, %v1330_v23  ;;  %v1364_v26 = vcombine.high %v1356_v5, %v1363_v24  ;;  %v1395_v34 = vrot.slane %v1381_v25, %v2248_v33 }
 0x58f   :  { %v1427_v36 = vrot.slane %v1413_v27, %v2248_v33  ;;  %1604 = vst [vmem:[%s2307_s17 + $0x1e] sm:$0x3f] %v1478_v28  ;;  %v1504_v37 = vcombine.low %v1496_v11, %v1503_v29  ;;  %v1530_v38 = vcombine.high %v1522_v12, %v1529_v30 }
 0x590   :  { %1333 = vst [vmem:[%s2307_s17] sm:$0x3f] %v1331_v31  ;;  %1600 = vst [vmem:[%s2307_s17 + $0x6] sm:$0x3f] %v1364_v26  ;;  %v1396_v39 = vcombine.low %v1388_v32, %v1395_v34 }
 0x591   :  { %v1428_v40 = vcombine.high %v1420_v35, %v1427_v36  ;;  %1605 = vst [vmem:[%s2307_s17 + $0x24] sm:$0x3f] %v1504_v37  ;;  %1606 = vst [vmem:[%s2307_s17 + $0x2a] sm:$0x3f] %v1530_v38 }
 0x592   :  { %1601 = vst [vmem:[%s2307_s17 + $0xc] sm:$0x3f] %v1396_v39 }
 0x593   :  { %1602 = vst [vmem:[%s2307_s17 + $0x12] sm:$0x3f] %v1428_v40 }
 0x594   :  { %1542 = vsyncpa [#allocation3], 1 }
 0x595   :  { %1543 = vsyncpa [#allocation5], 1 }
 0x596   :  { %1544 = vsyncpa [#allocation8], 1 }
 0x597   :  { %1545 = vsyncpa [#allocation11], 1 }
 0x598   :  { %1546 = vsyncpa [#allocation14], 1 }

// kernel: forward.3
= control target key start
LH: loop header
LB: loop body
LE: loop exit
PB: predicated region body
PF: predicated region fallthrough
CT: control target
= control target key end

     0   :  { %16 = vsyncpa [#allocation4], 0  ;;  %s10005_s0 = inlined_call_operand.vmem [shape: f32[8,2,384], index: 0, kind: input, shape index: {}]   ;;  %s10006_s1 = inlined_call_operand.vmem [shape: f32[128,384], index: 1, kind: input, shape index: {}]   ;;  %s10007_s2 = inlined_call_operand.vmem [shape: f32[1,128], index: 2, kind: input, shape index: {}]   ;;  %s10008_s3 = inlined_call_operand.hbm [shape: f32[128,384], index: 3, kind: input, shape index: {}]   ;;  %s10009_s4 = inlined_call_operand.vmem [shape: f32[1,384], index: 4, kind: input, shape index: {}]   ;;  %s10010_s5 = inlined_call_operand.hbm [shape: f32[128,384], index: 5, kind: input, shape index: {}]   ;;  %s10011_s6 = inlined_call_operand.vmem [shape: f32[1,128], index: 6, kind: input, shape index: {}]   ;;  %s10012_s7 = inlined_call_operand.hbm [shape: f32[128,128], index: 7, kind: input, shape index: {}]   ;;  %s10013_s8 = inlined_call_operand.vmem [shape: f32[1,128], index: 8, kind: input, shape index: {}]   ;;  %s10014_s9 = inlined_call_operand.hbm [shape: f32[128,128], index: 9, kind: input, shape index: {}]   ;;  %s10015_s10 = inlined_call_operand.vmem [shape: f32[1,128], index: 10, kind: input, shape index: {}]   ;;  %s10016_s11 = inlined_call_operand.vmem [shape: f32[16,128], index: 11, kind: output, shape index: {}]  }
   0x1   :  { %17 = vsyncpa [#allocation6], 0 }
   0x2   :  { %18 = vsyncpa [#allocation9], 0  ;;  %s6367_s17 = smov [#allocation5]   ;;  %s6368_s19 = smov [#allocation3]  }
   0x3   :  { %s44_s18 = sshll.u32 %s6367_s17, 4  ;;  %s30_s20 = sshll.u32 %s6368_s19, 4  ;;  %s45_s18 = int_to_ptr.vmem [resolvable:$true] %s44_s18  ;;  %s31_s20 = int_to_ptr.vmem [resolvable:$true] %s30_s20 }
   0x4   :  { %s6289_s21 = scalar_lea.vmem %s45_s18, 6144  ;;  %p6294_p1 = scmp.lt.s32.totalorder %s45_s18, %s45_s18 }
   0x5   :  { %p6290_p0 = scmp.ne.s32.totalorder %s45_s18, %s6289_s21  ;;  %p6295_p2 = scmp.lt.s32.totalorder %s6289_s21, %s6289_s21 }
   0x7   :  { %p6296_p3 = por %p6295_p2, %p6294_p1 }
   0x9   :  { %p6297_p4 = pnand %p6296_p3, %p6290_p0 }
   0xb   :  { %6300 = shalt.err (!%p6297_p4)
}
   0xc   :  { %s6369_s22 = smov 384   ;;  %s6370_s23 = smov 24  }
   0xd   :  { %50 = dma.hbm_to_vmem [thread:$0]  %s10010_s5, 6144, %s45_s18, [#allocation6], %s6369_s22, %s6369_s22, %s6370_s23  }
   0xe   :  { %s6309_s26 = scalar_lea.vmem %s31_s20, 6144  ;;  %p6314_p6 = scmp.lt.s32.totalorder %s31_s20, %s31_s20 }
   0xf   :  { %p6310_p5 = scmp.ne.s32.totalorder %s31_s20, %s6309_s26  ;;  %p6315_p7 = scmp.lt.s32.totalorder %s6309_s26, %s6309_s26 }
  0x11   :  { %p6316_p8 = por %p6315_p7, %p6314_p6 }
  0x13   :  { %p6317_p9 = pnand %p6316_p8, %p6310_p5 }
  0x15   :  { %6320 = shalt.err (!%p6317_p9)
}
  0x16   :  { %36 = dma.hbm_to_vmem [thread:$0]  %s10008_s3, 6144, %s31_s20, [#allocation4], %s6369_s22, %s6369_s22, %s6370_s23  }
  0x17   :  { %s6371_s29 = smov [#allocation7]  }
  0x18   :  { %s58_s30 = sshll.u32 %s6371_s29, 4  ;;  %s59_s30 = int_to_ptr.vmem [resolvable:$true] %s58_s30 }
  0x19   :  { %s6329_s12 = scalar_lea.vmem %s59_s30, 2048  ;;  %p6334_p11 = scmp.lt.s32.totalorder %s59_s30, %s59_s30 }
  0x1a   :  { %p6330_p10 = scmp.ne.s32.totalorder %s59_s30, %s6329_s12  ;;  %p6335_p12 = scmp.lt.s32.totalorder %s6329_s12, %s6329_s12 }
  0x1c   :  { %p6336_p13 = por %p6335_p12, %p6334_p11 }
  0x1e   :  { %p6337_p0 = pnand %p6336_p13, %p6330_p10 }
  0x20   :  { %6340 = shalt.err (!%p6337_p0)
}
  0x21   :  { %s6372_s5 = smov 128   ;;  %s6373_s13 = smov 8  }
  0x22   :  { %64 = dma.hbm_to_vmem [thread:$0]  %s10012_s7, 2048, %s59_s30, [#allocation6], %s6372_s5, %s6372_s5, %s6373_s13  }
  0x23   :  { %s6374_s16 = smov [#allocation8]  }
  0x24   :  { %s72_s17 = sshll.u32 %s6374_s16, 4  ;;  %s73_s17 = int_to_ptr.vmem [resolvable:$true] %s72_s17 }
  0x25   :  { %s6349_s3 = scalar_lea.vmem %s73_s17, 2048  ;;  %p6354_p2 = scmp.lt.s32.totalorder %s73_s17, %s73_s17 }
  0x26   :  { %p6350_p1 = scmp.ne.s32.totalorder %s73_s17, %s6349_s3  ;;  %p6355_p3 = scmp.lt.s32.totalorder %s6349_s3, %s6349_s3 }
  0x28   :  { %p6356_p4 = por %p6355_p3, %p6354_p2 }
  0x2a   :  { %p6357_p5 = pnand %p6356_p4, %p6350_p1 }
  0x2c   :  { %6360 = shalt.err (!%p6357_p5)
}
  0x2d   :  { %78 = dma.hbm_to_vmem [thread:$0]  %s10014_s9, 2048, %s73_s17, [#allocation9], %s6372_s5, %s6372_s5, %s6373_s13  }
  0x2e   :  { %6361 = dma.done.wait [#allocation4], 6144  }
  0x2f   :  { %6362 = vsyncadd [#allocation4], 4294961152 }
  0x30   :  { %6363 = dma.done.wait [#allocation6], 8192  }
  0x31   :  { %6364 = vsyncadd [#allocation6], 4294959104 }
  0x32   :  { %6365 = dma.done.wait [#allocation9], 2048  }
  0x33   :  { %6366 = vsyncadd [#allocation9], 4294965248  ;;  %v10064_v0 = vmov 0.0   ;;  %vm6376_vm0 = vmmov 0   ;;  %v6456_v1 = vld [vmem:[%s10006_s1 + $0x170] sm:$0xff]  ;;  %v6461_v2 = vld [vmem:[%s10006_s1 + $0x168] sm:$0xff] }
  0x34   :  { %4763 = vmatprep.subr.mxu1 %v10064_v0  ;;  %305 = vmatprep.mubr.f32.mxu0 %v10064_v0  ;;  %v6466_v3 = vld [vmem:[%s10006_s1 + $0x158] sm:$0xff]  ;;  %v6472_v4 = vld [vmem:[%s10006_s1 + $0x150] sm:$0xff]  ;;  %v6478_v5 = vld [vmem:[%s10006_s1 + $0x140] sm:$0xff] }
  0x35   :  { %4795 = vmatprep.mubr.msk.f32.mxu1 %vm6376_vm0, %v10064_v0  ;;  %241 = vmatprep.subr.mxu0 %v6456_v1  ;;  %v6484_v6 = vld [vmem:[%s10006_s1 + $0x138] sm:$0xff]  ;;  %v6490_v7 = vld [vmem:[%s10006_s1 + $0x128] sm:$0xff]  ;;  %v6496_v8 = vld [vmem:[%s10006_s1 + $0x120] sm:$0xff] }
  0x36   :  { %242 = vmatpush1.msra.mxu0 %v6461_v2  ;;  %v6502_v9 = vld [vmem:[%s10006_s1 + $0x110] sm:$0xff]  ;;  %v6508_v10 = vld [vmem:[%s10006_s1 + $0x108] sm:$0xff]  ;;  %v6514_v11 = vld [vmem:[%s10006_s1 + $0xf8] sm:$0xff] }
  0x37   :  { %243 = vmatprep.subr.mxu0 %v6466_v3  ;;  %v6520_v12 = vld [vmem:[%s10006_s1 + $0xf0] sm:$0xff]  ;;  %v6526_v13 = vld [vmem:[%s10006_s1 + $0xe0] sm:$0xff]  ;;  %v6531_v14 = vld [vmem:[%s10006_s1 + $0x178] sm:$0xff] }
  0x38   :  { %244 = vmatpush1.msra.mxu0 %v6472_v4  ;;  %v6537_v15 = vld [vmem:[%s10006_s1 + $0xd8] sm:$0xff]  ;;  %4764 = vmatpush3.msra.mxu1 %v6531_v14  ;;  %v6543_v16 = vld [vmem:[%s10006_s1 + $0x160] sm:$0xff]  ;;  %v6549_v17 = vld [vmem:[%s10006_s1 + $0xc8] sm:$0xff] }
  0x39   :  { %245 = vmatprep.subr.mxu0 %v6478_v5  ;;  %4765 = vmatprep.subr.mxu1 %v10064_v0  ;;  %v6555_v18 = vld [vmem:[%s10006_s1 + $0x148] sm:$0xff]  ;;  %v6561_v19 = vld [vmem:[%s10006_s1 + $0xc0] sm:$0xff]  ;;  %v6568_v20 = vld [vmem:[%s10006_s1 + $0xb0] sm:$0xff] }
  0x3a   :  { %246 = vmatpush1.msra.mxu0 %v6484_v6  ;;  %4766 = vmatpush3.msra.mxu1 %v6543_v16  ;;  %v6574_v21 = vld [vmem:[%s10006_s1 + $0x130] sm:$0xff]  ;;  %v6580_v22 = vld [vmem:[%s10006_s1 + $0xa8] sm:$0xff]  ;;  %v6587_v23 = vld [vmem:[%s10006_s1 + $0x98] sm:$0xff] }
  0x3b   :  { %247 = vmatprep.subr.mxu0 %v6490_v7  ;;  %4767 = vmatprep.subr.mxu1 %v10064_v0  ;;  %v6593_v24 = vld [vmem:[%s10006_s1 + $0x118] sm:$0xff]  ;;  %v6599_v25 = vld [vmem:[%s10006_s1 + $0x90] sm:$0xff]  ;;  %v6606_v26 = vld [vmem:[%s10006_s1 + $0x80] sm:$0xff] }
  0x3c   :  { %248 = vmatpush1.msra.mxu0 %v6496_v8  ;;  %4768 = vmatpush3.msra.mxu1 %v6555_v18  ;;  %v6612_v27 = vld [vmem:[%s10006_s1 + $0x100] sm:$0xff]  ;;  %v6618_v28 = vld [vmem:[%s10006_s1 + $0x78] sm:$0xff]  ;;  %v6625_v29 = vld [vmem:[%s10006_s1 + $0x68] sm:$0xff] }
  0x3d   :  { %249 = vmatprep.subr.mxu0 %v6502_v9  ;;  %4769 = vmatprep.subr.mxu1 %v10064_v0  ;;  %v6631_v30 = vld [vmem:[%s10006_s1 + $0xe8] sm:$0xff]  ;;  %v6637_v31 = vld [vmem:[%s10006_s1 + $0x60] sm:$0xff]  ;;  %v6644_v32 = vld [vmem:[%s10006_s1 + $0x50] sm:$0xff] }
  0x3e   :  { %250 = vmatpush1.msra.mxu0 %v6508_v10  ;;  %4770 = vmatpush3.msra.mxu1 %v6574_v21  ;;  %v6650_v33 = vld [vmem:[%s10006_s1 + $0xd0] sm:$0xff]  ;;  %v6656_v34 = vld [vmem:[%s10006_s1 + $0x48] sm:$0xff]  ;;  %v6663_v35 = vld [vmem:[%s10006_s1 + $0x38] sm:$0xff] }
  0x3f   :  { %251 = vmatprep.subr.mxu0 %v6514_v11  ;;  %4771 = vmatprep.subr.mxu1 %v10064_v0  ;;  %v6669_v36 = vld [vmem:[%s10006_s1 + $0xb8] sm:$0xff]  ;;  %v6675_v37 = vld [vmem:[%s10006_s1 + $0x30] sm:$0xff]  ;;  %v6682_v38 = vld [vmem:[%s10006_s1 + $0x20] sm:$0xff] }
  0x40   :  { %252 = vmatpush1.msra.mxu0 %v6520_v12  ;;  %4772 = vmatpush3.msra.mxu1 %v6593_v24  ;;  %v6688_v39 = vld [vmem:[%s10006_s1 + $0xa0] sm:$0xff]  ;;  %v6694_v40 = vld [vmem:[%s10006_s1 + $0x18] sm:$0xff]  ;;  %v6701_v41 = vld [vmem:[%s10006_s1 + $0x8] sm:$0xff] }
  0x41   :  { %253 = vmatprep.subr.mxu0 %v6526_v13  ;;  %4773 = vmatprep.subr.mxu1 %v10064_v0  ;;  %v6707_v42 = vld [vmem:[%s10006_s1 + $0x88] sm:$0xff]  ;;  %v6713_v43 = vld [vmem:[%s10006_s1] sm:$0xff]  ;;  %v6721_v44 = vld [vmem:[%s10006_s1 + $0x70] sm:$0xff] }
  0x42   :  { %254 = vmatpush1.msra.mxu0 %v6537_v15  ;;  %4774 = vmatpush3.msra.mxu1 %v6612_v27  ;;  %10365 = vst [vmem:[#allocation13_spill] sm:$0xff] %v6713_v43  ;;  %v6730_v45 = vld [vmem:[%s10006_s1 + $0x58] sm:$0xff]  ;;  %v6738_v46 = vld [vmem:[%s10006_s1 + $0x40] sm:$0xff]  ;;  %v6746_v47 = vld [vmem:[%s10006_s1 + $0x28] sm:$0xff] }
  0x43   :  { %255 = vmatprep.subr.mxu0 %v6549_v17  ;;  %4775 = vmatprep.subr.mxu1 %v10064_v0  ;;  %v6753_v48 = vld [vmem:[%s10006_s1 + $0x10] sm:$0xff]  ;;  %v6762_v49 = vld [vmem:[#allocation3 + $0x170] sm:$0xff]  ;;  %v6764_v50 = vld [vmem:[#allocation3 + $0x168] sm:$0xff] }
  0x44   :  { %256 = vmatpush1.msra.mxu0 %v6561_v19  ;;  %4776 = vmatpush3.msra.mxu1 %v6631_v30  ;;  %10366 = vst [vmem:[#allocation14_spill] sm:$0xff] %v6753_v48  ;;  %10367 = vst [vmem:[#allocation15_spill] sm:$0xff] %v6762_v49  ;;  %v6766_v51 = vld [vmem:[#allocation3 + $0x178] sm:$0xff]  ;;  %v6772_v53 = vld [vmem:[#allocation3 + $0x150] sm:$0xff] }
  0x45   :  { %257 = vmatprep.subr.mxu0 %v6568_v20  ;;  %4777 = vmatprep.subr.mxu1 %v10064_v0  ;;  %10368 = vst [vmem:[#allocation16_spill] sm:$0xff] %v6764_v50  ;;  %10369 = vst [vmem:[#allocation17_spill] sm:$0xff] %v6766_v51  ;;  %v6770_v52 = vld [vmem:[#allocation3 + $0x158] sm:$0xff]  ;;  %v6774_v54 = vld [vmem:[#allocation3 + $0x160] sm:$0xff] }
  0x46   :  { %258 = vmatpush1.msra.mxu0 %v6580_v22  ;;  %4778 = vmatpush3.msra.mxu1 %v6650_v33  ;;  %10370 = vst [vmem:[#allocation18_spill] sm:$0xff] %v6770_v52  ;;  %10371 = vst [vmem:[#allocation19_spill] sm:$0xff] %v6772_v53  ;;  %v6778_v55 = vld [vmem:[#allocation3 + $0x140] sm:$0xff]  ;;  %v6780_v56 = vld [vmem:[#allocation3 + $0x148] sm:$0xff] }
  0x47   :  { %259 = vmatprep.subr.mxu0 %v6587_v23  ;;  %4779 = vmatprep.subr.mxu1 %v10064_v0  ;;  %10372 = vst [vmem:[#allocation20_spill] sm:$0xff] %v6774_v54  ;;  %10373 = vst [vmem:[#allocation21_spill] sm:$0xff] %v6778_v55  ;;  %v6784_v57 = vld [vmem:[#allocation3 + $0x138] sm:$0xff]  ;;  %v6791_v58 = vld [vmem:[#allocation3 + $0x128] sm:$0xff] }
  0x48   :  { %260 = vmatpush1.msra.mxu0 %v6599_v25  ;;  %4780 = vmatpush3.msra.mxu1 %v6669_v36  ;;  %10374 = vst [vmem:[#allocation22_spill] sm:$0xff] %v6780_v56  ;;  %10375 = vst [vmem:[#allocation23_spill] sm:$0xff] %v6784_v57  ;;  %v6795_v59 = vld [vmem:[#allocation3 + $0x120] sm:$0xff]  ;;  %v6797_v60 = vld [vmem:[#allocation3 + $0x130] sm:$0xff] }
  0x49   :  { %261 = vmatprep.subr.mxu0 %v6606_v26  ;;  %4781 = vmatprep.subr.mxu1 %v10064_v0  ;;  %10376 = vst [vmem:[#allocation24_spill] sm:$0xff] %v6791_v58  ;;  %10377 = vst [vmem:[#allocation25_spill] sm:$0xff] %v6795_v59  ;;  %v6801_v61 = vld [vmem:[#allocation3 + $0x110] sm:$0xff]  ;;  %v6805_v62 = vld [vmem:[#allocation3 + $0x108] sm:$0xff] }
  0x4a   :  { %262 = vmatpush1.msra.mxu0 %v6618_v28  ;;  %4782 = vmatpush3.msra.mxu1 %v6688_v39  ;;  %10378 = vst [vmem:[#allocation26_spill] sm:$0xff] %v6797_v60  ;;  %10379 = vst [vmem:[#allocation27_spill] sm:$0xff] %v6801_v61  ;;  %v6807_v63 = vld [vmem:[#allocation3 + $0x118] sm:$0xff] }
  0x4b   :  { %263 = vmatprep.subr.mxu0 %v6625_v29  ;;  %4783 = vmatprep.subr.mxu1 %v10064_v0  ;;  %10380 = vst [vmem:[#allocation28_spill] sm:$0xff] %v6805_v62  ;;  %10381 = vst [vmem:[#allocation29_spill] sm:$0xff] %v6807_v63 }
  0x4c   :  { %264 = vmatpush1.msra.mxu0 %v6637_v31  ;;  %4784 = vmatpush3.msra.mxu1 %v6707_v42 }
  0x4d   :  { %265 = vmatprep.subr.mxu0 %v6644_v32  ;;  %4785 = vmatprep.subr.mxu1 %v10064_v0 }
  0x4e   :  { %266 = vmatpush1.msra.mxu0 %v6656_v34  ;;  %4786 = vmatpush3.msra.mxu1 %v6721_v44 }
  0x4f   :  { %267 = vmatprep.subr.mxu0 %v6663_v35  ;;  %4787 = vmatprep.subr.mxu1 %v10064_v0 }
  0x50   :  { %268 = vmatpush1.msra.mxu0 %v6675_v37  ;;  %4788 = vmatpush3.msra.mxu1 %v6730_v45 }
  0x51   :  { %269 = vmatprep.subr.mxu0 %v6682_v38  ;;  %4789 = vmatprep.subr.mxu1 %v10064_v0 }
  0x52   :  { %270 = vmatpush1.msra.mxu0 %v6694_v40  ;;  %4790 = vmatpush3.msra.mxu1 %v6738_v46 }
  0x53   :  { %271 = vmatprep.subr.mxu0 %v6701_v41  ;;  %4791 = vmatprep.subr.mxu1 %v10064_v0 }
  0x54   :  { %272 = vmatpush1.msra.mxu0 %v6713_v43  ;;  %4792 = vmatpush3.msra.mxu1 %v6746_v47  ;;  %v6938_v43 = vld [vmem:[#allocation5 + $0x178] sm:$0xff] }
  0x55   :  { %306 = vmatmul.mubr.f32.vlgmr.msra.gmra.mxu0 %v10064_v0  ;;  %4793 = vmatprep.subr.mxu1 %v10064_v0 }
  0x56   :  { %495 = vmatprep.mubr.f32.mxu0 %v10064_v0  ;;  %4794 = vmatpush3.msra.mxu1 %v6753_v48  ;;  %v6936_v48 = vld [vmem:[#allocation5 + $0x168] sm:$0xff] }
  0x57   :  { %4796 = vmatmul.mubr.f32.vlgmr.msra.gmra.mxu1 %v10064_v0  ;;  %4798 = vmatprep.subr.mxu1 %v10064_v0 }
  0x58   :  { %4830 = vmatprep.mubr.msk.f32.mxu1 %vm6376_vm0, %v10064_v0  ;;  %431 = vmatprep.subr.mxu0 %v6762_v49 }
  0x59   :  { %4799 = vmatpush3.msra.mxu1 %v6766_v51  ;;  %432 = vmatpush1.msra.mxu0 %v6764_v50 }
  0x5a   :  { %4800 = vmatprep.subr.mxu1 %v10064_v0  ;;  %433 = vmatprep.subr.mxu0 %v6770_v52 }
  0x5b   :  { %4801 = vmatpush3.msra.mxu1 %v6774_v54  ;;  %434 = vmatpush1.msra.mxu0 %v6772_v53 }
  0x5c   :  { %4802 = vmatprep.subr.mxu1 %v10064_v0  ;;  %435 = vmatprep.subr.mxu0 %v6778_v55  ;;  %v6867_v55 = vld [vmem:[#allocation3 + $0x68] sm:$0xff] }
  0x5d   :  { %4803 = vmatpush3.msra.mxu1 %v6780_v56  ;;  %436 = vmatpush1.msra.mxu0 %v6784_v57  ;;  %v6843_v56 = vld [vmem:[#allocation3 + $0xa8] sm:$0xff]  ;;  %v6853_v57 = vld [vmem:[#allocation3 + $0xa0] sm:$0xff]  ;;  %10400 = vst [vmem:[#allocation48_spill] sm:$0xff] %v6867_v55 }
  0x5e   :  { %4804 = vmatprep.subr.mxu1 %v10064_v0  ;;  %437 = vmatprep.subr.mxu0 %v6791_v58  ;;  %v6811_v58 = vld [vmem:[#allocation3 + $0xf8] sm:$0xff]  ;;  %10392 = vst [vmem:[#allocation40_spill] sm:$0xff] %v6843_v56  ;;  %10396 = vst [vmem:[#allocation44_spill] sm:$0xff] %v6853_v57 }
  0x5f   :  { %438 = vmatpush1.msra.mxu0 %v6795_v59  ;;  %4805 = vmatpush3.msra.mxu1 %v6797_v60  ;;  %10382 = vst [vmem:[#allocation30_spill] sm:$0xff] %v6811_v58  ;;  %v6815_v60 = vld [vmem:[#allocation3 + $0xf0] sm:$0xff]  ;;  %v6817_v59 = vld [vmem:[#allocation3 + $0x100] sm:$0xff] }
  0x60   :  { %439 = vmatprep.subr.mxu0 %v6801_v61  ;;  %4806 = vmatprep.subr.mxu1 %v10064_v0  ;;  %10383 = vst [vmem:[#allocation31_spill] sm:$0xff] %v6815_v60  ;;  %10384 = vst [vmem:[#allocation32_spill] sm:$0xff] %v6817_v59  ;;  %v6821_v61 = vld [vmem:[#allocation3 + $0xe0] sm:$0xff] }
  0x61   :  { %440 = vmatpush1.msra.mxu0 %v6805_v62  ;;  %4807 = vmatpush3.msra.mxu1 %v6807_v63  ;;  %10385 = vst [vmem:[#allocation33_spill] sm:$0xff] %v6821_v61  ;;  %v6825_v63 = vld [vmem:[#allocation3 + $0xd8] sm:$0xff]  ;;  %v6827_v62 = vld [vmem:[#allocation3 + $0xe8] sm:$0xff] }
  0x62   :  { %441 = vmatprep.subr.mxu0 %v6811_v58  ;;  %4808 = vmatprep.subr.mxu1 %v10064_v0  ;;  %10386 = vst [vmem:[#allocation34_spill] sm:$0xff] %v6825_v63  ;;  %10387 = vst [vmem:[#allocation35_spill] sm:$0xff] %v6827_v62  ;;  %v6831_v58 = vld [vmem:[#allocation3 + $0xc8] sm:$0xff] }
  0x63   :  { %442 = vmatpush1.msra.mxu0 %v6815_v60  ;;  %4809 = vmatpush3.msra.mxu1 %v6817_v59  ;;  %10388 = vst [vmem:[#allocation36_spill] sm:$0xff] %v6831_v58  ;;  %v6835_v59 = vld [vmem:[#allocation3 + $0xc0] sm:$0xff]  ;;  %v6837_v60 = vld [vmem:[#allocation3 + $0xd0] sm:$0xff] }
  0x64   :  { %443 = vmatprep.subr.mxu0 %v6821_v61  ;;  %4810 = vmatprep.subr.mxu1 %v10064_v0  ;;  %10389 = vst [vmem:[#allocation37_spill] sm:$0xff] %v6835_v59  ;;  %10390 = vst [vmem:[#allocation38_spill] sm:$0xff] %v6837_v60  ;;  %v6841_v61 = vld [vmem:[#allocation3 + $0xb0] sm:$0xff] }
  0x65   :  { %444 = vmatpush1.msra.mxu0 %v6825_v63  ;;  %4811 = vmatpush3.msra.mxu1 %v6827_v62  ;;  %10391 = vst [vmem:[#allocation39_spill] sm:$0xff] %v6841_v61  ;;  %v6845_v63 = vld [vmem:[#allocation3 + $0xb8] sm:$0xff]  ;;  %v6851_v62 = vld [vmem:[#allocation3 + $0x90] sm:$0xff] }
  0x66   :  { %445 = vmatprep.subr.mxu0 %v6831_v58  ;;  %4812 = vmatprep.subr.mxu1 %v10064_v0  ;;  %10393 = vst [vmem:[#allocation41_spill] sm:$0xff] %v6845_v63  ;;  %v6849_v58 = vld [vmem:[#allocation3 + $0x98] sm:$0xff]  ;;  %10395 = vst [vmem:[#allocation43_spill] sm:$0xff] %v6851_v62 }
  0x67   :  { %446 = vmatpush1.msra.mxu0 %v6835_v59  ;;  %4813 = vmatpush3.msra.mxu1 %v6837_v60  ;;  %10394 = vst [vmem:[#allocation42_spill] sm:$0xff] %v6849_v58  ;;  %v6857_v60 = vld [vmem:[#allocation3 + $0x80] sm:$0xff]  ;;  %v6861_v59 = vld [vmem:[#allocation3 + $0x78] sm:$0xff] }
  0x68   :  { %447 = vmatprep.subr.mxu0 %v6841_v61  ;;  %4814 = vmatprep.subr.mxu1 %v10064_v0  ;;  %10397 = vst [vmem:[#allocation45_spill] sm:$0xff] %v6857_v60  ;;  %10398 = vst [vmem:[#allocation46_spill] sm:$0xff] %v6861_v59  ;;  %v6863_v61 = vld [vmem:[#allocation3 + $0x88] sm:$0xff] }
  0x69   :  { %448 = vmatpush1.msra.mxu0 %v6843_v56  ;;  %4815 = vmatpush3.msra.mxu1 %v6845_v63  ;;  %10399 = vst [vmem:[#allocation47_spill] sm:$0xff] %v6863_v61  ;;  %v6871_v63 = vld [vmem:[#allocation3 + $0x60] sm:$0xff]  ;;  %v6873_v56 = vld [vmem:[#allocation3 + $0x70] sm:$0xff] }
  0x6a   :  { %449 = vmatprep.subr.mxu0 %v6849_v58  ;;  %4816 = vmatprep.subr.mxu1 %v10064_v0  ;;  %10401 = vst [vmem:[#allocation49_spill] sm:$0xff] %v6871_v63  ;;  %10402 = vst [vmem:[#allocation50_spill] sm:$0xff] %v6873_v56  ;;  %v6877_v58 = vld [vmem:[#allocation3 + $0x50] sm:$0xff] }
  0x6b   :  { %450 = vmatpush1.msra.mxu0 %v6851_v62  ;;  %4817 = vmatpush3.msra.mxu1 %v6853_v57  ;;  %10403 = vst [vmem:[#allocation51_spill] sm:$0xff] %v6877_v58  ;;  %v6881_v57 = vld [vmem:[#allocation3 + $0x48] sm:$0xff]  ;;  %v6883_v62 = vld [vmem:[#allocation3 + $0x58] sm:$0xff] }
  0x6c   :  { %451 = vmatprep.subr.mxu0 %v6857_v60  ;;  %4818 = vmatprep.subr.mxu1 %v10064_v0  ;;  %10404 = vst [vmem:[#allocation52_spill] sm:$0xff] %v6881_v57  ;;  %10405 = vst [vmem:[#allocation53_spill] sm:$0xff] %v6883_v62  ;;  %v6887_v60 = vld [vmem:[#allocation3 + $0x38] sm:$0xff] }
  0x6d   :  { %452 = vmatpush1.msra.mxu0 %v6861_v59  ;;  %4819 = vmatpush3.msra.mxu1 %v6863_v61  ;;  %10406 = vst [vmem:[#allocation54_spill] sm:$0xff] %v6887_v60  ;;  %v6891_v61 = vld [vmem:[#allocation3 + $0x30] sm:$0xff]  ;;  %v6893_v59 = vld [vmem:[#allocation3 + $0x40] sm:$0xff] }
  0x6e   :  { %453 = vmatprep.subr.mxu0 %v6867_v55  ;;  %4820 = vmatprep.subr.mxu1 %v10064_v0  ;;  %10407 = vst [vmem:[#allocation55_spill] sm:$0xff] %v6891_v61  ;;  %10408 = vst [vmem:[#allocation56_spill] sm:$0xff] %v6893_v59  ;;  %v6897_v55 = vld [vmem:[#allocation3 + $0x20] sm:$0xff] }
  0x6f   :  { %454 = vmatpush1.msra.mxu0 %v6871_v63  ;;  %4821 = vmatpush3.msra.mxu1 %v6873_v56  ;;  %10409 = vst [vmem:[#allocation57_spill] sm:$0xff] %v6897_v55  ;;  %v6901_v56 = vld [vmem:[#allocation3 + $0x18] sm:$0xff]  ;;  %v6903_v63 = vld [vmem:[#allocation3 + $0x28] sm:$0xff] }
  0x70   :  { %455 = vmatprep.subr.mxu0 %v6877_v58  ;;  %4822 = vmatprep.subr.mxu1 %v10064_v0  ;;  %10410 = vst [vmem:[#allocation58_spill] sm:$0xff] %v6901_v56  ;;  %10411 = vst [vmem:[#allocation59_spill] sm:$0xff] %v6903_v63  ;;  %v6907_v58 = vld [vmem:[#allocation3 + $0x8] sm:$0xff] }
  0x71   :  { %456 = vmatpush1.msra.mxu0 %v6881_v57  ;;  %4823 = vmatpush3.msra.mxu1 %v6883_v62  ;;  %10412 = vst [vmem:[#allocation60_spill] sm:$0xff] %v6907_v58  ;;  %v6911_v62 = vld [vmem:[#allocation3] sm:$0xff]  ;;  %v6913_v57 = vld [vmem:[#allocation3 + $0x10] sm:$0xff] }
  0x72   :  { %457 = vmatprep.subr.mxu0 %v6887_v60  ;;  %4824 = vmatprep.subr.mxu1 %v10064_v0  ;;  %10413 = vst [vmem:[#allocation61_spill] sm:$0xff] %v6911_v62  ;;  %10414 = vst [vmem:[#allocation62_spill] sm:$0xff] %v6913_v57  ;;  %v6917_v60 = vld [vmem:[#allocation5 + $0x170] sm:$0xff] }
  0x73   :  { %458 = vmatpush1.msra.mxu0 %v6891_v61  ;;  %4825 = vmatpush3.msra.mxu1 %v6893_v59  ;;  %10415 = vst [vmem:[#allocation63_spill] sm:$0xff] %v6917_v60 }
  0x74   :  { %459 = vmatprep.subr.mxu0 %v6897_v55  ;;  %4826 = vmatprep.subr.mxu1 %v10064_v0 }
  0x75   :  { %460 = vmatpush1.msra.mxu0 %v6901_v56  ;;  %4827 = vmatpush3.msra.mxu1 %v6903_v63  ;;  %v240_v56 = vld [vmem:[%s10005_s0] sm:$0x3f] }
  0x76   :  { %461 = vmatprep.subr.mxu0 %v6907_v58  ;;  %4828 = vmatprep.subr.mxu1 %v10064_v0  ;;  %v390_v61 = vrot.slane %v240_v56, 2 }
  0x77   :  { %462 = vmatpush1.msra.mxu0 %v6911_v62  ;;  %4829 = vmatpush3.msra.mxu1 %v6913_v57 }
  0x78   :  { %572 = vmatprep.subr.mxu0 %v6917_v60  ;;  %4833 = vmatprep.subr.mxu1 %v10064_v0  ;;  %v6931_v0 = vld [vmem:[%s10007_s2] ss:$0 sm:$0xff] }
 0x115   :  { %v307_v55 = vpop.f32.mrf.mxu0 }
 0x116   :  { %v382_v63 = vadd.f32 %v307_v55, %v240_v56 }
 0x117   :  { %v309_v54 = vpop.f32.mrf.mxu0  ;;  %v378_v53 = vpop.f32.mrf.mxu1 }
 0x118   :  { %v4276_v59 = vmul.f32 -1.442695, %v382_v63  ;;  %v392_v58 = vadd.f32 %v390_v61, %v309_v54  ;;  %v405_v55 = vadd.f32 %v6931_v0, %v378_v53  ;;  %v407_v63 = vrot.slane %v240_v56, 4  ;;  %v6950_v53 = vld [vmem:[#allocation5 + $0x140] sm:$0xff] }
 0x119   :  { %v4797_v62 = vpop.f32.mrf.mxu1  ;;  %v10416_v56 = vmov 0.0  }
 0x11a   :  { %5683 = vpow2.f32 %v4276_v59  ;;  %v4277_v52 = vmul.f32 -1.442695, %v392_v58 }
 0x11c   :  { %5685 = vpow2.f32 %v4277_v52 }
 0x127   :  { %v5684_v57 = vpop.eup %5683 }
 0x128   :  { %v386_v51 = vadd.f32 1.0, %v5684_v57 }
 0x129   :  { %v5686_v60 = vpop.eup %5685 }
 0x12a   :  { %5687 = vrcp.f32 %v386_v51  ;;  %v396_v50 = vadd.f32 1.0, %v5686_v60  ;;  %v6940_v60 = vld [vmem:[#allocation5 + $0x158] sm:$0xff] }
 0x12c   :  { %5689 = vrcp.f32 %v396_v50  ;;  %v6946_v50 = vld [vmem:[#allocation5 + $0x160] sm:$0xff] }
 0x137   :  { %v5688_v49 = vpop.eup %5687 }
 0x138   :  { %v406_v54 = vmul.f32 %v5688_v49, %v405_v55  ;;  %v6944_v49 = vld [vmem:[#allocation5 + $0x150] sm:$0xff]  ;;  %v6954_v55 = vld [vmem:[#allocation5 + $0x138] sm:$0xff] }
 0x139   :  { %v5690_v58 = vpop.eup %5689  ;;  %10417 = vst [vmem:[#allocation64_spill] sm:$0xff] %v6954_v55 }
 0x13a   :  { %v409_v59 = vadd.f32 %v407_v63, %v406_v54  ;;  %v411_v52 = vsub.f32 1.0, %v5690_v58  ;;  %v413_v51 = vmul.f32 0.0, %v5690_v58  ;;  %v6956_v63 = vld [vmem:[#allocation5 + $0x148] sm:$0xff]  ;;  %v6966_v58 = vld [vmem:[#allocation5 + $0x130] sm:$0xff] }
 0x13b   :  { %10418 = vst [vmem:[#allocation65_spill] sm:$0xff] %v6956_v63  ;;  %v6960_v54 = vld [vmem:[#allocation5 + $0x128] sm:$0xff]  ;;  %10421 = vst [vmem:[#allocation68_spill] sm:$0xff] %v6966_v58 }
 0x13c   :  { %5691 = vtanh.f32 %v409_v59  ;;  %10419 = vst [vmem:[#allocation66_spill] sm:$0xff] %v6960_v54  ;;  %v6964_v59 = vld [vmem:[#allocation5 + $0x120] sm:$0xff] }
 0x13d   :  { %10420 = vst [vmem:[#allocation67_spill] sm:$0xff] %v6964_v59 }
 0x149   :  { %v5692_v61 = vpop.eup %5691 }
 0x14a   :  { %v412_v57 = vmul.f32 %v5692_v61, %v411_v52  ;;  %v6970_v52 = vld [vmem:[#allocation5 + $0x110] sm:$0xff]  ;;  %v6974_v61 = vld [vmem:[#allocation5 + $0x108] sm:$0xff] }
 0x14b   :  { %10422 = vst [vmem:[#allocation69_spill] sm:$0xff] %v6970_v52  ;;  %10423 = vst [vmem:[#allocation70_spill] sm:$0xff] %v6974_v61 }
 0x14c   :  { %v6934_v62 = vadd.f32 %v413_v51, %v412_v57  ;;  %v6976_v57 = vld [vmem:[#allocation5 + $0x118] sm:$0xff] }
 0x14d   :  { %10424 = vst [vmem:[#allocation71_spill] sm:$0xff] %v6976_v57  ;;  %v6980_v51 = vld [vmem:[#allocation5 + $0xf8] sm:$0xff] }
 0x14e   :  { %496 = vmatmul.mubr.f32.vlgmr.msra.gmra.mxu0 %v6934_v62  ;;  %4831 = vmatmul.mubr.f32.vlgmr.msra.gmra.mxu1 %v6934_v62  ;;  %10425 = vst [vmem:[#allocation72_spill] sm:$0xff] %v6980_v51 }
 0x14f   :  { %573 = vmatpush1.msra.mxu0 %v6936_v48  ;;  %4834 = vmatpush3.msra.mxu1 %v6938_v43 }
 0x150   :  { %574 = vmatprep.subr.mxu0 %v6940_v60  ;;  %4835 = vmatprep.subr.mxu1 %v10416_v56 }
 0x151   :  { %575 = vmatpush1.msra.mxu0 %v6944_v49  ;;  %4836 = vmatpush3.msra.mxu1 %v6946_v50 }
 0x152   :  { %576 = vmatprep.subr.mxu0 %v6950_v53  ;;  %4837 = vmatprep.subr.mxu1 %v10416_v56 }
 0x153   :  { %577 = vmatpush1.msra.mxu0 %v6954_v55  ;;  %4838 = vmatpush3.msra.mxu1 %v6956_v63  ;;  %v6984_v63 = vld [vmem:[#allocation5 + $0xf0] sm:$0xff]  ;;  %v6986_v55 = vld [vmem:[#allocation5 + $0x100] sm:$0xff] }
 0x154   :  { %578 = vmatprep.subr.mxu0 %v6960_v54  ;;  %4839 = vmatprep.subr.mxu1 %v10416_v56  ;;  %10426 = vst [vmem:[#allocation73_spill] sm:$0xff] %v6984_v63  ;;  %10427 = vst [vmem:[#allocation74_spill] sm:$0xff] %v6986_v55  ;;  %v6990_v54 = vld [vmem:[#allocation5 + $0xe0] sm:$0xff] }
 0x155   :  { %579 = vmatpush1.msra.mxu0 %v6964_v59  ;;  %4840 = vmatpush3.msra.mxu1 %v6966_v58  ;;  %10428 = vst [vmem:[#allocation75_spill] sm:$0xff] %v6990_v54  ;;  %v6994_v58 = vld [vmem:[#allocation5 + $0xd8] sm:$0xff]  ;;  %v6996_v59 = vld [vmem:[#allocation5 + $0xe8] sm:$0xff] }
 0x156   :  { %580 = vmatprep.subr.mxu0 %v6970_v52  ;;  %4841 = vmatprep.subr.mxu1 %v10416_v56  ;;  %10429 = vst [vmem:[#allocation76_spill] sm:$0xff] %v6994_v58  ;;  %10430 = vst [vmem:[#allocation77_spill] sm:$0xff] %v6996_v59  ;;  %v7000_v52 = vld [vmem:[#allocation5 + $0xc8] sm:$0xff] }
 0x157   :  { %581 = vmatpush1.msra.mxu0 %v6974_v61  ;;  %4842 = vmatpush3.msra.mxu1 %v6976_v57  ;;  %10431 = vst [vmem:[#allocation78_spill] sm:$0xff] %v7000_v52  ;;  %v7004_v57 = vld [vmem:[#allocation5 + $0xc0] sm:$0xff]  ;;  %v7006_v61 = vld [vmem:[#allocation5 + $0xd0] sm:$0xff] }
 0x158   :  { %582 = vmatprep.subr.mxu0 %v6980_v51  ;;  %4843 = vmatprep.subr.mxu1 %v10416_v56  ;;  %10432 = vst [vmem:[#allocation79_spill] sm:$0xff] %v7004_v57  ;;  %10433 = vst [vmem:[#allocation80_spill] sm:$0xff] %v7006_v61  ;;  %v7010_v51 = vld [vmem:[#allocation5 + $0xb0] sm:$0xff] }
 0x159   :  { %583 = vmatpush1.msra.mxu0 %v6984_v63  ;;  %4844 = vmatpush3.msra.mxu1 %v6986_v55  ;;  %10434 = vst [vmem:[#allocation81_spill] sm:$0xff] %v7010_v51  ;;  %v7014_v55 = vld [vmem:[#allocation5 + $0xa8] sm:$0xff]  ;;  %v7016_v63 = vld [vmem:[#allocation5 + $0xb8] sm:$0xff] }
 0x15a   :  { %584 = vmatprep.subr.mxu0 %v6990_v54  ;;  %4845 = vmatprep.subr.mxu1 %v10416_v56  ;;  %10435 = vst [vmem:[#allocation82_spill] sm:$0xff] %v7014_v55  ;;  %10436 = vst [vmem:[#allocation83_spill] sm:$0xff] %v7016_v63  ;;  %v7020_v54 = vld [vmem:[#allocation5 + $0x98] sm:$0xff] }
 0x15b   :  { %585 = vmatpush1.msra.mxu0 %v6994_v58  ;;  %4846 = vmatpush3.msra.mxu1 %v6996_v59  ;;  %10437 = vst [vmem:[#allocation84_spill] sm:$0xff] %v7020_v54  ;;  %v7024_v59 = vld [vmem:[#allocation5 + $0x90] sm:$0xff]  ;;  %v7026_v58 = vld [vmem:[#allocation5 + $0xa0] sm:$0xff] }
 0x15c   :  { %586 = vmatprep.subr.mxu0 %v7000_v52  ;;  %4847 = vmatprep.subr.mxu1 %v10416_v56  ;;  %10438 = vst [vmem:[#allocation85_spill] sm:$0xff] %v7024_v59  ;;  %10439 = vst [vmem:[#allocation86_spill] sm:$0xff] %v7026_v58  ;;  %v7030_v52 = vld [vmem:[#allocation5 + $0x80] sm:$0xff] }
 0x15d   :  { %587 = vmatpush1.msra.mxu0 %v7004_v57  ;;  %4848 = vmatpush3.msra.mxu1 %v7006_v61  ;;  %10440 = vst [vmem:[#allocation87_spill] sm:$0xff] %v7030_v52  ;;  %v7034_v61 = vld [vmem:[#allocation5 + $0x78] sm:$0xff]  ;;  %v7036_v57 = vld [vmem:[#allocation5 + $0x88] sm:$0xff] }
 0x15e   :  { %588 = vmatprep.subr.mxu0 %v7010_v51  ;;  %4849 = vmatprep.subr.mxu1 %v10416_v56  ;;  %10441 = vst [vmem:[#allocation88_spill] sm:$0xff] %v7034_v61  ;;  %10442 = vst [vmem:[#allocation89_spill] sm:$0xff] %v7036_v57  ;;  %v7040_v51 = vld [vmem:[#allocation5 + $0x68] sm:$0xff] }
 0x15f   :  { %589 = vmatpush1.msra.mxu0 %v7014_v55  ;;  %4850 = vmatpush3.msra.mxu1 %v7016_v63  ;;  %10443 = vst [vmem:[#allocation90_spill] sm:$0xff] %v7040_v51  ;;  %v7044_v63 = vld [vmem:[#allocation5 + $0x60] sm:$0xff]  ;;  %v7046_v55 = vld [vmem:[#allocation5 + $0x70] sm:$0xff] }
 0x160   :  { %590 = vmatprep.subr.mxu0 %v7020_v54  ;;  %4851 = vmatprep.subr.mxu1 %v10416_v56  ;;  %10444 = vst [vmem:[#allocation91_spill] sm:$0xff] %v7044_v63  ;;  %10445 = vst [vmem:[#allocation92_spill] sm:$0xff] %v7046_v55  ;;  %v7050_v54 = vld [vmem:[#allocation5 + $0x50] sm:$0xff] }
 0x161   :  { %591 = vmatpush1.msra.mxu0 %v7024_v59  ;;  %4852 = vmatpush3.msra.mxu1 %v7026_v58  ;;  %10446 = vst [vmem:[#allocation93_spill] sm:$0xff] %v7050_v54  ;;  %v7054_v58 = vld [vmem:[#allocation5 + $0x48] sm:$0xff]  ;;  %v7056_v59 = vld [vmem:[#allocation5 + $0x58] sm:$0xff] }
 0x162   :  { %592 = vmatprep.subr.mxu0 %v7030_v52  ;;  %4853 = vmatprep.subr.mxu1 %v10416_v56  ;;  %10447 = vst [vmem:[#allocation94_spill] sm:$0xff] %v7056_v59  ;;  %v7060_v52 = vld [vmem:[#allocation5 + $0x38] sm:$0xff] }
 0x163   :  { %593 = vmatpush1.msra.mxu0 %v7034_v61  ;;  %4854 = vmatpush3.msra.mxu1 %v7036_v57  ;;  %10448 = vst [vmem:[#allocation95_spill] sm:$0xff] %v7060_v52  ;;  %v7064_v57 = vld [vmem:[#allocation5 + $0x30] sm:$0xff]  ;;  %v7066_v61 = vld [vmem:[#allocation5 + $0x40] sm:$0xff] }
 0x164   :  { %594 = vmatprep.subr.mxu0 %v7040_v51  ;;  %4855 = vmatprep.subr.mxu1 %v10416_v56  ;;  %v7070_v51 = vld [vmem:[#allocation5 + $0x20] sm:$0xff] }
 0x165   :  { %595 = vmatpush1.msra.mxu0 %v7044_v63  ;;  %4856 = vmatpush3.msra.mxu1 %v7046_v55  ;;  %v7074_v55 = vld [vmem:[#allocation5 + $0x18] sm:$0xff]  ;;  %v7076_v63 = vld [vmem:[#allocation5 + $0x28] sm:$0xff] }
 0x166   :  { %596 = vmatprep.subr.mxu0 %v7050_v54  ;;  %4857 = vmatprep.subr.mxu1 %v10416_v56  ;;  %v7080_v54 = vld [vmem:[#allocation5 + $0x8] sm:$0xff] }
 0x167   :  { %597 = vmatpush1.msra.mxu0 %v7054_v58  ;;  %4858 = vmatpush3.msra.mxu1 %v7056_v59  ;;  %v7084_v59 = vld [vmem:[#allocation5] sm:$0xff] }
 0x168   :  { %598 = vmatprep.subr.mxu0 %v7060_v52  ;;  %4859 = vmatprep.subr.mxu1 %v10416_v56  ;;  %v7088_v52 = vld [vmem:[#allocation5 + $0x10] sm:$0xff] }
 0x169   :  { %599 = vmatpush1.msra.mxu0 %v7064_v57  ;;  %4860 = vmatpush3.msra.mxu1 %v7066_v61 }
 0x16a   :  { %600 = vmatprep.subr.mxu0 %v7070_v51  ;;  %4861 = vmatprep.subr.mxu1 %v10416_v56 }
 0x16b   :  { %601 = vmatpush1.msra.mxu0 %v7074_v55  ;;  %4862 = vmatpush3.msra.mxu1 %v7076_v63 }
 0x16c   :  { %602 = vmatprep.subr.mxu0 %v7080_v54  ;;  %4863 = vmatprep.subr.mxu1 %v10416_v56 }
 0x16d   :  { %603 = vmatpush1.msra.mxu0 %v7084_v59  ;;  %636 = vmatprep.mubr.f32.mxu0 %v10416_v56 }
 0x16e   :  { %4864 = vmatpush3.msra.mxu1 %v7088_v52  ;;  %637 = vmatmul.mubr.f32.vlgmr.msra.gmra.mxu0 %v10416_v56 }
 0x16f   :  { %4865 = vmatprep.mubr.msk.f32.mxu1 %vm6376_vm0, %v10416_v56  ;;  %744 = vmatprep.subr.mxu0 %v6456_v1  ;;  %v10449_v1 = vld [vmem:[#allocation13_spill] sm:$0xff] }
 0x170   :  { %4868 = vmatprep.subr.mxu1 %v10416_v56  ;;  %4866 = vmatmul.mubr.f32.vlgmr.msra.gmra.mxu1 %v10416_v56 }
 0x171   :  { %745 = vmatpush1.msra.mxu0 %v6461_v2  ;;  %4869 = vmatpush3.msra.mxu1 %v6531_v14  ;;  %v10450_v2 = vld [vmem:[#allocation14_spill] sm:$0xff] }
 0x172   :  { %746 = vmatprep.subr.mxu0 %v6466_v3  ;;  %4870 = vmatprep.subr.mxu1 %v10416_v56  ;;  %v10451_v3 = vld [vmem:[#allocation15_spill] sm:$0xff]  ;;  %v10462_v14 = vld [vmem:[#allocation26_spill] sm:$0xff] }
 0x173   :  { %747 = vmatpush1.msra.mxu0 %v6472_v4  ;;  %4871 = vmatpush3.msra.mxu1 %v6543_v16  ;;  %v10452_v4 = vld [vmem:[#allocation16_spill] sm:$0xff] }
 0x174   :  { %748 = vmatprep.subr.mxu0 %v6478_v5  ;;  %4872 = vmatprep.subr.mxu1 %v10416_v56  ;;  %v10453_v5 = vld [vmem:[#allocation17_spill] sm:$0xff]  ;;  %v10464_v16 = vld [vmem:[#allocation28_spill] sm:$0xff] }
 0x175   :  { %749 = vmatpush1.msra.mxu0 %v6484_v6  ;;  %4873 = vmatpush3.msra.mxu1 %v6555_v18  ;;  %v10454_v6 = vld [vmem:[#allocation18_spill] sm:$0xff] }
 0x176   :  { %750 = vmatprep.subr.mxu0 %v6490_v7  ;;  %4874 = vmatprep.subr.mxu1 %v10416_v56  ;;  %v10455_v7 = vld [vmem:[#allocation19_spill] sm:$0xff]  ;;  %v10466_v18 = vld [vmem:[#allocation30_spill] sm:$0xff] }
 0x177   :  { %751 = vmatpush1.msra.mxu0 %v6496_v8  ;;  %4875 = vmatpush3.msra.mxu1 %v6574_v21  ;;  %v10456_v8 = vld [vmem:[#allocation20_spill] sm:$0xff]  ;;  %v10469_v21 = vld [vmem:[#allocation33_spill] sm:$0xff] }
 0x178   :  { %752 = vmatprep.subr.mxu0 %v6502_v9  ;;  %4876 = vmatprep.subr.mxu1 %v10416_v56  ;;  %v10457_v9 = vld [vmem:[#allocation21_spill] sm:$0xff] }
 0x179   :  { %753 = vmatpush1.msra.mxu0 %v6508_v10  ;;  %4877 = vmatpush3.msra.mxu1 %v6593_v24  ;;  %v10458_v10 = vld [vmem:[#allocation23_spill] sm:$0xff]  ;;  %v10472_v24 = vld [vmem:[#allocation36_spill] sm:$0xff] }
 0x17a   :  { %754 = vmatprep.subr.mxu0 %v6514_v11  ;;  %4878 = vmatprep.subr.mxu1 %v10416_v56  ;;  %v10459_v11 = vld [vmem:[#allocation22_spill] sm:$0xff] }
 0x17b   :  { %755 = vmatpush1.msra.mxu0 %v6520_v12  ;;  %4879 = vmatpush3.msra.mxu1 %v6612_v27  ;;  %v10460_v12 = vld [vmem:[#allocation24_spill] sm:$0xff]  ;;  %v10475_v27 = vld [vmem:[#allocation39_spill] sm:$0xff] }
 0x17c   :  { %756 = vmatprep.subr.mxu0 %v6526_v13  ;;  %4880 = vmatprep.subr.mxu1 %v10416_v56  ;;  %v10461_v13 = vld [vmem:[#allocation25_spill] sm:$0xff] }
 0x17d   :  { %757 = vmatpush1.msra.mxu0 %v6537_v15  ;;  %4881 = vmatpush3.msra.mxu1 %v6631_v30  ;;  %v10463_v15 = vld [vmem:[#allocation27_spill] sm:$0xff]  ;;  %v10478_v30 = vld [vmem:[#allocation42_spill] sm:$0xff] }
 0x17e   :  { %758 = vmatprep.subr.mxu0 %v6549_v17  ;;  %4882 = vmatprep.subr.mxu1 %v10416_v56  ;;  %v10465_v17 = vld [vmem:[#allocation29_spill] sm:$0xff] }
 0x17f   :  { %759 = vmatpush1.msra.mxu0 %v6561_v19  ;;  %4883 = vmatpush3.msra.mxu1 %v6650_v33  ;;  %v10467_v19 = vld [vmem:[#allocation31_spill] sm:$0xff]  ;;  %v10481_v33 = vld [vmem:[#allocation45_spill] sm:$0xff] }
 0x180   :  { %760 = vmatprep.subr.mxu0 %v6568_v20  ;;  %4884 = vmatprep.subr.mxu1 %v10416_v56  ;;  %v10468_v20 = vld [vmem:[#allocation32_spill] sm:$0xff] }
 0x181   :  { %761 = vmatpush1.msra.mxu0 %v6580_v22  ;;  %4885 = vmatpush3.msra.mxu1 %v6669_v36  ;;  %v10470_v22 = vld [vmem:[#allocation34_spill] sm:$0xff]  ;;  %v10484_v36 = vld [vmem:[#allocation48_spill] sm:$0xff] }
 0x182   :  { %762 = vmatprep.subr.mxu0 %v6587_v23  ;;  %4886 = vmatprep.subr.mxu1 %v10416_v56  ;;  %v10471_v23 = vld [vmem:[#allocation35_spill] sm:$0xff] }
 0x183   :  { %763 = vmatpush1.msra.mxu0 %v6599_v25  ;;  %4887 = vmatpush3.msra.mxu1 %v6688_v39  ;;  %v10473_v25 = vld [vmem:[#allocation37_spill] sm:$0xff]  ;;  %v10487_v39 = vld [vmem:[#allocation51_spill] sm:$0xff] }
 0x184   :  { %764 = vmatprep.subr.mxu0 %v6606_v26  ;;  %4888 = vmatprep.subr.mxu1 %v10416_v56  ;;  %v10474_v26 = vld [vmem:[#allocation38_spill] sm:$0xff] }
 0x185   :  { %765 = vmatpush1.msra.mxu0 %v6618_v28  ;;  %4889 = vmatpush3.msra.mxu1 %v6707_v42  ;;  %v10476_v28 = vld [vmem:[#allocation40_spill] sm:$0xff]  ;;  %v10490_v42 = vld [vmem:[#allocation54_spill] sm:$0xff] }
 0x186   :  { %766 = vmatprep.subr.mxu0 %v6625_v29  ;;  %4890 = vmatprep.subr.mxu1 %v10416_v56  ;;  %v10477_v29 = vld [vmem:[#allocation41_spill] sm:$0xff] }
 0x187   :  { %767 = vmatpush1.msra.mxu0 %v6637_v31  ;;  %4891 = vmatpush3.msra.mxu1 %v6721_v44  ;;  %v10479_v31 = vld [vmem:[#allocation43_spill] sm:$0xff] }
 0x188   :  { %768 = vmatprep.subr.mxu0 %v6644_v32  ;;  %4892 = vmatprep.subr.mxu1 %v10416_v56  ;;  %v10480_v32 = vld [vmem:[#allocation44_spill] sm:$0xff]  ;;  %v10491_v44 = vld [vmem:[#allocation55_spill] sm:$0xff] }
 0x189   :  { %769 = vmatpush1.msra.mxu0 %v6656_v34  ;;  %4893 = vmatpush3.msra.mxu1 %v6730_v45  ;;  %v10482_v34 = vld [vmem:[#allocation46_spill] sm:$0xff]  ;;  %v10492_v45 = vld [vmem:[#allocation56_spill] sm:$0xff] }
 0x18a   :  { %770 = vmatprep.subr.mxu0 %v6663_v35  ;;  %4894 = vmatprep.subr.mxu1 %v10416_v56  ;;  %v10483_v35 = vld [vmem:[#allocation47_spill] sm:$0xff] }
 0x18b   :  { %771 = vmatpush1.msra.mxu0 %v6675_v37  ;;  %4895 = vmatpush3.msra.mxu1 %v6738_v46  ;;  %v10485_v37 = vld [vmem:[#allocation49_spill] sm:$0xff] }
 0x18c   :  { %772 = vmatprep.subr.mxu0 %v6682_v38  ;;  %4896 = vmatprep.subr.mxu1 %v10416_v56  ;;  %v10486_v38 = vld [vmem:[#allocation50_spill] sm:$0xff]  ;;  %v10493_v46 = vld [vmem:[#allocation57_spill] sm:$0xff] }
 0x18d   :  { %773 = vmatpush1.msra.mxu0 %v6694_v40  ;;  %4897 = vmatpush3.msra.mxu1 %v6746_v47  ;;  %v10488_v40 = vld [vmem:[#allocation52_spill] sm:$0xff]  ;;  %v10494_v47 = vld [vmem:[#allocation58_spill] sm:$0xff] }
 0x18e   :  { %774 = vmatprep.subr.mxu0 %v6701_v41  ;;  %4898 = vmatprep.subr.mxu1 %v10416_v56  ;;  %v10489_v41 = vld [vmem:[#allocation53_spill] sm:$0xff] }
 0x18f   :  { %775 = vmatpush1.msra.mxu0 %v10449_v1  ;;  %808 = vmatprep.mubr.f32.mxu0 %v10416_v56  ;;  %v10495_v1 = vld [vmem:[#allocation59_spill] sm:$0xff] }
 0x190   :  { %4899 = vmatpush3.msra.mxu1 %v10450_v2  ;;  %4900 = vmatprep.mubr.msk.f32.mxu1 %vm6376_vm0, %v10416_v56  ;;  %v10496_v2 = vld [vmem:[#allocation60_spill] sm:$0xff] }
 0x191   :  { %809 = vmatmul.mubr.f32.vlgmr.msra.gmra.mxu0 %v6934_v62  ;;  %4901 = vmatmul.mubr.f32.vlgmr.msra.gmra.mxu1 %v6934_v62 }
 0x192   :  { %912 = vmatprep.subr.mxu0 %v10451_v3  ;;  %4903 = vmatprep.subr.mxu1 %v10416_v56  ;;  %v10497_v3 = vld [vmem:[#allocation61_spill] sm:$0xff] }
 0x193   :  { %913 = vmatpush1.msra.mxu0 %v10452_v4  ;;  %4904 = vmatpush3.msra.mxu1 %v10453_v5  ;;  %v10498_v4 = vld [vmem:[#allocation62_spill] sm:$0xff]  ;;  %v10499_v5 = vld [vmem:[#allocation63_spill] sm:$0xff] }
 0x194   :  { %914 = vmatprep.subr.mxu0 %v10454_v6  ;;  %4905 = vmatprep.subr.mxu1 %v10416_v56 }
 0x195   :  { %915 = vmatpush1.msra.mxu0 %v10455_v7  ;;  %4906 = vmatpush3.msra.mxu1 %v10456_v8  ;;  %v416_v8 = vlaneseq }
 0x196   :  { %916 = vmatprep.subr.mxu0 %v10457_v9  ;;  %4907 = vmatprep.subr.mxu1 %v10416_v56 }
 0x197   :  { %917 = vmatpush1.msra.mxu0 %v10458_v10  ;;  %4908 = vmatpush3.msra.mxu1 %v10459_v11  ;;  %v417_v9 = vshrl.u32 %v416_v8, 7  ;;  %v237_v11 = vld [vmem:[%s10009_s4] sm:$0x7] }
 0x198   :  { %918 = vmatprep.subr.mxu0 %v10460_v12  ;;  %4909 = vmatprep.subr.mxu1 %v10416_v56 }
 0x199   :  { %919 = vmatpush1.msra.mxu0 %v10461_v13  ;;  %4910 = vmatpush3.msra.mxu1 %v10462_v14  ;;  %v418_v10 = vsub.s32 0, %v417_v9  ;;  %v422_v14 = vsub.s32 1, %v417_v9 }
 0x19a   :  { %920 = vmatprep.subr.mxu0 %v10463_v15  ;;  %4911 = vmatprep.subr.mxu1 %v10416_v56 }
 0x19b   :  { %921 = vmatpush1.msra.mxu0 %v10464_v16  ;;  %4912 = vmatpush3.msra.mxu1 %v10465_v17  ;;  %v7240_v13 = vrot.slane %v237_v11, %v418_v10 }
 0x19c   :  { %922 = vmatprep.subr.mxu0 %v10466_v18  ;;  %4913 = vmatprep.subr.mxu1 %v10416_v56  ;;  %v7243_v18 = vrot.slane %v237_v11, %v422_v14 }
 0x19d   :  { %923 = vmatpush1.msra.mxu0 %v10467_v19  ;;  %4914 = vmatpush3.msra.mxu1 %v10468_v20  ;;  %10500 = vst [vmem:[#allocation13_spill] sm:$0xff] %v7240_v13 }
 0x19e   :  { %924 = vmatprep.subr.mxu0 %v10469_v21  ;;  %4915 = vmatprep.subr.mxu1 %v10416_v56  ;;  %10501 = vst [vmem:[#allocation14_spill] sm:$0xff] %v7243_v18 }
 0x19f   :  { %925 = vmatpush1.msra.mxu0 %v10470_v22  ;;  %4916 = vmatpush3.msra.mxu1 %v10471_v23 }
 0x1a0   :  { %926 = vmatprep.subr.mxu0 %v10472_v24  ;;  %4917 = vmatprep.subr.mxu1 %v10416_v56 }
 0x1a1   :  { %927 = vmatpush1.msra.mxu0 %v10473_v25  ;;  %4918 = vmatpush3.msra.mxu1 %v10474_v26 }
 0x1a2   :  { %928 = vmatprep.subr.mxu0 %v10475_v27  ;;  %4919 = vmatprep.subr.mxu1 %v10416_v56 }
 0x1a3   :  { %929 = vmatpush1.msra.mxu0 %v10476_v28  ;;  %4920 = vmatpush3.msra.mxu1 %v10477_v29  ;;  %v426_v29 = vsub.s32 2, %v417_v9 }
 0x1a4   :  { %930 = vmatprep.subr.mxu0 %v10478_v30  ;;  %4921 = vmatprep.subr.mxu1 %v10416_v56 }
 0x1a5   :  { %931 = vmatpush1.msra.mxu0 %v10479_v31  ;;  %4922 = vmatpush3.msra.mxu1 %v10480_v32  ;;  %v7249_v31 = vld [vmem:[%s10011_s6] ss:$0 sm:$0xff]  ;;  %v7251_v32 = vrot.slane %v237_v11, %v426_v29 }
 0x1a6   :  { %932 = vmatprep.subr.mxu0 %v10481_v33  ;;  %4923 = vmatprep.subr.mxu1 %v10416_v56  ;;  %v10513_v29 = vld [vmem:[#allocation75_spill] sm:$0xff] }
 0x1a7   :  { %933 = vmatpush1.msra.mxu0 %v10482_v34  ;;  %4924 = vmatpush3.msra.mxu1 %v10483_v35  ;;  %v4282_v35 = vld [vmem:[%s10005_s0 + $0x6] sm:$0x3f] }
 0x1a8   :  { %934 = vmatprep.subr.mxu0 %v10484_v36  ;;  %4925 = vmatprep.subr.mxu1 %v10416_v56  ;;  %v904_v14 = vrot.slane %v4282_v35, 4 }
 0x1a9   :  { %935 = vmatpush1.msra.mxu0 %v10485_v37  ;;  %4926 = vmatpush3.msra.mxu1 %v10486_v38 }
 0x1aa   :  { %936 = vmatprep.subr.mxu0 %v10487_v39  ;;  %4927 = vmatprep.subr.mxu1 %v10416_v56 }
 0x1ab   :  { %937 = vmatpush1.msra.mxu0 %v10488_v40  ;;  %4928 = vmatpush3.msra.mxu1 %v10489_v41 }
 0x1ac   :  { %938 = vmatprep.subr.mxu0 %v10490_v42  ;;  %4929 = vmatprep.subr.mxu1 %v10416_v56 }
 0x1ad   :  { %939 = vmatpush1.msra.mxu0 %v10491_v44  ;;  %4930 = vmatpush3.msra.mxu1 %v10492_v45 }
 0x1ae   :  { %940 = vmatprep.subr.mxu0 %v10493_v46  ;;  %4931 = vmatprep.subr.mxu1 %v10416_v56  ;;  %v893_v46 = vrot.slane %v4282_v35, 2 }
 0x1af   :  { %941 = vmatpush1.msra.mxu0 %v10494_v47  ;;  %4932 = vmatpush3.msra.mxu1 %v10495_v1 }
 0x1b0   :  { %942 = vmatprep.subr.mxu0 %v10496_v2  ;;  %4933 = vmatprep.subr.mxu1 %v10416_v56 }
 0x1b1   :  { %943 = vmatpush1.msra.mxu0 %v10497_v3  ;;  %4934 = vmatpush3.msra.mxu1 %v10498_v4 }
 0x1b2   :  { %976 = vmatprep.mubr.f32.mxu0 %v10416_v56  ;;  %4935 = vmatprep.mubr.msk.f32.mxu1 %vm6376_vm0, %v10416_v56 }
 0x1b3   :  { %1053 = vmatprep.subr.mxu0 %v10499_v5  ;;  %4938 = vmatprep.subr.mxu1 %v10416_v56 }
 0x20e   :  { %v568_v6 = vpop.f32.mrf.mxu1  ;;  %v497_v12 = vpop.f32.mrf.mxu0 }
 0x20f   :  { %v498_v16 = vadd.f32 %v497_v12, %v7240_v13  ;;  %v569_v37 = vadd.f32 %v568_v6, %v7251_v32 }
 0x210   :  { %v4832_v7 = vpop.f32.mrf.mxu1  ;;  %v499_v15 = vpop.f32.mrf.mxu0 }
 0x211   :  { %v500_v24 = vadd.f32 %v499_v15, %v7243_v18 }
 0x22e   :  { %v638_v17 = vpop.f32.mrf.mxu0 }
 0x22f   :  { %v713_v19 = vadd.f32 %v638_v17, %v498_v16 }
 0x230   :  { %v709_v20 = vpop.f32.mrf.mxu1  ;;  %v640_v22 = vpop.f32.mrf.mxu0 }
 0x231   :  { %v4279_v21 = vmul.f32 -1.442695, %v713_v19  ;;  %v720_v25 = vadd.f32 %v640_v22, %v500_v24  ;;  %v733_v34 = vadd.f32 %v7249_v31, %v709_v20 }
 0x232   :  { %v4867_v23 = vpop.f32.mrf.mxu1 }
 0x233   :  { %5693 = vpow2.f32 %v4279_v21  ;;  %v4280_v26 = vmul.f32 -1.442695, %v720_v25 }
 0x235   :  { %5695 = vpow2.f32 %v4280_v26  ;;  %v10504_v26 = vld [vmem:[#allocation66_spill] sm:$0xff] }
 0x240   :  { %v5694_v27 = vpop.eup %5693 }
 0x241   :  { %v717_v28 = vadd.f32 1.0, %v5694_v27  ;;  %v10511_v27 = vld [vmem:[#allocation73_spill] sm:$0xff] }
 0x242   :  { %v5696_v30 = vpop.eup %5695 }
 0x243   :  { %5697 = vrcp.f32 %v717_v28  ;;  %v724_v33 = vadd.f32 1.0, %v5696_v30  ;;  %v10512_v28 = vld [vmem:[#allocation74_spill] sm:$0xff]  ;;  %v10514_v30 = vld [vmem:[#allocation76_spill] sm:$0xff] }
 0x245   :  { %5699 = vrcp.f32 %v724_v33  ;;  %v10515_v33 = vld [vmem:[#allocation77_spill] sm:$0xff] }
 0x250   :  { %v5698_v36 = vpop.eup %5697 }
 0x251   :  { %v734_v38 = vmul.f32 %v5698_v36, %v733_v34  ;;  %v810_v39 = vpop.f32.mrf.mxu0  ;;  %v881_v40 = vpop.f32.mrf.mxu1  ;;  %v10516_v34 = vld [vmem:[#allocation78_spill] sm:$0xff]  ;;  %v10518_v36 = vld [vmem:[#allocation80_spill] sm:$0xff] }
 0x252   :  { %v885_v41 = vadd.f32 %v4282_v35, %v810_v39  ;;  %v5700_v3 = vpop.eup %5699  ;;  %v902_v15 = vadd.f32 %v6931_v0, %v881_v40  ;;  %v10502_v0 = vld [vmem:[#allocation64_spill] sm:$0xff]  ;;  %v10517_v35 = vld [vmem:[#allocation79_spill] sm:$0xff] }
 0x253   :  { %v735_v42 = vadd.f32 %v734_v38, %v569_v37  ;;  %v4902_v44 = vpop.f32.mrf.mxu1  ;;  %v812_v47 = vpop.f32.mrf.mxu0  ;;  %v737_v4 = vsub.f32 1.0, %v5700_v3  ;;  %v739_v8 = vmul.f32 0.0, %v5700_v3  ;;  %v10519_v37 = vld [vmem:[#allocation81_spill] sm:$0xff]  ;;  %v10520_v38 = vld [vmem:[#allocation82_spill] sm:$0xff]  ;;  %v10521_v39 = vld [vmem:[#allocation83_spill] sm:$0xff] }
 0x254   :  { %v4283_v45 = vmul.f32 -1.442695, %v885_v41  ;;  %v895_v1 = vadd.f32 %v893_v46, %v812_v47  ;;  %v10522_v40 = vld [vmem:[#allocation84_spill] sm:$0xff]  ;;  %v10523_v41 = vld [vmem:[#allocation85_spill] sm:$0xff]  ;;  %v10525_v44 = vld [vmem:[#allocation87_spill] sm:$0xff] }
 0x255   :  { %5701 = vtanh.f32 %v735_v42  ;;  %v10524_v42 = vld [vmem:[#allocation86_spill] sm:$0xff]  ;;  %v10527_v46 = vld [vmem:[#allocation89_spill] sm:$0xff] }
 0x256   :  { %5703 = vpow2.f32 %v4283_v45  ;;  %v4284_v2 = vmul.f32 -1.442695, %v895_v1  ;;  %v10526_v45 = vld [vmem:[#allocation88_spill] sm:$0xff]  ;;  %v10528_v47 = vld [vmem:[#allocation90_spill] sm:$0xff]  ;;  %v10529_v1 = vld [vmem:[#allocation91_spill] sm:$0xff] }
 0x257   :  { %v10531_v3 = vld [vmem:[#allocation93_spill] sm:$0xff] }
 0x258   :  { %5705 = vpow2.f32 %v4284_v2  ;;  %v10530_v2 = vld [vmem:[#allocation92_spill] sm:$0xff] }
 0x262   :  { %v5702_v5 = vpop.eup %5701 }
 0x263   :  { %v5704_v7 = vpop.eup %5703  ;;  %v738_v6 = vmul.f32 %v5702_v5, %v737_v4  ;;  %v10532_v4 = vld [vmem:[#allocation94_spill] sm:$0xff]  ;;  %v10533_v5 = vld [vmem:[#allocation95_spill] sm:$0xff] }
 0x264   :  { %v889_v9 = vadd.f32 1.0, %v5704_v7  ;;  %v7394_v7 = vld [vmem:[%s10006_s1 + $0x128] sm:$0xff] }
 0x265   :  { %v7258_v10 = vadd.f32 %v739_v8, %v738_v6  ;;  %v5706_v11 = vpop.eup %5705  ;;  %v7401_v6 = vld [vmem:[%s10006_s1 + $0x120] sm:$0xff]  ;;  %v7407_v8 = vld [vmem:[%s10006_s1 + $0x130] sm:$0xff] }
 0x266   :  { %5707 = vrcp.f32 %v889_v9  ;;  %v899_v12 = vadd.f32 1.0, %v5706_v11  ;;  %v7413_v9 = vld [vmem:[%s10006_s1 + $0x110] sm:$0xff]  ;;  %v7420_v11 = vld [vmem:[%s10006_s1 + $0x108] sm:$0xff] }
 0x267   :  { %741 = vst [vmem:[#allocation2] sm:$0x3] %v7258_v10 }
 0x268   :  { %5709 = vrcp.f32 %v899_v12  ;;  %v7426_v12 = vld [vmem:[%s10006_s1 + $0x118] sm:$0xff] }
 0x273   :  { %v5708_v16 = vpop.eup %5707 }
 0x274   :  { %v903_v17 = vmul.f32 %v5708_v16, %v902_v15  ;;  %v7439_v15 = vld [vmem:[%s10006_s1 + $0xf0] sm:$0xff]  ;;  %v7445_v16 = vld [vmem:[%s10006_s1 + $0x100] sm:$0xff] }
 0x275   :  { %v5710_v20 = vpop.eup %5709 }
 0x276   :  { %v906_v19 = vadd.f32 %v904_v14, %v903_v17  ;;  %v908_v21 = vsub.f32 1.0, %v5710_v20  ;;  %v910_v24 = vmul.f32 %v5710_v20, %v6934_v62  ;;  %v10503_v62 = vld [vmem:[#allocation65_spill] sm:$0xff]  ;;  %v7432_v14 = vld [vmem:[%s10006_s1 + $0xf8] sm:$0xff]  ;;  %v7451_v17 = vld [vmem:[%s10006_s1 + $0xe0] sm:$0xff] }
 0x277   :  { %v7464_v20 = vld [vmem:[%s10006_s1 + $0xe8] sm:$0xff] }
 0x278   :  { %5711 = vtanh.f32 %v906_v19  ;;  %v7458_v19 = vld [vmem:[%s10006_s1 + $0xd8] sm:$0xff] }
 0x285   :  { %v5712_v22 = vpop.eup %5711 }
 0x286   :  { %v909_v23 = vmul.f32 %v5712_v22, %v908_v21  ;;  %v7470_v21 = vld [vmem:[%s10006_s1 + $0xc8] sm:$0xff]  ;;  %v7477_v22 = vld [vmem:[%s10006_s1 + $0xc0] sm:$0xff] }
 0x288   :  { %v7263_v25 = vadd.f32 %v910_v24, %v909_v23  ;;  %v7483_v23 = vld [vmem:[%s10006_s1 + $0xd0] sm:$0xff] }
 0x289   :  { %v7489_v24 = vld [vmem:[%s10006_s1 + $0xb0] sm:$0xff] }
 0x28a   :  { %977 = vmatmul.mubr.f32.vlgmr.msra.gmra.mxu0 %v7263_v25  ;;  %4936 = vmatmul.mubr.f32.vlgmr.msra.gmra.mxu1 %v7263_v25 }
 0x28b   :  { %1054 = vmatpush1.msra.mxu0 %v6936_v48  ;;  %4939 = vmatpush3.msra.mxu1 %v6938_v43  ;;  %v10505_v43 = vld [vmem:[#allocation67_spill] sm:$0xff]  ;;  %v10506_v48 = vld [vmem:[#allocation68_spill] sm:$0xff] }
 0x28c   :  { %1055 = vmatprep.subr.mxu0 %v6940_v60  ;;  %4940 = vmatprep.subr.mxu1 %v10416_v56  ;;  %v10507_v60 = vld [vmem:[#allocation69_spill] sm:$0xff] }
 0x28d   :  { %1056 = vmatpush1.msra.mxu0 %v6944_v49  ;;  %4941 = vmatpush3.msra.mxu1 %v6946_v50  ;;  %v10508_v49 = vld [vmem:[#allocation70_spill] sm:$0xff]  ;;  %v10509_v50 = vld [vmem:[#allocation71_spill] sm:$0xff] }
 0x28e   :  { %1057 = vmatprep.subr.mxu0 %v6950_v53  ;;  %4942 = vmatprep.subr.mxu1 %v10416_v56  ;;  %v10510_v53 = vld [vmem:[#allocation72_spill] sm:$0xff] }
 0x28f   :  { %1058 = vmatpush1.msra.mxu0 %v10502_v0  ;;  %4943 = vmatpush3.msra.mxu1 %v10503_v62  ;;  %v7496_v0 = vld [vmem:[%s10006_s1 + $0xa8] sm:$0xff]  ;;  %v7502_v62 = vld [vmem:[%s10006_s1 + $0xb8] sm:$0xff] }
 0x290   :  { %1059 = vmatprep.subr.mxu0 %v10504_v26  ;;  %4944 = vmatprep.subr.mxu1 %v10416_v56  ;;  %v7508_v26 = vld [vmem:[%s10006_s1 + $0x98] sm:$0xff] }
 0x291   :  { %1060 = vmatpush1.msra.mxu0 %v10505_v43  ;;  %4945 = vmatpush3.msra.mxu1 %v10506_v48  ;;  %v7515_v43 = vld [vmem:[%s10006_s1 + $0x90] sm:$0xff]  ;;  %v7521_v48 = vld [vmem:[%s10006_s1 + $0xa0] sm:$0xff] }
 0x292   :  { %1061 = vmatprep.subr.mxu0 %v10507_v60  ;;  %4946 = vmatprep.subr.mxu1 %v10416_v56  ;;  %v7527_v60 = vld [vmem:[%s10006_s1 + $0x80] sm:$0xff] }
 0x293   :  { %1062 = vmatpush1.msra.mxu0 %v10508_v49  ;;  %4947 = vmatpush3.msra.mxu1 %v10509_v50  ;;  %v7534_v49 = vld [vmem:[%s10006_s1 + $0x78] sm:$0xff]  ;;  %v7540_v50 = vld [vmem:[%s10006_s1 + $0x88] sm:$0xff] }
 0x294   :  { %1063 = vmatprep.subr.mxu0 %v10510_v53  ;;  %4948 = vmatprep.subr.mxu1 %v10416_v56  ;;  %v7546_v53 = vld [vmem:[%s10006_s1 + $0x68] sm:$0xff] }
 0x295   :  { %1064 = vmatpush1.msra.mxu0 %v10511_v27  ;;  %4949 = vmatpush3.msra.mxu1 %v10512_v28  ;;  %v7553_v27 = vld [vmem:[%s10006_s1 + $0x60] sm:$0xff]  ;;  %v7559_v28 = vld [vmem:[%s10006_s1 + $0x70] sm:$0xff] }
 0x296   :  { %1065 = vmatprep.subr.mxu0 %v10513_v29  ;;  %4950 = vmatprep.subr.mxu1 %v10416_v56  ;;  %v7565_v29 = vld [vmem:[%s10006_s1 + $0x50] sm:$0xff] }
 0x297   :  { %1066 = vmatpush1.msra.mxu0 %v10514_v30  ;;  %4951 = vmatpush3.msra.mxu1 %v10515_v33  ;;  %v7572_v30 = vld [vmem:[%s10006_s1 + $0x48] sm:$0xff]  ;;  %v7578_v33 = vld [vmem:[%s10006_s1 + $0x58] sm:$0xff] }
 0x298   :  { %1067 = vmatprep.subr.mxu0 %v10516_v34  ;;  %4952 = vmatprep.subr.mxu1 %v10416_v56  ;;  %10534 = vst [vmem:[#allocation15_spill] sm:$0xff] %v7578_v33  ;;  %v7584_v34 = vld [vmem:[%s10006_s1 + $0x38] sm:$0xff] }
 0x299   :  { %1068 = vmatpush1.msra.mxu0 %v10517_v35  ;;  %4953 = vmatpush3.msra.mxu1 %v10518_v36  ;;  %10535 = vst [vmem:[#allocation16_spill] sm:$0xff] %v7584_v34  ;;  %v7591_v35 = vld [vmem:[%s10006_s1 + $0x30] sm:$0xff]  ;;  %v7597_v36 = vld [vmem:[%s10006_s1 + $0x40] sm:$0xff] }
 0x29a   :  { %1069 = vmatprep.subr.mxu0 %v10519_v37  ;;  %4954 = vmatprep.subr.mxu1 %v10416_v56  ;;  %10536 = vst [vmem:[#allocation17_spill] sm:$0xff] %v7591_v35  ;;  %10537 = vst [vmem:[#allocation18_spill] sm:$0xff] %v7597_v36  ;;  %v7603_v37 = vld [vmem:[%s10006_s1 + $0x20] sm:$0xff] }
 0x29b   :  { %1070 = vmatpush1.msra.mxu0 %v10520_v38  ;;  %4955 = vmatpush3.msra.mxu1 %v10521_v39  ;;  %10538 = vst [vmem:[#allocation19_spill] sm:$0xff] %v7603_v37  ;;  %v7610_v38 = vld [vmem:[%s10006_s1 + $0x18] sm:$0xff]  ;;  %v7616_v39 = vld [vmem:[%s10006_s1 + $0x28] sm:$0xff] }
 0x29c   :  { %1071 = vmatprep.subr.mxu0 %v10522_v40  ;;  %4956 = vmatprep.subr.mxu1 %v10416_v56  ;;  %10539 = vst [vmem:[#allocation20_spill] sm:$0xff] %v7610_v38  ;;  %10540 = vst [vmem:[#allocation21_spill] sm:$0xff] %v7616_v39  ;;  %v7622_v40 = vld [vmem:[%s10006_s1 + $0x8] sm:$0xff] }
 0x29d   :  { %1072 = vmatpush1.msra.mxu0 %v10523_v41  ;;  %4957 = vmatpush3.msra.mxu1 %v10524_v42  ;;  %10541 = vst [vmem:[#allocation23_spill] sm:$0xff] %v7622_v40  ;;  %v7629_v41 = vld [vmem:[%s10006_s1] sm:$0xff]  ;;  %v7636_v42 = vld [vmem:[%s10006_s1 + $0x10] sm:$0xff] }
 0x29e   :  { %1073 = vmatprep.subr.mxu0 %v10525_v44  ;;  %4958 = vmatprep.subr.mxu1 %v10416_v56  ;;  %10542 = vst [vmem:[#allocation22_spill] sm:$0xff] %v7629_v41  ;;  %10543 = vst [vmem:[#allocation24_spill] sm:$0xff] %v7636_v42  ;;  %v7643_v44 = vld [vmem:[#allocation3 + $0x170] sm:$0xff] }
 0x29f   :  { %1074 = vmatpush1.msra.mxu0 %v10526_v45  ;;  %4959 = vmatpush3.msra.mxu1 %v10527_v46  ;;  %10544 = vst [vmem:[#allocation25_spill] sm:$0xff] %v7643_v44  ;;  %v7647_v45 = vld [vmem:[#allocation3 + $0x168] sm:$0xff]  ;;  %v7650_v46 = vld [vmem:[#allocation3 + $0x178] sm:$0xff] }
 0x2a0   :  { %1075 = vmatprep.subr.mxu0 %v10528_v47  ;;  %4960 = vmatprep.subr.mxu1 %v10416_v56  ;;  %10545 = vst [vmem:[#allocation26_spill] sm:$0xff] %v7647_v45  ;;  %10546 = vst [vmem:[#allocation27_spill] sm:$0xff] %v7650_v46  ;;  %v7653_v47 = vld [vmem:[#allocation3 + $0x158] sm:$0xff] }
 0x2a1   :  { %1076 = vmatpush1.msra.mxu0 %v10529_v1  ;;  %4961 = vmatpush3.msra.mxu1 %v10530_v2  ;;  %10547 = vst [vmem:[#allocation28_spill] sm:$0xff] %v7653_v47  ;;  %v7657_v1 = vld [vmem:[#allocation3 + $0x150] sm:$0xff]  ;;  %v7660_v2 = vld [vmem:[#allocation3 + $0x160] sm:$0xff] }
 0x2a2   :  { %1077 = vmatprep.subr.mxu0 %v10531_v3  ;;  %4962 = vmatprep.subr.mxu1 %v10416_v56  ;;  %10548 = vst [vmem:[#allocation29_spill] sm:$0xff] %v7657_v1  ;;  %10549 = vst [vmem:[#allocation30_spill] sm:$0xff] %v7660_v2  ;;  %v7663_v3 = vld [vmem:[#allocation3 + $0x140] sm:$0xff] }
 0x2a3   :  { %1078 = vmatpush1.msra.mxu0 %v7054_v58  ;;  %4963 = vmatpush3.msra.mxu1 %v10532_v4  ;;  %v7363_v58 = vld [vmem:[%s10006_s1 + $0x150] sm:$0xff]  ;;  %10550 = vst [vmem:[#allocation31_spill] sm:$0xff] %v7663_v3  ;;  %v7667_v4 = vld [vmem:[#allocation3 + $0x138] sm:$0xff] }
 0x2a4   :  { %1079 = vmatprep.subr.mxu0 %v10533_v5  ;;  %4964 = vmatprep.subr.mxu1 %v10416_v56  ;;  %10551 = vst [vmem:[#allocation32_spill] sm:$0xff] %v7667_v4  ;;  %v7670_v5 = vld [vmem:[#allocation3 + $0x148] sm:$0xff] }
 0x2a5   :  { %1080 = vmatpush1.msra.mxu0 %v7064_v57  ;;  %4965 = vmatpush3.msra.mxu1 %v7066_v61  ;;  %v7375_v61 = vld [vmem:[%s10006_s1 + $0x140] sm:$0xff]  ;;  %v7382_v57 = vld [vmem:[%s10006_s1 + $0x138] sm:$0xff]  ;;  %10552 = vst [vmem:[#allocation33_spill] sm:$0xff] %v7670_v5 }
 0x2a6   :  { %1081 = vmatprep.subr.mxu0 %v7070_v51  ;;  %4966 = vmatprep.subr.mxu1 %v10416_v56  ;;  %v7388_v51 = vld [vmem:[%s10006_s1 + $0x148] sm:$0xff] }
 0x2a7   :  { %1082 = vmatpush1.msra.mxu0 %v7074_v55  ;;  %4967 = vmatpush3.msra.mxu1 %v7076_v63  ;;  %v7337_v55 = vld [vmem:[%s10006_s1 + $0x170] sm:$0xff]  ;;  %v7344_v63 = vld [vmem:[%s10006_s1 + $0x168] sm:$0xff] }
 0x2a8   :  { %1083 = vmatprep.subr.mxu0 %v7080_v54  ;;  %4968 = vmatprep.subr.mxu1 %v10416_v56  ;;  %v7350_v54 = vld [vmem:[%s10006_s1 + $0x178] sm:$0xff] }
 0x2a9   :  { %1084 = vmatpush1.msra.mxu0 %v7084_v59  ;;  %1117 = vmatprep.mubr.f32.mxu0 %v10416_v56  ;;  %v7356_v59 = vld [vmem:[%s10006_s1 + $0x158] sm:$0xff] }
 0x2aa   :  { %4969 = vmatpush3.msra.mxu1 %v7088_v52  ;;  %4970 = vmatprep.mubr.msk.f32.mxu1 %vm6376_vm0, %v10416_v56  ;;  %v7369_v52 = vld [vmem:[%s10006_s1 + $0x160] sm:$0xff] }
 0x2ab   :  { %1118 = vmatmul.mubr.f32.vlgmr.msra.gmra.mxu0 %v7258_v10  ;;  %4971 = vmatmul.mubr.f32.vlgmr.msra.gmra.mxu1 %v7258_v10 }
 0x2ac   :  { %1219 = vmatprep.subr.mxu0 %v7337_v55  ;;  %4973 = vmatprep.subr.mxu1 %v10416_v56 }
 0x2ad   :  { %1220 = vmatpush1.msra.mxu0 %v7344_v63  ;;  %4974 = vmatpush3.msra.mxu1 %v7350_v54 }
 0x2ae   :  { %1221 = vmatprep.subr.mxu0 %v7356_v59  ;;  %4975 = vmatprep.subr.mxu1 %v10416_v56 }
 0x2af   :  { %1222 = vmatpush1.msra.mxu0 %v7363_v58  ;;  %4976 = vmatpush3.msra.mxu1 %v7369_v52 }
 0x2b0   :  { %1223 = vmatprep.subr.mxu0 %v7375_v61  ;;  %4977 = vmatprep.subr.mxu1 %v10416_v56 }
 0x2b1   :  { %1224 = vmatpush1.msra.mxu0 %v7382_v57  ;;  %4978 = vmatpush3.msra.mxu1 %v7388_v51 }
 0x2b2   :  { %1225 = vmatprep.subr.mxu0 %v7394_v7  ;;  %4979 = vmatprep.subr.mxu1 %v10416_v56 }
 0x2b3   :  { %1226 = vmatpush1.msra.mxu0 %v7401_v6  ;;  %4980 = vmatpush3.msra.mxu1 %v7407_v8 }
 0x2b4   :  { %1227 = vmatprep.subr.mxu0 %v7413_v9  ;;  %4981 = vmatprep.subr.mxu1 %v10416_v56 }
 0x2b5   :  { %1228 = vmatpush1.msra.mxu0 %v7420_v11  ;;  %4982 = vmatpush3.msra.mxu1 %v7426_v12 }
 0x2b6   :  { %1229 = vmatprep.subr.mxu0 %v7432_v14  ;;  %4983 = vmatprep.subr.mxu1 %v10416_v56 }
 0x2b7   :  { %1230 = vmatpush1.msra.mxu0 %v7439_v15  ;;  %4984 = vmatpush3.msra.mxu1 %v7445_v16 }
 0x2b8   :  { %1231 = vmatprep.subr.mxu0 %v7451_v17  ;;  %4985 = vmatprep.subr.mxu1 %v10416_v56 }
 0x2b9   :  { %1232 = vmatpush1.msra.mxu0 %v7458_v19  ;;  %4986 = vmatpush3.msra.mxu1 %v7464_v20 }
 0x2ba   :  { %1233 = vmatprep.subr.mxu0 %v7470_v21  ;;  %4987 = vmatprep.subr.mxu1 %v10416_v56 }
 0x2bb   :  { %1234 = vmatpush1.msra.mxu0 %v7477_v22  ;;  %4988 = vmatpush3.msra.mxu1 %v7483_v23 }
 0x2bc   :  { %1235 = vmatprep.subr.mxu0 %v7489_v24  ;;  %4989 = vmatprep.subr.mxu1 %v10416_v56 }
 0x2bd   :  { %1236 = vmatpush1.msra.mxu0 %v7496_v0  ;;  %4990 = vmatpush3.msra.mxu1 %v7502_v62 }
 0x2be   :  { %1237 = vmatprep.subr.mxu0 %v7508_v26  ;;  %4991 = vmatprep.subr.mxu1 %v10416_v56 }
 0x2bf   :  { %1238 = vmatpush1.msra.mxu0 %v7515_v43  ;;  %4992 = vmatpush3.msra.mxu1 %v7521_v48 }
 0x2c0   :  { %1239 = vmatprep.subr.mxu0 %v7527_v60  ;;  %4993 = vmatprep.subr.mxu1 %v10416_v56 }
 0x2c1   :  { %1240 = vmatpush1.msra.mxu0 %v7534_v49  ;;  %4994 = vmatpush3.msra.mxu1 %v7540_v50 }
 0x2c2   :  { %1241 = vmatprep.subr.mxu0 %v7546_v53  ;;  %4995 = vmatprep.subr.mxu1 %v10416_v56 }
 0x2c3   :  { %1242 = vmatpush1.msra.mxu0 %v7553_v27  ;;  %4996 = vmatpush3.msra.mxu1 %v7559_v28 }
 0x2c4   :  { %1243 = vmatprep.subr.mxu0 %v7565_v29  ;;  %4997 = vmatprep.subr.mxu1 %v10416_v56 }
 0x2c5   :  { %1244 = vmatpush1.msra.mxu0 %v7572_v30  ;;  %4998 = vmatpush3.msra.mxu1 %v7578_v33 }
 0x2c6   :  { %1245 = vmatprep.subr.mxu0 %v7584_v34  ;;  %4999 = vmatprep.subr.mxu1 %v10416_v56 }
 0x2c7   :  { %1246 = vmatpush1.msra.mxu0 %v7591_v35  ;;  %5000 = vmatpush3.msra.mxu1 %v7597_v36 }
 0x2c8   :  { %1247 = vmatprep.subr.mxu0 %v7603_v37  ;;  %5001 = vmatprep.subr.mxu1 %v10416_v56 }
 0x2c9   :  { %1248 = vmatpush1.msra.mxu0 %v7610_v38  ;;  %5002 = vmatpush3.msra.mxu1 %v7616_v39 }
 0x2ca   :  { %1249 = vmatprep.subr.mxu0 %v7622_v40  ;;  %5003 = vmatprep.subr.mxu1 %v10416_v56 }
 0x2cb   :  { %1250 = vmatpush1.msra.mxu0 %v7629_v41  ;;  %1283 = vmatprep.mubr.f32.mxu0 %v10416_v56 }
 0x2cc   :  { %5004 = vmatpush3.msra.mxu1 %v7636_v42  ;;  %5005 = vmatprep.mubr.msk.f32.mxu1 %vm6376_vm0, %v10416_v56 }
 0x2cd   :  { %1284 = vmatmul.mubr.f32.vlgmr.msra.gmra.mxu0 %v7263_v25  ;;  %5006 = vmatmul.mubr.f32.vlgmr.msra.gmra.mxu1 %v7263_v25 }
 0x2ce   :  { %1387 = vmatprep.subr.mxu0 %v7643_v44  ;;  %5008 = vmatprep.subr.mxu1 %v10416_v56 }
 0x2cf   :  { %1388 = vmatpush1.msra.mxu0 %v7647_v45  ;;  %5009 = vmatpush3.msra.mxu1 %v7650_v46 }
 0x2d0   :  { %1389 = vmatprep.subr.mxu0 %v7653_v47  ;;  %5010 = vmatprep.subr.mxu1 %v10416_v56  ;;  %v7673_v47 = vld [vmem:[#allocation3 + $0x128] sm:$0xff] }
 0x2d1   :  { %1390 = vmatpush1.msra.mxu0 %v7657_v1  ;;  %5011 = vmatpush3.msra.mxu1 %v7660_v2  ;;  %10553 = vst [vmem:[#allocation34_spill] sm:$0xff] %v7673_v47  ;;  %v7677_v2 = vld [vmem:[#allocation3 + $0x120] sm:$0xff]  ;;  %v7683_v1 = vld [vmem:[#allocation3 + $0x110] sm:$0xff] }
 0x2d2   :  { %1391 = vmatprep.subr.mxu0 %v7663_v3  ;;  %5012 = vmatprep.subr.mxu1 %v10416_v56  ;;  %10554 = vst [vmem:[#allocation35_spill] sm:$0xff] %v7677_v2  ;;  %v7680_v3 = vld [vmem:[#allocation3 + $0x130] sm:$0xff]  ;;  %10556 = vst [vmem:[#allocation37_spill] sm:$0xff] %v7683_v1 }
 0x2d3   :  { %1392 = vmatpush1.msra.mxu0 %v7667_v4  ;;  %5013 = vmatpush3.msra.mxu1 %v7670_v5  ;;  %10555 = vst [vmem:[#allocation36_spill] sm:$0xff] %v7680_v3  ;;  %v7687_v5 = vld [vmem:[#allocation3 + $0x108] sm:$0xff]  ;;  %v7693_v4 = vld [vmem:[#allocation3 + $0xf8] sm:$0xff] }
 0x2d4   :  { %1393 = vmatprep.subr.mxu0 %v7673_v47  ;;  %5014 = vmatprep.subr.mxu1 %v10416_v56  ;;  %10557 = vst [vmem:[#allocation38_spill] sm:$0xff] %v7687_v5  ;;  %v7690_v47 = vld [vmem:[#allocation3 + $0x118] sm:$0xff]  ;;  %10559 = vst [vmem:[#allocation40_spill] sm:$0xff] %v7693_v4 }
 0x2d5   :  { %1394 = vmatpush1.msra.mxu0 %v7677_v2  ;;  %5015 = vmatpush3.msra.mxu1 %v7680_v3  ;;  %10558 = vst [vmem:[#allocation39_spill] sm:$0xff] %v7690_v47  ;;  %v7697_v3 = vld [vmem:[#allocation3 + $0xf0] sm:$0xff]  ;;  %v7703_v2 = vld [vmem:[#allocation3 + $0xe0] sm:$0xff] }
 0x2d6   :  { %1395 = vmatprep.subr.mxu0 %v7683_v1  ;;  %5016 = vmatprep.subr.mxu1 %v10416_v56  ;;  %10560 = vst [vmem:[#allocation41_spill] sm:$0xff] %v7697_v3  ;;  %v7700_v1 = vld [vmem:[#allocation3 + $0x100] sm:$0xff]  ;;  %10562 = vst [vmem:[#allocation43_spill] sm:$0xff] %v7703_v2 }
 0x2d7   :  { %1396 = vmatpush1.msra.mxu0 %v7687_v5  ;;  %5017 = vmatpush3.msra.mxu1 %v7690_v47  ;;  %10561 = vst [vmem:[#allocation42_spill] sm:$0xff] %v7700_v1  ;;  %v7707_v47 = vld [vmem:[#allocation3 + $0xd8] sm:$0xff]  ;;  %v7713_v5 = vld [vmem:[#allocation3 + $0xc8] sm:$0xff] }
 0x2d8   :  { %1397 = vmatprep.subr.mxu0 %v7693_v4  ;;  %5018 = vmatprep.subr.mxu1 %v10416_v56  ;;  %10563 = vst [vmem:[#allocation44_spill] sm:$0xff] %v7707_v47  ;;  %v7710_v4 = vld [vmem:[#allocation3 + $0xe8] sm:$0xff]  ;;  %10565 = vst [vmem:[#allocation46_spill] sm:$0xff] %v7713_v5 }
 0x2d9   :  { %1398 = vmatpush1.msra.mxu0 %v7697_v3  ;;  %5019 = vmatpush3.msra.mxu1 %v7700_v1  ;;  %10564 = vst [vmem:[#allocation45_spill] sm:$0xff] %v7710_v4  ;;  %v7717_v1 = vld [vmem:[#allocation3 + $0xc0] sm:$0xff]  ;;  %v7723_v3 = vld [vmem:[#allocation3 + $0xb0] sm:$0xff] }
 0x2da   :  { %1399 = vmatprep.subr.mxu0 %v7703_v2  ;;  %5020 = vmatprep.subr.mxu1 %v10416_v56  ;;  %10566 = vst [vmem:[#allocation47_spill] sm:$0xff] %v7717_v1  ;;  %v7720_v2 = vld [vmem:[#allocation3 + $0xd0] sm:$0xff]  ;;  %10568 = vst [vmem:[#allocation49_spill] sm:$0xff] %v7723_v3 }
 0x2db   :  { %1400 = vmatpush1.msra.mxu0 %v7707_v47  ;;  %5021 = vmatpush3.msra.mxu1 %v7710_v4  ;;  %10567 = vst [vmem:[#allocation48_spill] sm:$0xff] %v7720_v2  ;;  %v7727_v4 = vld [vmem:[#allocation3 + $0xa8] sm:$0xff]  ;;  %v7733_v47 = vld [vmem:[#allocation3 + $0x98] sm:$0xff] }
 0x2dc   :  { %1401 = vmatprep.subr.mxu0 %v7713_v5  ;;  %5022 = vmatprep.subr.mxu1 %v10416_v56  ;;  %10569 = vst [vmem:[#allocation50_spill] sm:$0xff] %v7727_v4  ;;  %v7730_v5 = vld [vmem:[#allocation3 + $0xb8] sm:$0xff]  ;;  %10571 = vst [vmem:[#allocation52_spill] sm:$0xff] %v7733_v47 }
 0x2dd   :  { %1402 = vmatpush1.msra.mxu0 %v7717_v1  ;;  %5023 = vmatpush3.msra.mxu1 %v7720_v2  ;;  %10570 = vst [vmem:[#allocation51_spill] sm:$0xff] %v7730_v5  ;;  %v7737_v2 = vld [vmem:[#allocation3 + $0x90] sm:$0xff]  ;;  %v7743_v1 = vld [vmem:[#allocation3 + $0x80] sm:$0xff] }
 0x2de   :  { %1403 = vmatprep.subr.mxu0 %v7723_v3  ;;  %5024 = vmatprep.subr.mxu1 %v10416_v56  ;;  %10572 = vst [vmem:[#allocation53_spill] sm:$0xff] %v7737_v2  ;;  %v7740_v3 = vld [vmem:[#allocation3 + $0xa0] sm:$0xff]  ;;  %10574 = vst [vmem:[#allocation55_spill] sm:$0xff] %v7743_v1 }
 0x2df   :  { %1404 = vmatpush1.msra.mxu0 %v7727_v4  ;;  %5025 = vmatpush3.msra.mxu1 %v7730_v5  ;;  %10573 = vst [vmem:[#allocation54_spill] sm:$0xff] %v7740_v3  ;;  %v7747_v5 = vld [vmem:[#allocation3 + $0x78] sm:$0xff]  ;;  %v7753_v4 = vld [vmem:[#allocation3 + $0x68] sm:$0xff] }
 0x2e0   :  { %1405 = vmatprep.subr.mxu0 %v7733_v47  ;;  %5026 = vmatprep.subr.mxu1 %v10416_v56  ;;  %10575 = vst [vmem:[#allocation56_spill] sm:$0xff] %v7747_v5  ;;  %v7750_v47 = vld [vmem:[#allocation3 + $0x88] sm:$0xff]  ;;  %10577 = vst [vmem:[#allocation58_spill] sm:$0xff] %v7753_v4 }
 0x2e1   :  { %1406 = vmatpush1.msra.mxu0 %v7737_v2  ;;  %5027 = vmatpush3.msra.mxu1 %v7740_v3  ;;  %10576 = vst [vmem:[#allocation57_spill] sm:$0xff] %v7750_v47  ;;  %v7757_v3 = vld [vmem:[#allocation3 + $0x60] sm:$0xff]  ;;  %v7763_v2 = vld [vmem:[#allocation3 + $0x50] sm:$0xff] }
 0x2e2   :  { %1407 = vmatprep.subr.mxu0 %v7743_v1  ;;  %5028 = vmatprep.subr.mxu1 %v10416_v56  ;;  %10578 = vst [vmem:[#allocation59_spill] sm:$0xff] %v7757_v3  ;;  %v7760_v1 = vld [vmem:[#allocation3 + $0x70] sm:$0xff]  ;;  %10580 = vst [vmem:[#allocation61_spill] sm:$0xff] %v7763_v2 }
 0x2e3   :  { %1408 = vmatpush1.msra.mxu0 %v7747_v5  ;;  %5029 = vmatpush3.msra.mxu1 %v7750_v47  ;;  %10579 = vst [vmem:[#allocation60_spill] sm:$0xff] %v7760_v1  ;;  %v7767_v47 = vld [vmem:[#allocation3 + $0x48] sm:$0xff]  ;;  %v7773_v5 = vld [vmem:[#allocation3 + $0x38] sm:$0xff] }
 0x2e4   :  { %1409 = vmatprep.subr.mxu0 %v7753_v4  ;;  %5030 = vmatprep.subr.mxu1 %v10416_v56  ;;  %10581 = vst [vmem:[#allocation62_spill] sm:$0xff] %v7767_v47  ;;  %v7770_v4 = vld [vmem:[#allocation3 + $0x58] sm:$0xff]  ;;  %10583 = vst [vmem:[#allocation64_spill] sm:$0xff] %v7773_v5 }
 0x2e5   :  { %1410 = vmatpush1.msra.mxu0 %v7757_v3  ;;  %5031 = vmatpush3.msra.mxu1 %v7760_v1  ;;  %10582 = vst [vmem:[#allocation63_spill] sm:$0xff] %v7770_v4  ;;  %v7777_v1 = vld [vmem:[#allocation3 + $0x30] sm:$0xff]  ;;  %v7783_v3 = vld [vmem:[#allocation3 + $0x20] sm:$0xff] }
 0x2e6   :  { %1411 = vmatprep.subr.mxu0 %v7763_v2  ;;  %5032 = vmatprep.subr.mxu1 %v10416_v56  ;;  %10584 = vst [vmem:[#allocation65_spill] sm:$0xff] %v7777_v1  ;;  %v7780_v2 = vld [vmem:[#allocation3 + $0x40] sm:$0xff]  ;;  %10586 = vst [vmem:[#allocation67_spill] sm:$0xff] %v7783_v3 }
 0x2e7   :  { %1412 = vmatpush1.msra.mxu0 %v7767_v47  ;;  %5033 = vmatpush3.msra.mxu1 %v7770_v4  ;;  %10585 = vst [vmem:[#allocation66_spill] sm:$0xff] %v7780_v2  ;;  %v7787_v4 = vld [vmem:[#allocation3 + $0x18] sm:$0xff]  ;;  %v7793_v47 = vld [vmem:[#allocation3 + $0x8] sm:$0xff] }
 0x2e8   :  { %1413 = vmatprep.subr.mxu0 %v7773_v5  ;;  %5034 = vmatprep.subr.mxu1 %v10416_v56  ;;  %10587 = vst [vmem:[#allocation68_spill] sm:$0xff] %v7787_v4  ;;  %v7790_v5 = vld [vmem:[#allocation3 + $0x28] sm:$0xff]  ;;  %10589 = vst [vmem:[#allocation70_spill] sm:$0xff] %v7793_v47 }
 0x2e9   :  { %1414 = vmatpush1.msra.mxu0 %v7777_v1  ;;  %5035 = vmatpush3.msra.mxu1 %v7780_v2  ;;  %10588 = vst [vmem:[#allocation69_spill] sm:$0xff] %v7790_v5  ;;  %v7797_v2 = vld [vmem:[#allocation3] sm:$0xff] }
 0x2ea   :  { %1415 = vmatprep.subr.mxu0 %v7783_v3  ;;  %5036 = vmatprep.subr.mxu1 %v10416_v56  ;;  %10590 = vst [vmem:[#allocation71_spill] sm:$0xff] %v7797_v2  ;;  %v7800_v3 = vld [vmem:[#allocation3 + $0x10] sm:$0xff] }
 0x2eb   :  { %1416 = vmatpush1.msra.mxu0 %v7787_v4  ;;  %5037 = vmatpush3.msra.mxu1 %v7790_v5  ;;  %10591 = vst [vmem:[#allocation72_spill] sm:$0xff] %v7800_v3  ;;  %v7806_v5 = vld [vmem:[#allocation5 + $0x170] sm:$0xff] }
 0x2ec   :  { %1417 = vmatprep.subr.mxu0 %v7793_v47  ;;  %5038 = vmatprep.subr.mxu1 %v10416_v56  ;;  %10592 = vst [vmem:[#allocation73_spill] sm:$0xff] %v7806_v5 }
 0x2ed   :  { %1418 = vmatpush1.msra.mxu0 %v7797_v2  ;;  %5039 = vmatpush3.msra.mxu1 %v7800_v3 }
 0x2ee   :  { %1451 = vmatprep.mubr.f32.mxu0 %v10416_v56  ;;  %5040 = vmatprep.mubr.msk.f32.mxu1 %vm6376_vm0, %v10416_v56 }
 0x2ef   :  { %1528 = vmatprep.subr.mxu0 %v7806_v5  ;;  %5043 = vmatprep.subr.mxu1 %v10416_v56 }
 0x34a   :  { %v1049_v47 = vpop.f32.mrf.mxu1  ;;  %v978_v1 = vpop.f32.mrf.mxu0 }
 0x34b   :  { %v979_v2 = vadd.f32 %v978_v1, %v7240_v13  ;;  %v4287_v1 = vld [vmem:[%s10005_s0 + $0xc] sm:$0x3f] }
 0x34c   :  { %v4937_v4 = vpop.f32.mrf.mxu1  ;;  %v980_v46 = vpop.f32.mrf.mxu0 }
 0x34d   :  { %v981_v39 = vadd.f32 %v980_v46, %v7243_v18  ;;  %v1050_v46 = vadd.f32 %v1049_v47, %v7251_v32 }
 0x36b   :  { %v1119_v45 = vpop.f32.mrf.mxu0  ;;  %v1190_v44 = vpop.f32.mrf.mxu1 }
 0x36c   :  { %v1194_v3 = vadd.f32 %v1119_v45, %v979_v2  ;;  %v1208_v45 = vadd.f32 %v7249_v31, %v1190_v44 }
 0x36d   :  { %v4972_v42 = vpop.f32.mrf.mxu1  ;;  %v1121_v40 = vpop.f32.mrf.mxu0 }
 0x36e   :  { %v4285_v41 = vmul.f32 -1.442695, %v1194_v3  ;;  %v1201_v38 = vadd.f32 %v1121_v40, %v981_v39 }
 0x370   :  { %5713 = vpow2.f32 %v4285_v41  ;;  %v4286_v37 = vmul.f32 -1.442695, %v1201_v38 }
 0x372   :  { %5715 = vpow2.f32 %v4286_v37 }
 0x37d   :  { %v5714_v5 = vpop.eup %5713 }
 0x37e   :  { %v1198_v36 = vadd.f32 1.0, %v5714_v5 }
 0x37f   :  { %v5716_v4 = vpop.eup %5715 }
 0x380   :  { %5717 = vrcp.f32 %v1198_v36  ;;  %v1205_v35 = vadd.f32 1.0, %v5716_v4  ;;  %v1368_v36 = vrot.slane %v4287_v1, 2 }
 0x382   :  { %5719 = vrcp.f32 %v1205_v35 }
 0x38d   :  { %v5718_v42 = vpop.eup %5717  ;;  %v1285_v2 = vpop.f32.mrf.mxu0 }
 0x38e   :  { %v1356_v3 = vpop.f32.mrf.mxu1  ;;  %v1209_v41 = vmul.f32 %v5718_v42, %v1208_v45  ;;  %v1360_v38 = vadd.f32 %v4287_v1, %v1285_v2 }
 0x38f   :  { %v1287_v5 = vpop.f32.mrf.mxu0  ;;  %v5720_v13 = vpop.eup %5719 }
 0x390   :  { %v5007_v37 = vpop.f32.mrf.mxu1  ;;  %v1210_v39 = vadd.f32 %v1209_v41, %v1050_v46  ;;  %v4288_v40 = vmul.f32 -1.442695, %v1360_v38  ;;  %v1370_v4 = vadd.f32 %v1368_v36, %v1287_v5  ;;  %v1212_v31 = vsub.f32 1.0, %v5720_v13  ;;  %v7824_v41 = vld [vmem:[%s10007_s2] ss:$0 sm:$0xff]  ;;  %v7838_v5 = vld [vmem:[#allocation5 + $0x158] sm:$0xff] }
 0x391   :  { %v1214_v47 = vmul.f32 %v5720_v13, %v7258_v10  ;;  %v1379_v46 = vrot.slane %v4287_v1, 4  ;;  %v7832_v1 = vld [vmem:[#allocation5 + $0x168] sm:$0xff] }
 0x392   :  { %5721 = vtanh.f32 %v1210_v39  ;;  %v4289_v18 = vmul.f32 -1.442695, %v1370_v4  ;;  %v7845_v4 = vld [vmem:[#allocation5 + $0x160] sm:$0xff] }
 0x393   :  { %5723 = vpow2.f32 %v4288_v40 }
 0x394   :  { %5725 = vpow2.f32 %v4289_v18  ;;  %v1377_v18 = vadd.f32 %v7824_v41, %v1356_v3  ;;  %v7835_v3 = vld [vmem:[#allocation5 + $0x178] sm:$0xff] }
 0x39f   :  { %v5722_v44 = vpop.eup %5721 }
 0x3a0   :  { %v5724_v34 = vpop.eup %5723  ;;  %v1213_v33 = vmul.f32 %v5722_v44, %v1212_v31  ;;  %v7848_v31 = vld [vmem:[#allocation5 + $0x140] sm:$0xff]  ;;  %v7852_v44 = vld [vmem:[#allocation5 + $0x138] sm:$0xff] }
 0x3a1   :  { %v1364_v45 = vadd.f32 1.0, %v5724_v34  ;;  %v5726_v42 = vpop.eup %5725 }
 0x3a2   :  { %v7818_v35 = vadd.f32 %v1214_v47, %v1213_v33  ;;  %v1374_v2 = vadd.f32 1.0, %v5726_v42  ;;  %v7855_v47 = vld [vmem:[#allocation5 + $0x148] sm:$0xff]  ;;  %v7862_v42 = vld [vmem:[#allocation5 + $0x120] sm:$0xff] }
 0x3a3   :  { %5727 = vrcp.f32 %v1364_v45  ;;  %v7858_v45 = vld [vmem:[#allocation5 + $0x128] sm:$0xff] }
 0x3a4   :  { %1216 = vst [vmem:[#allocation2 + $0x2] sm:$0x3] %v7818_v35  ;;  %5729 = vrcp.f32 %v1374_v2  ;;  %v7865_v2 = vld [vmem:[#allocation5 + $0x130] sm:$0xff] }
 0x3b0   :  { %v5728_v38 = vpop.eup %5727 }
 0x3b1   :  { %v1378_v37 = vmul.f32 %v5728_v38, %v1377_v18  ;;  %v5730_v10 = vpop.eup %5729  ;;  %v7872_v18 = vld [vmem:[#allocation5 + $0x108] sm:$0xff]  ;;  %v7875_v38 = vld [vmem:[#allocation5 + $0x118] sm:$0xff] }
 0x3b2   :  { %v1383_v33 = vsub.f32 1.0, %v5730_v10  ;;  %v1385_v40 = vmul.f32 %v5730_v10, %v7263_v25  ;;  %v7842_v25 = vld [vmem:[#allocation5 + $0x150] sm:$0xff]  ;;  %v7885_v10 = vld [vmem:[#allocation5 + $0x100] sm:$0xff] }
 0x3b3   :  { %v1381_v13 = vadd.f32 %v1379_v46, %v1378_v37  ;;  %v7868_v46 = vld [vmem:[#allocation5 + $0x110] sm:$0xff]  ;;  %v7878_v37 = vld [vmem:[#allocation5 + $0xf8] sm:$0xff]  ;;  %10594 = vst [vmem:[#allocation75_spill] sm:$0xff] %v7885_v10 }
 0x3b5   :  { %5731 = vtanh.f32 %v1381_v13  ;;  %v7882_v13 = vld [vmem:[#allocation5 + $0xf0] sm:$0xff] }
 0x3b6   :  { %10593 = vst [vmem:[#allocation74_spill] sm:$0xff] %v7882_v13 }
 0x3c2   :  { %v5732_v34 = vpop.eup %5731 }
 0x3c3   :  { %v1384_v39 = vmul.f32 %v5732_v34, %v1383_v33  ;;  %v7888_v33 = vld [vmem:[#allocation5 + $0xe0] sm:$0xff]  ;;  %v7892_v34 = vld [vmem:[#allocation5 + $0xd8] sm:$0xff] }
 0x3c4   :  { %10595 = vst [vmem:[#allocation76_spill] sm:$0xff] %v7888_v33  ;;  %10596 = vst [vmem:[#allocation77_spill] sm:$0xff] %v7892_v34 }
 0x3c5   :  { %v7828_v36 = vadd.f32 %v1385_v40, %v1384_v39  ;;  %v7895_v39 = vld [vmem:[#allocation5 + $0xe8] sm:$0xff] }
 0x3c6   :  { %10597 = vst [vmem:[#allocation78_spill] sm:$0xff] %v7895_v39  ;;  %v7898_v40 = vld [vmem:[#allocation5 + $0xc8] sm:$0xff] }
 0x3c7   :  { %1452 = vmatmul.mubr.f32.vlgmr.msra.gmra.mxu0 %v7828_v36  ;;  %5041 = vmatmul.mubr.f32.vlgmr.msra.gmra.mxu1 %v7828_v36  ;;  %10598 = vst [vmem:[#allocation79_spill] sm:$0xff] %v7898_v40 }
 0x3c8   :  { %1529 = vmatpush1.msra.mxu0 %v7832_v1  ;;  %5044 = vmatpush3.msra.mxu1 %v7835_v3 }
 0x3c9   :  { %1530 = vmatprep.subr.mxu0 %v7838_v5  ;;  %5045 = vmatprep.subr.mxu1 %v10416_v56 }
 0x3ca   :  { %1531 = vmatpush1.msra.mxu0 %v7842_v25  ;;  %5046 = vmatpush3.msra.mxu1 %v7845_v4 }
 0x3cb   :  { %1532 = vmatprep.subr.mxu0 %v7848_v31  ;;  %5047 = vmatprep.subr.mxu1 %v10416_v56 }
 0x3cc   :  { %1533 = vmatpush1.msra.mxu0 %v7852_v44  ;;  %5048 = vmatpush3.msra.mxu1 %v7855_v47 }
 0x3cd   :  { %1534 = vmatprep.subr.mxu0 %v7858_v45  ;;  %5049 = vmatprep.subr.mxu1 %v10416_v56 }
 0x3ce   :  { %1535 = vmatpush1.msra.mxu0 %v7862_v42  ;;  %5050 = vmatpush3.msra.mxu1 %v7865_v2 }
 0x3cf   :  { %1536 = vmatprep.subr.mxu0 %v7868_v46  ;;  %5051 = vmatprep.subr.mxu1 %v10416_v56 }
 0x3d0   :  { %1537 = vmatpush1.msra.mxu0 %v7872_v18  ;;  %5052 = vmatpush3.msra.mxu1 %v7875_v38 }
 0x3d1   :  { %1538 = vmatprep.subr.mxu0 %v7878_v37  ;;  %5053 = vmatprep.subr.mxu1 %v10416_v56 }
 0x3d2   :  { %1539 = vmatpush1.msra.mxu0 %v7882_v13  ;;  %5054 = vmatpush3.msra.mxu1 %v7885_v10  ;;  %v7902_v10 = vld [vmem:[#allocation5 + $0xc0] sm:$0xff]  ;;  %v7908_v13 = vld [vmem:[#allocation5 + $0xb0] sm:$0xff] }
 0x3d3   :  { %1540 = vmatprep.subr.mxu0 %v7888_v33  ;;  %5055 = vmatprep.subr.mxu1 %v10416_v56  ;;  %10599 = vst [vmem:[#allocation80_spill] sm:$0xff] %v7902_v10  ;;  %v7905_v33 = vld [vmem:[#allocation5 + $0xd0] sm:$0xff]  ;;  %10601 = vst [vmem:[#allocation82_spill] sm:$0xff] %v7908_v13 }
 0x3d4   :  { %1541 = vmatpush1.msra.mxu0 %v7892_v34  ;;  %5056 = vmatpush3.msra.mxu1 %v7895_v39  ;;  %10600 = vst [vmem:[#allocation81_spill] sm:$0xff] %v7905_v33  ;;  %v7912_v39 = vld [vmem:[#allocation5 + $0xa8] sm:$0xff]  ;;  %v7918_v34 = vld [vmem:[#allocation5 + $0x98] sm:$0xff] }
 0x3d5   :  { %1542 = vmatprep.subr.mxu0 %v7898_v40  ;;  %5057 = vmatprep.subr.mxu1 %v10416_v56  ;;  %10602 = vst [vmem:[#allocation83_spill] sm:$0xff] %v7912_v39  ;;  %v7915_v40 = vld [vmem:[#allocation5 + $0xb8] sm:$0xff]  ;;  %10604 = vst [vmem:[#allocation85_spill] sm:$0xff] %v7918_v34 }
 0x3d6   :  { %1543 = vmatpush1.msra.mxu0 %v7902_v10  ;;  %5058 = vmatpush3.msra.mxu1 %v7905_v33  ;;  %10603 = vst [vmem:[#allocation84_spill] sm:$0xff] %v7915_v40  ;;  %v7922_v33 = vld [vmem:[#allocation5 + $0x90] sm:$0xff]  ;;  %v7928_v10 = vld [vmem:[#allocation5 + $0x80] sm:$0xff] }
 0x3d7   :  { %1544 = vmatprep.subr.mxu0 %v7908_v13  ;;  %5059 = vmatprep.subr.mxu1 %v10416_v56  ;;  %10605 = vst [vmem:[#allocation86_spill] sm:$0xff] %v7922_v33  ;;  %v7925_v13 = vld [vmem:[#allocation5 + $0xa0] sm:$0xff]  ;;  %10607 = vst [vmem:[#allocation88_spill] sm:$0xff] %v7928_v10 }
 0x3d8   :  { %1545 = vmatpush1.msra.mxu0 %v7912_v39  ;;  %5060 = vmatpush3.msra.mxu1 %v7915_v40  ;;  %10606 = vst [vmem:[#allocation87_spill] sm:$0xff] %v7925_v13  ;;  %v7932_v40 = vld [vmem:[#allocation5 + $0x78] sm:$0xff]  ;;  %v7938_v39 = vld [vmem:[#allocation5 + $0x68] sm:$0xff] }
 0x3d9   :  { %1546 = vmatprep.subr.mxu0 %v7918_v34  ;;  %5061 = vmatprep.subr.mxu1 %v10416_v56  ;;  %10608 = vst [vmem:[#allocation89_spill] sm:$0xff] %v7932_v40  ;;  %v7935_v34 = vld [vmem:[#allocation5 + $0x88] sm:$0xff]  ;;  %10610 = vst [vmem:[#allocation91_spill] sm:$0xff] %v7938_v39 }
 0x3da   :  { %1547 = vmatpush1.msra.mxu0 %v7922_v33  ;;  %5062 = vmatpush3.msra.mxu1 %v7925_v13  ;;  %10609 = vst [vmem:[#allocation90_spill] sm:$0xff] %v7935_v34  ;;  %v7942_v13 = vld [vmem:[#allocation5 + $0x60] sm:$0xff]  ;;  %v7948_v33 = vld [vmem:[#allocation5 + $0x50] sm:$0xff] }
 0x3db   :  { %1548 = vmatprep.subr.mxu0 %v7928_v10  ;;  %5063 = vmatprep.subr.mxu1 %v10416_v56  ;;  %10611 = vst [vmem:[#allocation92_spill] sm:$0xff] %v7942_v13  ;;  %v7945_v10 = vld [vmem:[#allocation5 + $0x70] sm:$0xff]  ;;  %10613 = vst [vmem:[#allocation94_spill] sm:$0xff] %v7948_v33 }
 0x3dc   :  { %1549 = vmatpush1.msra.mxu0 %v7932_v40  ;;  %5064 = vmatpush3.msra.mxu1 %v7935_v34  ;;  %10612 = vst [vmem:[#allocation93_spill] sm:$0xff] %v7945_v10  ;;  %v7952_v34 = vld [vmem:[#allocation5 + $0x48] sm:$0xff]  ;;  %v7958_v40 = vld [vmem:[#allocation5 + $0x38] sm:$0xff] }
 0x3dd   :  { %1550 = vmatprep.subr.mxu0 %v7938_v39  ;;  %5065 = vmatprep.subr.mxu1 %v10416_v56  ;;  %10614 = vst [vmem:[#allocation95_spill] sm:$0xff] %v7952_v34  ;;  %v7955_v39 = vld [vmem:[#allocation5 + $0x58] sm:$0xff]  ;;  %10616 = vst [vmem:[#allocation97_spill] sm:$0xff] %v7958_v40 }
 0x3de   :  { %1551 = vmatpush1.msra.mxu0 %v7942_v13  ;;  %5066 = vmatpush3.msra.mxu1 %v7945_v10  ;;  %10615 = vst [vmem:[#allocation96_spill] sm:$0xff] %v7955_v39  ;;  %v7962_v10 = vld [vmem:[#allocation5 + $0x30] sm:$0xff]  ;;  %v7968_v13 = vld [vmem:[#allocation5 + $0x20] sm:$0xff] }
 0x3df   :  { %1552 = vmatprep.subr.mxu0 %v7948_v33  ;;  %5067 = vmatprep.subr.mxu1 %v10416_v56  ;;  %v7965_v33 = vld [vmem:[#allocation5 + $0x40] sm:$0xff]  ;;  %10618 = vst [vmem:[#allocation99_spill] sm:$0xff] %v7968_v13 }
 0x3e0   :  { %1553 = vmatpush1.msra.mxu0 %v7952_v34  ;;  %5068 = vmatpush3.msra.mxu1 %v7955_v39  ;;  %10617 = vst [vmem:[#allocation98_spill] sm:$0xff] %v7965_v33  ;;  %v7972_v39 = vld [vmem:[#allocation5 + $0x18] sm:$0xff]  ;;  %v7978_v34 = vld [vmem:[#allocation5 + $0x8] sm:$0xff] }
 0x3e1   :  { %1554 = vmatprep.subr.mxu0 %v7958_v40  ;;  %5069 = vmatprep.subr.mxu1 %v10416_v56  ;;  %v7975_v40 = vld [vmem:[#allocation5 + $0x28] sm:$0xff] }
 0x3e2   :  { %1555 = vmatpush1.msra.mxu0 %v7962_v10  ;;  %5070 = vmatpush3.msra.mxu1 %v7965_v33  ;;  %v7982_v33 = vld [vmem:[#allocation5] sm:$0xff] }
 0x3e3   :  { %1556 = vmatprep.subr.mxu0 %v7968_v13  ;;  %5071 = vmatprep.subr.mxu1 %v10416_v56  ;;  %v7986_v13 = vld [vmem:[#allocation5 + $0x10] sm:$0xff] }
 0x3e4   :  { %1557 = vmatpush1.msra.mxu0 %v7972_v39  ;;  %5072 = vmatpush3.msra.mxu1 %v7975_v40 }
 0x3e5   :  { %1558 = vmatprep.subr.mxu0 %v7978_v34  ;;  %5073 = vmatprep.subr.mxu1 %v10416_v56 }
 0x3e6   :  { %1559 = vmatpush1.msra.mxu0 %v7982_v33  ;;  %1592 = vmatprep.mubr.f32.mxu0 %v10416_v56 }
 0x3e7   :  { %5074 = vmatpush3.msra.mxu1 %v7986_v13  ;;  %5075 = vmatprep.mubr.msk.f32.mxu1 %vm6376_vm0, %v10416_v56 }
 0x3e8   :  { %1593 = vmatmul.mubr.f32.vlgmr.msra.gmra.mxu0 %v7818_v35  ;;  %5076 = vmatmul.mubr.f32.vlgmr.msra.gmra.mxu1 %v7818_v35 }
 0x3e9   :  { %1694 = vmatprep.subr.mxu0 %v7337_v55  ;;  %5078 = vmatprep.subr.mxu1 %v10416_v56  ;;  %v10619_v55 = vld [vmem:[#allocation15_spill] sm:$0xff] }
 0x3ea   :  { %1695 = vmatpush1.msra.mxu0 %v7344_v63  ;;  %5079 = vmatpush3.msra.mxu1 %v7350_v54  ;;  %v10620_v63 = vld [vmem:[#allocation16_spill] sm:$0xff]  ;;  %v10621_v54 = vld [vmem:[#allocation17_spill] sm:$0xff] }
 0x3eb   :  { %1696 = vmatprep.subr.mxu0 %v7356_v59  ;;  %5080 = vmatprep.subr.mxu1 %v10416_v56  ;;  %v10622_v59 = vld [vmem:[#allocation18_spill] sm:$0xff] }
 0x3ec   :  { %1697 = vmatpush1.msra.mxu0 %v7363_v58  ;;  %5081 = vmatpush3.msra.mxu1 %v7369_v52  ;;  %v10623_v58 = vld [vmem:[#allocation19_spill] sm:$0xff]  ;;  %v10624_v52 = vld [vmem:[#allocation20_spill] sm:$0xff] }
 0x3ed   :  { %1698 = vmatprep.subr.mxu0 %v7375_v61  ;;  %5082 = vmatprep.subr.mxu1 %v10416_v56  ;;  %v10625_v61 = vld [vmem:[#allocation21_spill] sm:$0xff] }
 0x3ee   :  { %1699 = vmatpush1.msra.mxu0 %v7382_v57  ;;  %5083 = vmatpush3.msra.mxu1 %v7388_v51  ;;  %v10626_v57 = vld [vmem:[#allocation23_spill] sm:$0xff]  ;;  %v10627_v51 = vld [vmem:[#allocation22_spill] sm:$0xff] }
 0x3ef   :  { %1700 = vmatprep.subr.mxu0 %v7394_v7  ;;  %5084 = vmatprep.subr.mxu1 %v10416_v56  ;;  %v10628_v7 = vld [vmem:[#allocation24_spill] sm:$0xff] }
 0x3f0   :  { %1701 = vmatpush1.msra.mxu0 %v7401_v6  ;;  %5085 = vmatpush3.msra.mxu1 %v7407_v8  ;;  %v10629_v6 = vld [vmem:[#allocation25_spill] sm:$0xff]  ;;  %v10630_v8 = vld [vmem:[#allocation26_spill] sm:$0xff] }
 0x3f1   :  { %1702 = vmatprep.subr.mxu0 %v7413_v9  ;;  %5086 = vmatprep.subr.mxu1 %v10416_v56  ;;  %v10631_v9 = vld [vmem:[#allocation27_spill] sm:$0xff] }
 0x3f2   :  { %1703 = vmatpush1.msra.mxu0 %v7420_v11  ;;  %5087 = vmatpush3.msra.mxu1 %v7426_v12  ;;  %v10632_v11 = vld [vmem:[#allocation28_spill] sm:$0xff]  ;;  %v10633_v12 = vld [vmem:[#allocation29_spill] sm:$0xff] }
 0x3f3   :  { %1704 = vmatprep.subr.mxu0 %v7432_v14  ;;  %5088 = vmatprep.subr.mxu1 %v10416_v56  ;;  %v10634_v14 = vld [vmem:[#allocation30_spill] sm:$0xff] }
 0x3f4   :  { %1705 = vmatpush1.msra.mxu0 %v7439_v15  ;;  %5089 = vmatpush3.msra.mxu1 %v7445_v16  ;;  %v10635_v15 = vld [vmem:[#allocation31_spill] sm:$0xff]  ;;  %v10636_v16 = vld [vmem:[#allocation32_spill] sm:$0xff] }
 0x3f5   :  { %1706 = vmatprep.subr.mxu0 %v7451_v17  ;;  %5090 = vmatprep.subr.mxu1 %v10416_v56  ;;  %v10637_v17 = vld [vmem:[#allocation33_spill] sm:$0xff] }
 0x3f6   :  { %1707 = vmatpush1.msra.mxu0 %v7458_v19  ;;  %5091 = vmatpush3.msra.mxu1 %v7464_v20  ;;  %v10638_v19 = vld [vmem:[#allocation34_spill] sm:$0xff]  ;;  %v10639_v20 = vld [vmem:[#allocation35_spill] sm:$0xff] }
 0x3f7   :  { %1708 = vmatprep.subr.mxu0 %v7470_v21  ;;  %5092 = vmatprep.subr.mxu1 %v10416_v56  ;;  %v10640_v21 = vld [vmem:[#allocation36_spill] sm:$0xff] }
 0x3f8   :  { %1709 = vmatpush1.msra.mxu0 %v7477_v22  ;;  %5093 = vmatpush3.msra.mxu1 %v7483_v23  ;;  %v10641_v22 = vld [vmem:[#allocation37_spill] sm:$0xff]  ;;  %v10642_v23 = vld [vmem:[#allocation38_spill] sm:$0xff] }
 0x3f9   :  { %1710 = vmatprep.subr.mxu0 %v7489_v24  ;;  %5094 = vmatprep.subr.mxu1 %v10416_v56  ;;  %v10643_v24 = vld [vmem:[#allocation39_spill] sm:$0xff] }
 0x3fa   :  { %1711 = vmatpush1.msra.mxu0 %v7496_v0  ;;  %5095 = vmatpush3.msra.mxu1 %v7502_v62  ;;  %v10644_v0 = vld [vmem:[#allocation40_spill] sm:$0xff]  ;;  %v10645_v62 = vld [vmem:[#allocation41_spill] sm:$0xff] }
 0x3fb   :  { %1712 = vmatprep.subr.mxu0 %v7508_v26  ;;  %5096 = vmatprep.subr.mxu1 %v10416_v56  ;;  %v10646_v26 = vld [vmem:[#allocation42_spill] sm:$0xff] }
 0x3fc   :  { %1713 = vmatpush1.msra.mxu0 %v7515_v43  ;;  %5097 = vmatpush3.msra.mxu1 %v7521_v48  ;;  %v10647_v43 = vld [vmem:[#allocation43_spill] sm:$0xff]  ;;  %v10648_v48 = vld [vmem:[#allocation44_spill] sm:$0xff] }
 0x3fd   :  { %1714 = vmatprep.subr.mxu0 %v7527_v60  ;;  %5098 = vmatprep.subr.mxu1 %v10416_v56  ;;  %v10649_v60 = vld [vmem:[#allocation45_spill] sm:$0xff] }
 0x3fe   :  { %1715 = vmatpush1.msra.mxu0 %v7534_v49  ;;  %5099 = vmatpush3.msra.mxu1 %v7540_v50  ;;  %v10650_v49 = vld [vmem:[#allocation46_spill] sm:$0xff]  ;;  %v10651_v50 = vld [vmem:[#allocation47_spill] sm:$0xff] }
 0x3ff   :  { %1716 = vmatprep.subr.mxu0 %v7546_v53  ;;  %5100 = vmatprep.subr.mxu1 %v10416_v56  ;;  %v10652_v53 = vld [vmem:[#allocation48_spill] sm:$0xff] }
 0x400   :  { %1717 = vmatpush1.msra.mxu0 %v7553_v27  ;;  %5101 = vmatpush3.msra.mxu1 %v7559_v28  ;;  %v10653_v27 = vld [vmem:[#allocation49_spill] sm:$0xff]  ;;  %v10654_v28 = vld [vmem:[#allocation50_spill] sm:$0xff] }
 0x401   :  { %1718 = vmatprep.subr.mxu0 %v7565_v29  ;;  %5102 = vmatprep.subr.mxu1 %v10416_v56  ;;  %v10655_v29 = vld [vmem:[#allocation51_spill] sm:$0xff] }
 0x402   :  { %1719 = vmatpush1.msra.mxu0 %v7572_v30  ;;  %5103 = vmatpush3.msra.mxu1 %v10619_v55  ;;  %v10656_v30 = vld [vmem:[#allocation52_spill] sm:$0xff]  ;;  %v10657_v55 = vld [vmem:[#allocation53_spill] sm:$0xff] }
 0x403   :  { %1720 = vmatprep.subr.mxu0 %v10620_v63  ;;  %5104 = vmatprep.subr.mxu1 %v10416_v56  ;;  %v10658_v63 = vld [vmem:[#allocation54_spill] sm:$0xff] }
 0x404   :  { %1721 = vmatpush1.msra.mxu0 %v10621_v54  ;;  %5105 = vmatpush3.msra.mxu1 %v10622_v59  ;;  %v10659_v54 = vld [vmem:[#allocation55_spill] sm:$0xff]  ;;  %v10660_v59 = vld [vmem:[#allocation56_spill] sm:$0xff] }
 0x405   :  { %1722 = vmatprep.subr.mxu0 %v10623_v58  ;;  %5106 = vmatprep.subr.mxu1 %v10416_v56  ;;  %v10661_v58 = vld [vmem:[#allocation57_spill] sm:$0xff] }
 0x406   :  { %1723 = vmatpush1.msra.mxu0 %v10624_v52  ;;  %5107 = vmatpush3.msra.mxu1 %v10625_v61  ;;  %v10662_v52 = vld [vmem:[#allocation58_spill] sm:$0xff]  ;;  %v10663_v61 = vld [vmem:[#allocation59_spill] sm:$0xff] }
 0x407   :  { %1724 = vmatprep.subr.mxu0 %v10626_v57  ;;  %5108 = vmatprep.subr.mxu1 %v10416_v56  ;;  %v10664_v57 = vld [vmem:[#allocation60_spill] sm:$0xff] }
 0x408   :  { %1725 = vmatpush1.msra.mxu0 %v10627_v51  ;;  %1758 = vmatprep.mubr.f32.mxu0 %v10416_v56  ;;  %v10665_v51 = vld [vmem:[#allocation61_spill] sm:$0xff] }
 0x409   :  { %5109 = vmatpush3.msra.mxu1 %v10628_v7  ;;  %5110 = vmatprep.mubr.msk.f32.mxu1 %vm6376_vm0, %v10416_v56  ;;  %v10666_v7 = vld [vmem:[#allocation62_spill] sm:$0xff] }
 0x40a   :  { %1759 = vmatmul.mubr.f32.vlgmr.msra.gmra.mxu0 %v7828_v36  ;;  %5111 = vmatmul.mubr.f32.vlgmr.msra.gmra.mxu1 %v7828_v36 }
 0x40b   :  { %1862 = vmatprep.subr.mxu0 %v10629_v6  ;;  %5113 = vmatprep.subr.mxu1 %v10416_v56  ;;  %v10667_v6 = vld [vmem:[#allocation63_spill] sm:$0xff] }
 0x40c   :  { %1863 = vmatpush1.msra.mxu0 %v10630_v8  ;;  %5114 = vmatpush3.msra.mxu1 %v10631_v9  ;;  %v10668_v8 = vld [vmem:[#allocation64_spill] sm:$0xff]  ;;  %v10669_v9 = vld [vmem:[#allocation65_spill] sm:$0xff] }
 0x40d   :  { %1864 = vmatprep.subr.mxu0 %v10632_v11  ;;  %5115 = vmatprep.subr.mxu1 %v10416_v56  ;;  %v10670_v11 = vld [vmem:[#allocation66_spill] sm:$0xff] }
 0x40e   :  { %1865 = vmatpush1.msra.mxu0 %v10633_v12  ;;  %5116 = vmatpush3.msra.mxu1 %v10634_v14  ;;  %v10671_v12 = vld [vmem:[#allocation67_spill] sm:$0xff]  ;;  %v10672_v14 = vld [vmem:[#allocation68_spill] sm:$0xff] }
 0x40f   :  { %1866 = vmatprep.subr.mxu0 %v10635_v15  ;;  %5117 = vmatprep.subr.mxu1 %v10416_v56  ;;  %v10673_v15 = vld [vmem:[#allocation69_spill] sm:$0xff] }
 0x410   :  { %1867 = vmatpush1.msra.mxu0 %v10636_v16  ;;  %5118 = vmatpush3.msra.mxu1 %v10637_v17  ;;  %v10674_v16 = vld [vmem:[#allocation70_spill] sm:$0xff]  ;;  %v10675_v17 = vld [vmem:[#allocation71_spill] sm:$0xff] }
 0x411   :  { %1868 = vmatprep.subr.mxu0 %v10638_v19  ;;  %5119 = vmatprep.subr.mxu1 %v10416_v56  ;;  %v10676_v19 = vld [vmem:[#allocation72_spill] sm:$0xff] }
 0x412   :  { %1869 = vmatpush1.msra.mxu0 %v10639_v20  ;;  %5120 = vmatpush3.msra.mxu1 %v10640_v21  ;;  %v10677_v20 = vld [vmem:[#allocation73_spill] sm:$0xff] }
 0x413   :  { %1870 = vmatprep.subr.mxu0 %v10641_v22  ;;  %5121 = vmatprep.subr.mxu1 %v10416_v56 }
 0x414   :  { %1871 = vmatpush1.msra.mxu0 %v10642_v23  ;;  %5122 = vmatpush3.msra.mxu1 %v10643_v24 }
 0x415   :  { %1872 = vmatprep.subr.mxu0 %v10644_v0  ;;  %5123 = vmatprep.subr.mxu1 %v10416_v56  ;;  %v10678_v0 = vld [vmem:[#allocation13_spill] sm:$0xff] }
 0x416   :  { %1873 = vmatpush1.msra.mxu0 %v10645_v62  ;;  %5124 = vmatpush3.msra.mxu1 %v10646_v26 }
 0x417   :  { %1874 = vmatprep.subr.mxu0 %v10647_v43  ;;  %5125 = vmatprep.subr.mxu1 %v10416_v56 }
 0x418   :  { %1875 = vmatpush1.msra.mxu0 %v10648_v48  ;;  %5126 = vmatpush3.msra.mxu1 %v10649_v60 }
 0x419   :  { %1876 = vmatprep.subr.mxu0 %v10650_v49  ;;  %5127 = vmatprep.subr.mxu1 %v10416_v56 }
 0x41a   :  { %1877 = vmatpush1.msra.mxu0 %v10651_v50  ;;  %5128 = vmatpush3.msra.mxu1 %v10652_v53  ;;  %v10679_v53 = vld [vmem:[#allocation14_spill] sm:$0xff] }
 0x41b   :  { %1878 = vmatprep.subr.mxu0 %v10653_v27  ;;  %5129 = vmatprep.subr.mxu1 %v10416_v56 }
 0x41c   :  { %1879 = vmatpush1.msra.mxu0 %v10654_v28  ;;  %5130 = vmatpush3.msra.mxu1 %v10655_v29 }
 0x41d   :  { %1880 = vmatprep.subr.mxu0 %v10656_v30  ;;  %5131 = vmatprep.subr.mxu1 %v10416_v56 }
 0x41e   :  { %1881 = vmatpush1.msra.mxu0 %v10657_v55  ;;  %5132 = vmatpush3.msra.mxu1 %v10658_v63 }
 0x41f   :  { %1882 = vmatprep.subr.mxu0 %v10659_v54  ;;  %5133 = vmatprep.subr.mxu1 %v10416_v56 }
 0x420   :  { %1883 = vmatpush1.msra.mxu0 %v10660_v59  ;;  %5134 = vmatpush3.msra.mxu1 %v10661_v58  ;;  %v4292_v59 = vld [vmem:[%s10005_s0 + $0x12] sm:$0x3f]  ;;  %v8139_v58 = vld [vmem:[%s10011_s6] ss:$0 sm:$0xff] }
 0x421   :  { %1884 = vmatprep.subr.mxu0 %v10662_v52  ;;  %5135 = vmatprep.subr.mxu1 %v10416_v56 }
 0x422   :  { %1885 = vmatpush1.msra.mxu0 %v10663_v61  ;;  %5136 = vmatpush3.msra.mxu1 %v10664_v57 }
 0x423   :  { %1886 = vmatprep.subr.mxu0 %v10665_v51  ;;  %5137 = vmatprep.subr.mxu1 %v10416_v56 }
 0x424   :  { %1887 = vmatpush1.msra.mxu0 %v10666_v7  ;;  %5138 = vmatpush3.msra.mxu1 %v10667_v6 }
 0x425   :  { %1888 = vmatprep.subr.mxu0 %v10668_v8  ;;  %5139 = vmatprep.subr.mxu1 %v10416_v56 }
 0x426   :  { %1889 = vmatpush1.msra.mxu0 %v10669_v9  ;;  %5140 = vmatpush3.msra.mxu1 %v10670_v11 }
 0x427   :  { %1890 = vmatprep.subr.mxu0 %v10671_v12  ;;  %5141 = vmatprep.subr.mxu1 %v10416_v56 }
 0x428   :  { %1891 = vmatpush1.msra.mxu0 %v10672_v14  ;;  %5142 = vmatpush3.msra.mxu1 %v10673_v15  ;;  %v1843_v14 = vrot.slane %v4292_v59, 2 }
 0x429   :  { %1892 = vmatprep.subr.mxu0 %v10674_v16  ;;  %5143 = vmatprep.subr.mxu1 %v10416_v56 }
 0x42a   :  { %1893 = vmatpush1.msra.mxu0 %v10675_v17  ;;  %5144 = vmatpush3.msra.mxu1 %v10676_v19 }
 0x42b   :  { %1926 = vmatprep.mubr.f32.mxu0 %v10416_v56  ;;  %5145 = vmatprep.mubr.msk.f32.mxu1 %vm6376_vm0, %v10416_v56 }
 0x42c   :  { %2003 = vmatprep.subr.mxu0 %v10677_v20  ;;  %5148 = vmatprep.subr.mxu1 %v10416_v56 }
 0x487   :  { %v1524_v21 = vpop.f32.mrf.mxu1  ;;  %v1453_v23 = vpop.f32.mrf.mxu0 }
 0x488   :  { %v1454_v62 = vadd.f32 %v1453_v23, %v10678_v0  ;;  %v1525_v7 = vadd.f32 %v1524_v21, %v7251_v32 }
 0x489   :  { %v5042_v22 = vpop.f32.mrf.mxu1  ;;  %v1455_v24 = vpop.f32.mrf.mxu0 }
 0x48a   :  { %v1456_v27 = vadd.f32 %v1455_v24, %v10679_v53 }
 0x4a8   :  { %v1594_v26 = vpop.f32.mrf.mxu0  ;;  %v1665_v43 = vpop.f32.mrf.mxu1 }
 0x4a9   :  { %v1669_v48 = vadd.f32 %v1594_v26, %v1454_v62  ;;  %v1683_v52 = vadd.f32 %v8139_v58, %v1665_v43 }
 0x4aa   :  { %v5077_v60 = vpop.f32.mrf.mxu1  ;;  %v1596_v50 = vpop.f32.mrf.mxu0 }
 0x4ab   :  { %v4290_v49 = vmul.f32 -1.442695, %v1669_v48  ;;  %v1676_v28 = vadd.f32 %v1596_v50, %v1456_v27  ;;  %v1854_v60 = vrot.slane %v4292_v59, 4 }
 0x4ad   :  { %5733 = vpow2.f32 %v4290_v49  ;;  %v4291_v29 = vmul.f32 -1.442695, %v1676_v28 }
 0x4af   :  { %5735 = vpow2.f32 %v4291_v29 }
 0x4ba   :  { %v5734_v30 = vpop.eup %5733 }
 0x4bb   :  { %v1673_v55 = vadd.f32 1.0, %v5734_v30 }
 0x4bc   :  { %v5736_v63 = vpop.eup %5735 }
 0x4bd   :  { %5737 = vrcp.f32 %v1673_v55  ;;  %v1680_v54 = vadd.f32 1.0, %v5736_v63 }
 0x4bf   :  { %5739 = vrcp.f32 %v1680_v54 }
 0x4ca   :  { %v5738_v61 = vpop.eup %5737  ;;  %v1760_v57 = vpop.f32.mrf.mxu0 }
 0x4cb   :  { %v1831_v51 = vpop.f32.mrf.mxu1  ;;  %v1684_v6 = vmul.f32 %v5738_v61, %v1683_v52  ;;  %v1835_v8 = vadd.f32 %v4292_v59, %v1760_v57  ;;  %v10697_v59 = vld [vmem:[#allocation91_spill] sm:$0xff]  ;;  %v10698_v52 = vld [vmem:[#allocation92_spill] sm:$0xff]  ;;  %v10699_v61 = vld [vmem:[#allocation93_spill] sm:$0xff] }
 0x4cc   :  { %v1762_v15 = vpop.f32.mrf.mxu0  ;;  %v5740_v19 = vpop.eup %5739  ;;  %v1852_v49 = vadd.f32 %v7824_v41, %v1831_v51  ;;  %v10680_v41 = vld [vmem:[#allocation74_spill] sm:$0xff]  ;;  %v10701_v51 = vld [vmem:[#allocation95_spill] sm:$0xff] }
 0x4cd   :  { %v5112_v9 = vpop.f32.mrf.mxu1  ;;  %v1685_v11 = vadd.f32 %v1684_v6, %v1525_v7  ;;  %v4293_v12 = vmul.f32 -1.442695, %v1835_v8  ;;  %v1845_v16 = vadd.f32 %v1843_v14, %v1762_v15  ;;  %v1687_v20 = vsub.f32 1.0, %v5740_v19  ;;  %v10700_v57 = vld [vmem:[#allocation94_spill] sm:$0xff]  ;;  %v10702_v7 = vld [vmem:[#allocation96_spill] sm:$0xff]  ;;  %v10703_v6 = vld [vmem:[#allocation97_spill] sm:$0xff] }
 0x4ce   :  { %v1689_v21 = vmul.f32 %v5740_v19, %v7818_v35  ;;  %v10704_v8 = vld [vmem:[#allocation98_spill] sm:$0xff]  ;;  %v10705_v9 = vld [vmem:[#allocation99_spill] sm:$0xff]  ;;  %v8274_v14 = vld [vmem:[%s10006_s1 + $0x148] sm:$0xff] }
 0x4cf   :  { %5741 = vtanh.f32 %v1685_v11  ;;  %v4294_v17 = vmul.f32 -1.442695, %v1845_v16  ;;  %v8261_v11 = vld [vmem:[%s10006_s1 + $0x140] sm:$0xff]  ;;  %v8280_v15 = vld [vmem:[%s10006_s1 + $0x128] sm:$0xff]  ;;  %v8299_v19 = vld [vmem:[%s10006_s1 + $0x110] sm:$0xff] }
 0x4d0   :  { %5743 = vpow2.f32 %v4293_v12  ;;  %v8268_v12 = vld [vmem:[%s10006_s1 + $0x138] sm:$0xff]  ;;  %v8287_v16 = vld [vmem:[%s10006_s1 + $0x120] sm:$0xff] }
 0x4d1   :  { %5745 = vpow2.f32 %v4294_v17  ;;  %v8293_v17 = vld [vmem:[%s10006_s1 + $0x130] sm:$0xff] }
 0x4dc   :  { %v5742_v22 = vpop.eup %5741 }
 0x4dd   :  { %v5744_v23 = vpop.eup %5743  ;;  %v1688_v24 = vmul.f32 %v5742_v22, %v1687_v20  ;;  %v8306_v20 = vld [vmem:[%s10006_s1 + $0x108] sm:$0xff]  ;;  %v8312_v22 = vld [vmem:[%s10006_s1 + $0x118] sm:$0xff] }
 0x4de   :  { %v1839_v62 = vadd.f32 1.0, %v5744_v23  ;;  %v5746_v43 = vpop.eup %5745  ;;  %v8318_v23 = vld [vmem:[%s10006_s1 + $0xf8] sm:$0xff] }
 0x4df   :  { %v8144_v26 = vadd.f32 %v1689_v21, %v1688_v24  ;;  %v1849_v48 = vadd.f32 1.0, %v5746_v43  ;;  %v8325_v24 = vld [vmem:[%s10006_s1 + $0xf0] sm:$0xff]  ;;  %v8331_v21 = vld [vmem:[%s10006_s1 + $0x100] sm:$0xff]  ;;  %v8344_v43 = vld [vmem:[%s10006_s1 + $0xd8] sm:$0xff] }
 0x4e0   :  { %5747 = vrcp.f32 %v1839_v62  ;;  %v8337_v62 = vld [vmem:[%s10006_s1 + $0xe0] sm:$0xff] }
 0x4e1   :  { %1691 = vst [vmem:[#allocation2 + $0x4] sm:$0x3] %v8144_v26  ;;  %5749 = vrcp.f32 %v1849_v48  ;;  %v8350_v48 = vld [vmem:[%s10006_s1 + $0xe8] sm:$0xff] }
 0x4ed   :  { %v5748_v50 = vpop.eup %5747 }
 0x4ee   :  { %v1853_v27 = vmul.f32 %v5748_v50, %v1852_v49  ;;  %v5750_v29 = vpop.eup %5749  ;;  %v8363_v49 = vld [vmem:[%s10006_s1 + $0xc0] sm:$0xff]  ;;  %v8369_v50 = vld [vmem:[%s10006_s1 + $0xd0] sm:$0xff] }
 0x4ef   :  { %v1858_v30 = vsub.f32 1.0, %v5750_v29  ;;  %v1860_v63 = vmul.f32 %v5750_v29, %v7828_v36  ;;  %v10681_v36 = vld [vmem:[#allocation75_spill] sm:$0xff]  ;;  %v8388_v29 = vld [vmem:[%s10006_s1 + $0xb8] sm:$0xff] }
 0x4f0   :  { %v1856_v28 = vadd.f32 %v1854_v60, %v1853_v27  ;;  %v8356_v60 = vld [vmem:[%s10006_s1 + $0xc8] sm:$0xff]  ;;  %v8375_v27 = vld [vmem:[%s10006_s1 + $0xb0] sm:$0xff] }
 0x4f2   :  { %5751 = vtanh.f32 %v1856_v28  ;;  %v8382_v28 = vld [vmem:[%s10006_s1 + $0xa8] sm:$0xff] }
 0x4ff   :  { %v5752_v55 = vpop.eup %5751 }
 0x500   :  { %v1859_v35 = vmul.f32 %v5752_v55, %v1858_v30  ;;  %v8394_v30 = vld [vmem:[%s10006_s1 + $0x98] sm:$0xff]  ;;  %v8401_v55 = vld [vmem:[%s10006_s1 + $0x90] sm:$0xff] }
 0x502   :  { %v8149_v54 = vadd.f32 %v1860_v63, %v1859_v35  ;;  %v8407_v35 = vld [vmem:[%s10006_s1 + $0xa0] sm:$0xff] }
 0x503   :  { %v8413_v63 = vld [vmem:[%s10006_s1 + $0x80] sm:$0xff] }
 0x504   :  { %1927 = vmatmul.mubr.f32.vlgmr.msra.gmra.mxu0 %v8149_v54  ;;  %5146 = vmatmul.mubr.f32.vlgmr.msra.gmra.mxu1 %v8149_v54 }
 0x505   :  { %2004 = vmatpush1.msra.mxu0 %v7832_v1  ;;  %5149 = vmatpush3.msra.mxu1 %v7835_v3  ;;  %v10682_v1 = vld [vmem:[#allocation76_spill] sm:$0xff]  ;;  %v10683_v3 = vld [vmem:[#allocation77_spill] sm:$0xff] }
 0x506   :  { %2005 = vmatprep.subr.mxu0 %v7838_v5  ;;  %5150 = vmatprep.subr.mxu1 %v10416_v56  ;;  %v10684_v5 = vld [vmem:[#allocation78_spill] sm:$0xff] }
 0x507   :  { %2006 = vmatpush1.msra.mxu0 %v7842_v25  ;;  %5151 = vmatpush3.msra.mxu1 %v7845_v4  ;;  %v10685_v25 = vld [vmem:[#allocation79_spill] sm:$0xff]  ;;  %v10686_v4 = vld [vmem:[#allocation80_spill] sm:$0xff] }
 0x508   :  { %2007 = vmatprep.subr.mxu0 %v7848_v31  ;;  %5152 = vmatprep.subr.mxu1 %v10416_v56  ;;  %v10687_v31 = vld [vmem:[#allocation81_spill] sm:$0xff] }
 0x509   :  { %2008 = vmatpush1.msra.mxu0 %v7852_v44  ;;  %5153 = vmatpush3.msra.mxu1 %v7855_v47  ;;  %v10688_v44 = vld [vmem:[#allocation82_spill] sm:$0xff]  ;;  %v10689_v47 = vld [vmem:[#allocation83_spill] sm:$0xff] }
 0x50a   :  { %2009 = vmatprep.subr.mxu0 %v7858_v45  ;;  %5154 = vmatprep.subr.mxu1 %v10416_v56  ;;  %v10690_v45 = vld [vmem:[#allocation84_spill] sm:$0xff] }
 0x50b   :  { %2010 = vmatpush1.msra.mxu0 %v7862_v42  ;;  %5155 = vmatpush3.msra.mxu1 %v7865_v2  ;;  %v10691_v42 = vld [vmem:[#allocation85_spill] sm:$0xff]  ;;  %v10692_v2 = vld [vmem:[#allocation86_spill] sm:$0xff] }
 0x50c   :  { %2011 = vmatprep.subr.mxu0 %v7868_v46  ;;  %5156 = vmatprep.subr.mxu1 %v10416_v56  ;;  %v10693_v46 = vld [vmem:[#allocation87_spill] sm:$0xff] }
 0x50d   :  { %2012 = vmatpush1.msra.mxu0 %v7872_v18  ;;  %5157 = vmatpush3.msra.mxu1 %v7875_v38  ;;  %v10694_v18 = vld [vmem:[#allocation88_spill] sm:$0xff]  ;;  %v10695_v38 = vld [vmem:[#allocation89_spill] sm:$0xff] }
 0x50e   :  { %2013 = vmatprep.subr.mxu0 %v7878_v37  ;;  %5158 = vmatprep.subr.mxu1 %v10416_v56  ;;  %v10696_v37 = vld [vmem:[#allocation90_spill] sm:$0xff] }
 0x50f   :  { %2014 = vmatpush1.msra.mxu0 %v10680_v41  ;;  %5159 = vmatpush3.msra.mxu1 %v10681_v36  ;;  %v8420_v41 = vld [vmem:[%s10006_s1 + $0x78] sm:$0xff]  ;;  %v8426_v36 = vld [vmem:[%s10006_s1 + $0x88] sm:$0xff] }
 0x510   :  { %2015 = vmatprep.subr.mxu0 %v10682_v1  ;;  %5160 = vmatprep.subr.mxu1 %v10416_v56  ;;  %v8432_v1 = vld [vmem:[%s10006_s1 + $0x68] sm:$0xff] }
 0x511   :  { %2016 = vmatpush1.msra.mxu0 %v10683_v3  ;;  %5161 = vmatpush3.msra.mxu1 %v10684_v5  ;;  %v8439_v3 = vld [vmem:[%s10006_s1 + $0x60] sm:$0xff]  ;;  %v8445_v5 = vld [vmem:[%s10006_s1 + $0x70] sm:$0xff] }
 0x512   :  { %2017 = vmatprep.subr.mxu0 %v10685_v25  ;;  %5162 = vmatprep.subr.mxu1 %v10416_v56  ;;  %v8451_v25 = vld [vmem:[%s10006_s1 + $0x50] sm:$0xff] }
 0x513   :  { %2018 = vmatpush1.msra.mxu0 %v10686_v4  ;;  %5163 = vmatpush3.msra.mxu1 %v10687_v31  ;;  %v8458_v4 = vld [vmem:[%s10006_s1 + $0x48] sm:$0xff]  ;;  %v8464_v31 = vld [vmem:[%s10006_s1 + $0x58] sm:$0xff] }
 0x514   :  { %2019 = vmatprep.subr.mxu0 %v10688_v44  ;;  %5164 = vmatprep.subr.mxu1 %v10416_v56  ;;  %10706 = vst [vmem:[#allocation15_spill] sm:$0xff] %v8464_v31  ;;  %v8470_v44 = vld [vmem:[%s10006_s1 + $0x38] sm:$0xff] }
 0x515   :  { %2020 = vmatpush1.msra.mxu0 %v10689_v47  ;;  %5165 = vmatpush3.msra.mxu1 %v10690_v45  ;;  %10707 = vst [vmem:[#allocation16_spill] sm:$0xff] %v8470_v44  ;;  %v8477_v47 = vld [vmem:[%s10006_s1 + $0x30] sm:$0xff]  ;;  %v8483_v45 = vld [vmem:[%s10006_s1 + $0x40] sm:$0xff] }
 0x516   :  { %2021 = vmatprep.subr.mxu0 %v10691_v42  ;;  %5166 = vmatprep.subr.mxu1 %v10416_v56  ;;  %10708 = vst [vmem:[#allocation17_spill] sm:$0xff] %v8477_v47  ;;  %10709 = vst [vmem:[#allocation18_spill] sm:$0xff] %v8483_v45  ;;  %v8489_v42 = vld [vmem:[%s10006_s1 + $0x20] sm:$0xff] }
 0x517   :  { %2022 = vmatpush1.msra.mxu0 %v10692_v2  ;;  %5167 = vmatpush3.msra.mxu1 %v10693_v46  ;;  %10710 = vst [vmem:[#allocation19_spill] sm:$0xff] %v8489_v42  ;;  %v8496_v2 = vld [vmem:[%s10006_s1 + $0x18] sm:$0xff]  ;;  %v8502_v46 = vld [vmem:[%s10006_s1 + $0x28] sm:$0xff] }
 0x518   :  { %2023 = vmatprep.subr.mxu0 %v10694_v18  ;;  %5168 = vmatprep.subr.mxu1 %v10416_v56  ;;  %10711 = vst [vmem:[#allocation20_spill] sm:$0xff] %v8496_v2  ;;  %10712 = vst [vmem:[#allocation21_spill] sm:$0xff] %v8502_v46  ;;  %v8508_v18 = vld [vmem:[%s10006_s1 + $0x8] sm:$0xff] }
 0x519   :  { %2024 = vmatpush1.msra.mxu0 %v10695_v38  ;;  %5169 = vmatpush3.msra.mxu1 %v10696_v37  ;;  %10713 = vst [vmem:[#allocation23_spill] sm:$0xff] %v8508_v18  ;;  %v8515_v38 = vld [vmem:[%s10006_s1] sm:$0xff]  ;;  %v8522_v37 = vld [vmem:[%s10006_s1 + $0x10] sm:$0xff] }
 0x51a   :  { %2025 = vmatprep.subr.mxu0 %v10697_v59  ;;  %5170 = vmatprep.subr.mxu1 %v10416_v56  ;;  %10714 = vst [vmem:[#allocation22_spill] sm:$0xff] %v8515_v38  ;;  %10715 = vst [vmem:[#allocation24_spill] sm:$0xff] %v8522_v37  ;;  %v8529_v59 = vld [vmem:[#allocation3 + $0x170] sm:$0xff] }
 0x51b   :  { %2026 = vmatpush1.msra.mxu0 %v10698_v52  ;;  %5171 = vmatpush3.msra.mxu1 %v10699_v61  ;;  %10716 = vst [vmem:[#allocation25_spill] sm:$0xff] %v8529_v59  ;;  %v8533_v52 = vld [vmem:[#allocation3 + $0x168] sm:$0xff]  ;;  %v8536_v61 = vld [vmem:[#allocation3 + $0x178] sm:$0xff] }
 0x51c   :  { %2027 = vmatprep.subr.mxu0 %v10700_v57  ;;  %5172 = vmatprep.subr.mxu1 %v10416_v56  ;;  %10717 = vst [vmem:[#allocation26_spill] sm:$0xff] %v8533_v52  ;;  %10718 = vst [vmem:[#allocation27_spill] sm:$0xff] %v8536_v61  ;;  %v8539_v57 = vld [vmem:[#allocation3 + $0x158] sm:$0xff] }
 0x51d   :  { %2028 = vmatpush1.msra.mxu0 %v10701_v51  ;;  %5173 = vmatpush3.msra.mxu1 %v10702_v7  ;;  %10719 = vst [vmem:[#allocation28_spill] sm:$0xff] %v8539_v57  ;;  %v8543_v51 = vld [vmem:[#allocation3 + $0x150] sm:$0xff]  ;;  %v8546_v7 = vld [vmem:[#allocation3 + $0x160] sm:$0xff] }
 0x51e   :  { %2029 = vmatprep.subr.mxu0 %v10703_v6  ;;  %5174 = vmatprep.subr.mxu1 %v10416_v56  ;;  %10720 = vst [vmem:[#allocation29_spill] sm:$0xff] %v8543_v51  ;;  %10721 = vst [vmem:[#allocation30_spill] sm:$0xff] %v8546_v7  ;;  %v8549_v6 = vld [vmem:[#allocation3 + $0x140] sm:$0xff] }
 0x51f   :  { %2030 = vmatpush1.msra.mxu0 %v7962_v10  ;;  %5175 = vmatpush3.msra.mxu1 %v10704_v8  ;;  %v8223_v10 = vld [vmem:[%s10006_s1 + $0x170] sm:$0xff]  ;;  %10722 = vst [vmem:[#allocation31_spill] sm:$0xff] %v8549_v6  ;;  %v8553_v8 = vld [vmem:[#allocation3 + $0x138] sm:$0xff] }
 0x520   :  { %2031 = vmatprep.subr.mxu0 %v10705_v9  ;;  %5176 = vmatprep.subr.mxu1 %v10416_v56  ;;  %10723 = vst [vmem:[#allocation32_spill] sm:$0xff] %v8553_v8  ;;  %v8556_v9 = vld [vmem:[#allocation3 + $0x148] sm:$0xff] }
 0x521   :  { %2032 = vmatpush1.msra.mxu0 %v7972_v39  ;;  %5177 = vmatpush3.msra.mxu1 %v7975_v40  ;;  %v8249_v39 = vld [vmem:[%s10006_s1 + $0x150] sm:$0xff]  ;;  %v8255_v40 = vld [vmem:[%s10006_s1 + $0x160] sm:$0xff]  ;;  %10724 = vst [vmem:[#allocation33_spill] sm:$0xff] %v8556_v9 }
 0x522   :  { %2033 = vmatprep.subr.mxu0 %v7978_v34  ;;  %5178 = vmatprep.subr.mxu1 %v10416_v56  ;;  %v8242_v34 = vld [vmem:[%s10006_s1 + $0x158] sm:$0xff] }
 0x523   :  { %2034 = vmatpush1.msra.mxu0 %v7982_v33  ;;  %2067 = vmatprep.mubr.f32.mxu0 %v10416_v56  ;;  %v8236_v33 = vld [vmem:[%s10006_s1 + $0x178] sm:$0xff] }
 0x524   :  { %5179 = vmatpush3.msra.mxu1 %v7986_v13  ;;  %5180 = vmatprep.mubr.msk.f32.mxu1 %vm6376_vm0, %v10416_v56  ;;  %v8230_v13 = vld [vmem:[%s10006_s1 + $0x168] sm:$0xff] }
 0x525   :  { %2068 = vmatmul.mubr.f32.vlgmr.msra.gmra.mxu0 %v8144_v26  ;;  %5181 = vmatmul.mubr.f32.vlgmr.msra.gmra.mxu1 %v8144_v26 }
 0x526   :  { %2169 = vmatprep.subr.mxu0 %v8223_v10  ;;  %5183 = vmatprep.subr.mxu1 %v10416_v56 }
 0x527   :  { %2170 = vmatpush1.msra.mxu0 %v8230_v13  ;;  %5184 = vmatpush3.msra.mxu1 %v8236_v33 }
 0x528   :  { %2171 = vmatprep.subr.mxu0 %v8242_v34  ;;  %5185 = vmatprep.subr.mxu1 %v10416_v56 }
 0x529   :  { %2172 = vmatpush1.msra.mxu0 %v8249_v39  ;;  %5186 = vmatpush3.msra.mxu1 %v8255_v40 }
 0x52a   :  { %2173 = vmatprep.subr.mxu0 %v8261_v11  ;;  %5187 = vmatprep.subr.mxu1 %v10416_v56 }
 0x52b   :  { %2174 = vmatpush1.msra.mxu0 %v8268_v12  ;;  %5188 = vmatpush3.msra.mxu1 %v8274_v14 }
 0x52c   :  { %2175 = vmatprep.subr.mxu0 %v8280_v15  ;;  %5189 = vmatprep.subr.mxu1 %v10416_v56 }
 0x52d   :  { %2176 = vmatpush1.msra.mxu0 %v8287_v16  ;;  %5190 = vmatpush3.msra.mxu1 %v8293_v17 }
 0x52e   :  { %2177 = vmatprep.subr.mxu0 %v8299_v19  ;;  %5191 = vmatprep.subr.mxu1 %v10416_v56 }
 0x52f   :  { %2178 = vmatpush1.msra.mxu0 %v8306_v20  ;;  %5192 = vmatpush3.msra.mxu1 %v8312_v22 }
 0x530   :  { %2179 = vmatprep.subr.mxu0 %v8318_v23  ;;  %5193 = vmatprep.subr.mxu1 %v10416_v56 }
 0x531   :  { %2180 = vmatpush1.msra.mxu0 %v8325_v24  ;;  %5194 = vmatpush3.msra.mxu1 %v8331_v21 }
 0x532   :  { %2181 = vmatprep.subr.mxu0 %v8337_v62  ;;  %5195 = vmatprep.subr.mxu1 %v10416_v56 }
 0x533   :  { %2182 = vmatpush1.msra.mxu0 %v8344_v43  ;;  %5196 = vmatpush3.msra.mxu1 %v8350_v48 }
 0x534   :  { %2183 = vmatprep.subr.mxu0 %v8356_v60  ;;  %5197 = vmatprep.subr.mxu1 %v10416_v56 }
 0x535   :  { %2184 = vmatpush1.msra.mxu0 %v8363_v49  ;;  %5198 = vmatpush3.msra.mxu1 %v8369_v50 }
 0x536   :  { %2185 = vmatprep.subr.mxu0 %v8375_v27  ;;  %5199 = vmatprep.subr.mxu1 %v10416_v56 }
 0x537   :  { %2186 = vmatpush1.msra.mxu0 %v8382_v28  ;;  %5200 = vmatpush3.msra.mxu1 %v8388_v29 }
 0x538   :  { %2187 = vmatprep.subr.mxu0 %v8394_v30  ;;  %5201 = vmatprep.subr.mxu1 %v10416_v56 }
 0x539   :  { %2188 = vmatpush1.msra.mxu0 %v8401_v55  ;;  %5202 = vmatpush3.msra.mxu1 %v8407_v35 }
 0x53a   :  { %2189 = vmatprep.subr.mxu0 %v8413_v63  ;;  %5203 = vmatprep.subr.mxu1 %v10416_v56 }
 0x53b   :  { %2190 = vmatpush1.msra.mxu0 %v8420_v41  ;;  %5204 = vmatpush3.msra.mxu1 %v8426_v36 }
 0x53c   :  { %2191 = vmatprep.subr.mxu0 %v8432_v1  ;;  %5205 = vmatprep.subr.mxu1 %v10416_v56 }
 0x53d   :  { %2192 = vmatpush1.msra.mxu0 %v8439_v3  ;;  %5206 = vmatpush3.msra.mxu1 %v8445_v5 }
 0x53e   :  { %2193 = vmatprep.subr.mxu0 %v8451_v25  ;;  %5207 = vmatprep.subr.mxu1 %v10416_v56 }
 0x53f   :  { %2194 = vmatpush1.msra.mxu0 %v8458_v4  ;;  %5208 = vmatpush3.msra.mxu1 %v8464_v31 }
 0x540   :  { %2195 = vmatprep.subr.mxu0 %v8470_v44  ;;  %5209 = vmatprep.subr.mxu1 %v10416_v56 }
 0x541   :  { %2196 = vmatpush1.msra.mxu0 %v8477_v47  ;;  %5210 = vmatpush3.msra.mxu1 %v8483_v45 }
 0x542   :  { %2197 = vmatprep.subr.mxu0 %v8489_v42  ;;  %5211 = vmatprep.subr.mxu1 %v10416_v56 }
 0x543   :  { %2198 = vmatpush1.msra.mxu0 %v8496_v2  ;;  %5212 = vmatpush3.msra.mxu1 %v8502_v46 }
 0x544   :  { %2199 = vmatprep.subr.mxu0 %v8508_v18  ;;  %5213 = vmatprep.subr.mxu1 %v10416_v56 }
 0x545   :  { %2200 = vmatpush1.msra.mxu0 %v8515_v38  ;;  %2233 = vmatprep.mubr.f32.mxu0 %v10416_v56 }
 0x546   :  { %5214 = vmatpush3.msra.mxu1 %v8522_v37  ;;  %5215 = vmatprep.mubr.msk.f32.mxu1 %vm6376_vm0, %v10416_v56 }
 0x547   :  { %2234 = vmatmul.mubr.f32.vlgmr.msra.gmra.mxu0 %v8149_v54  ;;  %5216 = vmatmul.mubr.f32.vlgmr.msra.gmra.mxu1 %v8149_v54 }
 0x548   :  { %2337 = vmatprep.subr.mxu0 %v8529_v59  ;;  %5218 = vmatprep.subr.mxu1 %v10416_v56 }
 0x549   :  { %2338 = vmatpush1.msra.mxu0 %v8533_v52  ;;  %5219 = vmatpush3.msra.mxu1 %v8536_v61 }
 0x54a   :  { %2339 = vmatprep.subr.mxu0 %v8539_v57  ;;  %5220 = vmatprep.subr.mxu1 %v10416_v56  ;;  %v8559_v57 = vld [vmem:[#allocation3 + $0x128] sm:$0xff] }
 0x54b   :  { %2340 = vmatpush1.msra.mxu0 %v8543_v51  ;;  %5221 = vmatpush3.msra.mxu1 %v8546_v7  ;;  %10725 = vst [vmem:[#allocation34_spill] sm:$0xff] %v8559_v57  ;;  %v8563_v7 = vld [vmem:[#allocation3 + $0x120] sm:$0xff]  ;;  %v8569_v51 = vld [vmem:[#allocation3 + $0x110] sm:$0xff] }
 0x54c   :  { %2341 = vmatprep.subr.mxu0 %v8549_v6  ;;  %5222 = vmatprep.subr.mxu1 %v10416_v56  ;;  %10726 = vst [vmem:[#allocation35_spill] sm:$0xff] %v8563_v7  ;;  %v8566_v6 = vld [vmem:[#allocation3 + $0x130] sm:$0xff]  ;;  %10728 = vst [vmem:[#allocation37_spill] sm:$0xff] %v8569_v51 }
 0x54d   :  { %2342 = vmatpush1.msra.mxu0 %v8553_v8  ;;  %5223 = vmatpush3.msra.mxu1 %v8556_v9  ;;  %10727 = vst [vmem:[#allocation36_spill] sm:$0xff] %v8566_v6  ;;  %v8573_v9 = vld [vmem:[#allocation3 + $0x108] sm:$0xff]  ;;  %v8579_v8 = vld [vmem:[#allocation3 + $0xf8] sm:$0xff] }
 0x54e   :  { %2343 = vmatprep.subr.mxu0 %v8559_v57  ;;  %5224 = vmatprep.subr.mxu1 %v10416_v56  ;;  %10729 = vst [vmem:[#allocation38_spill] sm:$0xff] %v8573_v9  ;;  %v8576_v57 = vld [vmem:[#allocation3 + $0x118] sm:$0xff]  ;;  %10731 = vst [vmem:[#allocation40_spill] sm:$0xff] %v8579_v8 }
 0x54f   :  { %2344 = vmatpush1.msra.mxu0 %v8563_v7  ;;  %5225 = vmatpush3.msra.mxu1 %v8566_v6  ;;  %10730 = vst [vmem:[#allocation39_spill] sm:$0xff] %v8576_v57  ;;  %v8583_v6 = vld [vmem:[#allocation3 + $0xf0] sm:$0xff]  ;;  %v8589_v7 = vld [vmem:[#allocation3 + $0xe0] sm:$0xff] }
 0x550   :  { %2345 = vmatprep.subr.mxu0 %v8569_v51  ;;  %5226 = vmatprep.subr.mxu1 %v10416_v56  ;;  %10732 = vst [vmem:[#allocation41_spill] sm:$0xff] %v8583_v6  ;;  %v8586_v51 = vld [vmem:[#allocation3 + $0x100] sm:$0xff]  ;;  %10734 = vst [vmem:[#allocation43_spill] sm:$0xff] %v8589_v7 }
 0x551   :  { %2346 = vmatpush1.msra.mxu0 %v8573_v9  ;;  %5227 = vmatpush3.msra.mxu1 %v8576_v57  ;;  %10733 = vst [vmem:[#allocation42_spill] sm:$0xff] %v8586_v51  ;;  %v8593_v57 = vld [vmem:[#allocation3 + $0xd8] sm:$0xff]  ;;  %v8599_v9 = vld [vmem:[#allocation3 + $0xc8] sm:$0xff] }
 0x552   :  { %2347 = vmatprep.subr.mxu0 %v8579_v8  ;;  %5228 = vmatprep.subr.mxu1 %v10416_v56  ;;  %10735 = vst [vmem:[#allocation44_spill] sm:$0xff] %v8593_v57  ;;  %v8596_v8 = vld [vmem:[#allocation3 + $0xe8] sm:$0xff]  ;;  %10737 = vst [vmem:[#allocation46_spill] sm:$0xff] %v8599_v9 }
 0x553   :  { %2348 = vmatpush1.msra.mxu0 %v8583_v6  ;;  %5229 = vmatpush3.msra.mxu1 %v8586_v51  ;;  %10736 = vst [vmem:[#allocation45_spill] sm:$0xff] %v8596_v8  ;;  %v8603_v51 = vld [vmem:[#allocation3 + $0xc0] sm:$0xff]  ;;  %v8609_v6 = vld [vmem:[#allocation3 + $0xb0] sm:$0xff] }
 0x554   :  { %2349 = vmatprep.subr.mxu0 %v8589_v7  ;;  %5230 = vmatprep.subr.mxu1 %v10416_v56  ;;  %10738 = vst [vmem:[#allocation47_spill] sm:$0xff] %v8603_v51  ;;  %v8606_v7 = vld [vmem:[#allocation3 + $0xd0] sm:$0xff]  ;;  %10740 = vst [vmem:[#allocation49_spill] sm:$0xff] %v8609_v6 }
 0x555   :  { %2350 = vmatpush1.msra.mxu0 %v8593_v57  ;;  %5231 = vmatpush3.msra.mxu1 %v8596_v8  ;;  %10739 = vst [vmem:[#allocation48_spill] sm:$0xff] %v8606_v7  ;;  %v8613_v8 = vld [vmem:[#allocation3 + $0xa8] sm:$0xff]  ;;  %v8619_v57 = vld [vmem:[#allocation3 + $0x98] sm:$0xff] }
 0x556   :  { %2351 = vmatprep.subr.mxu0 %v8599_v9  ;;  %5232 = vmatprep.subr.mxu1 %v10416_v56  ;;  %10741 = vst [vmem:[#allocation50_spill] sm:$0xff] %v8613_v8  ;;  %v8616_v9 = vld [vmem:[#allocation3 + $0xb8] sm:$0xff]  ;;  %10743 = vst [vmem:[#allocation52_spill] sm:$0xff] %v8619_v57 }
 0x557   :  { %2352 = vmatpush1.msra.mxu0 %v8603_v51  ;;  %5233 = vmatpush3.msra.mxu1 %v8606_v7  ;;  %10742 = vst [vmem:[#allocation51_spill] sm:$0xff] %v8616_v9  ;;  %v8623_v7 = vld [vmem:[#allocation3 + $0x90] sm:$0xff]  ;;  %v8629_v51 = vld [vmem:[#allocation3 + $0x80] sm:$0xff] }
 0x558   :  { %2353 = vmatprep.subr.mxu0 %v8609_v6  ;;  %5234 = vmatprep.subr.mxu1 %v10416_v56  ;;  %10744 = vst [vmem:[#allocation53_spill] sm:$0xff] %v8623_v7  ;;  %v8626_v6 = vld [vmem:[#allocation3 + $0xa0] sm:$0xff]  ;;  %10746 = vst [vmem:[#allocation55_spill] sm:$0xff] %v8629_v51 }
 0x559   :  { %2354 = vmatpush1.msra.mxu0 %v8613_v8  ;;  %5235 = vmatpush3.msra.mxu1 %v8616_v9  ;;  %10745 = vst [vmem:[#allocation54_spill] sm:$0xff] %v8626_v6  ;;  %v8633_v9 = vld [vmem:[#allocation3 + $0x78] sm:$0xff]  ;;  %v8639_v8 = vld [vmem:[#allocation3 + $0x68] sm:$0xff] }
 0x55a   :  { %2355 = vmatprep.subr.mxu0 %v8619_v57  ;;  %5236 = vmatprep.subr.mxu1 %v10416_v56  ;;  %10747 = vst [vmem:[#allocation56_spill] sm:$0xff] %v8633_v9  ;;  %v8636_v57 = vld [vmem:[#allocation3 + $0x88] sm:$0xff]  ;;  %10749 = vst [vmem:[#allocation58_spill] sm:$0xff] %v8639_v8 }
 0x55b   :  { %2356 = vmatpush1.msra.mxu0 %v8623_v7  ;;  %5237 = vmatpush3.msra.mxu1 %v8626_v6  ;;  %10748 = vst [vmem:[#allocation57_spill] sm:$0xff] %v8636_v57  ;;  %v8643_v6 = vld [vmem:[#allocation3 + $0x60] sm:$0xff]  ;;  %v8649_v7 = vld [vmem:[#allocation3 + $0x50] sm:$0xff] }
 0x55c   :  { %2357 = vmatprep.subr.mxu0 %v8629_v51  ;;  %5238 = vmatprep.subr.mxu1 %v10416_v56  ;;  %10750 = vst [vmem:[#allocation59_spill] sm:$0xff] %v8643_v6  ;;  %v8646_v51 = vld [vmem:[#allocation3 + $0x70] sm:$0xff]  ;;  %10752 = vst [vmem:[#allocation61_spill] sm:$0xff] %v8649_v7 }
 0x55d   :  { %2358 = vmatpush1.msra.mxu0 %v8633_v9  ;;  %5239 = vmatpush3.msra.mxu1 %v8636_v57  ;;  %10751 = vst [vmem:[#allocation60_spill] sm:$0xff] %v8646_v51  ;;  %v8653_v57 = vld [vmem:[#allocation3 + $0x48] sm:$0xff]  ;;  %v8659_v9 = vld [vmem:[#allocation3 + $0x38] sm:$0xff] }
 0x55e   :  { %2359 = vmatprep.subr.mxu0 %v8639_v8  ;;  %5240 = vmatprep.subr.mxu1 %v10416_v56  ;;  %10753 = vst [vmem:[#allocation62_spill] sm:$0xff] %v8653_v57  ;;  %v8656_v8 = vld [vmem:[#allocation3 + $0x58] sm:$0xff]  ;;  %10755 = vst [vmem:[#allocation64_spill] sm:$0xff] %v8659_v9 }
 0x55f   :  { %2360 = vmatpush1.msra.mxu0 %v8643_v6  ;;  %5241 = vmatpush3.msra.mxu1 %v8646_v51  ;;  %10754 = vst [vmem:[#allocation63_spill] sm:$0xff] %v8656_v8  ;;  %v8663_v51 = vld [vmem:[#allocation3 + $0x30] sm:$0xff]  ;;  %v8669_v6 = vld [vmem:[#allocation3 + $0x20] sm:$0xff] }
 0x560   :  { %2361 = vmatprep.subr.mxu0 %v8649_v7  ;;  %5242 = vmatprep.subr.mxu1 %v10416_v56  ;;  %10756 = vst [vmem:[#allocation65_spill] sm:$0xff] %v8663_v51  ;;  %v8666_v7 = vld [vmem:[#allocation3 + $0x40] sm:$0xff]  ;;  %10758 = vst [vmem:[#allocation67_spill] sm:$0xff] %v8669_v6 }
 0x561   :  { %2362 = vmatpush1.msra.mxu0 %v8653_v57  ;;  %5243 = vmatpush3.msra.mxu1 %v8656_v8  ;;  %10757 = vst [vmem:[#allocation66_spill] sm:$0xff] %v8666_v7  ;;  %v8673_v8 = vld [vmem:[#allocation3 + $0x18] sm:$0xff]  ;;  %v8679_v57 = vld [vmem:[#allocation3 + $0x8] sm:$0xff] }
 0x562   :  { %2363 = vmatprep.subr.mxu0 %v8659_v9  ;;  %5244 = vmatprep.subr.mxu1 %v10416_v56  ;;  %10759 = vst [vmem:[#allocation68_spill] sm:$0xff] %v8673_v8  ;;  %v8676_v9 = vld [vmem:[#allocation3 + $0x28] sm:$0xff]  ;;  %10761 = vst [vmem:[#allocation70_spill] sm:$0xff] %v8679_v57 }
 0x563   :  { %2364 = vmatpush1.msra.mxu0 %v8663_v51  ;;  %5245 = vmatpush3.msra.mxu1 %v8666_v7  ;;  %10760 = vst [vmem:[#allocation69_spill] sm:$0xff] %v8676_v9  ;;  %v8683_v7 = vld [vmem:[#allocation3] sm:$0xff] }
 0x564   :  { %2365 = vmatprep.subr.mxu0 %v8669_v6  ;;  %5246 = vmatprep.subr.mxu1 %v10416_v56  ;;  %10762 = vst [vmem:[#allocation71_spill] sm:$0xff] %v8683_v7  ;;  %v8686_v6 = vld [vmem:[#allocation3 + $0x10] sm:$0xff] }
 0x565   :  { %2366 = vmatpush1.msra.mxu0 %v8673_v8  ;;  %5247 = vmatpush3.msra.mxu1 %v8676_v9  ;;  %10763 = vst [vmem:[#allocation72_spill] sm:$0xff] %v8686_v6  ;;  %v8692_v9 = vld [vmem:[#allocation5 + $0x170] sm:$0xff] }
 0x566   :  { %2367 = vmatprep.subr.mxu0 %v8679_v57  ;;  %5248 = vmatprep.subr.mxu1 %v10416_v56  ;;  %10764 = vst [vmem:[#allocation73_spill] sm:$0xff] %v8692_v9 }
 0x567   :  { %2368 = vmatpush1.msra.mxu0 %v8683_v7  ;;  %5249 = vmatpush3.msra.mxu1 %v8686_v6 }
 0x568   :  { %2401 = vmatprep.mubr.f32.mxu0 %v10416_v56  ;;  %5250 = vmatprep.mubr.msk.f32.mxu1 %vm6376_vm0, %v10416_v56 }
 0x569   :  { %2478 = vmatprep.subr.mxu0 %v8692_v9  ;;  %5253 = vmatprep.subr.mxu1 %v10416_v56 }
 0x5c4   :  { %v1999_v57 = vpop.f32.mrf.mxu1  ;;  %v1928_v51 = vpop.f32.mrf.mxu0 }
 0x5c5   :  { %v1929_v7 = vadd.f32 %v1928_v51, %v10678_v0  ;;  %v4297_v51 = vld [vmem:[%s10005_s0 + $0x18] sm:$0x3f] }
 0x5c6   :  { %v5147_v8 = vpop.f32.mrf.mxu1  ;;  %v1930_v61 = vpop.f32.mrf.mxu0 }
 0x5c7   :  { %v1931_v46 = vadd.f32 %v1930_v61, %v10679_v53  ;;  %v2000_v61 = vadd.f32 %v1999_v57, %v7251_v32 }
 0x5e5   :  { %v2069_v52 = vpop.f32.mrf.mxu0  ;;  %v2140_v59 = vpop.f32.mrf.mxu1 }
 0x5e6   :  { %v2144_v6 = vadd.f32 %v2069_v52, %v1929_v7  ;;  %v2158_v52 = vadd.f32 %v8139_v58, %v2140_v59 }
 0x5e7   :  { %v5182_v37 = vpop.f32.mrf.mxu1  ;;  %v2071_v18 = vpop.f32.mrf.mxu0 }
 0x5e8   :  { %v4295_v38 = vmul.f32 -1.442695, %v2144_v6  ;;  %v2151_v2 = vadd.f32 %v2071_v18, %v1931_v46 }
 0x5ea   :  { %5753 = vpow2.f32 %v4295_v38  ;;  %v4296_v42 = vmul.f32 -1.442695, %v2151_v2 }
 0x5ec   :  { %5755 = vpow2.f32 %v4296_v42 }
 0x5f7   :  { %v5754_v9 = vpop.eup %5753 }
 0x5f8   :  { %v2148_v45 = vadd.f32 1.0, %v5754_v9 }
 0x5f9   :  { %v5756_v8 = vpop.eup %5755 }
 0x5fa   :  { %5757 = vrcp.f32 %v2148_v45  ;;  %v2155_v47 = vadd.f32 1.0, %v5756_v8  ;;  %v2318_v45 = vrot.slane %v4297_v51, 2 }
 0x5fc   :  { %5759 = vrcp.f32 %v2155_v47 }
 0x607   :  { %v5758_v37 = vpop.eup %5757  ;;  %v2235_v7 = vpop.f32.mrf.mxu0 }
 0x608   :  { %v2306_v6 = vpop.f32.mrf.mxu1  ;;  %v2159_v38 = vmul.f32 %v5758_v37, %v2158_v52  ;;  %v2310_v2 = vadd.f32 %v4297_v51, %v2235_v7 }
 0x609   :  { %v2237_v9 = vpop.f32.mrf.mxu0  ;;  %v5760_v0 = vpop.eup %5759 }
 0x60a   :  { %v5217_v42 = vpop.f32.mrf.mxu1  ;;  %v2160_v46 = vadd.f32 %v2159_v38, %v2000_v61  ;;  %v4298_v18 = vmul.f32 -1.442695, %v2310_v2  ;;  %v2320_v8 = vadd.f32 %v2318_v45, %v2237_v9  ;;  %v2162_v58 = vsub.f32 1.0, %v5760_v0  ;;  %v8710_v38 = vld [vmem:[%s10007_s2] ss:$0 sm:$0xff]  ;;  %v8724_v9 = vld [vmem:[#allocation5 + $0x158] sm:$0xff] }
 0x60b   :  { %v2164_v57 = vmul.f32 %v5760_v0, %v8144_v26  ;;  %v2329_v61 = vrot.slane %v4297_v51, 4  ;;  %v8718_v51 = vld [vmem:[#allocation5 + $0x168] sm:$0xff] }
 0x60c   :  { %5761 = vtanh.f32 %v2160_v46  ;;  %v4299_v53 = vmul.f32 -1.442695, %v2320_v8  ;;  %v8731_v8 = vld [vmem:[#allocation5 + $0x160] sm:$0xff] }
 0x60d   :  { %5763 = vpow2.f32 %v4298_v18 }
 0x60e   :  { %5765 = vpow2.f32 %v4299_v53  ;;  %v2327_v53 = vadd.f32 %v8710_v38, %v2306_v6  ;;  %v8721_v6 = vld [vmem:[#allocation5 + $0x178] sm:$0xff] }
 0x619   :  { %v5762_v59 = vpop.eup %5761 }
 0x61a   :  { %v5764_v44 = vpop.eup %5763  ;;  %v2163_v31 = vmul.f32 %v5762_v59, %v2162_v58  ;;  %v8734_v58 = vld [vmem:[#allocation5 + $0x140] sm:$0xff]  ;;  %v8738_v59 = vld [vmem:[#allocation5 + $0x138] sm:$0xff] }
 0x61b   :  { %v2314_v52 = vadd.f32 1.0, %v5764_v44  ;;  %v5766_v37 = vpop.eup %5765 }
 0x61c   :  { %v8704_v47 = vadd.f32 %v2164_v57, %v2163_v31  ;;  %v2324_v7 = vadd.f32 1.0, %v5766_v37  ;;  %v8741_v57 = vld [vmem:[#allocation5 + $0x148] sm:$0xff]  ;;  %v8748_v37 = vld [vmem:[#allocation5 + $0x120] sm:$0xff] }
 0x61d   :  { %5767 = vrcp.f32 %v2314_v52  ;;  %v8744_v52 = vld [vmem:[#allocation5 + $0x128] sm:$0xff] }
 0x61e   :  { %2166 = vst [vmem:[#allocation2 + $0x6] sm:$0x3] %v8704_v47  ;;  %5769 = vrcp.f32 %v2324_v7  ;;  %v8751_v7 = vld [vmem:[#allocation5 + $0x130] sm:$0xff] }
 0x62a   :  { %v5768_v2 = vpop.eup %5767 }
 0x62b   :  { %v2328_v42 = vmul.f32 %v5768_v2, %v2327_v53  ;;  %v5770_v26 = vpop.eup %5769  ;;  %v8758_v53 = vld [vmem:[#allocation5 + $0x108] sm:$0xff]  ;;  %v8761_v2 = vld [vmem:[#allocation5 + $0x118] sm:$0xff] }
 0x62c   :  { %v2333_v31 = vsub.f32 1.0, %v5770_v26  ;;  %v2335_v18 = vmul.f32 %v5770_v26, %v8149_v54  ;;  %v8728_v54 = vld [vmem:[#allocation5 + $0x150] sm:$0xff]  ;;  %v8771_v26 = vld [vmem:[#allocation5 + $0x100] sm:$0xff] }
 0x62d   :  { %v2331_v0 = vadd.f32 %v2329_v61, %v2328_v42  ;;  %v8754_v61 = vld [vmem:[#allocation5 + $0x110] sm:$0xff]  ;;  %v8764_v42 = vld [vmem:[#allocation5 + $0xf8] sm:$0xff]  ;;  %10766 = vst [vmem:[#allocation75_spill] sm:$0xff] %v8771_v26 }
 0x62f   :  { %5771 = vtanh.f32 %v2331_v0  ;;  %v8768_v0 = vld [vmem:[#allocation5 + $0xf0] sm:$0xff] }
 0x630   :  { %10765 = vst [vmem:[#allocation74_spill] sm:$0xff] %v8768_v0 }
 0x63c   :  { %v5772_v44 = vpop.eup %5771 }
 0x63d   :  { %v2334_v46 = vmul.f32 %v5772_v44, %v2333_v31  ;;  %v8774_v31 = vld [vmem:[#allocation5 + $0xe0] sm:$0xff]  ;;  %v8778_v44 = vld [vmem:[#allocation5 + $0xd8] sm:$0xff] }
 0x63e   :  { %10767 = vst [vmem:[#allocation76_spill] sm:$0xff] %v8774_v31  ;;  %10768 = vst [vmem:[#allocation77_spill] sm:$0xff] %v8778_v44 }
 0x63f   :  { %v8714_v45 = vadd.f32 %v2335_v18, %v2334_v46  ;;  %v8781_v46 = vld [vmem:[#allocation5 + $0xe8] sm:$0xff] }
 0x640   :  { %10769 = vst [vmem:[#allocation78_spill] sm:$0xff] %v8781_v46  ;;  %v8784_v18 = vld [vmem:[#allocation5 + $0xc8] sm:$0xff] }
 0x641   :  { %2402 = vmatmul.mubr.f32.vlgmr.msra.gmra.mxu0 %v8714_v45  ;;  %5251 = vmatmul.mubr.f32.vlgmr.msra.gmra.mxu1 %v8714_v45  ;;  %10770 = vst [vmem:[#allocation79_spill] sm:$0xff] %v8784_v18 }
 0x642   :  { %2479 = vmatpush1.msra.mxu0 %v8718_v51  ;;  %5254 = vmatpush3.msra.mxu1 %v8721_v6 }
 0x643   :  { %2480 = vmatprep.subr.mxu0 %v8724_v9  ;;  %5255 = vmatprep.subr.mxu1 %v10416_v56 }
 0x644   :  { %2481 = vmatpush1.msra.mxu0 %v8728_v54  ;;  %5256 = vmatpush3.msra.mxu1 %v8731_v8 }
 0x645   :  { %2482 = vmatprep.subr.mxu0 %v8734_v58  ;;  %5257 = vmatprep.subr.mxu1 %v10416_v56 }
 0x646   :  { %2483 = vmatpush1.msra.mxu0 %v8738_v59  ;;  %5258 = vmatpush3.msra.mxu1 %v8741_v57 }
 0x647   :  { %2484 = vmatprep.subr.mxu0 %v8744_v52  ;;  %5259 = vmatprep.subr.mxu1 %v10416_v56 }
 0x648   :  { %2485 = vmatpush1.msra.mxu0 %v8748_v37  ;;  %5260 = vmatpush3.msra.mxu1 %v8751_v7 }
 0x649   :  { %2486 = vmatprep.subr.mxu0 %v8754_v61  ;;  %5261 = vmatprep.subr.mxu1 %v10416_v56 }
 0x64a   :  { %2487 = vmatpush1.msra.mxu0 %v8758_v53  ;;  %5262 = vmatpush3.msra.mxu1 %v8761_v2 }
 0x64b   :  { %2488 = vmatprep.subr.mxu0 %v8764_v42  ;;  %5263 = vmatprep.subr.mxu1 %v10416_v56 }
 0x64c   :  { %2489 = vmatpush1.msra.mxu0 %v8768_v0  ;;  %5264 = vmatpush3.msra.mxu1 %v8771_v26  ;;  %v8788_v26 = vld [vmem:[#allocation5 + $0xc0] sm:$0xff]  ;;  %v8794_v0 = vld [vmem:[#allocation5 + $0xb0] sm:$0xff] }
 0x64d   :  { %2490 = vmatprep.subr.mxu0 %v8774_v31  ;;  %5265 = vmatprep.subr.mxu1 %v10416_v56  ;;  %10771 = vst [vmem:[#allocation80_spill] sm:$0xff] %v8788_v26  ;;  %v8791_v31 = vld [vmem:[#allocation5 + $0xd0] sm:$0xff]  ;;  %10773 = vst [vmem:[#allocation82_spill] sm:$0xff] %v8794_v0 }
 0x64e   :  { %2491 = vmatpush1.msra.mxu0 %v8778_v44  ;;  %5266 = vmatpush3.msra.mxu1 %v8781_v46  ;;  %10772 = vst [vmem:[#allocation81_spill] sm:$0xff] %v8791_v31  ;;  %v8798_v46 = vld [vmem:[#allocation5 + $0xa8] sm:$0xff]  ;;  %v8804_v44 = vld [vmem:[#allocation5 + $0x98] sm:$0xff] }
 0x64f   :  { %2492 = vmatprep.subr.mxu0 %v8784_v18  ;;  %5267 = vmatprep.subr.mxu1 %v10416_v56  ;;  %10774 = vst [vmem:[#allocation83_spill] sm:$0xff] %v8798_v46  ;;  %v8801_v18 = vld [vmem:[#allocation5 + $0xb8] sm:$0xff]  ;;  %10776 = vst [vmem:[#allocation85_spill] sm:$0xff] %v8804_v44 }
 0x650   :  { %2493 = vmatpush1.msra.mxu0 %v8788_v26  ;;  %5268 = vmatpush3.msra.mxu1 %v8791_v31  ;;  %10775 = vst [vmem:[#allocation84_spill] sm:$0xff] %v8801_v18  ;;  %v8808_v31 = vld [vmem:[#allocation5 + $0x90] sm:$0xff]  ;;  %v8814_v26 = vld [vmem:[#allocation5 + $0x80] sm:$0xff] }
 0x651   :  { %2494 = vmatprep.subr.mxu0 %v8794_v0  ;;  %5269 = vmatprep.subr.mxu1 %v10416_v56  ;;  %10777 = vst [vmem:[#allocation86_spill] sm:$0xff] %v8808_v31  ;;  %v8811_v0 = vld [vmem:[#allocation5 + $0xa0] sm:$0xff]  ;;  %10779 = vst [vmem:[#allocation88_spill] sm:$0xff] %v8814_v26 }
 0x652   :  { %2495 = vmatpush1.msra.mxu0 %v8798_v46  ;;  %5270 = vmatpush3.msra.mxu1 %v8801_v18  ;;  %10778 = vst [vmem:[#allocation87_spill] sm:$0xff] %v8811_v0  ;;  %v8818_v18 = vld [vmem:[#allocation5 + $0x78] sm:$0xff]  ;;  %v8824_v46 = vld [vmem:[#allocation5 + $0x68] sm:$0xff] }
 0x653   :  { %2496 = vmatprep.subr.mxu0 %v8804_v44  ;;  %5271 = vmatprep.subr.mxu1 %v10416_v56  ;;  %10780 = vst [vmem:[#allocation89_spill] sm:$0xff] %v8818_v18  ;;  %v8821_v44 = vld [vmem:[#allocation5 + $0x88] sm:$0xff]  ;;  %10782 = vst [vmem:[#allocation91_spill] sm:$0xff] %v8824_v46 }
 0x654   :  { %2497 = vmatpush1.msra.mxu0 %v8808_v31  ;;  %5272 = vmatpush3.msra.mxu1 %v8811_v0  ;;  %10781 = vst [vmem:[#allocation90_spill] sm:$0xff] %v8821_v44  ;;  %v8828_v0 = vld [vmem:[#allocation5 + $0x60] sm:$0xff]  ;;  %v8834_v31 = vld [vmem:[#allocation5 + $0x50] sm:$0xff] }
 0x655   :  { %2498 = vmatprep.subr.mxu0 %v8814_v26  ;;  %5273 = vmatprep.subr.mxu1 %v10416_v56  ;;  %10783 = vst [vmem:[#allocation92_spill] sm:$0xff] %v8828_v0  ;;  %v8831_v26 = vld [vmem:[#allocation5 + $0x70] sm:$0xff]  ;;  %10785 = vst [vmem:[#allocation94_spill] sm:$0xff] %v8834_v31 }
 0x656   :  { %2499 = vmatpush1.msra.mxu0 %v8818_v18  ;;  %5274 = vmatpush3.msra.mxu1 %v8821_v44  ;;  %10784 = vst [vmem:[#allocation93_spill] sm:$0xff] %v8831_v26  ;;  %v8838_v44 = vld [vmem:[#allocation5 + $0x48] sm:$0xff]  ;;  %v8844_v18 = vld [vmem:[#allocation5 + $0x38] sm:$0xff] }
 0x657   :  { %2500 = vmatprep.subr.mxu0 %v8824_v46  ;;  %5275 = vmatprep.subr.mxu1 %v10416_v56  ;;  %10786 = vst [vmem:[#allocation95_spill] sm:$0xff] %v8838_v44  ;;  %v8841_v46 = vld [vmem:[#allocation5 + $0x58] sm:$0xff]  ;;  %10788 = vst [vmem:[#allocation97_spill] sm:$0xff] %v8844_v18 }
 0x658   :  { %2501 = vmatpush1.msra.mxu0 %v8828_v0  ;;  %5276 = vmatpush3.msra.mxu1 %v8831_v26  ;;  %10787 = vst [vmem:[#allocation96_spill] sm:$0xff] %v8841_v46  ;;  %v8848_v26 = vld [vmem:[#allocation5 + $0x30] sm:$0xff]  ;;  %v8854_v0 = vld [vmem:[#allocation5 + $0x20] sm:$0xff] }
 0x659   :  { %2502 = vmatprep.subr.mxu0 %v8834_v31  ;;  %5277 = vmatprep.subr.mxu1 %v10416_v56  ;;  %v8851_v31 = vld [vmem:[#allocation5 + $0x40] sm:$0xff]  ;;  %10790 = vst [vmem:[#allocation99_spill] sm:$0xff] %v8854_v0 }
 0x65a   :  { %2503 = vmatpush1.msra.mxu0 %v8838_v44  ;;  %5278 = vmatpush3.msra.mxu1 %v8841_v46  ;;  %10789 = vst [vmem:[#allocation98_spill] sm:$0xff] %v8851_v31  ;;  %v8858_v46 = vld [vmem:[#allocation5 + $0x18] sm:$0xff]  ;;  %v8864_v44 = vld [vmem:[#allocation5 + $0x8] sm:$0xff] }
 0x65b   :  { %2504 = vmatprep.subr.mxu0 %v8844_v18  ;;  %5279 = vmatprep.subr.mxu1 %v10416_v56  ;;  %v8861_v18 = vld [vmem:[#allocation5 + $0x28] sm:$0xff] }
 0x65c   :  { %2505 = vmatpush1.msra.mxu0 %v8848_v26  ;;  %5280 = vmatpush3.msra.mxu1 %v8851_v31  ;;  %v8868_v31 = vld [vmem:[#allocation5] sm:$0xff] }
 0x65d   :  { %2506 = vmatprep.subr.mxu0 %v8854_v0  ;;  %5281 = vmatprep.subr.mxu1 %v10416_v56  ;;  %v8872_v0 = vld [vmem:[#allocation5 + $0x10] sm:$0xff] }
 0x65e   :  { %2507 = vmatpush1.msra.mxu0 %v8858_v46  ;;  %5282 = vmatpush3.msra.mxu1 %v8861_v18 }
 0x65f   :  { %2508 = vmatprep.subr.mxu0 %v8864_v44  ;;  %5283 = vmatprep.subr.mxu1 %v10416_v56 }
 0x660   :  { %2509 = vmatpush1.msra.mxu0 %v8868_v31  ;;  %2542 = vmatprep.mubr.f32.mxu0 %v10416_v56 }
 0x661   :  { %5284 = vmatpush3.msra.mxu1 %v8872_v0  ;;  %5285 = vmatprep.mubr.msk.f32.mxu1 %vm6376_vm0, %v10416_v56 }
 0x662   :  { %2543 = vmatmul.mubr.f32.vlgmr.msra.gmra.mxu0 %v8704_v47  ;;  %5286 = vmatmul.mubr.f32.vlgmr.msra.gmra.mxu1 %v8704_v47 }
 0x663   :  { %2644 = vmatprep.subr.mxu0 %v8223_v10  ;;  %5288 = vmatprep.subr.mxu1 %v10416_v56  ;;  %v10791_v10 = vld [vmem:[#allocation15_spill] sm:$0xff] }
 0x664   :  { %2645 = vmatpush1.msra.mxu0 %v8230_v13  ;;  %5289 = vmatpush3.msra.mxu1 %v8236_v33  ;;  %v10792_v13 = vld [vmem:[#allocation16_spill] sm:$0xff]  ;;  %v10793_v33 = vld [vmem:[#allocation17_spill] sm:$0xff] }
 0x665   :  { %2646 = vmatprep.subr.mxu0 %v8242_v34  ;;  %5290 = vmatprep.subr.mxu1 %v10416_v56  ;;  %v10794_v34 = vld [vmem:[#allocation18_spill] sm:$0xff] }
 0x666   :  { %2647 = vmatpush1.msra.mxu0 %v8249_v39  ;;  %5291 = vmatpush3.msra.mxu1 %v8255_v40  ;;  %v10795_v39 = vld [vmem:[#allocation19_spill] sm:$0xff]  ;;  %v10796_v40 = vld [vmem:[#allocation20_spill] sm:$0xff] }
 0x667   :  { %2648 = vmatprep.subr.mxu0 %v8261_v11  ;;  %5292 = vmatprep.subr.mxu1 %v10416_v56  ;;  %v10797_v11 = vld [vmem:[#allocation21_spill] sm:$0xff] }
 0x668   :  { %2649 = vmatpush1.msra.mxu0 %v8268_v12  ;;  %5293 = vmatpush3.msra.mxu1 %v8274_v14  ;;  %v10798_v12 = vld [vmem:[#allocation23_spill] sm:$0xff]  ;;  %v10799_v14 = vld [vmem:[#allocation22_spill] sm:$0xff] }
 0x669   :  { %2650 = vmatprep.subr.mxu0 %v8280_v15  ;;  %5294 = vmatprep.subr.mxu1 %v10416_v56  ;;  %v10800_v15 = vld [vmem:[#allocation24_spill] sm:$0xff] }
 0x66a   :  { %2651 = vmatpush1.msra.mxu0 %v8287_v16  ;;  %5295 = vmatpush3.msra.mxu1 %v8293_v17  ;;  %v10801_v16 = vld [vmem:[#allocation25_spill] sm:$0xff]  ;;  %v10802_v17 = vld [vmem:[#allocation26_spill] sm:$0xff] }
 0x66b   :  { %2652 = vmatprep.subr.mxu0 %v8299_v19  ;;  %5296 = vmatprep.subr.mxu1 %v10416_v56  ;;  %v10803_v19 = vld [vmem:[#allocation27_spill] sm:$0xff] }
 0x66c   :  { %2653 = vmatpush1.msra.mxu0 %v8306_v20  ;;  %5297 = vmatpush3.msra.mxu1 %v8312_v22  ;;  %v10804_v20 = vld [vmem:[#allocation28_spill] sm:$0xff]  ;;  %v10805_v22 = vld [vmem:[#allocation29_spill] sm:$0xff] }
 0x66d   :  { %2654 = vmatprep.subr.mxu0 %v8318_v23  ;;  %5298 = vmatprep.subr.mxu1 %v10416_v56  ;;  %v10806_v23 = vld [vmem:[#allocation30_spill] sm:$0xff] }
 0x66e   :  { %2655 = vmatpush1.msra.mxu0 %v8325_v24  ;;  %5299 = vmatpush3.msra.mxu1 %v8331_v21  ;;  %v10807_v24 = vld [vmem:[#allocation31_spill] sm:$0xff]  ;;  %v10808_v21 = vld [vmem:[#allocation32_spill] sm:$0xff] }
 0x66f   :  { %2656 = vmatprep.subr.mxu0 %v8337_v62  ;;  %5300 = vmatprep.subr.mxu1 %v10416_v56  ;;  %v10809_v62 = vld [vmem:[#allocation33_spill] sm:$0xff] }
 0x670   :  { %2657 = vmatpush1.msra.mxu0 %v8344_v43  ;;  %5301 = vmatpush3.msra.mxu1 %v8350_v48  ;;  %v10810_v43 = vld [vmem:[#allocation34_spill] sm:$0xff]  ;;  %v10811_v48 = vld [vmem:[#allocation35_spill] sm:$0xff] }
 0x671   :  { %2658 = vmatprep.subr.mxu0 %v8356_v60  ;;  %5302 = vmatprep.subr.mxu1 %v10416_v56  ;;  %v10812_v60 = vld [vmem:[#allocation36_spill] sm:$0xff] }
 0x672   :  { %2659 = vmatpush1.msra.mxu0 %v8363_v49  ;;  %5303 = vmatpush3.msra.mxu1 %v8369_v50  ;;  %v10813_v49 = vld [vmem:[#allocation37_spill] sm:$0xff]  ;;  %v10814_v50 = vld [vmem:[#allocation38_spill] sm:$0xff] }
 0x673   :  { %2660 = vmatprep.subr.mxu0 %v8375_v27  ;;  %5304 = vmatprep.subr.mxu1 %v10416_v56  ;;  %v10815_v27 = vld [vmem:[#allocation39_spill] sm:$0xff] }
 0x674   :  { %2661 = vmatpush1.msra.mxu0 %v8382_v28  ;;  %5305 = vmatpush3.msra.mxu1 %v8388_v29  ;;  %v10816_v28 = vld [vmem:[#allocation40_spill] sm:$0xff]  ;;  %v10817_v29 = vld [vmem:[#allocation41_spill] sm:$0xff] }
 0x675   :  { %2662 = vmatprep.subr.mxu0 %v8394_v30  ;;  %5306 = vmatprep.subr.mxu1 %v10416_v56  ;;  %v10818_v30 = vld [vmem:[#allocation42_spill] sm:$0xff] }
 0x676   :  { %2663 = vmatpush1.msra.mxu0 %v8401_v55  ;;  %5307 = vmatpush3.msra.mxu1 %v8407_v35  ;;  %v10819_v55 = vld [vmem:[#allocation43_spill] sm:$0xff]  ;;  %v10820_v35 = vld [vmem:[#allocation44_spill] sm:$0xff] }
 0x677   :  { %2664 = vmatprep.subr.mxu0 %v8413_v63  ;;  %5308 = vmatprep.subr.mxu1 %v10416_v56  ;;  %v10821_v63 = vld [vmem:[#allocation45_spill] sm:$0xff] }
 0x678   :  { %2665 = vmatpush1.msra.mxu0 %v8420_v41  ;;  %5309 = vmatpush3.msra.mxu1 %v8426_v36  ;;  %v10822_v41 = vld [vmem:[#allocation46_spill] sm:$0xff]  ;;  %v10823_v36 = vld [vmem:[#allocation47_spill] sm:$0xff] }
 0x679   :  { %2666 = vmatprep.subr.mxu0 %v8432_v1  ;;  %5310 = vmatprep.subr.mxu1 %v10416_v56  ;;  %v10824_v1 = vld [vmem:[#allocation48_spill] sm:$0xff] }
 0x67a   :  { %2667 = vmatpush1.msra.mxu0 %v8439_v3  ;;  %5311 = vmatpush3.msra.mxu1 %v8445_v5  ;;  %v10825_v3 = vld [vmem:[#allocation49_spill] sm:$0xff]  ;;  %v10826_v5 = vld [vmem:[#allocation50_spill] sm:$0xff] }
 0x67b   :  { %2668 = vmatprep.subr.mxu0 %v8451_v25  ;;  %5312 = vmatprep.subr.mxu1 %v10416_v56  ;;  %v10827_v25 = vld [vmem:[#allocation51_spill] sm:$0xff] }
 0x67c   :  { %2669 = vmatpush1.msra.mxu0 %v8458_v4  ;;  %5313 = vmatpush3.msra.mxu1 %v10791_v10  ;;  %v10828_v4 = vld [vmem:[#allocation52_spill] sm:$0xff]  ;;  %v10829_v10 = vld [vmem:[#allocation53_spill] sm:$0xff] }
 0x67d   :  { %2670 = vmatprep.subr.mxu0 %v10792_v13  ;;  %5314 = vmatprep.subr.mxu1 %v10416_v56  ;;  %v10830_v13 = vld [vmem:[#allocation54_spill] sm:$0xff] }
 0x67e   :  { %2671 = vmatpush1.msra.mxu0 %v10793_v33  ;;  %5315 = vmatpush3.msra.mxu1 %v10794_v34  ;;  %v10831_v33 = vld [vmem:[#allocation55_spill] sm:$0xff]  ;;  %v10832_v34 = vld [vmem:[#allocation56_spill] sm:$0xff] }
 0x67f   :  { %2672 = vmatprep.subr.mxu0 %v10795_v39  ;;  %5316 = vmatprep.subr.mxu1 %v10416_v56  ;;  %v10833_v39 = vld [vmem:[#allocation57_spill] sm:$0xff] }
 0x680   :  { %2673 = vmatpush1.msra.mxu0 %v10796_v40  ;;  %5317 = vmatpush3.msra.mxu1 %v10797_v11  ;;  %v10834_v40 = vld [vmem:[#allocation58_spill] sm:$0xff]  ;;  %v10835_v11 = vld [vmem:[#allocation59_spill] sm:$0xff] }
 0x681   :  { %2674 = vmatprep.subr.mxu0 %v10798_v12  ;;  %5318 = vmatprep.subr.mxu1 %v10416_v56  ;;  %v10836_v12 = vld [vmem:[#allocation60_spill] sm:$0xff] }
 0x682   :  { %2675 = vmatpush1.msra.mxu0 %v10799_v14  ;;  %2708 = vmatprep.mubr.f32.mxu0 %v10416_v56  ;;  %v10837_v14 = vld [vmem:[#allocation61_spill] sm:$0xff] }
 0x683   :  { %5319 = vmatpush3.msra.mxu1 %v10800_v15  ;;  %5320 = vmatprep.mubr.msk.f32.mxu1 %vm6376_vm0, %v10416_v56  ;;  %v10838_v15 = vld [vmem:[#allocation62_spill] sm:$0xff] }
 0x684   :  { %2709 = vmatmul.mubr.f32.vlgmr.msra.gmra.mxu0 %v8714_v45  ;;  %5321 = vmatmul.mubr.f32.vlgmr.msra.gmra.mxu1 %v8714_v45 }
 0x685   :  { %2812 = vmatprep.subr.mxu0 %v10801_v16  ;;  %5323 = vmatprep.subr.mxu1 %v10416_v56  ;;  %v10839_v16 = vld [vmem:[#allocation63_spill] sm:$0xff] }
 0x686   :  { %2813 = vmatpush1.msra.mxu0 %v10802_v17  ;;  %5324 = vmatpush3.msra.mxu1 %v10803_v19  ;;  %v10840_v17 = vld [vmem:[#allocation64_spill] sm:$0xff]  ;;  %v10841_v19 = vld [vmem:[#allocation65_spill] sm:$0xff] }
 0x687   :  { %2814 = vmatprep.subr.mxu0 %v10804_v20  ;;  %5325 = vmatprep.subr.mxu1 %v10416_v56  ;;  %v10842_v20 = vld [vmem:[#allocation66_spill] sm:$0xff] }
 0x688   :  { %2815 = vmatpush1.msra.mxu0 %v10805_v22  ;;  %5326 = vmatpush3.msra.mxu1 %v10806_v23  ;;  %v10843_v22 = vld [vmem:[#allocation67_spill] sm:$0xff]  ;;  %v10844_v23 = vld [vmem:[#allocation68_spill] sm:$0xff] }
 0x689   :  { %2816 = vmatprep.subr.mxu0 %v10807_v24  ;;  %5327 = vmatprep.subr.mxu1 %v10416_v56  ;;  %v10845_v24 = vld [vmem:[#allocation69_spill] sm:$0xff] }
 0x68a   :  { %2817 = vmatpush1.msra.mxu0 %v10808_v21  ;;  %5328 = vmatpush3.msra.mxu1 %v10809_v62  ;;  %v10846_v21 = vld [vmem:[#allocation70_spill] sm:$0xff]  ;;  %v10847_v62 = vld [vmem:[#allocation71_spill] sm:$0xff] }
 0x68b   :  { %2818 = vmatprep.subr.mxu0 %v10810_v43  ;;  %5329 = vmatprep.subr.mxu1 %v10416_v56  ;;  %v10848_v43 = vld [vmem:[#allocation72_spill] sm:$0xff] }
 0x68c   :  { %2819 = vmatpush1.msra.mxu0 %v10811_v48  ;;  %5330 = vmatpush3.msra.mxu1 %v10812_v60  ;;  %v10849_v48 = vld [vmem:[#allocation73_spill] sm:$0xff] }
 0x68d   :  { %2820 = vmatprep.subr.mxu0 %v10813_v49  ;;  %5331 = vmatprep.subr.mxu1 %v10416_v56 }
 0x68e   :  { %2821 = vmatpush1.msra.mxu0 %v10814_v50  ;;  %5332 = vmatpush3.msra.mxu1 %v10815_v27 }
 0x68f   :  { %2822 = vmatprep.subr.mxu0 %v10816_v28  ;;  %5333 = vmatprep.subr.mxu1 %v10416_v56  ;;  %v10850_v28 = vld [vmem:[#allocation13_spill] sm:$0xff] }
 0x690   :  { %2823 = vmatpush1.msra.mxu0 %v10817_v29  ;;  %5334 = vmatpush3.msra.mxu1 %v10818_v30 }
 0x691   :  { %2824 = vmatprep.subr.mxu0 %v10819_v55  ;;  %5335 = vmatprep.subr.mxu1 %v10416_v56 }
 0x692   :  { %2825 = vmatpush1.msra.mxu0 %v10820_v35  ;;  %5336 = vmatpush3.msra.mxu1 %v10821_v63 }
 0x693   :  { %2826 = vmatprep.subr.mxu0 %v10822_v41  ;;  %5337 = vmatprep.subr.mxu1 %v10416_v56 }
 0x694   :  { %2827 = vmatpush1.msra.mxu0 %v10823_v36  ;;  %5338 = vmatpush3.msra.mxu1 %v10824_v1  ;;  %v10851_v1 = vld [vmem:[#allocation14_spill] sm:$0xff] }
 0x695   :  { %2828 = vmatprep.subr.mxu0 %v10825_v3  ;;  %5339 = vmatprep.subr.mxu1 %v10416_v56 }
 0x696   :  { %2829 = vmatpush1.msra.mxu0 %v10826_v5  ;;  %5340 = vmatpush3.msra.mxu1 %v10827_v25 }
 0x697   :  { %2830 = vmatprep.subr.mxu0 %v10828_v4  ;;  %5341 = vmatprep.subr.mxu1 %v10416_v56 }
 0x698   :  { %2831 = vmatpush1.msra.mxu0 %v10829_v10  ;;  %5342 = vmatpush3.msra.mxu1 %v10830_v13 }
 0x699   :  { %2832 = vmatprep.subr.mxu0 %v10831_v33  ;;  %5343 = vmatprep.subr.mxu1 %v10416_v56 }
 0x69a   :  { %2833 = vmatpush1.msra.mxu0 %v10832_v34  ;;  %5344 = vmatpush3.msra.mxu1 %v10833_v39  ;;  %v4302_v34 = vld [vmem:[%s10005_s0 + $0x1e] sm:$0x3f] }
 0x69b   :  { %2834 = vmatprep.subr.mxu0 %v10834_v40  ;;  %5345 = vmatprep.subr.mxu1 %v10416_v56  ;;  %v9025_v39 = vld [vmem:[%s10011_s6] ss:$0 sm:$0xff] }
 0x69c   :  { %2835 = vmatpush1.msra.mxu0 %v10835_v11  ;;  %5346 = vmatpush3.msra.mxu1 %v10836_v12 }
 0x69d   :  { %2836 = vmatprep.subr.mxu0 %v10837_v14  ;;  %5347 = vmatprep.subr.mxu1 %v10416_v56 }
 0x69e   :  { %2837 = vmatpush1.msra.mxu0 %v10838_v15  ;;  %5348 = vmatpush3.msra.mxu1 %v10839_v16 }
 0x69f   :  { %2838 = vmatprep.subr.mxu0 %v10840_v17  ;;  %5349 = vmatprep.subr.mxu1 %v10416_v56 }
 0x6a0   :  { %2839 = vmatpush1.msra.mxu0 %v10841_v19  ;;  %5350 = vmatpush3.msra.mxu1 %v10842_v20 }
 0x6a1   :  { %2840 = vmatprep.subr.mxu0 %v10843_v22  ;;  %5351 = vmatprep.subr.mxu1 %v10416_v56 }
 0x6a2   :  { %2841 = vmatpush1.msra.mxu0 %v10844_v23  ;;  %5352 = vmatpush3.msra.mxu1 %v10845_v24  ;;  %v2793_v23 = vrot.slane %v4302_v34, 2 }
 0x6a3   :  { %2842 = vmatprep.subr.mxu0 %v10846_v21  ;;  %5353 = vmatprep.subr.mxu1 %v10416_v56 }
 0x6a4   :  { %2843 = vmatpush1.msra.mxu0 %v10847_v62  ;;  %5354 = vmatpush3.msra.mxu1 %v10848_v43 }
 0x6a5   :  { %2876 = vmatprep.mubr.f32.mxu0 %v10416_v56  ;;  %5355 = vmatprep.mubr.msk.f32.mxu1 %vm6376_vm0, %v10416_v56 }
 0x6a6   :  { %2953 = vmatprep.subr.mxu0 %v10849_v48  ;;  %5358 = vmatprep.subr.mxu1 %v10416_v56 }
 0x701   :  { %v2474_v60 = vpop.f32.mrf.mxu1  ;;  %v2403_v50 = vpop.f32.mrf.mxu0 }
 0x702   :  { %v2404_v29 = vadd.f32 %v2403_v50, %v10850_v28  ;;  %v2475_v15 = vadd.f32 %v2474_v60, %v7251_v32 }
 0x703   :  { %v5252_v49 = vpop.f32.mrf.mxu1  ;;  %v2405_v27 = vpop.f32.mrf.mxu0 }
 0x704   :  { %v2406_v3 = vadd.f32 %v2405_v27, %v10851_v1 }
 0x722   :  { %v2544_v30 = vpop.f32.mrf.mxu0  ;;  %v2615_v55 = vpop.f32.mrf.mxu1 }
 0x723   :  { %v2619_v35 = vadd.f32 %v2544_v30, %v2404_v29  ;;  %v2633_v40 = vadd.f32 %v9025_v39, %v2615_v55 }
 0x724   :  { %v5287_v63 = vpop.f32.mrf.mxu1  ;;  %v2546_v36 = vpop.f32.mrf.mxu0 }
 0x725   :  { %v4300_v41 = vmul.f32 -1.442695, %v2619_v35  ;;  %v2626_v5 = vadd.f32 %v2546_v36, %v2406_v3  ;;  %v2804_v63 = vrot.slane %v4302_v34, 4 }
 0x727   :  { %5773 = vpow2.f32 %v4300_v41  ;;  %v4301_v25 = vmul.f32 -1.442695, %v2626_v5 }
 0x729   :  { %5775 = vpow2.f32 %v4301_v25 }
 0x734   :  { %v5774_v4 = vpop.eup %5773 }
 0x735   :  { %v2623_v10 = vadd.f32 1.0, %v5774_v4 }
 0x736   :  { %v5776_v13 = vpop.eup %5775 }
 0x737   :  { %5777 = vrcp.f32 %v2623_v10  ;;  %v2630_v33 = vadd.f32 1.0, %v5776_v13 }
 0x739   :  { %5779 = vrcp.f32 %v2630_v33 }
 0x744   :  { %v5778_v11 = vpop.eup %5777  ;;  %v2710_v12 = vpop.f32.mrf.mxu0 }
 0x745   :  { %v2781_v14 = vpop.f32.mrf.mxu1  ;;  %v2634_v16 = vmul.f32 %v5778_v11, %v2633_v40  ;;  %v2785_v17 = vadd.f32 %v4302_v34, %v2710_v12  ;;  %v10869_v34 = vld [vmem:[#allocation91_spill] sm:$0xff]  ;;  %v10870_v40 = vld [vmem:[#allocation92_spill] sm:$0xff]  ;;  %v10871_v11 = vld [vmem:[#allocation93_spill] sm:$0xff] }
 0x746   :  { %v2712_v24 = vpop.f32.mrf.mxu0  ;;  %v5780_v43 = vpop.eup %5779  ;;  %v2802_v41 = vadd.f32 %v8710_v38, %v2781_v14  ;;  %v10852_v38 = vld [vmem:[#allocation74_spill] sm:$0xff]  ;;  %v10873_v14 = vld [vmem:[#allocation95_spill] sm:$0xff] }
 0x747   :  { %v5322_v19 = vpop.f32.mrf.mxu1  ;;  %v2635_v20 = vadd.f32 %v2634_v16, %v2475_v15  ;;  %v4303_v22 = vmul.f32 -1.442695, %v2785_v17  ;;  %v2795_v21 = vadd.f32 %v2793_v23, %v2712_v24  ;;  %v2637_v48 = vsub.f32 1.0, %v5780_v43  ;;  %v10872_v12 = vld [vmem:[#allocation94_spill] sm:$0xff]  ;;  %v10874_v15 = vld [vmem:[#allocation96_spill] sm:$0xff]  ;;  %v10875_v16 = vld [vmem:[#allocation97_spill] sm:$0xff] }
 0x748   :  { %v2639_v60 = vmul.f32 %v5780_v43, %v8704_v47  ;;  %v10876_v17 = vld [vmem:[#allocation98_spill] sm:$0xff]  ;;  %v10877_v19 = vld [vmem:[#allocation99_spill] sm:$0xff]  ;;  %v9160_v23 = vld [vmem:[%s10006_s1 + $0x148] sm:$0xff] }
 0x749   :  { %5781 = vtanh.f32 %v2635_v20  ;;  %v4304_v62 = vmul.f32 -1.442695, %v2795_v21  ;;  %v9147_v20 = vld [vmem:[%s10006_s1 + $0x140] sm:$0xff]  ;;  %v9166_v24 = vld [vmem:[%s10006_s1 + $0x128] sm:$0xff]  ;;  %v9185_v43 = vld [vmem:[%s10006_s1 + $0x110] sm:$0xff] }
 0x74a   :  { %5783 = vpow2.f32 %v4303_v22  ;;  %v9154_v22 = vld [vmem:[%s10006_s1 + $0x138] sm:$0xff]  ;;  %v9173_v21 = vld [vmem:[%s10006_s1 + $0x120] sm:$0xff] }
 0x74b   :  { %5785 = vpow2.f32 %v4304_v62  ;;  %v9179_v62 = vld [vmem:[%s10006_s1 + $0x130] sm:$0xff] }
 0x756   :  { %v5782_v49 = vpop.eup %5781 }
 0x757   :  { %v5784_v50 = vpop.eup %5783  ;;  %v2638_v27 = vmul.f32 %v5782_v49, %v2637_v48  ;;  %v9192_v48 = vld [vmem:[%s10006_s1 + $0x108] sm:$0xff]  ;;  %v9198_v49 = vld [vmem:[%s10006_s1 + $0x118] sm:$0xff] }
 0x758   :  { %v2789_v29 = vadd.f32 1.0, %v5784_v50  ;;  %v5786_v55 = vpop.eup %5785  ;;  %v9204_v50 = vld [vmem:[%s10006_s1 + $0xf8] sm:$0xff] }
 0x759   :  { %v9030_v30 = vadd.f32 %v2639_v60, %v2638_v27  ;;  %v2799_v35 = vadd.f32 1.0, %v5786_v55  ;;  %v9211_v27 = vld [vmem:[%s10006_s1 + $0xf0] sm:$0xff]  ;;  %v9217_v60 = vld [vmem:[%s10006_s1 + $0x100] sm:$0xff]  ;;  %v9230_v55 = vld [vmem:[%s10006_s1 + $0xd8] sm:$0xff] }
 0x75a   :  { %5787 = vrcp.f32 %v2789_v29  ;;  %v9223_v29 = vld [vmem:[%s10006_s1 + $0xe0] sm:$0xff] }
 0x75b   :  { %2641 = vst [vmem:[#allocation2 + $0x8] sm:$0x3] %v9030_v30  ;;  %5789 = vrcp.f32 %v2799_v35  ;;  %v9236_v35 = vld [vmem:[%s10006_s1 + $0xe8] sm:$0xff] }
 0x767   :  { %v5788_v36 = vpop.eup %5787 }
 0x768   :  { %v2803_v3 = vmul.f32 %v5788_v36, %v2802_v41  ;;  %v5790_v25 = vpop.eup %5789  ;;  %v9249_v41 = vld [vmem:[%s10006_s1 + $0xc0] sm:$0xff]  ;;  %v9255_v36 = vld [vmem:[%s10006_s1 + $0xd0] sm:$0xff] }
 0x769   :  { %v2808_v4 = vsub.f32 1.0, %v5790_v25  ;;  %v2810_v13 = vmul.f32 %v5790_v25, %v8714_v45  ;;  %v10853_v45 = vld [vmem:[#allocation75_spill] sm:$0xff]  ;;  %v9274_v25 = vld [vmem:[%s10006_s1 + $0xb8] sm:$0xff] }
 0x76a   :  { %v2806_v5 = vadd.f32 %v2804_v63, %v2803_v3  ;;  %v9242_v63 = vld [vmem:[%s10006_s1 + $0xc8] sm:$0xff]  ;;  %v9261_v3 = vld [vmem:[%s10006_s1 + $0xb0] sm:$0xff] }
 0x76c   :  { %5791 = vtanh.f32 %v2806_v5  ;;  %v9268_v5 = vld [vmem:[%s10006_s1 + $0xa8] sm:$0xff] }
 0x779   :  { %v5792_v10 = vpop.eup %5791 }
 0x77a   :  { %v2809_v47 = vmul.f32 %v5792_v10, %v2808_v4  ;;  %v9280_v4 = vld [vmem:[%s10006_s1 + $0x98] sm:$0xff]  ;;  %v9287_v10 = vld [vmem:[%s10006_s1 + $0x90] sm:$0xff] }
 0x77c   :  { %v9035_v33 = vadd.f32 %v2810_v13, %v2809_v47  ;;  %v9293_v47 = vld [vmem:[%s10006_s1 + $0xa0] sm:$0xff] }
 0x77d   :  { %v9299_v13 = vld [vmem:[%s10006_s1 + $0x80] sm:$0xff] }
 0x77e   :  { %2877 = vmatmul.mubr.f32.vlgmr.msra.gmra.mxu0 %v9035_v33  ;;  %5356 = vmatmul.mubr.f32.vlgmr.msra.gmra.mxu1 %v9035_v33 }
 0x77f   :  { %2954 = vmatpush1.msra.mxu0 %v8718_v51  ;;  %5359 = vmatpush3.msra.mxu1 %v8721_v6  ;;  %v10854_v51 = vld [vmem:[#allocation76_spill] sm:$0xff]  ;;  %v10855_v6 = vld [vmem:[#allocation77_spill] sm:$0xff] }
 0x780   :  { %2955 = vmatprep.subr.mxu0 %v8724_v9  ;;  %5360 = vmatprep.subr.mxu1 %v10416_v56  ;;  %v10856_v9 = vld [vmem:[#allocation78_spill] sm:$0xff] }
 0x781   :  { %2956 = vmatpush1.msra.mxu0 %v8728_v54  ;;  %5361 = vmatpush3.msra.mxu1 %v8731_v8  ;;  %v10857_v54 = vld [vmem:[#allocation79_spill] sm:$0xff]  ;;  %v10858_v8 = vld [vmem:[#allocation80_spill] sm:$0xff] }
 0x782   :  { %2957 = vmatprep.subr.mxu0 %v8734_v58  ;;  %5362 = vmatprep.subr.mxu1 %v10416_v56  ;;  %v10859_v58 = vld [vmem:[#allocation81_spill] sm:$0xff] }
 0x783   :  { %2958 = vmatpush1.msra.mxu0 %v8738_v59  ;;  %5363 = vmatpush3.msra.mxu1 %v8741_v57  ;;  %v10860_v59 = vld [vmem:[#allocation82_spill] sm:$0xff]  ;;  %v10861_v57 = vld [vmem:[#allocation83_spill] sm:$0xff] }
 0x784   :  { %2959 = vmatprep.subr.mxu0 %v8744_v52  ;;  %5364 = vmatprep.subr.mxu1 %v10416_v56  ;;  %v10862_v52 = vld [vmem:[#allocation84_spill] sm:$0xff] }
 0x785   :  { %2960 = vmatpush1.msra.mxu0 %v8748_v37  ;;  %5365 = vmatpush3.msra.mxu1 %v8751_v7  ;;  %v10863_v37 = vld [vmem:[#allocation85_spill] sm:$0xff]  ;;  %v10864_v7 = vld [vmem:[#allocation86_spill] sm:$0xff] }
 0x786   :  { %2961 = vmatprep.subr.mxu0 %v8754_v61  ;;  %5366 = vmatprep.subr.mxu1 %v10416_v56  ;;  %v10865_v61 = vld [vmem:[#allocation87_spill] sm:$0xff] }
 0x787   :  { %2962 = vmatpush1.msra.mxu0 %v8758_v53  ;;  %5367 = vmatpush3.msra.mxu1 %v8761_v2  ;;  %v10866_v53 = vld [vmem:[#allocation88_spill] sm:$0xff]  ;;  %v10867_v2 = vld [vmem:[#allocation89_spill] sm:$0xff] }
 0x788   :  { %2963 = vmatprep.subr.mxu0 %v8764_v42  ;;  %5368 = vmatprep.subr.mxu1 %v10416_v56  ;;  %v10868_v42 = vld [vmem:[#allocation90_spill] sm:$0xff] }
 0x789   :  { %2964 = vmatpush1.msra.mxu0 %v10852_v38  ;;  %5369 = vmatpush3.msra.mxu1 %v10853_v45  ;;  %v9306_v38 = vld [vmem:[%s10006_s1 + $0x78] sm:$0xff]  ;;  %v9312_v45 = vld [vmem:[%s10006_s1 + $0x88] sm:$0xff] }
 0x78a   :  { %2965 = vmatprep.subr.mxu0 %v10854_v51  ;;  %5370 = vmatprep.subr.mxu1 %v10416_v56  ;;  %v9318_v51 = vld [vmem:[%s10006_s1 + $0x68] sm:$0xff] }
 0x78b   :  { %2966 = vmatpush1.msra.mxu0 %v10855_v6  ;;  %5371 = vmatpush3.msra.mxu1 %v10856_v9  ;;  %v9325_v6 = vld [vmem:[%s10006_s1 + $0x60] sm:$0xff]  ;;  %v9331_v9 = vld [vmem:[%s10006_s1 + $0x70] sm:$0xff] }
 0x78c   :  { %2967 = vmatprep.subr.mxu0 %v10857_v54  ;;  %5372 = vmatprep.subr.mxu1 %v10416_v56  ;;  %v9337_v54 = vld [vmem:[%s10006_s1 + $0x50] sm:$0xff] }
 0x78d   :  { %2968 = vmatpush1.msra.mxu0 %v10858_v8  ;;  %5373 = vmatpush3.msra.mxu1 %v10859_v58  ;;  %v9344_v8 = vld [vmem:[%s10006_s1 + $0x48] sm:$0xff]  ;;  %v9350_v58 = vld [vmem:[%s10006_s1 + $0x58] sm:$0xff] }
 0x78e   :  { %2969 = vmatprep.subr.mxu0 %v10860_v59  ;;  %5374 = vmatprep.subr.mxu1 %v10416_v56  ;;  %10878 = vst [vmem:[#allocation15_spill] sm:$0xff] %v9350_v58  ;;  %v9356_v59 = vld [vmem:[%s10006_s1 + $0x38] sm:$0xff] }
 0x78f   :  { %2970 = vmatpush1.msra.mxu0 %v10861_v57  ;;  %5375 = vmatpush3.msra.mxu1 %v10862_v52  ;;  %10879 = vst [vmem:[#allocation16_spill] sm:$0xff] %v9356_v59  ;;  %v9363_v57 = vld [vmem:[%s10006_s1 + $0x30] sm:$0xff]  ;;  %v9369_v52 = vld [vmem:[%s10006_s1 + $0x40] sm:$0xff] }
 0x790   :  { %2971 = vmatprep.subr.mxu0 %v10863_v37  ;;  %5376 = vmatprep.subr.mxu1 %v10416_v56  ;;  %10880 = vst [vmem:[#allocation17_spill] sm:$0xff] %v9363_v57  ;;  %10881 = vst [vmem:[#allocation18_spill] sm:$0xff] %v9369_v52  ;;  %v9375_v37 = vld [vmem:[%s10006_s1 + $0x20] sm:$0xff] }
 0x791   :  { %2972 = vmatpush1.msra.mxu0 %v10864_v7  ;;  %5377 = vmatpush3.msra.mxu1 %v10865_v61  ;;  %10882 = vst [vmem:[#allocation19_spill] sm:$0xff] %v9375_v37  ;;  %v9382_v7 = vld [vmem:[%s10006_s1 + $0x18] sm:$0xff]  ;;  %v9388_v61 = vld [vmem:[%s10006_s1 + $0x28] sm:$0xff] }
 0x792   :  { %2973 = vmatprep.subr.mxu0 %v10866_v53  ;;  %5378 = vmatprep.subr.mxu1 %v10416_v56  ;;  %10883 = vst [vmem:[#allocation20_spill] sm:$0xff] %v9382_v7  ;;  %10884 = vst [vmem:[#allocation21_spill] sm:$0xff] %v9388_v61  ;;  %v9394_v53 = vld [vmem:[%s10006_s1 + $0x8] sm:$0xff] }
 0x793   :  { %2974 = vmatpush1.msra.mxu0 %v10867_v2  ;;  %5379 = vmatpush3.msra.mxu1 %v10868_v42  ;;  %10885 = vst [vmem:[#allocation23_spill] sm:$0xff] %v9394_v53  ;;  %v9401_v2 = vld [vmem:[%s10006_s1] sm:$0xff]  ;;  %v9408_v42 = vld [vmem:[%s10006_s1 + $0x10] sm:$0xff] }
 0x794   :  { %2975 = vmatprep.subr.mxu0 %v10869_v34  ;;  %5380 = vmatprep.subr.mxu1 %v10416_v56  ;;  %10886 = vst [vmem:[#allocation22_spill] sm:$0xff] %v9401_v2  ;;  %10887 = vst [vmem:[#allocation24_spill] sm:$0xff] %v9408_v42  ;;  %v9415_v34 = vld [vmem:[#allocation3 + $0x170] sm:$0xff] }
 0x795   :  { %2976 = vmatpush1.msra.mxu0 %v10870_v40  ;;  %5381 = vmatpush3.msra.mxu1 %v10871_v11  ;;  %10888 = vst [vmem:[#allocation25_spill] sm:$0xff] %v9415_v34  ;;  %v9419_v40 = vld [vmem:[#allocation3 + $0x168] sm:$0xff]  ;;  %v9422_v11 = vld [vmem:[#allocation3 + $0x178] sm:$0xff] }
 0x796   :  { %2977 = vmatprep.subr.mxu0 %v10872_v12  ;;  %5382 = vmatprep.subr.mxu1 %v10416_v56  ;;  %10889 = vst [vmem:[#allocation26_spill] sm:$0xff] %v9419_v40  ;;  %10890 = vst [vmem:[#allocation27_spill] sm:$0xff] %v9422_v11  ;;  %v9425_v12 = vld [vmem:[#allocation3 + $0x158] sm:$0xff] }
 0x797   :  { %2978 = vmatpush1.msra.mxu0 %v10873_v14  ;;  %5383 = vmatpush3.msra.mxu1 %v10874_v15  ;;  %10891 = vst [vmem:[#allocation28_spill] sm:$0xff] %v9425_v12  ;;  %v9429_v14 = vld [vmem:[#allocation3 + $0x150] sm:$0xff]  ;;  %v9432_v15 = vld [vmem:[#allocation3 + $0x160] sm:$0xff] }
 0x798   :  { %2979 = vmatprep.subr.mxu0 %v10875_v16  ;;  %5384 = vmatprep.subr.mxu1 %v10416_v56  ;;  %10892 = vst [vmem:[#allocation29_spill] sm:$0xff] %v9429_v14  ;;  %10893 = vst [vmem:[#allocation30_spill] sm:$0xff] %v9432_v15  ;;  %v9435_v16 = vld [vmem:[#allocation3 + $0x140] sm:$0xff] }
 0x799   :  { %2980 = vmatpush1.msra.mxu0 %v8848_v26  ;;  %5385 = vmatpush3.msra.mxu1 %v10876_v17  ;;  %v9109_v26 = vld [vmem:[%s10006_s1 + $0x170] sm:$0xff]  ;;  %10894 = vst [vmem:[#allocation31_spill] sm:$0xff] %v9435_v16  ;;  %v9439_v17 = vld [vmem:[#allocation3 + $0x138] sm:$0xff] }
 0x79a   :  { %2981 = vmatprep.subr.mxu0 %v10877_v19  ;;  %5386 = vmatprep.subr.mxu1 %v10416_v56  ;;  %10895 = vst [vmem:[#allocation32_spill] sm:$0xff] %v9439_v17  ;;  %v9442_v19 = vld [vmem:[#allocation3 + $0x148] sm:$0xff] }
 0x79b   :  { %2982 = vmatpush1.msra.mxu0 %v8858_v46  ;;  %5387 = vmatpush3.msra.mxu1 %v8861_v18  ;;  %v9135_v46 = vld [vmem:[%s10006_s1 + $0x150] sm:$0xff]  ;;  %v9141_v18 = vld [vmem:[%s10006_s1 + $0x160] sm:$0xff]  ;;  %10896 = vst [vmem:[#allocation33_spill] sm:$0xff] %v9442_v19 }
 0x79c   :  { %2983 = vmatprep.subr.mxu0 %v8864_v44  ;;  %5388 = vmatprep.subr.mxu1 %v10416_v56  ;;  %v9128_v44 = vld [vmem:[%s10006_s1 + $0x158] sm:$0xff] }
 0x79d   :  { %2984 = vmatpush1.msra.mxu0 %v8868_v31  ;;  %3017 = vmatprep.mubr.f32.mxu0 %v10416_v56  ;;  %v9122_v31 = vld [vmem:[%s10006_s1 + $0x178] sm:$0xff] }
 0x79e   :  { %5389 = vmatpush3.msra.mxu1 %v8872_v0  ;;  %5390 = vmatprep.mubr.msk.f32.mxu1 %vm6376_vm0, %v10416_v56  ;;  %v9116_v0 = vld [vmem:[%s10006_s1 + $0x168] sm:$0xff] }
 0x79f   :  { %3018 = vmatmul.mubr.f32.vlgmr.msra.gmra.mxu0 %v9030_v30  ;;  %5391 = vmatmul.mubr.f32.vlgmr.msra.gmra.mxu1 %v9030_v30 }
 0x7a0   :  { %3119 = vmatprep.subr.mxu0 %v9109_v26  ;;  %5393 = vmatprep.subr.mxu1 %v10416_v56 }
 0x7a1   :  { %3120 = vmatpush1.msra.mxu0 %v9116_v0  ;;  %5394 = vmatpush3.msra.mxu1 %v9122_v31 }
 0x7a2   :  { %3121 = vmatprep.subr.mxu0 %v9128_v44  ;;  %5395 = vmatprep.subr.mxu1 %v10416_v56 }
 0x7a3   :  { %3122 = vmatpush1.msra.mxu0 %v9135_v46  ;;  %5396 = vmatpush3.msra.mxu1 %v9141_v18 }
 0x7a4   :  { %3123 = vmatprep.subr.mxu0 %v9147_v20  ;;  %5397 = vmatprep.subr.mxu1 %v10416_v56 }
 0x7a5   :  { %3124 = vmatpush1.msra.mxu0 %v9154_v22  ;;  %5398 = vmatpush3.msra.mxu1 %v9160_v23 }
 0x7a6   :  { %3125 = vmatprep.subr.mxu0 %v9166_v24  ;;  %5399 = vmatprep.subr.mxu1 %v10416_v56 }
 0x7a7   :  { %3126 = vmatpush1.msra.mxu0 %v9173_v21  ;;  %5400 = vmatpush3.msra.mxu1 %v9179_v62 }
 0x7a8   :  { %3127 = vmatprep.subr.mxu0 %v9185_v43  ;;  %5401 = vmatprep.subr.mxu1 %v10416_v56 }
 0x7a9   :  { %3128 = vmatpush1.msra.mxu0 %v9192_v48  ;;  %5402 = vmatpush3.msra.mxu1 %v9198_v49 }
 0x7aa   :  { %3129 = vmatprep.subr.mxu0 %v9204_v50  ;;  %5403 = vmatprep.subr.mxu1 %v10416_v56 }
 0x7ab   :  { %3130 = vmatpush1.msra.mxu0 %v9211_v27  ;;  %5404 = vmatpush3.msra.mxu1 %v9217_v60 }
 0x7ac   :  { %3131 = vmatprep.subr.mxu0 %v9223_v29  ;;  %5405 = vmatprep.subr.mxu1 %v10416_v56 }
 0x7ad   :  { %3132 = vmatpush1.msra.mxu0 %v9230_v55  ;;  %5406 = vmatpush3.msra.mxu1 %v9236_v35 }
 0x7ae   :  { %3133 = vmatprep.subr.mxu0 %v9242_v63  ;;  %5407 = vmatprep.subr.mxu1 %v10416_v56 }
 0x7af   :  { %3134 = vmatpush1.msra.mxu0 %v9249_v41  ;;  %5408 = vmatpush3.msra.mxu1 %v9255_v36 }
 0x7b0   :  { %3135 = vmatprep.subr.mxu0 %v9261_v3  ;;  %5409 = vmatprep.subr.mxu1 %v10416_v56 }
 0x7b1   :  { %3136 = vmatpush1.msra.mxu0 %v9268_v5  ;;  %5410 = vmatpush3.msra.mxu1 %v9274_v25 }
 0x7b2   :  { %3137 = vmatprep.subr.mxu0 %v9280_v4  ;;  %5411 = vmatprep.subr.mxu1 %v10416_v56 }
 0x7b3   :  { %3138 = vmatpush1.msra.mxu0 %v9287_v10  ;;  %5412 = vmatpush3.msra.mxu1 %v9293_v47 }
 0x7b4   :  { %3139 = vmatprep.subr.mxu0 %v9299_v13  ;;  %5413 = vmatprep.subr.mxu1 %v10416_v56 }
 0x7b5   :  { %3140 = vmatpush1.msra.mxu0 %v9306_v38  ;;  %5414 = vmatpush3.msra.mxu1 %v9312_v45 }
 0x7b6   :  { %3141 = vmatprep.subr.mxu0 %v9318_v51  ;;  %5415 = vmatprep.subr.mxu1 %v10416_v56 }
 0x7b7   :  { %3142 = vmatpush1.msra.mxu0 %v9325_v6  ;;  %5416 = vmatpush3.msra.mxu1 %v9331_v9 }
 0x7b8   :  { %3143 = vmatprep.subr.mxu0 %v9337_v54  ;;  %5417 = vmatprep.subr.mxu1 %v10416_v56 }
 0x7b9   :  { %3144 = vmatpush1.msra.mxu0 %v9344_v8  ;;  %5418 = vmatpush3.msra.mxu1 %v9350_v58 }
 0x7ba   :  { %3145 = vmatprep.subr.mxu0 %v9356_v59  ;;  %5419 = vmatprep.subr.mxu1 %v10416_v56 }
 0x7bb   :  { %3146 = vmatpush1.msra.mxu0 %v9363_v57  ;;  %5420 = vmatpush3.msra.mxu1 %v9369_v52 }
 0x7bc   :  { %3147 = vmatprep.subr.mxu0 %v9375_v37  ;;  %5421 = vmatprep.subr.mxu1 %v10416_v56 }
 0x7bd   :  { %3148 = vmatpush1.msra.mxu0 %v9382_v7  ;;  %5422 = vmatpush3.msra.mxu1 %v9388_v61 }
 0x7be   :  { %3149 = vmatprep.subr.mxu0 %v9394_v53  ;;  %5423 = vmatprep.subr.mxu1 %v10416_v56 }
 0x7bf   :  { %3150 = vmatpush1.msra.mxu0 %v9401_v2  ;;  %3183 = vmatprep.mubr.f32.mxu0 %v10416_v56 }
 0x7c0   :  { %5424 = vmatpush3.msra.mxu1 %v9408_v42  ;;  %5425 = vmatprep.mubr.msk.f32.mxu1 %vm6376_vm0, %v10416_v56 }
 0x7c1   :  { %3184 = vmatmul.mubr.f32.vlgmr.msra.gmra.mxu0 %v9035_v33  ;;  %5426 = vmatmul.mubr.f32.vlgmr.msra.gmra.mxu1 %v9035_v33 }
 0x7c2   :  { %3287 = vmatprep.subr.mxu0 %v9415_v34  ;;  %5428 = vmatprep.subr.mxu1 %v10416_v56 }
 0x7c3   :  { %3288 = vmatpush1.msra.mxu0 %v9419_v40  ;;  %5429 = vmatpush3.msra.mxu1 %v9422_v11 }
 0x7c4   :  { %3289 = vmatprep.subr.mxu0 %v9425_v12  ;;  %5430 = vmatprep.subr.mxu1 %v10416_v56  ;;  %v9445_v12 = vld [vmem:[#allocation3 + $0x128] sm:$0xff] }
 0x7c5   :  { %3290 = vmatpush1.msra.mxu0 %v9429_v14  ;;  %5431 = vmatpush3.msra.mxu1 %v9432_v15  ;;  %10897 = vst [vmem:[#allocation34_spill] sm:$0xff] %v9445_v12  ;;  %v9449_v15 = vld [vmem:[#allocation3 + $0x120] sm:$0xff]  ;;  %v9455_v14 = vld [vmem:[#allocation3 + $0x110] sm:$0xff] }
 0x7c6   :  { %3291 = vmatprep.subr.mxu0 %v9435_v16  ;;  %5432 = vmatprep.subr.mxu1 %v10416_v56  ;;  %10898 = vst [vmem:[#allocation35_spill] sm:$0xff] %v9449_v15  ;;  %v9452_v16 = vld [vmem:[#allocation3 + $0x130] sm:$0xff]  ;;  %10900 = vst [vmem:[#allocation37_spill] sm:$0xff] %v9455_v14 }
 0x7c7   :  { %3292 = vmatpush1.msra.mxu0 %v9439_v17  ;;  %5433 = vmatpush3.msra.mxu1 %v9442_v19  ;;  %10899 = vst [vmem:[#allocation36_spill] sm:$0xff] %v9452_v16  ;;  %v9459_v19 = vld [vmem:[#allocation3 + $0x108] sm:$0xff]  ;;  %v9465_v17 = vld [vmem:[#allocation3 + $0xf8] sm:$0xff] }
 0x7c8   :  { %3293 = vmatprep.subr.mxu0 %v9445_v12  ;;  %5434 = vmatprep.subr.mxu1 %v10416_v56  ;;  %10901 = vst [vmem:[#allocation38_spill] sm:$0xff] %v9459_v19  ;;  %v9462_v12 = vld [vmem:[#allocation3 + $0x118] sm:$0xff]  ;;  %10903 = vst [vmem:[#allocation40_spill] sm:$0xff] %v9465_v17 }
 0x7c9   :  { %3294 = vmatpush1.msra.mxu0 %v9449_v15  ;;  %5435 = vmatpush3.msra.mxu1 %v9452_v16  ;;  %10902 = vst [vmem:[#allocation39_spill] sm:$0xff] %v9462_v12  ;;  %v9469_v16 = vld [vmem:[#allocation3 + $0xf0] sm:$0xff]  ;;  %v9475_v15 = vld [vmem:[#allocation3 + $0xe0] sm:$0xff] }
 0x7ca   :  { %3295 = vmatprep.subr.mxu0 %v9455_v14  ;;  %5436 = vmatprep.subr.mxu1 %v10416_v56  ;;  %10904 = vst [vmem:[#allocation41_spill] sm:$0xff] %v9469_v16  ;;  %v9472_v14 = vld [vmem:[#allocation3 + $0x100] sm:$0xff]  ;;  %10906 = vst [vmem:[#allocation43_spill] sm:$0xff] %v9475_v15 }
 0x7cb   :  { %3296 = vmatpush1.msra.mxu0 %v9459_v19  ;;  %5437 = vmatpush3.msra.mxu1 %v9462_v12  ;;  %10905 = vst [vmem:[#allocation42_spill] sm:$0xff] %v9472_v14  ;;  %v9479_v12 = vld [vmem:[#allocation3 + $0xd8] sm:$0xff]  ;;  %v9485_v19 = vld [vmem:[#allocation3 + $0xc8] sm:$0xff] }
 0x7cc   :  { %3297 = vmatprep.subr.mxu0 %v9465_v17  ;;  %5438 = vmatprep.subr.mxu1 %v10416_v56  ;;  %10907 = vst [vmem:[#allocation44_spill] sm:$0xff] %v9479_v12  ;;  %v9482_v17 = vld [vmem:[#allocation3 + $0xe8] sm:$0xff]  ;;  %10909 = vst [vmem:[#allocation46_spill] sm:$0xff] %v9485_v19 }
 0x7cd   :  { %3298 = vmatpush1.msra.mxu0 %v9469_v16  ;;  %5439 = vmatpush3.msra.mxu1 %v9472_v14  ;;  %10908 = vst [vmem:[#allocation45_spill] sm:$0xff] %v9482_v17  ;;  %v9489_v14 = vld [vmem:[#allocation3 + $0xc0] sm:$0xff]  ;;  %v9495_v16 = vld [vmem:[#allocation3 + $0xb0] sm:$0xff] }
 0x7ce   :  { %3299 = vmatprep.subr.mxu0 %v9475_v15  ;;  %5440 = vmatprep.subr.mxu1 %v10416_v56  ;;  %10910 = vst [vmem:[#allocation47_spill] sm:$0xff] %v9489_v14  ;;  %v9492_v15 = vld [vmem:[#allocation3 + $0xd0] sm:$0xff]  ;;  %10912 = vst [vmem:[#allocation49_spill] sm:$0xff] %v9495_v16 }
 0x7cf   :  { %3300 = vmatpush1.msra.mxu0 %v9479_v12  ;;  %5441 = vmatpush3.msra.mxu1 %v9482_v17  ;;  %10911 = vst [vmem:[#allocation48_spill] sm:$0xff] %v9492_v15  ;;  %v9499_v17 = vld [vmem:[#allocation3 + $0xa8] sm:$0xff]  ;;  %v9505_v12 = vld [vmem:[#allocation3 + $0x98] sm:$0xff] }
 0x7d0   :  { %3301 = vmatprep.subr.mxu0 %v9485_v19  ;;  %5442 = vmatprep.subr.mxu1 %v10416_v56  ;;  %10913 = vst [vmem:[#allocation50_spill] sm:$0xff] %v9499_v17  ;;  %v9502_v19 = vld [vmem:[#allocation3 + $0xb8] sm:$0xff]  ;;  %10915 = vst [vmem:[#allocation52_spill] sm:$0xff] %v9505_v12 }
 0x7d1   :  { %3302 = vmatpush1.msra.mxu0 %v9489_v14  ;;  %5443 = vmatpush3.msra.mxu1 %v9492_v15  ;;  %10914 = vst [vmem:[#allocation51_spill] sm:$0xff] %v9502_v19  ;;  %v9509_v15 = vld [vmem:[#allocation3 + $0x90] sm:$0xff]  ;;  %v9515_v14 = vld [vmem:[#allocation3 + $0x80] sm:$0xff] }
 0x7d2   :  { %3303 = vmatprep.subr.mxu0 %v9495_v16  ;;  %5444 = vmatprep.subr.mxu1 %v10416_v56  ;;  %10916 = vst [vmem:[#allocation53_spill] sm:$0xff] %v9509_v15  ;;  %v9512_v16 = vld [vmem:[#allocation3 + $0xa0] sm:$0xff]  ;;  %10918 = vst [vmem:[#allocation55_spill] sm:$0xff] %v9515_v14 }
 0x7d3   :  { %3304 = vmatpush1.msra.mxu0 %v9499_v17  ;;  %5445 = vmatpush3.msra.mxu1 %v9502_v19  ;;  %10917 = vst [vmem:[#allocation54_spill] sm:$0xff] %v9512_v16  ;;  %v9519_v19 = vld [vmem:[#allocation3 + $0x78] sm:$0xff]  ;;  %v9525_v17 = vld [vmem:[#allocation3 + $0x68] sm:$0xff] }
 0x7d4   :  { %3305 = vmatprep.subr.mxu0 %v9505_v12  ;;  %5446 = vmatprep.subr.mxu1 %v10416_v56  ;;  %10919 = vst [vmem:[#allocation56_spill] sm:$0xff] %v9519_v19  ;;  %v9522_v12 = vld [vmem:[#allocation3 + $0x88] sm:$0xff]  ;;  %10921 = vst [vmem:[#allocation58_spill] sm:$0xff] %v9525_v17 }
 0x7d5   :  { %3306 = vmatpush1.msra.mxu0 %v9509_v15  ;;  %5447 = vmatpush3.msra.mxu1 %v9512_v16  ;;  %10920 = vst [vmem:[#allocation57_spill] sm:$0xff] %v9522_v12  ;;  %v9529_v16 = vld [vmem:[#allocation3 + $0x60] sm:$0xff]  ;;  %v9535_v15 = vld [vmem:[#allocation3 + $0x50] sm:$0xff] }
 0x7d6   :  { %3307 = vmatprep.subr.mxu0 %v9515_v14  ;;  %5448 = vmatprep.subr.mxu1 %v10416_v56  ;;  %10922 = vst [vmem:[#allocation59_spill] sm:$0xff] %v9529_v16  ;;  %v9532_v14 = vld [vmem:[#allocation3 + $0x70] sm:$0xff]  ;;  %10924 = vst [vmem:[#allocation61_spill] sm:$0xff] %v9535_v15 }
 0x7d7   :  { %3308 = vmatpush1.msra.mxu0 %v9519_v19  ;;  %5449 = vmatpush3.msra.mxu1 %v9522_v12  ;;  %10923 = vst [vmem:[#allocation60_spill] sm:$0xff] %v9532_v14  ;;  %v9539_v12 = vld [vmem:[#allocation3 + $0x48] sm:$0xff]  ;;  %v9545_v19 = vld [vmem:[#allocation3 + $0x38] sm:$0xff] }
 0x7d8   :  { %3309 = vmatprep.subr.mxu0 %v9525_v17  ;;  %5450 = vmatprep.subr.mxu1 %v10416_v56  ;;  %10925 = vst [vmem:[#allocation62_spill] sm:$0xff] %v9539_v12  ;;  %v9542_v17 = vld [vmem:[#allocation3 + $0x58] sm:$0xff]  ;;  %10927 = vst [vmem:[#allocation64_spill] sm:$0xff] %v9545_v19 }
 0x7d9   :  { %3310 = vmatpush1.msra.mxu0 %v9529_v16  ;;  %5451 = vmatpush3.msra.mxu1 %v9532_v14  ;;  %10926 = vst [vmem:[#allocation63_spill] sm:$0xff] %v9542_v17  ;;  %v9549_v14 = vld [vmem:[#allocation3 + $0x30] sm:$0xff]  ;;  %v9555_v16 = vld [vmem:[#allocation3 + $0x20] sm:$0xff] }
 0x7da   :  { %3311 = vmatprep.subr.mxu0 %v9535_v15  ;;  %5452 = vmatprep.subr.mxu1 %v10416_v56  ;;  %10928 = vst [vmem:[#allocation65_spill] sm:$0xff] %v9549_v14  ;;  %v9552_v15 = vld [vmem:[#allocation3 + $0x40] sm:$0xff]  ;;  %10930 = vst [vmem:[#allocation67_spill] sm:$0xff] %v9555_v16 }
 0x7db   :  { %3312 = vmatpush1.msra.mxu0 %v9539_v12  ;;  %5453 = vmatpush3.msra.mxu1 %v9542_v17  ;;  %10929 = vst [vmem:[#allocation66_spill] sm:$0xff] %v9552_v15  ;;  %v9559_v17 = vld [vmem:[#allocation3 + $0x18] sm:$0xff]  ;;  %v9565_v12 = vld [vmem:[#allocation3 + $0x8] sm:$0xff] }
 0x7dc   :  { %3313 = vmatprep.subr.mxu0 %v9545_v19  ;;  %5454 = vmatprep.subr.mxu1 %v10416_v56  ;;  %10931 = vst [vmem:[#allocation68_spill] sm:$0xff] %v9559_v17  ;;  %v9562_v19 = vld [vmem:[#allocation3 + $0x28] sm:$0xff]  ;;  %10933 = vst [vmem:[#allocation70_spill] sm:$0xff] %v9565_v12 }
 0x7dd   :  { %3314 = vmatpush1.msra.mxu0 %v9549_v14  ;;  %5455 = vmatpush3.msra.mxu1 %v9552_v15  ;;  %10932 = vst [vmem:[#allocation69_spill] sm:$0xff] %v9562_v19  ;;  %v9569_v15 = vld [vmem:[#allocation3] sm:$0xff] }
 0x7de   :  { %3315 = vmatprep.subr.mxu0 %v9555_v16  ;;  %5456 = vmatprep.subr.mxu1 %v10416_v56  ;;  %10934 = vst [vmem:[#allocation71_spill] sm:$0xff] %v9569_v15  ;;  %v9572_v16 = vld [vmem:[#allocation3 + $0x10] sm:$0xff] }
 0x7df   :  { %3316 = vmatpush1.msra.mxu0 %v9559_v17  ;;  %5457 = vmatpush3.msra.mxu1 %v9562_v19  ;;  %10935 = vst [vmem:[#allocation72_spill] sm:$0xff] %v9572_v16  ;;  %v9578_v19 = vld [vmem:[#allocation5 + $0x170] sm:$0xff] }
 0x7e0   :  { %3317 = vmatprep.subr.mxu0 %v9565_v12  ;;  %5458 = vmatprep.subr.mxu1 %v10416_v56  ;;  %10936 = vst [vmem:[#allocation73_spill] sm:$0xff] %v9578_v19 }
 0x7e1   :  { %3318 = vmatpush1.msra.mxu0 %v9569_v15  ;;  %5459 = vmatpush3.msra.mxu1 %v9572_v16 }
 0x7e2   :  { %3351 = vmatprep.mubr.f32.mxu0 %v10416_v56  ;;  %5460 = vmatprep.mubr.msk.f32.mxu1 %vm6376_vm0, %v10416_v56 }
 0x7e3   :  { %3428 = vmatprep.subr.mxu0 %v9578_v19  ;;  %5463 = vmatprep.subr.mxu1 %v10416_v56 }
 0x83e   :  { %v2949_v12 = vpop.f32.mrf.mxu1  ;;  %v2878_v14 = vpop.f32.mrf.mxu0 }
 0x83f   :  { %v2879_v15 = vadd.f32 %v2878_v14, %v10850_v28  ;;  %v4307_v14 = vld [vmem:[%s10005_s0 + $0x24] sm:$0x3f] }
 0x840   :  { %v5357_v17 = vpop.f32.mrf.mxu1  ;;  %v2880_v11 = vpop.f32.mrf.mxu0 }
 0x841   :  { %v2881_v61 = vadd.f32 %v2880_v11, %v10851_v1  ;;  %v2950_v11 = vadd.f32 %v2949_v12, %v7251_v32 }
 0x85f   :  { %v3019_v40 = vpop.f32.mrf.mxu0  ;;  %v3090_v34 = vpop.f32.mrf.mxu1 }
 0x860   :  { %v3094_v16 = vadd.f32 %v3019_v40, %v2879_v15  ;;  %v3108_v40 = vadd.f32 %v9025_v39, %v3090_v34 }
 0x861   :  { %v5392_v42 = vpop.f32.mrf.mxu1  ;;  %v3021_v53 = vpop.f32.mrf.mxu0 }
 0x862   :  { %v4305_v2 = vmul.f32 -1.442695, %v3094_v16  ;;  %v3101_v7 = vadd.f32 %v3021_v53, %v2881_v61 }
 0x864   :  { %5793 = vpow2.f32 %v4305_v2  ;;  %v4306_v37 = vmul.f32 -1.442695, %v3101_v7 }
 0x866   :  { %5795 = vpow2.f32 %v4306_v37 }
 0x871   :  { %v5794_v19 = vpop.eup %5793 }
 0x872   :  { %v3098_v52 = vadd.f32 1.0, %v5794_v19 }
 0x873   :  { %v5796_v17 = vpop.eup %5795 }
 0x874   :  { %5797 = vrcp.f32 %v3098_v52  ;;  %v3105_v57 = vadd.f32 1.0, %v5796_v17  ;;  %v3268_v52 = vrot.slane %v4307_v14, 2 }
 0x876   :  { %5799 = vrcp.f32 %v3105_v57 }
 0x881   :  { %v5798_v42 = vpop.eup %5797  ;;  %v3185_v15 = vpop.f32.mrf.mxu0 }
 0x882   :  { %v3256_v16 = vpop.f32.mrf.mxu1  ;;  %v3109_v2 = vmul.f32 %v5798_v42, %v3108_v40  ;;  %v3260_v7 = vadd.f32 %v4307_v14, %v3185_v15 }
 0x883   :  { %v3187_v19 = vpop.f32.mrf.mxu0  ;;  %v5800_v28 = vpop.eup %5799 }
 0x884   :  { %v5427_v37 = vpop.f32.mrf.mxu1  ;;  %v3110_v61 = vadd.f32 %v3109_v2, %v2950_v11  ;;  %v4308_v53 = vmul.f32 -1.442695, %v3260_v7  ;;  %v3270_v17 = vadd.f32 %v3268_v52, %v3187_v19  ;;  %v3112_v39 = vsub.f32 1.0, %v5800_v28  ;;  %v9596_v2 = vld [vmem:[%s10007_s2] ss:$0 sm:$0xff]  ;;  %v9610_v19 = vld [vmem:[#allocation5 + $0x158] sm:$0xff] }
 0x885   :  { %v3114_v12 = vmul.f32 %v5800_v28, %v9030_v30  ;;  %v3279_v11 = vrot.slane %v4307_v14, 4  ;;  %v9604_v14 = vld [vmem:[#allocation5 + $0x168] sm:$0xff] }
 0x886   :  { %5801 = vtanh.f32 %v3110_v61  ;;  %v4309_v1 = vmul.f32 -1.442695, %v3270_v17  ;;  %v9617_v17 = vld [vmem:[#allocation5 + $0x160] sm:$0xff] }
 0x887   :  { %5803 = vpow2.f32 %v4308_v53 }
 0x888   :  { %5805 = vpow2.f32 %v4309_v1  ;;  %v3277_v1 = vadd.f32 %v9596_v2, %v3256_v16  ;;  %v9607_v16 = vld [vmem:[#allocation5 + $0x178] sm:$0xff] }
 0x893   :  { %v5802_v34 = vpop.eup %5801 }
 0x894   :  { %v5804_v59 = vpop.eup %5803  ;;  %v3113_v58 = vmul.f32 %v5802_v34, %v3112_v39  ;;  %v9620_v39 = vld [vmem:[#allocation5 + $0x140] sm:$0xff]  ;;  %v9624_v34 = vld [vmem:[#allocation5 + $0x138] sm:$0xff] }
 0x895   :  { %v3264_v40 = vadd.f32 1.0, %v5804_v59  ;;  %v5806_v42 = vpop.eup %5805 }
 0x896   :  { %v9590_v57 = vadd.f32 %v3114_v12, %v3113_v58  ;;  %v3274_v15 = vadd.f32 1.0, %v5806_v42  ;;  %v9627_v12 = vld [vmem:[#allocation5 + $0x148] sm:$0xff]  ;;  %v9634_v42 = vld [vmem:[#allocation5 + $0x120] sm:$0xff] }
 0x897   :  { %5807 = vrcp.f32 %v3264_v40  ;;  %v9630_v40 = vld [vmem:[#allocation5 + $0x128] sm:$0xff] }
 0x898   :  { %3116 = vst [vmem:[#allocation2 + $0xa] sm:$0x3] %v9590_v57  ;;  %5809 = vrcp.f32 %v3274_v15  ;;  %v9637_v15 = vld [vmem:[#allocation5 + $0x130] sm:$0xff] }
 0x8a4   :  { %v5808_v7 = vpop.eup %5807 }
 0x8a5   :  { %v3278_v37 = vmul.f32 %v5808_v7, %v3277_v1  ;;  %v5810_v30 = vpop.eup %5809  ;;  %v9644_v1 = vld [vmem:[#allocation5 + $0x108] sm:$0xff]  ;;  %v9647_v7 = vld [vmem:[#allocation5 + $0x118] sm:$0xff] }
 0x8a6   :  { %v3283_v58 = vsub.f32 1.0, %v5810_v30  ;;  %v3285_v53 = vmul.f32 %v5810_v30, %v9035_v33  ;;  %v9614_v33 = vld [vmem:[#allocation5 + $0x150] sm:$0xff]  ;;  %v9657_v30 = vld [vmem:[#allocation5 + $0x100] sm:$0xff] }
 0x8a7   :  { %v3281_v28 = vadd.f32 %v3279_v11, %v3278_v37  ;;  %v9640_v11 = vld [vmem:[#allocation5 + $0x110] sm:$0xff]  ;;  %v9650_v37 = vld [vmem:[#allocation5 + $0xf8] sm:$0xff]  ;;  %10938 = vst [vmem:[#allocation75_spill] sm:$0xff] %v9657_v30 }
 0x8a9   :  { %5811 = vtanh.f32 %v3281_v28  ;;  %v9654_v28 = vld [vmem:[#allocation5 + $0xf0] sm:$0xff] }
 0x8aa   :  { %10937 = vst [vmem:[#allocation74_spill] sm:$0xff] %v9654_v28 }
 0x8b6   :  { %v5812_v59 = vpop.eup %5811 }
 0x8b7   :  { %v3284_v61 = vmul.f32 %v5812_v59, %v3283_v58  ;;  %v9660_v58 = vld [vmem:[#allocation5 + $0xe0] sm:$0xff]  ;;  %v9664_v59 = vld [vmem:[#allocation5 + $0xd8] sm:$0xff] }
 0x8b8   :  { %10939 = vst [vmem:[#allocation76_spill] sm:$0xff] %v9660_v58  ;;  %10940 = vst [vmem:[#allocation77_spill] sm:$0xff] %v9664_v59 }
 0x8b9   :  { %v9600_v52 = vadd.f32 %v3285_v53, %v3284_v61  ;;  %v9667_v61 = vld [vmem:[#allocation5 + $0xe8] sm:$0xff] }
 0x8ba   :  { %10941 = vst [vmem:[#allocation78_spill] sm:$0xff] %v9667_v61  ;;  %v9670_v53 = vld [vmem:[#allocation5 + $0xc8] sm:$0xff] }
 0x8bb   :  { %3352 = vmatmul.mubr.f32.vlgmr.msra.gmra.mxu0 %v9600_v52  ;;  %5461 = vmatmul.mubr.f32.vlgmr.msra.gmra.mxu1 %v9600_v52  ;;  %10942 = vst [vmem:[#allocation79_spill] sm:$0xff] %v9670_v53 }
 0x8bc   :  { %3429 = vmatpush1.msra.mxu0 %v9604_v14  ;;  %5464 = vmatpush3.msra.mxu1 %v9607_v16 }
 0x8bd   :  { %3430 = vmatprep.subr.mxu0 %v9610_v19  ;;  %5465 = vmatprep.subr.mxu1 %v10416_v56 }
 0x8be   :  { %3431 = vmatpush1.msra.mxu0 %v9614_v33  ;;  %5466 = vmatpush3.msra.mxu1 %v9617_v17 }
 0x8bf   :  { %3432 = vmatprep.subr.mxu0 %v9620_v39  ;;  %5467 = vmatprep.subr.mxu1 %v10416_v56 }
 0x8c0   :  { %3433 = vmatpush1.msra.mxu0 %v9624_v34  ;;  %5468 = vmatpush3.msra.mxu1 %v9627_v12 }
 0x8c1   :  { %3434 = vmatprep.subr.mxu0 %v9630_v40  ;;  %5469 = vmatprep.subr.mxu1 %v10416_v56 }
 0x8c2   :  { %3435 = vmatpush1.msra.mxu0 %v9634_v42  ;;  %5470 = vmatpush3.msra.mxu1 %v9637_v15 }
 0x8c3   :  { %3436 = vmatprep.subr.mxu0 %v9640_v11  ;;  %5471 = vmatprep.subr.mxu1 %v10416_v56 }
 0x8c4   :  { %3437 = vmatpush1.msra.mxu0 %v9644_v1  ;;  %5472 = vmatpush3.msra.mxu1 %v9647_v7 }
 0x8c5   :  { %3438 = vmatprep.subr.mxu0 %v9650_v37  ;;  %5473 = vmatprep.subr.mxu1 %v10416_v56 }
 0x8c6   :  { %3439 = vmatpush1.msra.mxu0 %v9654_v28  ;;  %5474 = vmatpush3.msra.mxu1 %v9657_v30  ;;  %v9674_v30 = vld [vmem:[#allocation5 + $0xc0] sm:$0xff]  ;;  %v9680_v28 = vld [vmem:[#allocation5 + $0xb0] sm:$0xff] }
 0x8c7   :  { %3440 = vmatprep.subr.mxu0 %v9660_v58  ;;  %5475 = vmatprep.subr.mxu1 %v10416_v56  ;;  %10943 = vst [vmem:[#allocation80_spill] sm:$0xff] %v9674_v30  ;;  %v9677_v58 = vld [vmem:[#allocation5 + $0xd0] sm:$0xff]  ;;  %10945 = vst [vmem:[#allocation82_spill] sm:$0xff] %v9680_v28 }
 0x8c8   :  { %3441 = vmatpush1.msra.mxu0 %v9664_v59  ;;  %5476 = vmatpush3.msra.mxu1 %v9667_v61  ;;  %10944 = vst [vmem:[#allocation81_spill] sm:$0xff] %v9677_v58  ;;  %v9684_v61 = vld [vmem:[#allocation5 + $0xa8] sm:$0xff]  ;;  %v9690_v59 = vld [vmem:[#allocation5 + $0x98] sm:$0xff] }
 0x8c9   :  { %3442 = vmatprep.subr.mxu0 %v9670_v53  ;;  %5477 = vmatprep.subr.mxu1 %v10416_v56  ;;  %10946 = vst [vmem:[#allocation83_spill] sm:$0xff] %v9684_v61  ;;  %v9687_v53 = vld [vmem:[#allocation5 + $0xb8] sm:$0xff]  ;;  %10948 = vst [vmem:[#allocation85_spill] sm:$0xff] %v9690_v59 }
 0x8ca   :  { %3443 = vmatpush1.msra.mxu0 %v9674_v30  ;;  %5478 = vmatpush3.msra.mxu1 %v9677_v58  ;;  %10947 = vst [vmem:[#allocation84_spill] sm:$0xff] %v9687_v53  ;;  %v9694_v58 = vld [vmem:[#allocation5 + $0x90] sm:$0xff]  ;;  %v9700_v30 = vld [vmem:[#allocation5 + $0x80] sm:$0xff] }
 0x8cb   :  { %3444 = vmatprep.subr.mxu0 %v9680_v28  ;;  %5479 = vmatprep.subr.mxu1 %v10416_v56  ;;  %10949 = vst [vmem:[#allocation86_spill] sm:$0xff] %v9694_v58  ;;  %v9697_v28 = vld [vmem:[#allocation5 + $0xa0] sm:$0xff]  ;;  %10951 = vst [vmem:[#allocation88_spill] sm:$0xff] %v9700_v30 }
 0x8cc   :  { %3445 = vmatpush1.msra.mxu0 %v9684_v61  ;;  %5480 = vmatpush3.msra.mxu1 %v9687_v53  ;;  %10950 = vst [vmem:[#allocation87_spill] sm:$0xff] %v9697_v28  ;;  %v9704_v53 = vld [vmem:[#allocation5 + $0x78] sm:$0xff]  ;;  %v9710_v61 = vld [vmem:[#allocation5 + $0x68] sm:$0xff] }
 0x8cd   :  { %3446 = vmatprep.subr.mxu0 %v9690_v59  ;;  %5481 = vmatprep.subr.mxu1 %v10416_v56  ;;  %10952 = vst [vmem:[#allocation89_spill] sm:$0xff] %v9704_v53  ;;  %v9707_v59 = vld [vmem:[#allocation5 + $0x88] sm:$0xff]  ;;  %10954 = vst [vmem:[#allocation91_spill] sm:$0xff] %v9710_v61 }
 0x8ce   :  { %3447 = vmatpush1.msra.mxu0 %v9694_v58  ;;  %5482 = vmatpush3.msra.mxu1 %v9697_v28  ;;  %10953 = vst [vmem:[#allocation90_spill] sm:$0xff] %v9707_v59  ;;  %v9714_v28 = vld [vmem:[#allocation5 + $0x60] sm:$0xff]  ;;  %v9720_v58 = vld [vmem:[#allocation5 + $0x50] sm:$0xff] }
 0x8cf   :  { %3448 = vmatprep.subr.mxu0 %v9700_v30  ;;  %5483 = vmatprep.subr.mxu1 %v10416_v56  ;;  %10955 = vst [vmem:[#allocation92_spill] sm:$0xff] %v9714_v28  ;;  %v9717_v30 = vld [vmem:[#allocation5 + $0x70] sm:$0xff]  ;;  %10957 = vst [vmem:[#allocation94_spill] sm:$0xff] %v9720_v58 }
 0x8d0   :  { %3449 = vmatpush1.msra.mxu0 %v9704_v53  ;;  %5484 = vmatpush3.msra.mxu1 %v9707_v59  ;;  %10956 = vst [vmem:[#allocation93_spill] sm:$0xff] %v9717_v30  ;;  %v9724_v59 = vld [vmem:[#allocation5 + $0x48] sm:$0xff]  ;;  %v9730_v53 = vld [vmem:[#allocation5 + $0x38] sm:$0xff] }
 0x8d1   :  { %3450 = vmatprep.subr.mxu0 %v9710_v61  ;;  %5485 = vmatprep.subr.mxu1 %v10416_v56  ;;  %10958 = vst [vmem:[#allocation95_spill] sm:$0xff] %v9724_v59  ;;  %v9727_v61 = vld [vmem:[#allocation5 + $0x58] sm:$0xff]  ;;  %10960 = vst [vmem:[#allocation97_spill] sm:$0xff] %v9730_v53 }
 0x8d2   :  { %3451 = vmatpush1.msra.mxu0 %v9714_v28  ;;  %5486 = vmatpush3.msra.mxu1 %v9717_v30  ;;  %10959 = vst [vmem:[#allocation96_spill] sm:$0xff] %v9727_v61  ;;  %v9734_v30 = vld [vmem:[#allocation5 + $0x30] sm:$0xff]  ;;  %v9740_v28 = vld [vmem:[#allocation5 + $0x20] sm:$0xff] }
 0x8d3   :  { %3452 = vmatprep.subr.mxu0 %v9720_v58  ;;  %5487 = vmatprep.subr.mxu1 %v10416_v56  ;;  %v9737_v58 = vld [vmem:[#allocation5 + $0x40] sm:$0xff]  ;;  %10962 = vst [vmem:[#allocation99_spill] sm:$0xff] %v9740_v28 }
 0x8d4   :  { %3453 = vmatpush1.msra.mxu0 %v9724_v59  ;;  %5488 = vmatpush3.msra.mxu1 %v9727_v61  ;;  %10961 = vst [vmem:[#allocation98_spill] sm:$0xff] %v9737_v58  ;;  %v9744_v61 = vld [vmem:[#allocation5 + $0x18] sm:$0xff]  ;;  %v9750_v59 = vld [vmem:[#allocation5 + $0x8] sm:$0xff] }
 0x8d5   :  { %3454 = vmatprep.subr.mxu0 %v9730_v53  ;;  %5489 = vmatprep.subr.mxu1 %v10416_v56  ;;  %v9747_v53 = vld [vmem:[#allocation5 + $0x28] sm:$0xff] }
 0x8d6   :  { %3455 = vmatpush1.msra.mxu0 %v9734_v30  ;;  %5490 = vmatpush3.msra.mxu1 %v9737_v58  ;;  %v9754_v58 = vld [vmem:[#allocation5] sm:$0xff] }
 0x8d7   :  { %3456 = vmatprep.subr.mxu0 %v9740_v28  ;;  %5491 = vmatprep.subr.mxu1 %v10416_v56  ;;  %v9758_v28 = vld [vmem:[#allocation5 + $0x10] sm:$0xff] }
 0x8d8   :  { %3457 = vmatpush1.msra.mxu0 %v9744_v61  ;;  %5492 = vmatpush3.msra.mxu1 %v9747_v53 }
 0x8d9   :  { %3458 = vmatprep.subr.mxu0 %v9750_v59  ;;  %5493 = vmatprep.subr.mxu1 %v10416_v56 }
 0x8da   :  { %3459 = vmatpush1.msra.mxu0 %v9754_v58  ;;  %3492 = vmatprep.mubr.f32.mxu0 %v10416_v56 }
 0x8db   :  { %5494 = vmatpush3.msra.mxu1 %v9758_v28  ;;  %5495 = vmatprep.mubr.msk.f32.mxu1 %vm6376_vm0, %v10416_v56 }
 0x8dc   :  { %3493 = vmatmul.mubr.f32.vlgmr.msra.gmra.mxu0 %v9590_v57  ;;  %5496 = vmatmul.mubr.f32.vlgmr.msra.gmra.mxu1 %v9590_v57 }
 0x8dd   :  { %3594 = vmatprep.subr.mxu0 %v9109_v26  ;;  %5498 = vmatprep.subr.mxu1 %v10416_v56  ;;  %v10963_v26 = vld [vmem:[#allocation15_spill] sm:$0xff] }
 0x8de   :  { %3595 = vmatpush1.msra.mxu0 %v9116_v0  ;;  %5499 = vmatpush3.msra.mxu1 %v9122_v31  ;;  %v10964_v0 = vld [vmem:[#allocation16_spill] sm:$0xff]  ;;  %v10965_v31 = vld [vmem:[#allocation17_spill] sm:$0xff] }
 0x8df   :  { %3596 = vmatprep.subr.mxu0 %v9128_v44  ;;  %5500 = vmatprep.subr.mxu1 %v10416_v56  ;;  %v10966_v44 = vld [vmem:[#allocation18_spill] sm:$0xff] }
 0x8e0   :  { %3597 = vmatpush1.msra.mxu0 %v9135_v46  ;;  %5501 = vmatpush3.msra.mxu1 %v9141_v18  ;;  %v10967_v46 = vld [vmem:[#allocation19_spill] sm:$0xff]  ;;  %v10968_v18 = vld [vmem:[#allocation20_spill] sm:$0xff] }
 0x8e1   :  { %3598 = vmatprep.subr.mxu0 %v9147_v20  ;;  %5502 = vmatprep.subr.mxu1 %v10416_v56  ;;  %v10969_v20 = vld [vmem:[#allocation21_spill] sm:$0xff] }
 0x8e2   :  { %3599 = vmatpush1.msra.mxu0 %v9154_v22  ;;  %5503 = vmatpush3.msra.mxu1 %v9160_v23  ;;  %v10970_v22 = vld [vmem:[#allocation23_spill] sm:$0xff]  ;;  %v10971_v23 = vld [vmem:[#allocation22_spill] sm:$0xff] }
 0x8e3   :  { %3600 = vmatprep.subr.mxu0 %v9166_v24  ;;  %5504 = vmatprep.subr.mxu1 %v10416_v56  ;;  %v10972_v24 = vld [vmem:[#allocation24_spill] sm:$0xff] }
 0x8e4   :  { %3601 = vmatpush1.msra.mxu0 %v9173_v21  ;;  %5505 = vmatpush3.msra.mxu1 %v9179_v62  ;;  %v10973_v21 = vld [vmem:[#allocation25_spill] sm:$0xff]  ;;  %v10974_v62 = vld [vmem:[#allocation26_spill] sm:$0xff] }
 0x8e5   :  { %3602 = vmatprep.subr.mxu0 %v9185_v43  ;;  %5506 = vmatprep.subr.mxu1 %v10416_v56  ;;  %v10975_v43 = vld [vmem:[#allocation27_spill] sm:$0xff] }
 0x8e6   :  { %3603 = vmatpush1.msra.mxu0 %v9192_v48  ;;  %5507 = vmatpush3.msra.mxu1 %v9198_v49  ;;  %v10976_v48 = vld [vmem:[#allocation28_spill] sm:$0xff]  ;;  %v10977_v49 = vld [vmem:[#allocation29_spill] sm:$0xff] }
 0x8e7   :  { %3604 = vmatprep.subr.mxu0 %v9204_v50  ;;  %5508 = vmatprep.subr.mxu1 %v10416_v56  ;;  %v10978_v50 = vld [vmem:[#allocation30_spill] sm:$0xff] }
 0x8e8   :  { %3605 = vmatpush1.msra.mxu0 %v9211_v27  ;;  %5509 = vmatpush3.msra.mxu1 %v9217_v60  ;;  %v10979_v27 = vld [vmem:[#allocation31_spill] sm:$0xff]  ;;  %v10980_v60 = vld [vmem:[#allocation32_spill] sm:$0xff] }
 0x8e9   :  { %3606 = vmatprep.subr.mxu0 %v9223_v29  ;;  %5510 = vmatprep.subr.mxu1 %v10416_v56  ;;  %v10981_v29 = vld [vmem:[#allocation33_spill] sm:$0xff] }
 0x8ea   :  { %3607 = vmatpush1.msra.mxu0 %v9230_v55  ;;  %5511 = vmatpush3.msra.mxu1 %v9236_v35  ;;  %v10982_v55 = vld [vmem:[#allocation34_spill] sm:$0xff]  ;;  %v10983_v35 = vld [vmem:[#allocation35_spill] sm:$0xff] }
 0x8eb   :  { %3608 = vmatprep.subr.mxu0 %v9242_v63  ;;  %5512 = vmatprep.subr.mxu1 %v10416_v56  ;;  %v10984_v63 = vld [vmem:[#allocation36_spill] sm:$0xff] }
 0x8ec   :  { %3609 = vmatpush1.msra.mxu0 %v9249_v41  ;;  %5513 = vmatpush3.msra.mxu1 %v9255_v36  ;;  %v10985_v41 = vld [vmem:[#allocation37_spill] sm:$0xff]  ;;  %v10986_v36 = vld [vmem:[#allocation38_spill] sm:$0xff] }
 0x8ed   :  { %3610 = vmatprep.subr.mxu0 %v9261_v3  ;;  %5514 = vmatprep.subr.mxu1 %v10416_v56  ;;  %v10987_v3 = vld [vmem:[#allocation39_spill] sm:$0xff] }
 0x8ee   :  { %3611 = vmatpush1.msra.mxu0 %v9268_v5  ;;  %5515 = vmatpush3.msra.mxu1 %v9274_v25  ;;  %v10988_v5 = vld [vmem:[#allocation40_spill] sm:$0xff]  ;;  %v10989_v25 = vld [vmem:[#allocation41_spill] sm:$0xff] }
 0x8ef   :  { %3612 = vmatprep.subr.mxu0 %v9280_v4  ;;  %5516 = vmatprep.subr.mxu1 %v10416_v56  ;;  %v10990_v4 = vld [vmem:[#allocation42_spill] sm:$0xff] }
 0x8f0   :  { %3613 = vmatpush1.msra.mxu0 %v9287_v10  ;;  %5517 = vmatpush3.msra.mxu1 %v9293_v47  ;;  %v10991_v10 = vld [vmem:[#allocation43_spill] sm:$0xff]  ;;  %v10992_v47 = vld [vmem:[#allocation44_spill] sm:$0xff] }
 0x8f1   :  { %3614 = vmatprep.subr.mxu0 %v9299_v13  ;;  %5518 = vmatprep.subr.mxu1 %v10416_v56  ;;  %v10993_v13 = vld [vmem:[#allocation45_spill] sm:$0xff] }
 0x8f2   :  { %3615 = vmatpush1.msra.mxu0 %v9306_v38  ;;  %5519 = vmatpush3.msra.mxu1 %v9312_v45  ;;  %v10994_v38 = vld [vmem:[#allocation46_spill] sm:$0xff]  ;;  %v10995_v45 = vld [vmem:[#allocation47_spill] sm:$0xff] }
 0x8f3   :  { %3616 = vmatprep.subr.mxu0 %v9318_v51  ;;  %5520 = vmatprep.subr.mxu1 %v10416_v56  ;;  %v10996_v51 = vld [vmem:[#allocation48_spill] sm:$0xff] }
 0x8f4   :  { %3617 = vmatpush1.msra.mxu0 %v9325_v6  ;;  %5521 = vmatpush3.msra.mxu1 %v9331_v9  ;;  %v10997_v6 = vld [vmem:[#allocation49_spill] sm:$0xff]  ;;  %v10998_v9 = vld [vmem:[#allocation50_spill] sm:$0xff] }
 0x8f5   :  { %3618 = vmatprep.subr.mxu0 %v9337_v54  ;;  %5522 = vmatprep.subr.mxu1 %v10416_v56  ;;  %v10999_v54 = vld [vmem:[#allocation51_spill] sm:$0xff] }
 0x8f6   :  { %3619 = vmatpush1.msra.mxu0 %v9344_v8  ;;  %5523 = vmatpush3.msra.mxu1 %v10963_v26  ;;  %v11000_v8 = vld [vmem:[#allocation52_spill] sm:$0xff]  ;;  %v11001_v26 = vld [vmem:[#allocation53_spill] sm:$0xff] }
 0x8f7   :  { %3620 = vmatprep.subr.mxu0 %v10964_v0  ;;  %5524 = vmatprep.subr.mxu1 %v10416_v56  ;;  %v11002_v0 = vld [vmem:[#allocation54_spill] sm:$0xff] }
 0x8f8   :  { %3621 = vmatpush1.msra.mxu0 %v10965_v31  ;;  %5525 = vmatpush3.msra.mxu1 %v10966_v44  ;;  %v11003_v31 = vld [vmem:[#allocation55_spill] sm:$0xff]  ;;  %v11004_v44 = vld [vmem:[#allocation56_spill] sm:$0xff] }
 0x8f9   :  { %3622 = vmatprep.subr.mxu0 %v10967_v46  ;;  %5526 = vmatprep.subr.mxu1 %v10416_v56  ;;  %v11005_v46 = vld [vmem:[#allocation57_spill] sm:$0xff] }
 0x8fa   :  { %3623 = vmatpush1.msra.mxu0 %v10968_v18  ;;  %5527 = vmatpush3.msra.mxu1 %v10969_v20  ;;  %v11006_v18 = vld [vmem:[#allocation58_spill] sm:$0xff]  ;;  %v11007_v20 = vld [vmem:[#allocation59_spill] sm:$0xff] }
 0x8fb   :  { %3624 = vmatprep.subr.mxu0 %v10970_v22  ;;  %5528 = vmatprep.subr.mxu1 %v10416_v56  ;;  %v11008_v22 = vld [vmem:[#allocation60_spill] sm:$0xff] }
 0x8fc   :  { %3625 = vmatpush1.msra.mxu0 %v10971_v23  ;;  %3658 = vmatprep.mubr.f32.mxu0 %v10416_v56  ;;  %v11009_v23 = vld [vmem:[#allocation61_spill] sm:$0xff] }
 0x8fd   :  { %5529 = vmatpush3.msra.mxu1 %v10972_v24  ;;  %5530 = vmatprep.mubr.msk.f32.mxu1 %vm6376_vm0, %v10416_v56  ;;  %v11010_v24 = vld [vmem:[#allocation62_spill] sm:$0xff] }
 0x8fe   :  { %3659 = vmatmul.mubr.f32.vlgmr.msra.gmra.mxu0 %v9600_v52  ;;  %5531 = vmatmul.mubr.f32.vlgmr.msra.gmra.mxu1 %v9600_v52 }
 0x8ff   :  { %3762 = vmatprep.subr.mxu0 %v10973_v21  ;;  %5533 = vmatprep.subr.mxu1 %v10416_v56  ;;  %v11011_v21 = vld [vmem:[#allocation63_spill] sm:$0xff] }
 0x900   :  { %3763 = vmatpush1.msra.mxu0 %v10974_v62  ;;  %5534 = vmatpush3.msra.mxu1 %v10975_v43  ;;  %v11012_v62 = vld [vmem:[#allocation64_spill] sm:$0xff]  ;;  %v11013_v43 = vld [vmem:[#allocation65_spill] sm:$0xff] }
 0x901   :  { %3764 = vmatprep.subr.mxu0 %v10976_v48  ;;  %5535 = vmatprep.subr.mxu1 %v10416_v56  ;;  %v11014_v48 = vld [vmem:[#allocation66_spill] sm:$0xff] }
 0x902   :  { %3765 = vmatpush1.msra.mxu0 %v10977_v49  ;;  %5536 = vmatpush3.msra.mxu1 %v10978_v50  ;;  %v11015_v49 = vld [vmem:[#allocation67_spill] sm:$0xff]  ;;  %v11016_v50 = vld [vmem:[#allocation68_spill] sm:$0xff] }
 0x903   :  { %3766 = vmatprep.subr.mxu0 %v10979_v27  ;;  %5537 = vmatprep.subr.mxu1 %v10416_v56  ;;  %v11017_v27 = vld [vmem:[#allocation69_spill] sm:$0xff] }
 0x904   :  { %3767 = vmatpush1.msra.mxu0 %v10980_v60  ;;  %5538 = vmatpush3.msra.mxu1 %v10981_v29  ;;  %v11018_v60 = vld [vmem:[#allocation70_spill] sm:$0xff]  ;;  %v11019_v29 = vld [vmem:[#allocation71_spill] sm:$0xff] }
 0x905   :  { %3768 = vmatprep.subr.mxu0 %v10982_v55  ;;  %5539 = vmatprep.subr.mxu1 %v10416_v56  ;;  %v11020_v55 = vld [vmem:[#allocation72_spill] sm:$0xff] }
 0x906   :  { %3769 = vmatpush1.msra.mxu0 %v10983_v35  ;;  %5540 = vmatpush3.msra.mxu1 %v10984_v63  ;;  %v11021_v35 = vld [vmem:[#allocation73_spill] sm:$0xff] }
 0x907   :  { %3770 = vmatprep.subr.mxu0 %v10985_v41  ;;  %5541 = vmatprep.subr.mxu1 %v10416_v56 }
 0x908   :  { %3771 = vmatpush1.msra.mxu0 %v10986_v36  ;;  %5542 = vmatpush3.msra.mxu1 %v10987_v3 }
 0x909   :  { %3772 = vmatprep.subr.mxu0 %v10988_v5  ;;  %5543 = vmatprep.subr.mxu1 %v10416_v56  ;;  %v11022_v5 = vld [vmem:[#allocation13_spill] sm:$0xff] }
 0x90a   :  { %3773 = vmatpush1.msra.mxu0 %v10989_v25  ;;  %5544 = vmatpush3.msra.mxu1 %v10990_v4 }
 0x90b   :  { %3774 = vmatprep.subr.mxu0 %v10991_v10  ;;  %5545 = vmatprep.subr.mxu1 %v10416_v56 }
 0x90c   :  { %3775 = vmatpush1.msra.mxu0 %v10992_v47  ;;  %5546 = vmatpush3.msra.mxu1 %v10993_v13 }
 0x90d   :  { %3776 = vmatprep.subr.mxu0 %v10994_v38  ;;  %5547 = vmatprep.subr.mxu1 %v10416_v56 }
 0x90e   :  { %3777 = vmatpush1.msra.mxu0 %v10995_v45  ;;  %5548 = vmatpush3.msra.mxu1 %v10996_v51  ;;  %v11023_v51 = vld [vmem:[#allocation14_spill] sm:$0xff] }
 0x90f   :  { %3778 = vmatprep.subr.mxu0 %v10997_v6  ;;  %5549 = vmatprep.subr.mxu1 %v10416_v56 }
 0x910   :  { %3779 = vmatpush1.msra.mxu0 %v10998_v9  ;;  %5550 = vmatpush3.msra.mxu1 %v10999_v54 }
 0x911   :  { %3780 = vmatprep.subr.mxu0 %v11000_v8  ;;  %5551 = vmatprep.subr.mxu1 %v10416_v56 }
 0x912   :  { %3781 = vmatpush1.msra.mxu0 %v11001_v26  ;;  %5552 = vmatpush3.msra.mxu1 %v11002_v0 }
 0x913   :  { %3782 = vmatprep.subr.mxu0 %v11003_v31  ;;  %5553 = vmatprep.subr.mxu1 %v10416_v56 }
 0x914   :  { %3783 = vmatpush1.msra.mxu0 %v11004_v44  ;;  %5554 = vmatpush3.msra.mxu1 %v11005_v46  ;;  %v4312_v44 = vld [vmem:[%s10005_s0 + $0x2a] sm:$0x3f]  ;;  %v9911_v46 = vld [vmem:[%s10011_s6] ss:$0 sm:$0xff] }
 0x915   :  { %3784 = vmatprep.subr.mxu0 %v11006_v18  ;;  %5555 = vmatprep.subr.mxu1 %v10416_v56 }
 0x916   :  { %3785 = vmatpush1.msra.mxu0 %v11007_v20  ;;  %5556 = vmatpush3.msra.mxu1 %v11008_v22 }
 0x917   :  { %3786 = vmatprep.subr.mxu0 %v11009_v23  ;;  %5557 = vmatprep.subr.mxu1 %v10416_v56 }
 0x918   :  { %3787 = vmatpush1.msra.mxu0 %v11010_v24  ;;  %5558 = vmatpush3.msra.mxu1 %v11011_v21 }
 0x919   :  { %3788 = vmatprep.subr.mxu0 %v11012_v62  ;;  %5559 = vmatprep.subr.mxu1 %v10416_v56 }
 0x91a   :  { %3789 = vmatpush1.msra.mxu0 %v11013_v43  ;;  %5560 = vmatpush3.msra.mxu1 %v11014_v48 }
 0x91b   :  { %3790 = vmatprep.subr.mxu0 %v11015_v49  ;;  %5561 = vmatprep.subr.mxu1 %v10416_v56 }
 0x91c   :  { %3791 = vmatpush1.msra.mxu0 %v11016_v50  ;;  %5562 = vmatpush3.msra.mxu1 %v11017_v27  ;;  %v3743_v50 = vrot.slane %v4312_v44, 2 }
 0x91d   :  { %3792 = vmatprep.subr.mxu0 %v11018_v60  ;;  %5563 = vmatprep.subr.mxu1 %v10416_v56 }
 0x91e   :  { %3793 = vmatpush1.msra.mxu0 %v11019_v29  ;;  %5564 = vmatpush3.msra.mxu1 %v11020_v55 }
 0x91f   :  { %3826 = vmatprep.mubr.f32.mxu0 %v10416_v56  ;;  %5565 = vmatprep.mubr.msk.f32.mxu1 %vm6376_vm0, %v10416_v56 }
 0x920   :  { %3903 = vmatprep.subr.mxu0 %v11021_v35  ;;  %5568 = vmatprep.subr.mxu1 %v10416_v56 }
 0x97b   :  { %v3424_v63 = vpop.f32.mrf.mxu1  ;;  %v3353_v36 = vpop.f32.mrf.mxu0 }
 0x97c   :  { %v3354_v25 = vadd.f32 %v3353_v36, %v11022_v5  ;;  %v3425_v24 = vadd.f32 %v3424_v63, %v7251_v32 }
 0x97d   :  { %v5462_v41 = vpop.f32.mrf.mxu1  ;;  %v3355_v3 = vpop.f32.mrf.mxu0 }
 0x97e   :  { %v3356_v6 = vadd.f32 %v3355_v3, %v11023_v51 }
 0x99c   :  { %v3494_v4 = vpop.f32.mrf.mxu0  ;;  %v3565_v10 = vpop.f32.mrf.mxu1 }
 0x99d   :  { %v3569_v47 = vadd.f32 %v3494_v4, %v3354_v25  ;;  %v3583_v18 = vadd.f32 %v9911_v46, %v3565_v10 }
 0x99e   :  { %v5497_v13 = vpop.f32.mrf.mxu1  ;;  %v3496_v45 = vpop.f32.mrf.mxu0 }
 0x99f   :  { %v4310_v38 = vmul.f32 -1.442695, %v3569_v47  ;;  %v3576_v9 = vadd.f32 %v3496_v45, %v3356_v6  ;;  %v3754_v13 = vrot.slane %v4312_v44, 4 }
 0x9a1   :  { %5813 = vpow2.f32 %v4310_v38  ;;  %v4311_v54 = vmul.f32 -1.442695, %v3576_v9 }
 0x9a3   :  { %5815 = vpow2.f32 %v4311_v54 }
 0x9ae   :  { %v5814_v8 = vpop.eup %5813 }
 0x9af   :  { %v3573_v26 = vadd.f32 1.0, %v5814_v8 }
 0x9b0   :  { %v5816_v0 = vpop.eup %5815 }
 0x9b1   :  { %5817 = vrcp.f32 %v3573_v26  ;;  %v3580_v31 = vadd.f32 1.0, %v5816_v0 }
 0x9b3   :  { %5819 = vrcp.f32 %v3580_v31 }
 0x9be   :  { %v5818_v20 = vpop.eup %5817  ;;  %v3660_v22 = vpop.f32.mrf.mxu0 }
 0x9bf   :  { %v3731_v23 = vpop.f32.mrf.mxu1  ;;  %v3584_v21 = vmul.f32 %v5818_v20, %v3583_v18  ;;  %v3735_v62 = vadd.f32 %v4312_v44, %v3660_v22  ;;  %v11041_v44 = vld [vmem:[#allocation91_spill] sm:$0xff]  ;;  %v11042_v18 = vld [vmem:[#allocation92_spill] sm:$0xff]  ;;  %v11043_v20 = vld [vmem:[#allocation93_spill] sm:$0xff] }
 0x9c0   :  { %v3662_v27 = vpop.f32.mrf.mxu0  ;;  %v5820_v55 = vpop.eup %5819  ;;  %v3752_v38 = vadd.f32 %v9596_v2, %v3731_v23  ;;  %v11024_v2 = vld [vmem:[#allocation74_spill] sm:$0xff]  ;;  %v11045_v23 = vld [vmem:[#allocation95_spill] sm:$0xff] }
 0x9c1   :  { %v5532_v43 = vpop.f32.mrf.mxu1  ;;  %v3585_v48 = vadd.f32 %v3584_v21, %v3425_v24  ;;  %v4313_v49 = vmul.f32 -1.442695, %v3735_v62  ;;  %v3745_v60 = vadd.f32 %v3743_v50, %v3662_v27  ;;  %v3587_v35 = vsub.f32 1.0, %v5820_v55  ;;  %v11044_v22 = vld [vmem:[#allocation94_spill] sm:$0xff]  ;;  %v11046_v24 = vld [vmem:[#allocation96_spill] sm:$0xff]  ;;  %v11047_v21 = vld [vmem:[#allocation97_spill] sm:$0xff] }
 0x9c2   :  { %v3589_v63 = vmul.f32 %v5820_v55, %v9590_v57  ;;  %v11048_v62 = vld [vmem:[#allocation98_spill] sm:$0xff]  ;;  %v11049_v43 = vld [vmem:[#allocation99_spill] sm:$0xff]  ;;  %v4076_v50 = vld [vmem:[#allocation7 + $0x38] sm:$0xff] }
 0x9c3   :  { %5821 = vtanh.f32 %v3585_v48  ;;  %v4314_v29 = vmul.f32 -1.442695, %v3745_v60  ;;  %v4078_v48 = vld [vmem:[#allocation7 + $0x48] sm:$0xff]  ;;  %v4075_v27 = vld [vmem:[#allocation7 + $0x30] sm:$0xff]  ;;  %v4072_v55 = vld [vmem:[#allocation7 + $0x18] sm:$0xff] }
 0x9c4   :  { %5823 = vpow2.f32 %v4313_v49  ;;  %v4077_v49 = vld [vmem:[#allocation7 + $0x40] sm:$0xff]  ;;  %v4074_v60 = vld [vmem:[#allocation7 + $0x28] sm:$0xff] }
 0x9c5   :  { %5825 = vpow2.f32 %v4314_v29  ;;  %v4073_v29 = vld [vmem:[#allocation7 + $0x20] sm:$0xff] }
 0x9d0   :  { %v5822_v41 = vpop.eup %5821 }
 0x9d1   :  { %v5824_v36 = vpop.eup %5823  ;;  %v3588_v3 = vmul.f32 %v5822_v41, %v3587_v35  ;;  %v4071_v35 = vld [vmem:[#allocation7 + $0x10] sm:$0xff]  ;;  %v4070_v41 = vld [vmem:[#allocation7 + $0x8] sm:$0xff] }
 0x9d2   :  { %v3739_v25 = vadd.f32 1.0, %v5824_v36  ;;  %v5826_v10 = vpop.eup %5825  ;;  %v4069_v36 = vld [vmem:[#allocation7] sm:$0xff] }
 0x9d3   :  { %v9916_v4 = vadd.f32 %v3589_v63, %v3588_v3  ;;  %v3749_v47 = vadd.f32 1.0, %v5826_v10  ;;  %v4184_v3 = vld [vmem:[#allocation8 + $0x78] sm:$0xff]  ;;  %v4183_v63 = vld [vmem:[#allocation8 + $0x70] sm:$0xff]  ;;  %v4181_v10 = vld [vmem:[#allocation8 + $0x60] sm:$0xff] }
 0x9d4   :  { %5827 = vrcp.f32 %v3739_v25  ;;  %v4182_v25 = vld [vmem:[#allocation8 + $0x68] sm:$0xff] }
 0x9d5   :  { %3591 = vst [vmem:[#allocation2 + $0xc] sm:$0x3] %v9916_v4  ;;  %5829 = vrcp.f32 %v3749_v47  ;;  %v4180_v47 = vld [vmem:[#allocation8 + $0x58] sm:$0xff] }
 0x9e1   :  { %v5828_v45 = vpop.eup %5827 }
 0x9e2   :  { %v3753_v6 = vmul.f32 %v5828_v45, %v3752_v38  ;;  %v5830_v54 = vpop.eup %5829  ;;  %v4178_v38 = vld [vmem:[#allocation8 + $0x48] sm:$0xff]  ;;  %v4177_v45 = vld [vmem:[#allocation8 + $0x40] sm:$0xff] }
 0x9e3   :  { %v3758_v8 = vsub.f32 1.0, %v5830_v54  ;;  %v3760_v0 = vmul.f32 %v5830_v54, %v9600_v52  ;;  %v11025_v52 = vld [vmem:[#allocation75_spill] sm:$0xff]  ;;  %v4174_v54 = vld [vmem:[#allocation8 + $0x28] sm:$0xff] }
 0x9e4   :  { %v3756_v9 = vadd.f32 %v3754_v13, %v3753_v6  ;;  %v4179_v13 = vld [vmem:[#allocation8 + $0x50] sm:$0xff]  ;;  %v4176_v6 = vld [vmem:[#allocation8 + $0x38] sm:$0xff] }
 0x9e6   :  { %5831 = vtanh.f32 %v3756_v9  ;;  %v4175_v9 = vld [vmem:[#allocation8 + $0x30] sm:$0xff] }
 0x9f3   :  { %v5832_v26 = vpop.eup %5831 }
 0x9f4   :  { %v3759_v57 = vmul.f32 %v5832_v26, %v3758_v8  ;;  %v4173_v8 = vld [vmem:[#allocation8 + $0x20] sm:$0xff] }
 0x9f6   :  { %v3761_v31 = vadd.f32 %v3760_v0, %v3759_v57 }
 0x9f8   :  { %3827 = vmatmul.mubr.f32.vlgmr.msra.gmra.mxu0 %v3761_v31  ;;  %5566 = vmatmul.mubr.f32.vlgmr.msra.gmra.mxu1 %v3761_v31 }
 0x9f9   :  { %3904 = vmatpush1.msra.mxu0 %v9604_v14  ;;  %5569 = vmatpush3.msra.mxu1 %v9607_v16  ;;  %v11026_v14 = vld [vmem:[#allocation76_spill] sm:$0xff]  ;;  %v11027_v16 = vld [vmem:[#allocation77_spill] sm:$0xff] }
 0x9fa   :  { %3905 = vmatprep.subr.mxu0 %v9610_v19  ;;  %5570 = vmatprep.subr.mxu1 %v10416_v56  ;;  %v11028_v19 = vld [vmem:[#allocation78_spill] sm:$0xff] }
 0x9fb   :  { %3906 = vmatpush1.msra.mxu0 %v9614_v33  ;;  %5571 = vmatpush3.msra.mxu1 %v9617_v17  ;;  %v11029_v33 = vld [vmem:[#allocation79_spill] sm:$0xff]  ;;  %v11030_v17 = vld [vmem:[#allocation80_spill] sm:$0xff] }
 0x9fc   :  { %3907 = vmatprep.subr.mxu0 %v9620_v39  ;;  %5572 = vmatprep.subr.mxu1 %v10416_v56  ;;  %v11031_v39 = vld [vmem:[#allocation81_spill] sm:$0xff] }
 0x9fd   :  { %3908 = vmatpush1.msra.mxu0 %v9624_v34  ;;  %5573 = vmatpush3.msra.mxu1 %v9627_v12  ;;  %v11032_v34 = vld [vmem:[#allocation82_spill] sm:$0xff]  ;;  %v11033_v12 = vld [vmem:[#allocation83_spill] sm:$0xff] }
 0x9fe   :  { %3909 = vmatprep.subr.mxu0 %v9630_v40  ;;  %5574 = vmatprep.subr.mxu1 %v10416_v56  ;;  %v11034_v40 = vld [vmem:[#allocation84_spill] sm:$0xff] }
 0x9ff   :  { %3910 = vmatpush1.msra.mxu0 %v9634_v42  ;;  %5575 = vmatpush3.msra.mxu1 %v9637_v15  ;;  %v11035_v42 = vld [vmem:[#allocation85_spill] sm:$0xff]  ;;  %v11036_v15 = vld [vmem:[#allocation86_spill] sm:$0xff] }
 0xa00   :  { %3911 = vmatprep.subr.mxu0 %v9640_v11  ;;  %5576 = vmatprep.subr.mxu1 %v10416_v56  ;;  %v11037_v11 = vld [vmem:[#allocation87_spill] sm:$0xff] }
 0xa01   :  { %3912 = vmatpush1.msra.mxu0 %v9644_v1  ;;  %5577 = vmatpush3.msra.mxu1 %v9647_v7  ;;  %v11038_v1 = vld [vmem:[#allocation88_spill] sm:$0xff]  ;;  %v11039_v7 = vld [vmem:[#allocation89_spill] sm:$0xff] }
 0xa02   :  { %3913 = vmatprep.subr.mxu0 %v9650_v37  ;;  %5578 = vmatprep.subr.mxu1 %v10416_v56  ;;  %v11040_v37 = vld [vmem:[#allocation90_spill] sm:$0xff] }
 0xa03   :  { %3914 = vmatpush1.msra.mxu0 %v11024_v2  ;;  %5579 = vmatpush3.msra.mxu1 %v11025_v52 }
 0xa04   :  { %3915 = vmatprep.subr.mxu0 %v11026_v14  ;;  %5580 = vmatprep.subr.mxu1 %v10416_v56 }
 0xa05   :  { %3916 = vmatpush1.msra.mxu0 %v11027_v16  ;;  %5581 = vmatpush3.msra.mxu1 %v11028_v19 }
 0xa06   :  { %3917 = vmatprep.subr.mxu0 %v11029_v33  ;;  %5582 = vmatprep.subr.mxu1 %v10416_v56 }
 0xa07   :  { %3918 = vmatpush1.msra.mxu0 %v11030_v17  ;;  %5583 = vmatpush3.msra.mxu1 %v11031_v39 }
 0xa08   :  { %3919 = vmatprep.subr.mxu0 %v11032_v34  ;;  %5584 = vmatprep.subr.mxu1 %v10416_v56 }
 0xa09   :  { %3920 = vmatpush1.msra.mxu0 %v11033_v12  ;;  %5585 = vmatpush3.msra.mxu1 %v11034_v40 }
 0xa0a   :  { %3921 = vmatprep.subr.mxu0 %v11035_v42  ;;  %5586 = vmatprep.subr.mxu1 %v10416_v56 }
 0xa0b   :  { %3922 = vmatpush1.msra.mxu0 %v11036_v15  ;;  %5587 = vmatpush3.msra.mxu1 %v11037_v11 }
 0xa0c   :  { %3923 = vmatprep.subr.mxu0 %v11038_v1  ;;  %5588 = vmatprep.subr.mxu1 %v10416_v56 }
 0xa0d   :  { %3924 = vmatpush1.msra.mxu0 %v11039_v7  ;;  %5589 = vmatpush3.msra.mxu1 %v11040_v37 }
 0xa0e   :  { %3925 = vmatprep.subr.mxu0 %v11041_v44  ;;  %5590 = vmatprep.subr.mxu1 %v10416_v56 }
 0xa0f   :  { %3926 = vmatpush1.msra.mxu0 %v11042_v18  ;;  %5591 = vmatpush3.msra.mxu1 %v11043_v20 }
 0xa10   :  { %3927 = vmatprep.subr.mxu0 %v11044_v22  ;;  %5592 = vmatprep.subr.mxu1 %v10416_v56 }
 0xa11   :  { %3928 = vmatpush1.msra.mxu0 %v11045_v23  ;;  %5593 = vmatpush3.msra.mxu1 %v11046_v24 }
 0xa12   :  { %3929 = vmatprep.subr.mxu0 %v11047_v21  ;;  %5594 = vmatprep.subr.mxu1 %v10416_v56 }
 0xa13   :  { %3930 = vmatpush1.msra.mxu0 %v9734_v30  ;;  %5595 = vmatpush3.msra.mxu1 %v11048_v62  ;;  %v4067_v30 = vld [vmem:[#allocation2] sm:$0xff]  ;;  %v4172_v62 = vld [vmem:[#allocation8 + $0x18] sm:$0xff] }
 0xa14   :  { %3931 = vmatprep.subr.mxu0 %v11049_v43  ;;  %5596 = vmatprep.subr.mxu1 %v10416_v56  ;;  %v4169_v43 = vld [vmem:[#allocation8] sm:$0xff] }
 0xa15   :  { %3932 = vmatpush1.msra.mxu0 %v9744_v61  ;;  %5597 = vmatpush3.msra.mxu1 %v9747_v53  ;;  %v4084_v61 = vld [vmem:[#allocation7 + $0x78] sm:$0xff]  ;;  %v4081_v53 = vld [vmem:[#allocation7 + $0x60] sm:$0xff] }
 0xa16   :  { %3933 = vmatprep.subr.mxu0 %v9750_v59  ;;  %5598 = vmatprep.subr.mxu1 %v10416_v56  ;;  %v4083_v59 = vld [vmem:[#allocation7 + $0x70] sm:$0xff] }
 0xa17   :  { %3934 = vmatpush1.msra.mxu0 %v9754_v58  ;;  %3967 = vmatprep.mubr.f32.mxu0 %v10416_v56  ;;  %v4082_v58 = vld [vmem:[#allocation7 + $0x68] sm:$0xff] }
 0xa18   :  { %5599 = vmatpush3.msra.mxu1 %v9758_v28  ;;  %5600 = vmatprep.mubr.msk.f32.mxu1 %vm6376_vm0, %v10416_v56  ;;  %v4080_v28 = vld [vmem:[#allocation7 + $0x58] sm:$0xff]  ;;  %v4079_v56 = vld [vmem:[#allocation7 + $0x50] sm:$0xff] }
 0xa19   :  { %3968 = vmatmul.mubr.f32.vlgmr.msra.gmra.mxu0 %v9916_v4  ;;  %5601 = vmatmul.mubr.f32.vlgmr.msra.gmra.mxu1 %v9916_v4 }
 0xa1a   :  { %5635 = vmatprep.mubr.f32.mxu0 %v4067_v30  ;;  %5603 = vmatprep.subr.mxu0 %v4084_v61 }
 0xa1b   :  { %5604 = vmatpush3.msra.mxu0 %v4084_v61  ;;  %5638 = vmatprep.subr.mxu1 %v4184_v3 }
 0xa1c   :  { %5605 = vmatprep.subr.mxu0 %v4083_v59  ;;  %5639 = vmatpush3.msra.mxu1 %v4184_v3 }
 0xa1d   :  { %5606 = vmatpush3.msra.mxu0 %v4083_v59  ;;  %5640 = vmatprep.subr.mxu1 %v4183_v63 }
 0xa1e   :  { %5607 = vmatprep.subr.mxu0 %v4082_v58  ;;  %5641 = vmatpush3.msra.mxu1 %v4183_v63 }
 0xa1f   :  { %5608 = vmatpush3.msra.mxu0 %v4082_v58  ;;  %5642 = vmatprep.subr.mxu1 %v4182_v25 }
 0xa20   :  { %5609 = vmatprep.subr.mxu0 %v4081_v53  ;;  %5643 = vmatpush3.msra.mxu1 %v4182_v25 }
 0xa21   :  { %5610 = vmatpush3.msra.mxu0 %v4081_v53  ;;  %5644 = vmatprep.subr.mxu1 %v4181_v10 }
 0xa22   :  { %5611 = vmatprep.subr.mxu0 %v4080_v28  ;;  %5645 = vmatpush3.msra.mxu1 %v4181_v10 }
 0xa23   :  { %5612 = vmatpush3.msra.mxu0 %v4080_v28  ;;  %5646 = vmatprep.subr.mxu1 %v4180_v47 }
 0xa24   :  { %5613 = vmatprep.subr.mxu0 %v4079_v56  ;;  %5647 = vmatpush3.msra.mxu1 %v4180_v47 }
 0xa25   :  { %5614 = vmatpush3.msra.mxu0 %v4079_v56  ;;  %5648 = vmatprep.subr.mxu1 %v4179_v13  ;;  %v4318_v56 = vld [vmem:[%s10015_s10] ss:$0 sm:$0xff] }
 0xa26   :  { %5615 = vmatprep.subr.mxu0 %v4078_v48  ;;  %5649 = vmatpush3.msra.mxu1 %v4179_v13 }
 0xa27   :  { %5616 = vmatpush3.msra.mxu0 %v4078_v48  ;;  %5650 = vmatprep.subr.mxu1 %v4178_v38 }
 0xa28   :  { %5617 = vmatprep.subr.mxu0 %v4077_v49  ;;  %5651 = vmatpush3.msra.mxu1 %v4178_v38 }
 0xa29   :  { %5618 = vmatpush3.msra.mxu0 %v4077_v49  ;;  %5652 = vmatprep.subr.mxu1 %v4177_v45 }
 0xa2a   :  { %5619 = vmatprep.subr.mxu0 %v4076_v50  ;;  %5653 = vmatpush3.msra.mxu1 %v4177_v45 }
 0xa2b   :  { %5620 = vmatpush3.msra.mxu0 %v4076_v50  ;;  %5654 = vmatprep.subr.mxu1 %v4176_v6 }
 0xa2c   :  { %5621 = vmatprep.subr.mxu0 %v4075_v27  ;;  %5655 = vmatpush3.msra.mxu1 %v4176_v6 }
 0xa2d   :  { %5622 = vmatpush3.msra.mxu0 %v4075_v27  ;;  %5656 = vmatprep.subr.mxu1 %v4175_v9 }
 0xa2e   :  { %5623 = vmatprep.subr.mxu0 %v4074_v60  ;;  %5657 = vmatpush3.msra.mxu1 %v4175_v9 }
 0xa2f   :  { %5624 = vmatpush3.msra.mxu0 %v4074_v60  ;;  %5658 = vmatprep.subr.mxu1 %v4174_v54 }
 0xa30   :  { %5625 = vmatprep.subr.mxu0 %v4073_v29  ;;  %5659 = vmatpush3.msra.mxu1 %v4174_v54 }
 0xa31   :  { %5626 = vmatpush3.msra.mxu0 %v4073_v29  ;;  %5660 = vmatprep.subr.mxu1 %v4173_v8 }
 0xa32   :  { %5627 = vmatprep.subr.mxu0 %v4072_v55  ;;  %5661 = vmatpush3.msra.mxu1 %v4173_v8 }
 0xa33   :  { %5628 = vmatpush3.msra.mxu0 %v4072_v55  ;;  %5662 = vmatprep.subr.mxu1 %v4172_v62 }
 0xa34   :  { %5629 = vmatprep.subr.mxu0 %v4071_v35  ;;  %5663 = vmatpush3.msra.mxu1 %v4172_v62 }
 0xa35   :  { %5630 = vmatpush3.msra.mxu0 %v4071_v35 }
 0xa36   :  { %5631 = vmatprep.subr.mxu0 %v4070_v41 }
 0xa37   :  { %5632 = vmatpush3.msra.mxu0 %v4070_v41 }
 0xa38   :  { %5633 = vmatprep.subr.mxu0 %v4069_v36 }
 0xa39   :  { %5634 = vmatpush3.msra.mxu0 %v4069_v36 }
 0xab8   :  { %v3899_v26 = vpop.f32.mrf.mxu1  ;;  %v3828_v0 = vpop.f32.mrf.mxu0 }
 0xab9   :  { %v3829_v2 = vadd.f32 %v3828_v0, %v11022_v5  ;;  %v3900_v7 = vadd.f32 %v3899_v26, %v7251_v32  ;;  %v4170_v32 = vld [vmem:[#allocation8 + $0x8] sm:$0xff] }
 0xaba   :  { %v5567_v57 = vpop.f32.mrf.mxu1  ;;  %v3830_v31 = vpop.f32.mrf.mxu0 }
 0xabb   :  { %v3831_v39 = vadd.f32 %v3830_v31, %v11023_v51 }
 0xad9   :  { %v3969_v52 = vpop.f32.mrf.mxu0  ;;  %v4040_v14 = vpop.f32.mrf.mxu1 }
 0xada   :  { %v4044_v16 = vadd.f32 %v3969_v52, %v3829_v2  ;;  %v4058_v1 = vadd.f32 %v9911_v46, %v4040_v14  ;;  %v4171_v46 = vld [vmem:[#allocation8 + $0x10] sm:$0xff] }
 0xadb   :  { %v5602_v19 = vpop.f32.mrf.mxu1  ;;  %v3971_v17 = vpop.f32.mrf.mxu0  ;;  %5664 = vmatprep.subr.mxu1 %v4171_v46 }
 0xadc   :  { %v4315_v33 = vmul.f32 -1.442695, %v4044_v16  ;;  %v4051_v34 = vadd.f32 %v3971_v17, %v3831_v39  ;;  %5665 = vmatpush3.msra.mxu1 %v4171_v46 }
 0xadd   :  { %5666 = vmatprep.subr.mxu1 %v4170_v32 }
 0xade   :  { %5833 = vpow2.f32 %v4315_v33  ;;  %v4316_v12 = vmul.f32 -1.442695, %v4051_v34  ;;  %5667 = vmatpush3.msra.mxu1 %v4170_v32 }
 0xadf   :  { %5668 = vmatprep.subr.mxu1 %v4169_v43 }
 0xae0   :  { %5835 = vpow2.f32 %v4316_v12  ;;  %5669 = vmatpush3.msra.mxu1 %v4169_v43 }
 0xaeb   :  { %v5834_v40 = vpop.eup %5833 }
 0xaec   :  { %v4048_v42 = vadd.f32 1.0, %v5834_v40 }
 0xaed   :  { %v5836_v15 = vpop.eup %5835 }
 0xaee   :  { %5837 = vrcp.f32 %v4048_v42  ;;  %v4055_v11 = vadd.f32 1.0, %v5836_v15 }
 0xaf0   :  { %5839 = vrcp.f32 %v4055_v11 }
 0xafb   :  { %v5838_v5 = vpop.eup %5837 }
 0xafc   :  { %v4059_v37 = vmul.f32 %v5838_v5, %v4058_v1 }
 0xafd   :  { %v5840_v18 = vpop.eup %5839 }
 0xafe   :  { %v4060_v44 = vadd.f32 %v4059_v37, %v3900_v7  ;;  %v4062_v51 = vsub.f32 1.0, %v5840_v18  ;;  %v4064_v23 = vmul.f32 %v5840_v18, %v9916_v4  ;;  %v4317_v4 = vld [vmem:[%s10013_s8] ss:$0 sm:$0xff] }
 0xb00   :  { %5841 = vtanh.f32 %v4060_v44 }
 0xb0d   :  { %v5842_v20 = vpop.eup %5841 }
 0xb0e   :  { %v4063_v22 = vmul.f32 %v5842_v20, %v4062_v51 }
 0xb10   :  { %v4065_v24 = vadd.f32 %v4064_v23, %v4063_v22 }
 0xb12   :  { %4066 = vst [vmem:[#allocation2 + $0xe] sm:$0x3] %v4065_v24 }
 0xb19   :  { %v4068_v21 = vld [vmem:[#allocation2 + $0x8] sm:$0xff] }
 0xb1a   :  { %5636 = vmatmul.mubr.f32.vlgmr.msra.gmra.mxu0 %v4068_v21 }
 0xbda   :  { %v5637_v30 = vpop.f32.mrf.mxu0 }
 0xbdb   :  { %v4164_v61 = vadd.f32 %v5637_v30, %v4317_v4 }
 0xbdc   :  { %v4158_v59 = vpop.f32.mrf.mxu0 }
 0xbdd   :  { %v4159_v58 = vadd.f32 %v4317_v4, %v4158_v59  ;;  %v4168_v28 = vmax.f32 %v4164_v61, 0.0 }
 0xbdf   :  { %v4167_v53 = vmax.f32 %v4159_v58, 0.0 }
 0xbe1   :  { %5670 = vmatprep.mubr.f32.mxu1 %v4167_v53 }
 0xbe2   :  { %5671 = vmatmul.mubr.f32.vlgmr.msra.gmra.mxu1 %v4168_v28 }
 0xca2   :  { %v5672_v48 = vpop.f32.mrf.mxu1 }
 0xca3   :  { %v4264_v49 = vadd.f32 %v5672_v48, %v4318_v56 }
 0xca4   :  { %v4258_v50 = vpop.f32.mrf.mxu1 }
 0xca5   :  { %4268 = vst [vmem:[%s10016_s11 + $0x8] sm:$0xff] %v4264_v49  ;;  %v4259_v27 = vadd.f32 %v4318_v56, %v4258_v50 }
 0xca7   :  { %4267 = vst [vmem:[%s10016_s11] sm:$0xff] %v4259_v27 }
 0xca8   :  { %4273 = vsyncpa [#allocation4], 1 }
 0xca9   :  { %4274 = vsyncpa [#allocation6], 1 }
 0xcaa   :  { %4275 = vsyncpa [#allocation9], 1 }

</bundles_post_ra>
